<compile_context>
chip_gen: v5e
topology: v5e:2x2
jax: 0.10.0
libtpu: 0.0.40
codegen_flags: <defaults>
</compile_context>

<pallas_src>
import functools

import jax
import jax.numpy as jnp
from jax.experimental import pallas as pl
from jax.experimental.pallas import tpu as pltpu

BN_EPS = 1e-5
_VMEM = pl.BlockSpec(memory_space=pltpu.MemorySpace.VMEM)
_ARB2 = pltpu.CompilerParams(dimension_semantics=("arbitrary", "arbitrary"))


def _pick_tile(n, cap=512):
    """Largest tile <= cap that divides n and is a multiple of 8 (else n)."""
    for t in (512, 384, 256, 128, 64, 32, 16, 8):
        if t <= cap and t <= n and n % t == 0:
            return t
    return n


# --------------------------------------------------------------------------
# Shared kernel helpers
# --------------------------------------------------------------------------
def _bn_scale_shift(ps, gamma, beta, n_rows):
    """Fold (sum, sum-sq) batch stats + affine params into scale/shift."""
    mu = ps[0:1, :] * (1.0 / n_rows)
    var = jnp.maximum(ps[1:2, :] * (1.0 / n_rows) - mu * mu, 0.0)
    scale = gamma * jax.lax.rsqrt(var + BN_EPS)
    shift = beta - mu * scale
    return scale, shift


def _acc_stats(stat_ref, y, step):
    """Accumulate per-channel [sum; sum-sq] of y into a (2, C) output block."""
    @pl.when(step == 0)
    def _():
        stat_ref[...] = jnp.zeros_like(stat_ref)

    stat_ref[...] = stat_ref[...] + jnp.concatenate(
        [jnp.sum(y, axis=0, keepdims=True),
         jnp.sum(y * y, axis=0, keepdims=True)], axis=0)


# --------------------------------------------------------------------------
# Encoder kernels (row-tiled, grid = (B, N // TM))
# --------------------------------------------------------------------------
def _enc_first_kernel(x_ref, w_ref, b_ref, y_ref, stat_ref):
    step = pl.program_id(0) * pl.num_programs(1) + pl.program_id(1)
    x = x_ref[0]                                     # (TM, 3)
    w = w_ref[...]                                   # (3, C)
    # K=3 contraction as 3 broadcast FMAs on the VPU (MXU would pad K to 128+).
    y = (x[:, 0:1] * w[0:1, :] + x[:, 1:2] * w[1:2, :]
         + x[:, 2:3] * w[2:3, :] + b_ref[...])
    y_ref[0] = y
    _acc_stats(stat_ref, y, step)


def _enc_mid_kernel(x_ref, g_ref, be_ref, ps_ref, w_ref, b_ref,
                    y_ref, stat_ref, *, n_rows):
    step = pl.program_id(0) * pl.num_programs(1) + pl.program_id(1)
    scale, shift = _bn_scale_shift(ps_ref[...], g_ref[...], be_ref[...], n_rows)
    h = jnp.maximum(x_ref[0] * scale + shift, 0.0)   # prev BN + ReLU
    y = jnp.dot(h.astype(jnp.bfloat16), w_ref[...].astype(jnp.bfloat16),
                preferred_element_type=jnp.float32) + b_ref[...]
    y_ref[0] = y
    _acc_stats(stat_ref, y, step)


def _enc_last_kernel(x_ref, g_ref, be_ref, ps_ref, w_ref, b_ref,
                     mm_ref, stat_ref, *, n_rows):
    t = pl.program_id(1)
    step = pl.program_id(0) * pl.num_programs(1) + t
    scale, shift = _bn_scale_shift(ps_ref[...], g_ref[...], be_ref[...], n_rows)
    h = jnp.maximum(x_ref[0] * scale + shift, 0.0)
    y = jnp.dot(h.astype(jnp.bfloat16), w_ref[...].astype(jnp.bfloat16),
                preferred_element_type=jnp.float32) + b_ref[...]
    c = y.shape[1]

    @pl.when(t == 0)
    def _():
        mm_ref[0] = jnp.concatenate(
            [jnp.full((1, c), -jnp.inf, jnp.float32),
             jnp.full((1, c), jnp.inf, jnp.float32)], axis=0)

    cur = mm_ref[0]                                  # (2, C): [max; min]
    mm_ref[0] = jnp.concatenate(
        [jnp.maximum(cur[0:1, :], jnp.max(y, axis=0, keepdims=True)),
         jnp.minimum(cur[1:2, :], jnp.min(y, axis=0, keepdims=True))], axis=0)
    _acc_stats(stat_ref, y, step)


def encoder_convs(p, xp):
    """xp: (B, N, 3) -> (mm (B,2,512) pre-BN4 per-batch max/min, stat4 (2,512))."""
    B, N, _ = xp.shape
    TM = _pick_tile(N)
    grid = (B, N // TM)
    n_rows = float(B * N)

    def tile_spec(c):
        return pl.BlockSpec((1, TM, c), lambda b, t: (b, t, 0))

    def full_spec(a):
        nd = a.ndim
        return pl.BlockSpec(a.shape, lambda b, t: (0,) * nd)

    def stat_spec(c):
        return pl.BlockSpec((2, c), lambda b, t: (0, 0))

    def cost(cin, cout):
        return pl.CostEstimate(
            flops=2 * B * N * cin * cout, transcendentals=0,
            bytes_accessed=4 * (B * N * (cin + cout) + cin * cout))

    w1 = p["conv1_w"]
    b1 = p["conv1_b"].reshape(1, -1)
    y1, s1 = pl.pallas_call(
        _enc_first_kernel, grid=grid,
        in_specs=[tile_spec(3), full_spec(w1), full_spec(b1)],
        out_specs=(tile_spec(128), stat_spec(128)),
        out_shape=(jax.ShapeDtypeStruct((B, N, 128), jnp.float32),
                   jax.ShapeDtypeStruct((2, 128), jnp.float32)),
        compiler_params=_ARB2, cost_estimate=cost(3, 128),
    )(xp, w1, b1)

    def layer(x, stats, bn_g, bn_b, w, b, cin, cout, last=False):
        g = bn_g.reshape(1, -1)
        be = bn_b.reshape(1, -1)
        br = b.reshape(1, -1)
        kern = functools.partial(
            _enc_last_kernel if last else _enc_mid_kernel, n_rows=n_rows)
        if last:
            out_specs = (pl.BlockSpec((1, 2, cout), lambda bb, t: (bb, 0, 0)),
                         stat_spec(cout))
            out_shape = (jax.ShapeDtypeStruct((B, 2, cout), jnp.float32),
                         jax.ShapeDtypeStruct((2, cout), jnp.float32))
        else:
            out_specs = (tile_spec(cout), stat_spec(cout))
            out_shape = (jax.ShapeDtypeStruct((B, N, cout), jnp.float32),
                         jax.ShapeDtypeStruct((2, cout), jnp.float32))
        return pl.pallas_call(
            kern, grid=grid,
            in_specs=[tile_spec(cin), full_spec(g), full_spec(be),
                      full_spec(stats), full_spec(w), full_spec(br)],
            out_specs=out_specs, out_shape=out_shape,
            compiler_params=_ARB2, cost_estimate=cost(cin, cout),
        )(x, g, be, stats, w, br)

    y2, s2 = layer(y1, s1, p["bn1_g"], p["bn1_b"], p["conv2_w"], p["conv2_b"], 128, 128)
    y3, s3 = layer(y2, s2, p["bn2_g"], p["bn2_b"], p["conv3_w"], p["conv3_b"], 128, 256)
    mm, s4 = layer(y3, s3, p["bn3_g"], p["bn3_b"], p["conv4_w"], p["conv4_b"],
                   256, 512, last=True)
    return mm, s4


# --------------------------------------------------------------------------
# Fused heads + reparameterisation/KL + decoder (single pallas_call, no grid)
# --------------------------------------------------------------------------
def _head_dec_kernel(gmax_ref, gmin_ref, s4_ref, g4_ref, be4_ref,
                     w1m_ref, c1m_ref, g1m_ref, be1m_ref,
                     w2m_ref, c2m_ref, g2m_ref, be2m_ref,
                     w3m_ref, c3m_ref,
                     w1v_ref, c1v_ref, g1v_ref, be1v_ref,
                     w2v_ref, c2v_ref, g2v_ref, be2v_ref,
                     w3v_ref, c3v_ref,
                     dw1_ref, dc1_ref, dw2_ref, dc2_ref, dwf_ref, dcf_ref,
                     eps_ref, y_ref, kl_ref, *, n_rows):
    def matmul(a, w_ref, c_ref):
        return jnp.dot(a.astype(jnp.bfloat16), w_ref[...].astype(jnp.bfloat16),
                       preferred_element_type=jnp.float32) + c_ref[...]

    def bn_relu(y, g_ref, b_ref):
        mu = jnp.mean(y, axis=0, keepdims=True)
        var = jnp.mean((y - mu) ** 2, axis=0, keepdims=True)
        yn = (y - mu) * jax.lax.rsqrt(var + BN_EPS) * g_ref[...] + b_ref[...]
        return jnp.maximum(yn, 0.0)

    # Finish BN4 + max-pool over points: BN is affine per channel, so the max
    # of the normalized values is BN(max) when scale>=0 and BN(min) otherwise.
    scale4, shift4 = _bn_scale_shift(s4_ref[...], g4_ref[...], be4_ref[...], n_rows)
    g = jnp.where(scale4 >= 0.0, gmax_ref[...], gmin_ref[...]) * scale4 + shift4

    hm = bn_relu(matmul(g, w1m_ref, c1m_ref), g1m_ref, be1m_ref)
    hm = bn_relu(matmul(hm, w2m_ref, c2m_ref), g2m_ref, be2m_ref)
    m = matmul(hm, w3m_ref, c3m_ref)

    hv = bn_relu(matmul(g, w1v_ref, c1v_ref), g1v_ref, be1v_ref)
    hv = bn_relu(matmul(hv, w2v_ref, c2v_ref), g2v_ref, be2v_ref)
    v = jnp.logaddexp(matmul(hv, w3v_ref, c3v_ref), 0.0) + 1e-8   # softplus+eps

    z = m + jnp.sqrt(v) * eps_ref[...]               # reparameterisation
    kl = 0.5 * (-jnp.log(v) + v + m * m - 1.0)       # kl_normal(m, v, 0, 1)
    kl_ref[...] = jnp.mean(jnp.sum(kl, axis=-1, keepdims=True),
                           axis=0, keepdims=True)    # (1, 1) mean over batch

    d = jnp.maximum(matmul(z, dw1_ref, dc1_ref), 0.0)
    d = jnp.maximum(matmul(d, dw2_ref, dc2_ref), 0.0)
    y_ref[...] = matmul(d, dwf_ref, dcf_ref)


def head_and_decoder(p, gmax, gmin, s4, eps, n_rows):
    B = gmax.shape[0]
    n3 = p["dec_final_b"].shape[0]
    r = lambda a: a.reshape(1, -1)
    inputs = [
        gmax, gmin, s4, r(p["bn4_g"]), r(p["bn4_b"]),
        p["fc1_m_w"], r(p["fc1_m_b"]), r(p["fc_bn1_m_g"]), r(p["fc_bn1_m_b"]),
        p["fc2_m_w"], r(p["fc2_m_b"]), r(p["fc_bn2_m_g"]), r(p["fc_bn2_m_b"]),
        p["fc3_m_w"], r(p["fc3_m_b"]),
        p["fc1_v_w"], r(p["fc1_v_b"]), r(p["fc_bn1_v_g"]), r(p["fc_bn1_v_b"]),
        p["fc2_v_w"], r(p["fc2_v_b"]), r(p["fc_bn2_v_g"]), r(p["fc_bn2_v_b"]),
        p["fc3_v_w"], r(p["fc3_v_b"]),
        p["dec_fc1_w"], r(p["dec_fc1_b"]), p["dec_fc2_w"], r(p["dec_fc2_b"]),
        p["dec_final_w"], r(p["dec_final_b"]),
        eps,
    ]
    return pl.pallas_call(
        functools.partial(_head_dec_kernel, n_rows=n_rows),
        out_shape=(jax.ShapeDtypeStruct((B, n3), jnp.float32),
                   jax.ShapeDtypeStruct((1, 1), jnp.float32)),
        in_specs=[_VMEM] * len(inputs),
        out_specs=(_VMEM, _VMEM),
    )(*inputs)


# --------------------------------------------------------------------------
# Tiled Chamfer-L1 (grid = (B, Nx // TX), running-min accumulator for y->x)
# --------------------------------------------------------------------------
def _chamfer_kernel(yt_ref, x_ref, o_ref, min1_ref, s1_ref, s2_ref,
                    *, n_batch, ny, nx):
    b = pl.program_id(0)
    t = pl.program_id(1)
    nt = pl.num_programs(1)
    step = b * nt + t

    @pl.when(step == 0)
    def _():
        s1_ref[...] = jnp.zeros_like(s1_ref)
        s2_ref[...] = jnp.zeros_like(s2_ref)
        o_ref[...] = jnp.zeros_like(o_ref)

    @pl.when(t == 0)
    def _():
        min1_ref[...] = jnp.full_like(min1_ref, jnp.inf)

    yt = yt_ref[0]                                   # (3, Ny)
    x = x_ref[0]                                     # (TX, 3)
    tx = x.shape[0]
    d2 = jnp.zeros((tx, ny), jnp.float32)
    for d in range(3):                               # direct (x-y)^2 on the VPU
        diff = x[:, d:d + 1] - yt[d:d + 1, :]
        d2 = d2 + diff * diff

    # x-tile -> nearest y (full y block resident): accumulate sum of sqrt(min)
    s2_ref[...] = s2_ref[...] + jnp.sum(
        jnp.sqrt(jnp.min(d2, axis=1, keepdims=True)), axis=0, keepdims=True)
    # y -> nearest x: running min across x tiles
    min1_ref[...] = jnp.minimum(min1_ref[...], jnp.min(d2, axis=0, keepdims=True))

    @pl.when(t == nt - 1)
    def _():
        s1_ref[...] = s1_ref[...] + jnp.sum(jnp.sqrt(min1_ref[...]),
                                            axis=1, keepdims=True)

    @pl.when(step == n_batch * nt - 1)
    def _():
        o_ref[...] = 0.5 * (s1_ref[...] / (n_batch * ny)
                            + s2_ref[...] / (n_batch * nx))


def chamfer_l1(y_t, xp):
    """y_t: (B, 3, Ny) reconstruction (channel-major); xp: (B, Nx, 3) input."""
    B, _, Ny = y_t.shape
    Nx = xp.shape[1]
    TX = _pick_tile(Nx)
    out = pl.pallas_call(
        functools.partial(_chamfer_kernel, n_batch=B, ny=Ny, nx=Nx),
        grid=(B, Nx // TX),
        in_specs=[pl.BlockSpec((1, 3, Ny), lambda b, t: (b, 0, 0)),
                  pl.BlockSpec((1, TX, 3), lambda b, t: (b, t, 0))],
        out_specs=pl.BlockSpec((1, 1), lambda b, t: (0, 0)),
        out_shape=jax.ShapeDtypeStruct((1, 1), jnp.float32),
        scratch_shapes=[pltpu.VMEM((1, Ny), jnp.float32),
                        pltpu.VMEM((1, 1), jnp.float32),
                        pltpu.VMEM((1, 1), jnp.float32)],
        compiler_params=_ARB2,
        cost_estimate=pl.CostEstimate(
            flops=9 * B * Nx * Ny, transcendentals=B * (Nx + Ny),
            bytes_accessed=4 * B * 3 * (Nx + Ny)),
    )(y_t, xp)
    return out[0, 0]


# --------------------------------------------------------------------------
# Parameters (deterministic synthetic init; PyTorch-like uniform fan-in bound)
# --------------------------------------------------------------------------
def _dense_init(key, fan_in, fan_out):
    kw, kb = jax.random.split(key)
    bound = 1.0 / (fan_in ** 0.5)
    w = jax.random.uniform(kw, (fan_in, fan_out), jnp.float32, -bound, bound)
    b = jax.random.uniform(kb, (fan_out,), jnp.float32, -bound, bound)
    return w, b


def init_params(key, zdim, point_dim, n_point):
    layers = [
        ("conv1", point_dim, 128), ("conv2", 128, 128),
        ("conv3", 128, 256), ("conv4", 256, 512),
        ("fc1_m", 512, 256), ("fc2_m", 256, 128), ("fc3_m", 128, zdim),
        ("fc1_v", 512, 256), ("fc2_v", 256, 128), ("fc3_v", 128, zdim),
        ("dec_fc1", zdim, 256), ("dec_fc2", 256, 256),
        ("dec_final", 256, n_point * point_dim),
    ]
    p = {}
    for i, (name, fi, fo) in enumerate(layers):
        w, b = _dense_init(jax.random.fold_in(key, i), fi, fo)
        p[name + "_w"], p[name + "_b"] = w, b
    for name, c in [("bn1", 128), ("bn2", 128), ("bn3", 256), ("bn4", 512),
                    ("fc_bn1_m", 256), ("fc_bn2_m", 128),
                    ("fc_bn1_v", 256), ("fc_bn2_v", 128)]:
        p[name + "_g"] = jnp.ones((c,), jnp.float32)   # BN default gamma
        p[name + "_b"] = jnp.zeros((c,), jnp.float32)  # BN default beta
    return p


# --------------------------------------------------------------------------
# Full forward (matches BaseVAE.forward): returns (nelbo, kl_loss, x_reconst, y)
# --------------------------------------------------------------------------
def base_vae_forward(params, x, eps):
    p = params
    B, _, N = x.shape                        # NCL input (B, 3, N)
    xp = jnp.transpose(x, (0, 2, 1))         # (B, N, 3) per-point rows (layout glue)

    mm, s4 = encoder_convs(p, xp)            # (B,2,512) max/min of pre-BN4, stats
    gmax = mm[:, 0, :]                       # layout glue slices
    gmin = mm[:, 1, :]

    y_flat, kl_mean = head_and_decoder(p, gmax, gmin, s4, eps,
                                       n_rows=float(B * N))
    y = y_flat.reshape(B, -1, 3)             # (B, n_point, 3)

    # TODO(synk): ChamferDistanceL1 is an external CUDA extension; implemented
    # here as the standard L1 chamfer distance on point clouds.
    y_t = jnp.transpose(y, (0, 2, 1))        # (B, 3, n_point) layout glue
    x_reconst = chamfer_l1(y_t, xp)
    kl_loss = kl_mean[0, 0]
    nelbo = x_reconst + kl_loss
    # NOTE: torch.cat((z, m), dim=-1) in the reference is computed and discarded.
    return nelbo, kl_loss, x_reconst, y


# --------------------------------------------------------------------------
if __name__ == "__main__":
    key = jax.random.PRNGKey(0)
    pkey, xkey, ekey = jax.random.split(key, 3)

    # Small synthetic shapes consistent with the module structure.
    B, point_dim, N_in = 2, 3, 64      # encoder input points
    n_point, zdim = 64, 128            # decoder output points, latent dim

    params = init_params(pkey, zdim, point_dim, n_point)
    x = jax.random.normal(xkey, (B, point_dim, N_in), jnp.float32)   # NCL
    eps = jax.random.normal(ekey, (B, zdim), jnp.float32)            # reparam noise

    fwd = jax.jit(base_vae_forward)
    nelbo, kl_loss, x_reconst, y = fwd(params, x, eps)
    jax.block_until_ready((nelbo, kl_loss, x_reconst, y))

    assert y.shape == (B, n_point, point_dim)
    assert bool(jnp.isfinite(nelbo)) and bool(jnp.isfinite(kl_loss))
    assert bool(jnp.isfinite(x_reconst))
    print("KERNEL_OK")
</pallas_src>

<mosaic_0001>
module attributes {stable_mosaic.version = 11 : i64} {
  func.func @_enc_first_kernel(%arg0: i32, %arg1: i32, %arg2: memref<1x64x3xf32, #tpu.memory_space<vmem>>, %arg3: memref<3x128xf32, #tpu.memory_space<vmem>>, %arg4: memref<1x128xf32, #tpu.memory_space<vmem>>, %arg5: memref<1x64x128xf32, #tpu.memory_space<vmem>>, %arg6: memref<2x128xf32, #tpu.memory_space<vmem>>) attributes {dimension_semantics = [#tpu.dimension_semantics<arbitrary>, #tpu.dimension_semantics<arbitrary>], iteration_bounds = array<i64: 2, 1>, scalar_prefetch = 0 : i64, scratch_operands = 0 : i64, tpu.core_type = #tpu.core_type<tc>, window_params = [{transform_indices = @transform_0, window_bounds = array<i64: 1, 64, 3>}, {pipeline_mode = #tpu.pipeline_mode<synchronous>, transform_indices = @transform_1, window_bounds = array<i64: 3, 128>}, {pipeline_mode = #tpu.pipeline_mode<synchronous>, transform_indices = @transform_2, window_bounds = array<i64: 1, 128>}, {transform_indices = @transform_3, window_bounds = array<i64: 1, 64, 128>}, {pipeline_mode = #tpu.pipeline_mode<synchronous>, transform_indices = @transform_4, window_bounds = array<i64: 2, 128>}]} {
    %c1_i32 = arith.constant 1 : i32
    %0 = arith.muli %arg0, %c1_i32 : i32
    %1 = arith.addi %0, %arg1 : i32
    %c0 = arith.constant 0 : index
    %c0_0 = arith.constant 0 : index
    %c0_1 = arith.constant 0 : index
    %2 = vector.load %arg2[%c0, %c0_0, %c0_1] : memref<1x64x3xf32, #tpu.memory_space<vmem>>, vector<1x64x3xf32>
    %3 = vector.shape_cast %2 : vector<1x64x3xf32> to vector<64x3xf32>
    %c0_2 = arith.constant 0 : index
    %c0_3 = arith.constant 0 : index
    %4 = vector.load %arg3[%c0_2, %c0_3] : memref<3x128xf32, #tpu.memory_space<vmem>>, vector<3x128xf32>
    %5 = vector.extract_strided_slice %3 {offsets = [0, 0], sizes = [64, 1], strides = [1, 1]} : vector<64x3xf32> to vector<64x1xf32>
    %6 = vector.extract_strided_slice %4 {offsets = [0, 0], sizes = [1, 128], strides = [1, 1]} : vector<3x128xf32> to vector<1x128xf32>
    %7 = vector.broadcast %5 : vector<64x1xf32> to vector<64x128xf32>
    %8 = vector.broadcast %6 : vector<1x128xf32> to vector<64x128xf32>
    %9 = arith.mulf %7, %8 : vector<64x128xf32>
    %10 = vector.extract_strided_slice %3 {offsets = [0, 1], sizes = [64, 1], strides = [1, 1]} : vector<64x3xf32> to vector<64x1xf32>
    %11 = vector.extract_strided_slice %4 {offsets = [1, 0], sizes = [1, 128], strides = [1, 1]} : vector<3x128xf32> to vector<1x128xf32>
    %12 = vector.broadcast %10 : vector<64x1xf32> to vector<64x128xf32>
    %13 = vector.broadcast %11 : vector<1x128xf32> to vector<64x128xf32>
    %14 = arith.mulf %12, %13 : vector<64x128xf32>
    %15 = arith.addf %9, %14 : vector<64x128xf32>
    %16 = vector.extract_strided_slice %3 {offsets = [0, 2], sizes = [64, 1], strides = [1, 1]} : vector<64x3xf32> to vector<64x1xf32>
    %17 = vector.extract_strided_slice %4 {offsets = [2, 0], sizes = [1, 128], strides = [1, 1]} : vector<3x128xf32> to vector<1x128xf32>
    %18 = vector.broadcast %16 : vector<64x1xf32> to vector<64x128xf32>
    %19 = vector.broadcast %17 : vector<1x128xf32> to vector<64x128xf32>
    %20 = arith.mulf %18, %19 : vector<64x128xf32>
    %21 = arith.addf %15, %20 : vector<64x128xf32>
    %c0_4 = arith.constant 0 : index
    %c0_5 = arith.constant 0 : index
    %22 = vector.load %arg4[%c0_4, %c0_5] : memref<1x128xf32, #tpu.memory_space<vmem>>, vector<1x128xf32>
    %23 = vector.broadcast %22 : vector<1x128xf32> to vector<64x128xf32>
    %24 = arith.addf %21, %23 : vector<64x128xf32>
    %c0_6 = arith.constant 0 : index
    %c0_7 = arith.constant 0 : index
    %c0_8 = arith.constant 0 : index
    %25 = vector.load %arg5[%c0_6, %c0_7, %c0_8] : memref<1x64x128xf32, #tpu.memory_space<vmem>>, vector<1x64x128xf32>
    %26 = vector.shape_cast %25 : vector<1x64x128xf32> to vector<64x128xf32>
    %27 = vector.shape_cast %24 : vector<64x128xf32> to vector<1x64x128xf32>
    tpu.vector_store %arg5[%c0_6, %c0_7, %c0_8], %27 {strides = array<i32>} : memref<1x64x128xf32, #tpu.memory_space<vmem>>, vector<1x64x128xf32>,
    %c0_i32 = arith.constant 0 : i32
    %28 = arith.cmpi eq, %1, %c0_i32 : i32
    %29 = arith.extui %28 : i1 to i32
    %c0_i32_9 = arith.constant 0 : i32
    %30 = arith.cmpi ne, %29, %c0_i32_9 : i32
    scf.if %30 {
      %cst_15 = arith.constant 0.000000e+00 : f32
      %40 = vector.broadcast %cst_15 : f32 to vector<2x128xf32>
      %c0_16 = arith.constant 0 : index
      %c0_17 = arith.constant 0 : index
      %41 = vector.load %arg6[%c0_16, %c0_17] : memref<2x128xf32, #tpu.memory_space<vmem>>, vector<2x128xf32>
      tpu.vector_store %arg6[%c0_16, %c0_17], %40 {strides = array<i32>} : memref<2x128xf32, #tpu.memory_space<vmem>>, vector<2x128xf32>,
    } else {
    }
    %c0_10 = arith.constant 0 : index
    %c0_11 = arith.constant 0 : index
    %31 = vector.load %arg6[%c0_10, %c0_11] : memref<2x128xf32, #tpu.memory_space<vmem>>, vector<2x128xf32>
    %cst = arith.constant dense<0.000000e+00> : vector<128xf32>
    %32 = vector.multi_reduction <add>, %24, %cst [0] : vector<64x128xf32> to vector<128xf32>
    %33 = vector.shape_cast %32 : vector<128xf32> to vector<1x128xf32>
    %34 = arith.mulf %24, %24 : vector<64x128xf32>
    %cst_12 = arith.constant dense<0.000000e+00> : vector<128xf32>
    %35 = vector.multi_reduction <add>, %34, %cst_12 [0] : vector<64x128xf32> to vector<128xf32>
    %36 = vector.shape_cast %35 : vector<128xf32> to vector<1x128xf32>
    %37 = tpu.concatenate %33, %36 in 0 : vector<1x128xf32>, vector<1x128xf32> -> vector<2x128xf32>
    %38 = arith.addf %31, %37 : vector<2x128xf32>
    %c0_13 = arith.constant 0 : index
    %c0_14 = arith.constant 0 : index
    %39 = vector.load %arg6[%c0_13, %c0_14] : memref<2x128xf32, #tpu.memory_space<vmem>>, vector<2x128xf32>
    tpu.vector_store %arg6[%c0_13, %c0_14], %38 {strides = array<i32>} : memref<2x128xf32, #tpu.memory_space<vmem>>, vector<2x128xf32>,
    return
  }
  func.func @transform_0(%arg0: i32, %arg1: i32) -> (i32, i32, i32) {
    %c0_i32 = arith.constant 0 : i32
    %c0_i32_0 = arith.constant 0 : i32
    return %arg0, %arg1, %c0_i32 : i32, i32, i32
  }
  func.func @transform_1(%arg0: i32, %arg1: i32) -> (i32, i32) {
    %c0_i32 = arith.constant 0 : i32
    %c0_i32_0 = arith.constant 0 : i32
    %c0_i32_1 = arith.constant 0 : i32
    return %c0_i32, %c0_i32_0 : i32, i32
  }
  func.func @transform_2(%arg0: i32, %arg1: i32) -> (i32, i32) {
    %c0_i32 = arith.constant 0 : i32
    %c0_i32_0 = arith.constant 0 : i32
    %c0_i32_1 = arith.constant 0 : i32
    return %c0_i32, %c0_i32_0 : i32, i32
  }
  func.func @transform_3(%arg0: i32, %arg1: i32) -> (i32, i32, i32) {
    %c0_i32 = arith.constant 0 : i32
    %c0_i32_0 = arith.constant 0 : i32
    return %arg0, %arg1, %c0_i32 : i32, i32, i32
  }
  func.func @transform_4(%arg0: i32, %arg1: i32) -> (i32, i32) {
    %c0_i32 = arith.constant 0 : i32
    %c0_i32_0 = arith.constant 0 : i32
    %c0_i32_1 = arith.constant 0 : i32
    return %c0_i32, %c0_i32_0 : i32, i32
  }
}

module attributes {stable_mosaic.version = 11 : i64} {
  func.func @_enc_mid_kernel(%arg0: i32, %arg1: i32, %arg2: memref<1x64x128xf32, #tpu.memory_space<vmem>>, %arg3: memref<1x128xf32, #tpu.memory_space<vmem>>, %arg4: memref<1x128xf32, #tpu.memory_space<vmem>>, %arg5: memref<2x128xf32, #tpu.memory_space<vmem>>, %arg6: memref<128x256xf32, #tpu.memory_space<vmem>>, %arg7: memref<1x256xf32, #tpu.memory_space<vmem>>, %arg8: memref<1x64x256xf32, #tpu.memory_space<vmem>>, %arg9: memref<2x256xf32, #tpu.memory_space<vmem>>) attributes {dimension_semantics = [#tpu.dimension_semantics<arbitrary>, #tpu.dimension_semantics<arbitrary>], iteration_bounds = array<i64: 2, 1>, scalar_prefetch = 0 : i64, scratch_operands = 0 : i64, tpu.core_type = #tpu.core_type<tc>, window_params = [{transform_indices = @transform_0, window_bounds = array<i64: 1, 64, 128>}, {pipeline_mode = #tpu.pipeline_mode<synchronous>, transform_indices = @transform_1, window_bounds = array<i64: 1, 128>}, {pipeline_mode = #tpu.pipeline_mode<synchronous>, transform_indices = @transform_2, window_bounds = array<i64: 1, 128>}, {pipeline_mode = #tpu.pipeline_mode<synchronous>, transform_indices = @transform_3, window_bounds = array<i64: 2, 128>}, {pipeline_mode = #tpu.pipeline_mode<synchronous>, transform_indices = @transform_4, window_bounds = array<i64: 128, 256>}, {pipeline_mode = #tpu.pipeline_mode<synchronous>, transform_indices = @transform_5, window_bounds = array<i64: 1, 256>}, {transform_indices = @transform_6, window_bounds = array<i64: 1, 64, 256>}, {pipeline_mode = #tpu.pipeline_mode<synchronous>, transform_indices = @transform_7, window_bounds = array<i64: 2, 256>}]} {
    %c1_i32 = arith.constant 1 : i32
    %0 = arith.muli %arg0, %c1_i32 : i32
    %1 = arith.addi %0, %arg1 : i32
    %c0 = arith.constant 0 : index
    %c0_0 = arith.constant 0 : index
    %2 = vector.load %arg5[%c0, %c0_0] : memref<2x128xf32, #tpu.memory_space<vmem>>, vector<2x128xf32>
    %c0_1 = arith.constant 0 : index
    %c0_2 = arith.constant 0 : index
    %3 = vector.load %arg3[%c0_1, %c0_2] : memref<1x128xf32, #tpu.memory_space<vmem>>, vector<1x128xf32>
    %c0_3 = arith.constant 0 : index
    %c0_4 = arith.constant 0 : index
    %4 = vector.load %arg4[%c0_3, %c0_4] : memref<1x128xf32, #tpu.memory_space<vmem>>, vector<1x128xf32>
    %5 = vector.extract_strided_slice %2 {offsets = [0, 0], sizes = [1, 128], strides = [1, 1]} : vector<2x128xf32> to vector<1x128xf32>
    %cst = arith.constant 7.812500e-03 : f32
    %6 = vector.broadcast %cst : f32 to vector<1x128xf32>
    %7 = arith.mulf %5, %6 : vector<1x128xf32>
    %8 = vector.extract_strided_slice %2 {offsets = [1, 0], sizes = [1, 128], strides = [1, 1]} : vector<2x128xf32> to vector<1x128xf32>
    %cst_5 = arith.constant 7.812500e-03 : f32
    %9 = vector.broadcast %cst_5 : f32 to vector<1x128xf32>
    %10 = arith.mulf %8, %9 : vector<1x128xf32>
    %11 = arith.mulf %7, %7 : vector<1x128xf32>
    %12 = arith.subf %10, %11 : vector<1x128xf32>
    %cst_6 = arith.constant 0.000000e+00 : f32
    %13 = vector.broadcast %cst_6 : f32 to vector<1x128xf32>
    %14 = arith.maximumf %12, %13 : vector<1x128xf32>
    %cst_7 = arith.constant 9.99999974E-6 : f32
    %15 = vector.broadcast %cst_7 : f32 to vector<1x128xf32>
    %16 = arith.addf %14, %15 : vector<1x128xf32>
    %17 = math.rsqrt %16 : vector<1x128xf32>
    %18 = arith.mulf %3, %17 : vector<1x128xf32>
    %19 = arith.mulf %7, %18 : vector<1x128xf32>
    %20 = arith.subf %4, %19 : vector<1x128xf32>
    %c0_8 = arith.constant 0 : index
    %c0_9 = arith.constant 0 : index
    %c0_10 = arith.constant 0 : index
    %21 = vector.load %arg2[%c0_8, %c0_9, %c0_10] : memref<1x64x128xf32, #tpu.memory_space<vmem>>, vector<1x64x128xf32>
    %22 = vector.shape_cast %21 : vector<1x64x128xf32> to vector<64x128xf32>
    %23 = vector.broadcast %18 : vector<1x128xf32> to vector<64x128xf32>
    %24 = arith.mulf %22, %23 : vector<64x128xf32>
    %25 = vector.broadcast %20 : vector<1x128xf32> to vector<64x128xf32>
    %26 = arith.addf %24, %25 : vector<64x128xf32>
    %cst_11 = arith.constant 0.000000e+00 : f32
    %27 = vector.broadcast %cst_11 : f32 to vector<64x128xf32>
    %28 = arith.maximumf %26, %27 : vector<64x128xf32>
    %29 = arith.truncf %28 : vector<64x128xf32> to vector<64x128xbf16>
    %c0_12 = arith.constant 0 : index
    %c0_13 = arith.constant 0 : index
    %30 = vector.load %arg6[%c0_12, %c0_13] : memref<128x256xf32, #tpu.memory_space<vmem>>, vector<128x256xf32>
    %31 = arith.truncf %30 : vector<128x256xf32> to vector<128x256xbf16>
    %cst_14 = arith.constant dense<0.000000e+00> : vector<64x256xf32>
    %32 = tpu.matmul %29, %31, %cst_14 {dimension_numbers = #tpu.dot_dimension_numbers<[1], [0], [0], [1], [0, 0, 1, 1], [], []>} : vector<64x128xbf16>, vector<128x256xbf16>, vector<64x256xf32> -> vector<64x256xf32>
    %c0_15 = arith.constant 0 : index
    %c0_16 = arith.constant 0 : index
    %33 = vector.load %arg7[%c0_15, %c0_16] : memref<1x256xf32, #tpu.memory_space<vmem>>, vector<1x256xf32>
    %34 = vector.broadcast %33 : vector<1x256xf32> to vector<64x256xf32>
    %35 = arith.addf %32, %34 : vector<64x256xf32>
    %c0_17 = arith.constant 0 : index
    %c0_18 = arith.constant 0 : index
    %c0_19 = arith.constant 0 : index
    %36 = vector.load %arg8[%c0_17, %c0_18, %c0_19] : memref<1x64x256xf32, #tpu.memory_space<vmem>>, vector<1x64x256xf32>
    %37 = vector.shape_cast %36 : vector<1x64x256xf32> to vector<64x256xf32>
    %38 = vector.shape_cast %35 : vector<64x256xf32> to vector<1x64x256xf32>
    tpu.vector_store %arg8[%c0_17, %c0_18, %c0_19], %38 {strides = array<i32>} : memref<1x64x256xf32, #tpu.memory_space<vmem>>, vector<1x64x256xf32>,
    %c0_i32 = arith.constant 0 : i32
    %39 = arith.cmpi eq, %1, %c0_i32 : i32
    %40 = arith.extui %39 : i1 to i32
    %c0_i32_20 = arith.constant 0 : i32
    %41 = arith.cmpi ne, %40, %c0_i32_20 : i32
    scf.if %41 {
      %cst_27 = arith.constant 0.000000e+00 : f32
      %51 = vector.broadcast %cst_27 : f32 to vector<2x256xf32>
      %c0_28 = arith.constant 0 : index
      %c0_29 = arith.constant 0 : index
      %52 = vector.load %arg9[%c0_28, %c0_29] : memref<2x256xf32, #tpu.memory_space<vmem>>, vector<2x256xf32>
      tpu.vector_store %arg9[%c0_28, %c0_29], %51 {strides = array<i32>} : memref<2x256xf32, #tpu.memory_space<vmem>>, vector<2x256xf32>,
    } else {
    }
    %c0_21 = arith.constant 0 : index
    %c0_22 = arith.constant 0 : index
    %42 = vector.load %arg9[%c0_21, %c0_22] : memref<2x256xf32, #tpu.memory_space<vmem>>, vector<2x256xf32>
    %cst_23 = arith.constant dense<0.000000e+00> : vector<256xf32>
    %43 = vector.multi_reduction <add>, %35, %cst_23 [0] : vector<64x256xf32> to vector<256xf32>
    %44 = vector.shape_cast %43 : vector<256xf32> to vector<1x256xf32>
    %45 = arith.mulf %35, %35 : vector<64x256xf32>
    %cst_24 = arith.constant dense<0.000000e+00> : vector<256xf32>
    %46 = vector.multi_reduction <add>, %45, %cst_24 [0] : vector<64x256xf32> to vector<256xf32>
    %47 = vector.shape_cast %46 : vector<256xf32> to vector<1x256xf32>
    %48 = tpu.concatenate %44, %47 in 0 : vector<1x256xf32>, vector<1x256xf32> -> vector<2x256xf32>
    %49 = arith.addf %42, %48 : vector<2x256xf32>
    %c0_25 = arith.constant 0 : index
    %c0_26 = arith.constant 0 : index
    %50 = vector.load %arg9[%c0_25, %c0_26] : memref<2x256xf32, #tpu.memory_space<vmem>>, vector<2x256xf32>
    tpu.vector_store %arg9[%c0_25, %c0_26], %49 {strides = array<i32>} : memref<2x256xf32, #tpu.memory_space<vmem>>, vector<2x256xf32>,
    return
  }
  func.func @transform_0(%arg0: i32, %arg1: i32) -> (i32, i32, i32) {
    %c0_i32 = arith.constant 0 : i32
    %c0_i32_0 = arith.constant 0 : i32
    return %arg0, %arg1, %c0_i32 : i32, i32, i32
  }
  func.func @transform_1(%arg0: i32, %arg1: i32) -> (i32, i32) {
    %c0_i32 = arith.constant 0 : i32
    %c0_i32_0 = arith.constant 0 : i32
    %c0_i32_1 = arith.constant 0 : i32
    return %c0_i32, %c0_i32_0 : i32, i32
  }
  func.func @transform_2(%arg0: i32, %arg1: i32) -> (i32, i32) {
    %c0_i32 = arith.constant 0 : i32
    %c0_i32_0 = arith.constant 0 : i32
    %c0_i32_1 = arith.constant 0 : i32
    return %c0_i32, %c0_i32_0 : i32, i32
  }
  func.func @transform_3(%arg0: i32, %arg1: i32) -> (i32, i32) {
    %c0_i32 = arith.constant 0 : i32
    %c0_i32_0 = arith.constant 0 : i32
    %c0_i32_1 = arith.constant 0 : i32
    return %c0_i32, %c0_i32_0 : i32, i32
  }
  func.func @transform_4(%arg0: i32, %arg1: i32) -> (i32, i32) {
    %c0_i32 = arith.constant 0 : i32
    %c0_i32_0 = arith.constant 0 : i32
    %c0_i32_1 = arith.constant 0 : i32
    return %c0_i32, %c0_i32_0 : i32, i32
  }
  func.func @transform_5(%arg0: i32, %arg1: i32) -> (i32, i32) {
    %c0_i32 = arith.constant 0 : i32
    %c0_i32_0 = arith.constant 0 : i32
    %c0_i32_1 = arith.constant 0 : i32
    return %c0_i32, %c0_i32_0 : i32, i32
  }
  func.func @transform_6(%arg0: i32, %arg1: i32) -> (i32, i32, i32) {
    %c0_i32 = arith.constant 0 : i32
    %c0_i32_0 = arith.constant 0 : i32
    return %arg0, %arg1, %c0_i32 : i32, i32, i32
  }
  func.func @transform_7(%arg0: i32, %arg1: i32) -> (i32, i32) {
    %c0_i32 = arith.constant 0 : i32
    %c0_i32_0 = arith.constant 0 : i32
    %c0_i32_1 = arith.constant 0 : i32
    return %c0_i32, %c0_i32_0 : i32, i32
  }
}

module attributes {stable_mosaic.version = 11 : i64} {
  func.func @_enc_mid_kernel(%arg0: i32, %arg1: i32, %arg2: memref<1x64x128xf32, #tpu.memory_space<vmem>>, %arg3: memref<1x128xf32, #tpu.memory_space<vmem>>, %arg4: memref<1x128xf32, #tpu.memory_space<vmem>>, %arg5: memref<2x128xf32, #tpu.memory_space<vmem>>, %arg6: memref<128x128xf32, #tpu.memory_space<vmem>>, %arg7: memref<1x128xf32, #tpu.memory_space<vmem>>, %arg8: memref<1x64x128xf32, #tpu.memory_space<vmem>>, %arg9: memref<2x128xf32, #tpu.memory_space<vmem>>) attributes {dimension_semantics = [#tpu.dimension_semantics<arbitrary>, #tpu.dimension_semantics<arbitrary>], iteration_bounds = array<i64: 2, 1>, scalar_prefetch = 0 : i64, scratch_operands = 0 : i64, tpu.core_type = #tpu.core_type<tc>, window_params = [{transform_indices = @transform_0, window_bounds = array<i64: 1, 64, 128>}, {pipeline_mode = #tpu.pipeline_mode<synchronous>, transform_indices = @transform_1, window_bounds = array<i64: 1, 128>}, {pipeline_mode = #tpu.pipeline_mode<synchronous>, transform_indices = @transform_2, window_bounds = array<i64: 1, 128>}, {pipeline_mode = #tpu.pipeline_mode<synchronous>, transform_indices = @transform_3, window_bounds = array<i64: 2, 128>}, {pipeline_mode = #tpu.pipeline_mode<synchronous>, transform_indices = @transform_4, window_bounds = array<i64: 128, 128>}, {pipeline_mode = #tpu.pipeline_mode<synchronous>, transform_indices = @transform_5, window_bounds = array<i64: 1, 128>}, {transform_indices = @transform_6, window_bounds = array<i64: 1, 64, 128>}, {pipeline_mode = #tpu.pipeline_mode<synchronous>, transform_indices = @transform_7, window_bounds = array<i64: 2, 128>}]} {
    %c1_i32 = arith.constant 1 : i32
    %0 = arith.muli %arg0, %c1_i32 : i32
    %1 = arith.addi %0, %arg1 : i32
    %c0 = arith.constant 0 : index
    %c0_0 = arith.constant 0 : index
    %2 = vector.load %arg5[%c0, %c0_0] : memref<2x128xf32, #tpu.memory_space<vmem>>, vector<2x128xf32>
    %c0_1 = arith.constant 0 : index
    %c0_2 = arith.constant 0 : index
    %3 = vector.load %arg3[%c0_1, %c0_2] : memref<1x128xf32, #tpu.memory_space<vmem>>, vector<1x128xf32>
    %c0_3 = arith.constant 0 : index
    %c0_4 = arith.constant 0 : index
    %4 = vector.load %arg4[%c0_3, %c0_4] : memref<1x128xf32, #tpu.memory_space<vmem>>, vector<1x128xf32>
    %5 = vector.extract_strided_slice %2 {offsets = [0, 0], sizes = [1, 128], strides = [1, 1]} : vector<2x128xf32> to vector<1x128xf32>
    %cst = arith.constant 7.812500e-03 : f32
    %6 = vector.broadcast %cst : f32 to vector<1x128xf32>
    %7 = arith.mulf %5, %6 : vector<1x128xf32>
    %8 = vector.extract_strided_slice %2 {offsets = [1, 0], sizes = [1, 128], strides = [1, 1]} : vector<2x128xf32> to vector<1x128xf32>
    %cst_5 = arith.constant 7.812500e-03 : f32
    %9 = vector.broadcast %cst_5 : f32 to vector<1x128xf32>
    %10 = arith.mulf %8, %9 : vector<1x128xf32>
    %11 = arith.mulf %7, %7 : vector<1x128xf32>
    %12 = arith.subf %10, %11 : vector<1x128xf32>
    %cst_6 = arith.constant 0.000000e+00 : f32
    %13 = vector.broadcast %cst_6 : f32 to vector<1x128xf32>
    %14 = arith.maximumf %12, %13 : vector<1x128xf32>
    %cst_7 = arith.constant 9.99999974E-6 : f32
    %15 = vector.broadcast %cst_7 : f32 to vector<1x128xf32>
    %16 = arith.addf %14, %15 : vector<1x128xf32>
    %17 = math.rsqrt %16 : vector<1x128xf32>
    %18 = arith.mulf %3, %17 : vector<1x128xf32>
    %19 = arith.mulf %7, %18 : vector<1x128xf32>
    %20 = arith.subf %4, %19 : vector<1x128xf32>
    %c0_8 = arith.constant 0 : index
    %c0_9 = arith.constant 0 : index
    %c0_10 = arith.constant 0 : index
    %21 = vector.load %arg2[%c0_8, %c0_9, %c0_10] : memref<1x64x128xf32, #tpu.memory_space<vmem>>, vector<1x64x128xf32>
    %22 = vector.shape_cast %21 : vector<1x64x128xf32> to vector<64x128xf32>
    %23 = vector.broadcast %18 : vector<1x128xf32> to vector<64x128xf32>
    %24 = arith.mulf %22, %23 : vector<64x128xf32>
    %25 = vector.broadcast %20 : vector<1x128xf32> to vector<64x128xf32>
    %26 = arith.addf %24, %25 : vector<64x128xf32>
    %cst_11 = arith.constant 0.000000e+00 : f32
    %27 = vector.broadcast %cst_11 : f32 to vector<64x128xf32>
    %28 = arith.maximumf %26, %27 : vector<64x128xf32>
    %29 = arith.truncf %28 : vector<64x128xf32> to vector<64x128xbf16>
    %c0_12 = arith.constant 0 : index
    %c0_13 = arith.constant 0 : index
    %30 = vector.load %arg6[%c0_12, %c0_13] : memref<128x128xf32, #tpu.memory_space<vmem>>, vector<128x128xf32>
    %31 = arith.truncf %30 : vector<128x128xf32> to vector<128x128xbf16>
    %cst_14 = arith.constant dense<0.000000e+00> : vector<64x128xf32>
    %32 = tpu.matmul %29, %31, %cst_14 {dimension_numbers = #tpu.dot_dimension_numbers<[1], [0], [0], [1], [0, 0, 1, 1], [], []>} : vector<64x128xbf16>, vector<128x128xbf16>, vector<64x128xf32> -> vector<64x128xf32>
    %c0_15 = arith.constant 0 : index
    %c0_16 = arith.constant 0 : index
    %33 = vector.load %arg7[%c0_15, %c0_16] : memref<1x128xf32, #tpu.memory_space<vmem>>, vector<1x128xf32>
    %34 = vector.broadcast %33 : vector<1x128xf32> to vector<64x128xf32>
    %35 = arith.addf %32, %34 : vector<64x128xf32>
    %c0_17 = arith.constant 0 : index
    %c0_18 = arith.constant 0 : index
    %c0_19 = arith.constant 0 : index
    %36 = vector.load %arg8[%c0_17, %c0_18, %c0_19] : memref<1x64x128xf32, #tpu.memory_space<vmem>>, vector<1x64x128xf32>
    %37 = vector.shape_cast %36 : vector<1x64x128xf32> to vector<64x128xf32>
    %38 = vector.shape_cast %35 : vector<64x128xf32> to vector<1x64x128xf32>
    tpu.vector_store %arg8[%c0_17, %c0_18, %c0_19], %38 {strides = array<i32>} : memref<1x64x128xf32, #tpu.memory_space<vmem>>, vector<1x64x128xf32>,
    %c0_i32 = arith.constant 0 : i32
    %39 = arith.cmpi eq, %1, %c0_i32 : i32
    %40 = arith.extui %39 : i1 to i32
    %c0_i32_20 = arith.constant 0 : i32
    %41 = arith.cmpi ne, %40, %c0_i32_20 : i32
    scf.if %41 {
      %cst_27 = arith.constant 0.000000e+00 : f32
      %51 = vector.broadcast %cst_27 : f32 to vector<2x128xf32>
      %c0_28 = arith.constant 0 : index
      %c0_29 = arith.constant 0 : index
      %52 = vector.load %arg9[%c0_28, %c0_29] : memref<2x128xf32, #tpu.memory_space<vmem>>, vector<2x128xf32>
      tpu.vector_store %arg9[%c0_28, %c0_29], %51 {strides = array<i32>} : memref<2x128xf32, #tpu.memory_space<vmem>>, vector<2x128xf32>,
    } else {
    }
    %c0_21 = arith.constant 0 : index
    %c0_22 = arith.constant 0 : index
    %42 = vector.load %arg9[%c0_21, %c0_22] : memref<2x128xf32, #tpu.memory_space<vmem>>, vector<2x128xf32>
    %cst_23 = arith.constant dense<0.000000e+00> : vector<128xf32>
    %43 = vector.multi_reduction <add>, %35, %cst_23 [0] : vector<64x128xf32> to vector<128xf32>
    %44 = vector.shape_cast %43 : vector<128xf32> to vector<1x128xf32>
    %45 = arith.mulf %35, %35 : vector<64x128xf32>
    %cst_24 = arith.constant dense<0.000000e+00> : vector<128xf32>
    %46 = vector.multi_reduction <add>, %45, %cst_24 [0] : vector<64x128xf32> to vector<128xf32>
    %47 = vector.shape_cast %46 : vector<128xf32> to vector<1x128xf32>
    %48 = tpu.concatenate %44, %47 in 0 : vector<1x128xf32>, vector<1x128xf32> -> vector<2x128xf32>
    %49 = arith.addf %42, %48 : vector<2x128xf32>
    %c0_25 = arith.constant 0 : index
    %c0_26 = arith.constant 0 : index
    %50 = vector.load %arg9[%c0_25, %c0_26] : memref<2x128xf32, #tpu.memory_space<vmem>>, vector<2x128xf32>
    tpu.vector_store %arg9[%c0_25, %c0_26], %49 {strides = array<i32>} : memref<2x128xf32, #tpu.memory_space<vmem>>, vector<2x128xf32>,
    return
  }
  func.func @transform_0(%arg0: i32, %arg1: i32) -> (i32, i32, i32) {
    %c0_i32 = arith.constant 0 : i32
    %c0_i32_0 = arith.constant 0 : i32
    return %arg0, %arg1, %c0_i32 : i32, i32, i32
  }
  func.func @transform_1(%arg0: i32, %arg1: i32) -> (i32, i32) {
    %c0_i32 = arith.constant 0 : i32
    %c0_i32_0 = arith.constant 0 : i32
    %c0_i32_1 = arith.constant 0 : i32
    return %c0_i32, %c0_i32_0 : i32, i32
  }
  func.func @transform_2(%arg0: i32, %arg1: i32) -> (i32, i32) {
    %c0_i32 = arith.constant 0 : i32
    %c0_i32_0 = arith.constant 0 : i32
    %c0_i32_1 = arith.constant 0 : i32
    return %c0_i32, %c0_i32_0 : i32, i32
  }
  func.func @transform_3(%arg0: i32, %arg1: i32) -> (i32, i32) {
    %c0_i32 = arith.constant 0 : i32
    %c0_i32_0 = arith.constant 0 : i32
    %c0_i32_1 = arith.constant 0 : i32
    return %c0_i32, %c0_i32_0 : i32, i32
  }
  func.func @transform_4(%arg0: i32, %arg1: i32) -> (i32, i32) {
    %c0_i32 = arith.constant 0 : i32
    %c0_i32_0 = arith.constant 0 : i32
    %c0_i32_1 = arith.constant 0 : i32
    return %c0_i32, %c0_i32_0 : i32, i32
  }
  func.func @transform_5(%arg0: i32, %arg1: i32) -> (i32, i32) {
    %c0_i32 = arith.constant 0 : i32
    %c0_i32_0 = arith.constant 0 : i32
    %c0_i32_1 = arith.constant 0 : i32
    return %c0_i32, %c0_i32_0 : i32, i32
  }
  func.func @transform_6(%arg0: i32, %arg1: i32) -> (i32, i32, i32) {
    %c0_i32 = arith.constant 0 : i32
    %c0_i32_0 = arith.constant 0 : i32
    return %arg0, %arg1, %c0_i32 : i32, i32, i32
  }
  func.func @transform_7(%arg0: i32, %arg1: i32) -> (i32, i32) {
    %c0_i32 = arith.constant 0 : i32
    %c0_i32_0 = arith.constant 0 : i32
    %c0_i32_1 = arith.constant 0 : i32
    return %c0_i32, %c0_i32_0 : i32, i32
  }
}

module attributes {stable_mosaic.version = 11 : i64} {
  func.func @_enc_last_kernel(%arg0: i32, %arg1: i32, %arg2: memref<1x64x256xf32, #tpu.memory_space<vmem>>, %arg3: memref<1x256xf32, #tpu.memory_space<vmem>>, %arg4: memref<1x256xf32, #tpu.memory_space<vmem>>, %arg5: memref<2x256xf32, #tpu.memory_space<vmem>>, %arg6: memref<256x512xf32, #tpu.memory_space<vmem>>, %arg7: memref<1x512xf32, #tpu.memory_space<vmem>>, %arg8: memref<1x2x512xf32, #tpu.memory_space<vmem>>, %arg9: memref<2x512xf32, #tpu.memory_space<vmem>>) attributes {dimension_semantics = [#tpu.dimension_semantics<arbitrary>, #tpu.dimension_semantics<arbitrary>], iteration_bounds = array<i64: 2, 1>, scalar_prefetch = 0 : i64, scratch_operands = 0 : i64, tpu.core_type = #tpu.core_type<tc>, window_params = [{transform_indices = @transform_0, window_bounds = array<i64: 1, 64, 256>}, {pipeline_mode = #tpu.pipeline_mode<synchronous>, transform_indices = @transform_1, window_bounds = array<i64: 1, 256>}, {pipeline_mode = #tpu.pipeline_mode<synchronous>, transform_indices = @transform_2, window_bounds = array<i64: 1, 256>}, {pipeline_mode = #tpu.pipeline_mode<synchronous>, transform_indices = @transform_3, window_bounds = array<i64: 2, 256>}, {pipeline_mode = #tpu.pipeline_mode<synchronous>, transform_indices = @transform_4, window_bounds = array<i64: 256, 512>}, {pipeline_mode = #tpu.pipeline_mode<synchronous>, transform_indices = @transform_5, window_bounds = array<i64: 1, 512>}, {transform_indices = @transform_6, window_bounds = array<i64: 1, 2, 512>}, {pipeline_mode = #tpu.pipeline_mode<synchronous>, transform_indices = @transform_7, window_bounds = array<i64: 2, 512>}]} {
    %c1_i32 = arith.constant 1 : i32
    %0 = arith.muli %arg0, %c1_i32 : i32
    %1 = arith.addi %0, %arg1 : i32
    %c0 = arith.constant 0 : index
    %c0_0 = arith.constant 0 : index
    %2 = vector.load %arg5[%c0, %c0_0] : memref<2x256xf32, #tpu.memory_space<vmem>>, vector<2x256xf32>
    %c0_1 = arith.constant 0 : index
    %c0_2 = arith.constant 0 : index
    %3 = vector.load %arg3[%c0_1, %c0_2] : memref<1x256xf32, #tpu.memory_space<vmem>>, vector<1x256xf32>
    %c0_3 = arith.constant 0 : index
    %c0_4 = arith.constant 0 : index
    %4 = vector.load %arg4[%c0_3, %c0_4] : memref<1x256xf32, #tpu.memory_space<vmem>>, vector<1x256xf32>
    %5 = vector.extract_strided_slice %2 {offsets = [0, 0], sizes = [1, 256], strides = [1, 1]} : vector<2x256xf32> to vector<1x256xf32>
    %cst = arith.constant 7.812500e-03 : f32
    %6 = vector.broadcast %cst : f32 to vector<1x256xf32>
    %7 = arith.mulf %5, %6 : vector<1x256xf32>
    %8 = vector.extract_strided_slice %2 {offsets = [1, 0], sizes = [1, 256], strides = [1, 1]} : vector<2x256xf32> to vector<1x256xf32>
    %cst_5 = arith.constant 7.812500e-03 : f32
    %9 = vector.broadcast %cst_5 : f32 to vector<1x256xf32>
    %10 = arith.mulf %8, %9 : vector<1x256xf32>
    %11 = arith.mulf %7, %7 : vector<1x256xf32>
    %12 = arith.subf %10, %11 : vector<1x256xf32>
    %cst_6 = arith.constant 0.000000e+00 : f32
    %13 = vector.broadcast %cst_6 : f32 to vector<1x256xf32>
    %14 = arith.maximumf %12, %13 : vector<1x256xf32>
    %cst_7 = arith.constant 9.99999974E-6 : f32
    %15 = vector.broadcast %cst_7 : f32 to vector<1x256xf32>
    %16 = arith.addf %14, %15 : vector<1x256xf32>
    %17 = math.rsqrt %16 : vector<1x256xf32>
    %18 = arith.mulf %3, %17 : vector<1x256xf32>
    %19 = arith.mulf %7, %18 : vector<1x256xf32>
    %20 = arith.subf %4, %19 : vector<1x256xf32>
    %c0_8 = arith.constant 0 : index
    %c0_9 = arith.constant 0 : index
    %c0_10 = arith.constant 0 : index
    %21 = vector.load %arg2[%c0_8, %c0_9, %c0_10] : memref<1x64x256xf32, #tpu.memory_space<vmem>>, vector<1x64x256xf32>
    %22 = vector.shape_cast %21 : vector<1x64x256xf32> to vector<64x256xf32>
    %23 = vector.broadcast %18 : vector<1x256xf32> to vector<64x256xf32>
    %24 = arith.mulf %22, %23 : vector<64x256xf32>
    %25 = vector.broadcast %20 : vector<1x256xf32> to vector<64x256xf32>
    %26 = arith.addf %24, %25 : vector<64x256xf32>
    %cst_11 = arith.constant 0.000000e+00 : f32
    %27 = vector.broadcast %cst_11 : f32 to vector<64x256xf32>
    %28 = arith.maximumf %26, %27 : vector<64x256xf32>
    %29 = arith.truncf %28 : vector<64x256xf32> to vector<64x256xbf16>
    %c0_12 = arith.constant 0 : index
    %c0_13 = arith.constant 0 : index
    %30 = vector.load %arg6[%c0_12, %c0_13] : memref<256x512xf32, #tpu.memory_space<vmem>>, vector<256x512xf32>
    %31 = arith.truncf %30 : vector<256x512xf32> to vector<256x512xbf16>
    %cst_14 = arith.constant dense<0.000000e+00> : vector<64x512xf32>
    %32 = tpu.matmul %29, %31, %cst_14 {dimension_numbers = #tpu.dot_dimension_numbers<[1], [0], [0], [1], [0, 0, 1, 1], [], []>} : vector<64x256xbf16>, vector<256x512xbf16>, vector<64x512xf32> -> vector<64x512xf32>
    %c0_15 = arith.constant 0 : index
    %c0_16 = arith.constant 0 : index
    %33 = vector.load %arg7[%c0_15, %c0_16] : memref<1x512xf32, #tpu.memory_space<vmem>>, vector<1x512xf32>
    %34 = vector.broadcast %33 : vector<1x512xf32> to vector<64x512xf32>
    %35 = arith.addf %32, %34 : vector<64x512xf32>
    %c0_i32 = arith.constant 0 : i32
    %36 = arith.cmpi eq, %arg1, %c0_i32 : i32
    %37 = arith.extui %36 : i1 to i32
    %c0_i32_17 = arith.constant 0 : i32
    %38 = arith.cmpi ne, %37, %c0_i32_17 : i32
    scf.if %38 {
      %cst_34 = arith.constant 0xFF800000 : f32
      %65 = vector.broadcast %cst_34 : f32 to vector<1x512xf32>
      %cst_35 = arith.constant 0x7F800000 : f32
      %66 = vector.broadcast %cst_35 : f32 to vector<1x512xf32>
      %67 = tpu.concatenate %65, %66 in 0 : vector<1x512xf32>, vector<1x512xf32> -> vector<2x512xf32>
      %c0_36 = arith.constant 0 : index
      %c0_37 = arith.constant 0 : index
      %c0_38 = arith.constant 0 : index
      %68 = vector.load %arg8[%c0_36, %c0_37, %c0_38] : memref<1x2x512xf32, #tpu.memory_space<vmem>>, vector<1x2x512xf32>
      %69 = vector.shape_cast %68 : vector<1x2x512xf32> to vector<2x512xf32>
      %70 = vector.shape_cast %67 : vector<2x512xf32> to vector<1x2x512xf32>
      tpu.vector_store %arg8[%c0_36, %c0_37, %c0_38], %70 {strides = array<i32>} : memref<1x2x512xf32, #tpu.memory_space<vmem>>, vector<1x2x512xf32>,
    } else {
    }
    %c0_18 = arith.constant 0 : index
    %c0_19 = arith.constant 0 : index
    %c0_20 = arith.constant 0 : index
    %39 = vector.load %arg8[%c0_18, %c0_19, %c0_20] : memref<1x2x512xf32, #tpu.memory_space<vmem>>, vector<1x2x512xf32>
    %40 = vector.shape_cast %39 : vector<1x2x512xf32> to vector<2x512xf32>
    %41 = vector.extract_strided_slice %40 {offsets = [0, 0], sizes = [1, 512], strides = [1, 1]} : vector<2x512xf32> to vector<1x512xf32>
    %cst_21 = arith.constant dense<0xFF800000> : vector<512xf32>
    %42 = vector.multi_reduction <maximumf>, %35, %cst_21 [0] : vector<64x512xf32> to vector<512xf32>
    %43 = vector.shape_cast %42 : vector<512xf32> to vector<1x512xf32>
    %44 = arith.maximumf %41, %43 : vector<1x512xf32>
    %45 = vector.extract_strided_slice %40 {offsets = [1, 0], sizes = [1, 512], strides = [1, 1]} : vector<2x512xf32> to vector<1x512xf32>
    %cst_22 = arith.constant dense<0x7F800000> : vector<512xf32>
    %46 = vector.multi_reduction <minimumf>, %35, %cst_22 [0] : vector<64x512xf32> to vector<512xf32>
    %47 = vector.shape_cast %46 : vector<512xf32> to vector<1x512xf32>
    %48 = arith.minimumf %45, %47 : vector<1x512xf32>
    %49 = tpu.concatenate %44, %48 in 0 : vector<1x512xf32>, vector<1x512xf32> -> vector<2x512xf32>
    %c0_23 = arith.constant 0 : index
    %c0_24 = arith.constant 0 : index
    %c0_25 = arith.constant 0 : index
    %50 = vector.load %arg8[%c0_23, %c0_24, %c0_25] : memref<1x2x512xf32, #tpu.memory_space<vmem>>, vector<1x2x512xf32>
    %51 = vector.shape_cast %50 : vector<1x2x512xf32> to vector<2x512xf32>
    %52 = vector.shape_cast %49 : vector<2x512xf32> to vector<1x2x512xf32>
    tpu.vector_store %arg8[%c0_23, %c0_24, %c0_25], %52 {strides = array<i32>} : memref<1x2x512xf32, #tpu.memory_space<vmem>>, vector<1x2x512xf32>,
    %c0_i32_26 = arith.constant 0 : i32
    %53 = arith.cmpi eq, %1, %c0_i32_26 : i32
    %54 = arith.extui %53 : i1 to i32
    %c0_i32_27 = arith.constant 0 : i32
    %55 = arith.cmpi ne, %54, %c0_i32_27 : i32
    scf.if %55 {
      %cst_34 = arith.constant 0.000000e+00 : f32
      %65 = vector.broadcast %cst_34 : f32 to vector<2x512xf32>
      %c0_35 = arith.constant 0 : index
      %c0_36 = arith.constant 0 : index
      %66 = vector.load %arg9[%c0_35, %c0_36] : memref<2x512xf32, #tpu.memory_space<vmem>>, vector<2x512xf32>
      tpu.vector_store %arg9[%c0_35, %c0_36], %65 {strides = array<i32>} : memref<2x512xf32, #tpu.memory_space<vmem>>, vector<2x512xf32>,
    } else {
    }
    %c0_28 = arith.constant 0 : index
    %c0_29 = arith.constant 0 : index
    %56 = vector.load %arg9[%c0_28, %c0_29] : memref<2x512xf32, #tpu.memory_space<vmem>>, vector<2x512xf32>
    %cst_30 = arith.constant dense<0.000000e+00> : vector<512xf32>
    %57 = vector.multi_reduction <add>, %35, %cst_30 [0] : vector<64x512xf32> to vector<512xf32>
    %58 = vector.shape_cast %57 : vector<512xf32> to vector<1x512xf32>
    %59 = arith.mulf %35, %35 : vector<64x512xf32>
    %cst_31 = arith.constant dense<0.000000e+00> : vector<512xf32>
    %60 = vector.multi_reduction <add>, %59, %cst_31 [0] : vector<64x512xf32> to vector<512xf32>
    %61 = vector.shape_cast %60 : vector<512xf32> to vector<1x512xf32>
    %62 = tpu.concatenate %58, %61 in 0 : vector<1x512xf32>, vector<1x512xf32> -> vector<2x512xf32>
    %63 = arith.addf %56, %62 : vector<2x512xf32>
    %c0_32 = arith.constant 0 : index
    %c0_33 = arith.constant 0 : index
    %64 = vector.load %arg9[%c0_32, %c0_33] : memref<2x512xf32, #tpu.memory_space<vmem>>, vector<2x512xf32>
    tpu.vector_store %arg9[%c0_32, %c0_33], %63 {strides = array<i32>} : memref<2x512xf32, #tpu.memory_space<vmem>>, vector<2x512xf32>,
    return
  }
  func.func @transform_0(%arg0: i32, %arg1: i32) -> (i32, i32, i32) {
    %c0_i32 = arith.constant 0 : i32
    %c0_i32_0 = arith.constant 0 : i32
    return %arg0, %arg1, %c0_i32 : i32, i32, i32
  }
  func.func @transform_1(%arg0: i32, %arg1: i32) -> (i32, i32) {
    %c0_i32 = arith.constant 0 : i32
    %c0_i32_0 = arith.constant 0 : i32
    %c0_i32_1 = arith.constant 0 : i32
    return %c0_i32, %c0_i32_0 : i32, i32
  }
  func.func @transform_2(%arg0: i32, %arg1: i32) -> (i32, i32) {
    %c0_i32 = arith.constant 0 : i32
    %c0_i32_0 = arith.constant 0 : i32
    %c0_i32_1 = arith.constant 0 : i32
    return %c0_i32, %c0_i32_0 : i32, i32
  }
  func.func @transform_3(%arg0: i32, %arg1: i32) -> (i32, i32) {
    %c0_i32 = arith.constant 0 : i32
    %c0_i32_0 = arith.constant 0 : i32
    %c0_i32_1 = arith.constant 0 : i32
    return %c0_i32, %c0_i32_0 : i32, i32
  }
  func.func @transform_4(%arg0: i32, %arg1: i32) -> (i32, i32) {
    %c0_i32 = arith.constant 0 : i32
    %c0_i32_0 = arith.constant 0 : i32
    %c0_i32_1 = arith.constant 0 : i32
    return %c0_i32, %c0_i32_0 : i32, i32
  }
  func.func @transform_5(%arg0: i32, %arg1: i32) -> (i32, i32) {
    %c0_i32 = arith.constant 0 : i32
    %c0_i32_0 = arith.constant 0 : i32
    %c0_i32_1 = arith.constant 0 : i32
    return %c0_i32, %c0_i32_0 : i32, i32
  }
  func.func @transform_6(%arg0: i32, %arg1: i32) -> (i32, i32, i32) {
    %c0_i32 = arith.constant 0 : i32
    %c0_i32_0 = arith.constant 0 : i32
    %c0_i32_1 = arith.constant 0 : i32
    return %arg0, %c0_i32, %c0_i32_0 : i32, i32, i32
  }
  func.func @transform_7(%arg0: i32, %arg1: i32) -> (i32, i32) {
    %c0_i32 = arith.constant 0 : i32
    %c0_i32_0 = arith.constant 0 : i32
    %c0_i32_1 = arith.constant 0 : i32
    return %c0_i32, %c0_i32_0 : i32, i32
  }
}

module attributes {stable_mosaic.version = 11 : i64} {
  func.func @_head_dec_kernel(%arg0: memref<2x512xf32, #tpu.memory_space<vmem>>, %arg1: memref<2x512xf32, #tpu.memory_space<vmem>>, %arg2: memref<2x512xf32, #tpu.memory_space<vmem>>, %arg3: memref<1x512xf32, #tpu.memory_space<vmem>>, %arg4: memref<1x512xf32, #tpu.memory_space<vmem>>, %arg5: memref<512x256xf32, #tpu.memory_space<vmem>>, %arg6: memref<1x256xf32, #tpu.memory_space<vmem>>, %arg7: memref<1x256xf32, #tpu.memory_space<vmem>>, %arg8: memref<1x256xf32, #tpu.memory_space<vmem>>, %arg9: memref<256x128xf32, #tpu.memory_space<vmem>>, %arg10: memref<1x128xf32, #tpu.memory_space<vmem>>, %arg11: memref<1x128xf32, #tpu.memory_space<vmem>>, %arg12: memref<1x128xf32, #tpu.memory_space<vmem>>, %arg13: memref<128x128xf32, #tpu.memory_space<vmem>>, %arg14: memref<1x128xf32, #tpu.memory_space<vmem>>, %arg15: memref<512x256xf32, #tpu.memory_space<vmem>>, %arg16: memref<1x256xf32, #tpu.memory_space<vmem>>, %arg17: memref<1x256xf32, #tpu.memory_space<vmem>>, %arg18: memref<1x256xf32, #tpu.memory_space<vmem>>, %arg19: memref<256x128xf32, #tpu.memory_space<vmem>>, %arg20: memref<1x128xf32, #tpu.memory_space<vmem>>, %arg21: memref<1x128xf32, #tpu.memory_space<vmem>>, %arg22: memref<1x128xf32, #tpu.memory_space<vmem>>, %arg23: memref<128x128xf32, #tpu.memory_space<vmem>>, %arg24: memref<1x128xf32, #tpu.memory_space<vmem>>, %arg25: memref<128x256xf32, #tpu.memory_space<vmem>>, %arg26: memref<1x256xf32, #tpu.memory_space<vmem>>, %arg27: memref<256x256xf32, #tpu.memory_space<vmem>>, %arg28: memref<1x256xf32, #tpu.memory_space<vmem>>, %arg29: memref<256x192xf32, #tpu.memory_space<vmem>>, %arg30: memref<1x192xf32, #tpu.memory_space<vmem>>, %arg31: memref<2x128xf32, #tpu.memory_space<vmem>>, %arg32: memref<2x192xf32, #tpu.memory_space<vmem>>, %arg33: memref<1x1xf32, #tpu.memory_space<vmem>>) attributes {dimension_semantics = [], scalar_prefetch = 0 : i64, scratch_operands = 0 : i64, tpu.core_type = #tpu.core_type<tc>} {
    %c0 = arith.constant 0 : index
    %c0_0 = arith.constant 0 : index
    %0 = vector.load %arg2[%c0, %c0_0] : memref<2x512xf32, #tpu.memory_space<vmem>>, vector<2x512xf32>
    %c0_1 = arith.constant 0 : index
    %c0_2 = arith.constant 0 : index
    %1 = vector.load %arg3[%c0_1, %c0_2] : memref<1x512xf32, #tpu.memory_space<vmem>>, vector<1x512xf32>
    %c0_3 = arith.constant 0 : index
    %c0_4 = arith.constant 0 : index
    %2 = vector.load %arg4[%c0_3, %c0_4] : memref<1x512xf32, #tpu.memory_space<vmem>>, vector<1x512xf32>
    %3 = vector.extract_strided_slice %0 {offsets = [0, 0], sizes = [1, 512], strides = [1, 1]} : vector<2x512xf32> to vector<1x512xf32>
    %cst = arith.constant 7.812500e-03 : f32
    %4 = vector.broadcast %cst : f32 to vector<1x512xf32>
    %5 = arith.mulf %3, %4 : vector<1x512xf32>
    %6 = vector.extract_strided_slice %0 {offsets = [1, 0], sizes = [1, 512], strides = [1, 1]} : vector<2x512xf32> to vector<1x512xf32>
    %cst_5 = arith.constant 7.812500e-03 : f32
    %7 = vector.broadcast %cst_5 : f32 to vector<1x512xf32>
    %8 = arith.mulf %6, %7 : vector<1x512xf32>
    %9 = arith.mulf %5, %5 : vector<1x512xf32>
    %10 = arith.subf %8, %9 : vector<1x512xf32>
    %cst_6 = arith.constant 0.000000e+00 : f32
    %11 = vector.broadcast %cst_6 : f32 to vector<1x512xf32>
    %12 = arith.maximumf %10, %11 : vector<1x512xf32>
    %cst_7 = arith.constant 9.99999974E-6 : f32
    %13 = vector.broadcast %cst_7 : f32 to vector<1x512xf32>
    %14 = arith.addf %12, %13 : vector<1x512xf32>
    %15 = math.rsqrt %14 : vector<1x512xf32>
    %16 = arith.mulf %1, %15 : vector<1x512xf32>
    %17 = arith.mulf %5, %16 : vector<1x512xf32>
    %18 = arith.subf %2, %17 : vector<1x512xf32>
    %cst_8 = arith.constant 0.000000e+00 : f32
    %19 = vector.broadcast %cst_8 : f32 to vector<1x512xf32>
    %20 = arith.cmpf oge, %16, %19 : vector<1x512xf32>
    %c0_9 = arith.constant 0 : index
    %c0_10 = arith.constant 0 : index
    %21 = vector.load %arg0[%c0_9, %c0_10] : memref<2x512xf32, #tpu.memory_space<vmem>>, vector<2x512xf32>
    %c0_11 = arith.constant 0 : index
    %c0_12 = arith.constant 0 : index
    %22 = vector.load %arg1[%c0_11, %c0_12] : memref<2x512xf32, #tpu.memory_space<vmem>>, vector<2x512xf32>
    %23 = vector.shape_cast %20 : vector<1x512xi1> to vector<1x512xi1>
    %24 = vector.broadcast %23 : vector<1x512xi1> to vector<2x512xi1>
    %25 = arith.select %24, %21, %22 : vector<2x512xi1>, vector<2x512xf32>
    %26 = vector.broadcast %16 : vector<1x512xf32> to vector<2x512xf32>
    %27 = arith.mulf %25, %26 : vector<2x512xf32>
    %28 = vector.broadcast %18 : vector<1x512xf32> to vector<2x512xf32>
    %29 = arith.addf %27, %28 : vector<2x512xf32>
    %30 = arith.truncf %29 : vector<2x512xf32> to vector<2x512xbf16>
    %c0_13 = arith.constant 0 : index
    %c0_14 = arith.constant 0 : index
    %31 = vector.load %arg5[%c0_13, %c0_14] : memref<512x256xf32, #tpu.memory_space<vmem>>, vector<512x256xf32>
    %32 = arith.truncf %31 : vector<512x256xf32> to vector<512x256xbf16>
    %cst_15 = arith.constant dense<0.000000e+00> : vector<2x256xf32>
    %33 = tpu.matmul %30, %32, %cst_15 {dimension_numbers = #tpu.dot_dimension_numbers<[1], [0], [0], [1], [0, 0, 1, 1], [], []>} : vector<2x512xbf16>, vector<512x256xbf16>, vector<2x256xf32> -> vector<2x256xf32>
    %c0_16 = arith.constant 0 : index
    %c0_17 = arith.constant 0 : index
    %34 = vector.load %arg6[%c0_16, %c0_17] : memref<1x256xf32, #tpu.memory_space<vmem>>, vector<1x256xf32>
    %35 = vector.broadcast %34 : vector<1x256xf32> to vector<2x256xf32>
    %36 = arith.addf %33, %35 : vector<2x256xf32>
    %cst_18 = arith.constant dense<0.000000e+00> : vector<256xf32>
    %37 = vector.multi_reduction <add>, %36, %cst_18 [0] : vector<2x256xf32> to vector<256xf32>
    %38 = vector.shape_cast %37 : vector<256xf32> to vector<1x256xf32>
    %cst_19 = arith.constant 2.000000e+00 : f32
    %39 = vector.broadcast %cst_19 : f32 to vector<1x256xf32>
    %40 = arith.divf %38, %39 : vector<1x256xf32>
    %41 = vector.broadcast %40 : vector<1x256xf32> to vector<2x256xf32>
    %42 = arith.subf %36, %41 : vector<2x256xf32>
    %43 = arith.mulf %42, %42 : vector<2x256xf32>
    %cst_20 = arith.constant dense<0.000000e+00> : vector<256xf32>
    %44 = vector.multi_reduction <add>, %43, %cst_20 [0] : vector<2x256xf32> to vector<256xf32>
    %45 = vector.shape_cast %44 : vector<256xf32> to vector<1x256xf32>
    %cst_21 = arith.constant 2.000000e+00 : f32
    %46 = vector.broadcast %cst_21 : f32 to vector<1x256xf32>
    %47 = arith.divf %45, %46 : vector<1x256xf32>
    %48 = vector.broadcast %40 : vector<1x256xf32> to vector<2x256xf32>
    %49 = arith.subf %36, %48 : vector<2x256xf32>
    %cst_22 = arith.constant 9.99999974E-6 : f32
    %50 = vector.broadcast %cst_22 : f32 to vector<1x256xf32>
    %51 = arith.addf %47, %50 : vector<1x256xf32>
    %52 = math.rsqrt %51 : vector<1x256xf32>
    %53 = vector.broadcast %52 : vector<1x256xf32> to vector<2x256xf32>
    %54 = arith.mulf %49, %53 : vector<2x256xf32>
    %c0_23 = arith.constant 0 : index
    %c0_24 = arith.constant 0 : index
    %55 = vector.load %arg7[%c0_23, %c0_24] : memref<1x256xf32, #tpu.memory_space<vmem>>, vector<1x256xf32>
    %56 = vector.broadcast %55 : vector<1x256xf32> to vector<2x256xf32>
    %57 = arith.mulf %54, %56 : vector<2x256xf32>
    %c0_25 = arith.constant 0 : index
    %c0_26 = arith.constant 0 : index
    %58 = vector.load %arg8[%c0_25, %c0_26] : memref<1x256xf32, #tpu.memory_space<vmem>>, vector<1x256xf32>
    %59 = vector.broadcast %58 : vector<1x256xf32> to vector<2x256xf32>
    %60 = arith.addf %57, %59 : vector<2x256xf32>
    %cst_27 = arith.constant 0.000000e+00 : f32
    %61 = vector.broadcast %cst_27 : f32 to vector<2x256xf32>
    %62 = arith.maximumf %60, %61 : vector<2x256xf32>
    %63 = arith.truncf %62 : vector<2x256xf32> to vector<2x256xbf16>
    %c0_28 = arith.constant 0 : index
    %c0_29 = arith.constant 0 : index
    %64 = vector.load %arg9[%c0_28, %c0_29] : memref<256x128xf32, #tpu.memory_space<vmem>>, vector<256x128xf32>
    %65 = arith.truncf %64 : vector<256x128xf32> to vector<256x128xbf16>
    %cst_30 = arith.constant dense<0.000000e+00> : vector<2x128xf32>
    %66 = tpu.matmul %63, %65, %cst_30 {dimension_numbers = #tpu.dot_dimension_numbers<[1], [0], [0], [1], [0, 0, 1, 1], [], []>} : vector<2x256xbf16>, vector<256x128xbf16>, vector<2x128xf32> -> vector<2x128xf32>
    %c0_31 = arith.constant 0 : index
    %c0_32 = arith.constant 0 : index
    %67 = vector.load %arg10[%c0_31, %c0_32] : memref<1x128xf32, #tpu.memory_space<vmem>>, vector<1x128xf32>
    %68 = vector.broadcast %67 : vector<1x128xf32> to vector<2x128xf32>
    %69 = arith.addf %66, %68 : vector<2x128xf32>
    %cst_33 = arith.constant dense<0.000000e+00> : vector<128xf32>
    %70 = vector.multi_reduction <add>, %69, %cst_33 [0] : vector<2x128xf32> to vector<128xf32>
    %71 = vector.shape_cast %70 : vector<128xf32> to vector<1x128xf32>
    %cst_34 = arith.constant 2.000000e+00 : f32
    %72 = vector.broadcast %cst_34 : f32 to vector<1x128xf32>
    %73 = arith.divf %71, %72 : vector<1x128xf32>
    %74 = vector.broadcast %73 : vector<1x128xf32> to vector<2x128xf32>
    %75 = arith.subf %69, %74 : vector<2x128xf32>
    %76 = arith.mulf %75, %75 : vector<2x128xf32>
    %cst_35 = arith.constant dense<0.000000e+00> : vector<128xf32>
    %77 = vector.multi_reduction <add>, %76, %cst_35 [0] : vector<2x128xf32> to vector<128xf32>
    %78 = vector.shape_cast %77 : vector<128xf32> to vector<1x128xf32>
    %cst_36 = arith.constant 2.000000e+00 : f32
    %79 = vector.broadcast %cst_36 : f32 to vector<1x128xf32>
    %80 = arith.divf %78, %79 : vector<1x128xf32>
    %81 = vector.broadcast %73 : vector<1x128xf32> to vector<2x128xf32>
    %82 = arith.subf %69, %81 : vector<2x128xf32>
    %cst_37 = arith.constant 9.99999974E-6 : f32
    %83 = vector.broadcast %cst_37 : f32 to vector<1x128xf32>
    %84 = arith.addf %80, %83 : vector<1x128xf32>
    %85 = math.rsqrt %84 : vector<1x128xf32>
    %86 = vector.broadcast %85 : vector<1x128xf32> to vector<2x128xf32>
    %87 = arith.mulf %82, %86 : vector<2x128xf32>
    %c0_38 = arith.constant 0 : index
    %c0_39 = arith.constant 0 : index
    %88 = vector.load %arg11[%c0_38, %c0_39] : memref<1x128xf32, #tpu.memory_space<vmem>>, vector<1x128xf32>
    %89 = vector.broadcast %88 : vector<1x128xf32> to vector<2x128xf32>
    %90 = arith.mulf %87, %89 : vector<2x128xf32>
    %c0_40 = arith.constant 0 : index
    %c0_41 = arith.constant 0 : index
    %91 = vector.load %arg12[%c0_40, %c0_41] : memref<1x128xf32, #tpu.memory_space<vmem>>, vector<1x128xf32>
    %92 = vector.broadcast %91 : vector<1x128xf32> to vector<2x128xf32>
    %93 = arith.addf %90, %92 : vector<2x128xf32>
    %cst_42 = arith.constant 0.000000e+00 : f32
    %94 = vector.broadcast %cst_42 : f32 to vector<2x128xf32>
    %95 = arith.maximumf %93, %94 : vector<2x128xf32>
    %96 = arith.truncf %95 : vector<2x128xf32> to vector<2x128xbf16>
    %c0_43 = arith.constant 0 : index
    %c0_44 = arith.constant 0 : index
    %97 = vector.load %arg13[%c0_43, %c0_44] : memref<128x128xf32, #tpu.memory_space<vmem>>, vector<128x128xf32>
    %98 = arith.truncf %97 : vector<128x128xf32> to vector<128x128xbf16>
    %cst_45 = arith.constant dense<0.000000e+00> : vector<2x128xf32>
    %99 = tpu.matmul %96, %98, %cst_45 {dimension_numbers = #tpu.dot_dimension_numbers<[1], [0], [0], [1], [0, 0, 1, 1], [], []>} : vector<2x128xbf16>, vector<128x128xbf16>, vector<2x128xf32> -> vector<2x128xf32>
    %c0_46 = arith.constant 0 : index
    %c0_47 = arith.constant 0 : index
    %100 = vector.load %arg14[%c0_46, %c0_47] : memref<1x128xf32, #tpu.memory_space<vmem>>, vector<1x128xf32>
    %101 = vector.broadcast %100 : vector<1x128xf32> to vector<2x128xf32>
    %102 = arith.addf %99, %101 : vector<2x128xf32>
    %103 = arith.truncf %29 : vector<2x512xf32> to vector<2x512xbf16>
    %c0_48 = arith.constant 0 : index
    %c0_49 = arith.constant 0 : index
    %104 = vector.load %arg15[%c0_48, %c0_49] : memref<512x256xf32, #tpu.memory_space<vmem>>, vector<512x256xf32>
    %105 = arith.truncf %104 : vector<512x256xf32> to vector<512x256xbf16>
    %cst_50 = arith.constant dense<0.000000e+00> : vector<2x256xf32>
    %106 = tpu.matmul %103, %105, %cst_50 {dimension_numbers = #tpu.dot_dimension_numbers<[1], [0], [0], [1], [0, 0, 1, 1], [], []>} : vector<2x512xbf16>, vector<512x256xbf16>, vector<2x256xf32> -> vector<2x256xf32>
    %c0_51 = arith.constant 0 : index
    %c0_52 = arith.constant 0 : index
    %107 = vector.load %arg16[%c0_51, %c0_52] : memref<1x256xf32, #tpu.memory_space<vmem>>, vector<1x256xf32>
    %108 = vector.broadcast %107 : vector<1x256xf32> to vector<2x256xf32>
    %109 = arith.addf %106, %108 : vector<2x256xf32>
    %cst_53 = arith.constant dense<0.000000e+00> : vector<256xf32>
    %110 = vector.multi_reduction <add>, %109, %cst_53 [0] : vector<2x256xf32> to vector<256xf32>
    %111 = vector.shape_cast %110 : vector<256xf32> to vector<1x256xf32>
    %cst_54 = arith.constant 2.000000e+00 : f32
    %112 = vector.broadcast %cst_54 : f32 to vector<1x256xf32>
    %113 = arith.divf %111, %112 : vector<1x256xf32>
    %114 = vector.broadcast %113 : vector<1x256xf32> to vector<2x256xf32>
    %115 = arith.subf %109, %114 : vector<2x256xf32>
    %116 = arith.mulf %115, %115 : vector<2x256xf32>
    %cst_55 = arith.constant dense<0.000000e+00> : vector<256xf32>
    %117 = vector.multi_reduction <add>, %116, %cst_55 [0] : vector<2x256xf32> to vector<256xf32>
    %118 = vector.shape_cast %117 : vector<256xf32> to vector<1x256xf32>
    %cst_56 = arith.constant 2.000000e+00 : f32
    %119 = vector.broadcast %cst_56 : f32 to vector<1x256xf32>
    %120 = arith.divf %118, %119 : vector<1x256xf32>
    %121 = vector.broadcast %113 : vector<1x256xf32> to vector<2x256xf32>
    %122 = arith.subf %109, %121 : vector<2x256xf32>
    %cst_57 = arith.constant 9.99999974E-6 : f32
    %123 = vector.broadcast %cst_57 : f32 to vector<1x256xf32>
    %124 = arith.addf %120, %123 : vector<1x256xf32>
    %125 = math.rsqrt %124 : vector<1x256xf32>
    %126 = vector.broadcast %125 : vector<1x256xf32> to vector<2x256xf32>
    %127 = arith.mulf %122, %126 : vector<2x256xf32>
    %c0_58 = arith.constant 0 : index
    %c0_59 = arith.constant 0 : index
    %128 = vector.load %arg17[%c0_58, %c0_59] : memref<1x256xf32, #tpu.memory_space<vmem>>, vector<1x256xf32>
    %129 = vector.broadcast %128 : vector<1x256xf32> to vector<2x256xf32>
    %130 = arith.mulf %127, %129 : vector<2x256xf32>
    %c0_60 = arith.constant 0 : index
    %c0_61 = arith.constant 0 : index
    %131 = vector.load %arg18[%c0_60, %c0_61] : memref<1x256xf32, #tpu.memory_space<vmem>>, vector<1x256xf32>
    %132 = vector.broadcast %131 : vector<1x256xf32> to vector<2x256xf32>
    %133 = arith.addf %130, %132 : vector<2x256xf32>
    %cst_62 = arith.constant 0.000000e+00 : f32
    %134 = vector.broadcast %cst_62 : f32 to vector<2x256xf32>
    %135 = arith.maximumf %133, %134 : vector<2x256xf32>
    %136 = arith.truncf %135 : vector<2x256xf32> to vector<2x256xbf16>
    %c0_63 = arith.constant 0 : index
    %c0_64 = arith.constant 0 : index
    %137 = vector.load %arg19[%c0_63, %c0_64] : memref<256x128xf32, #tpu.memory_space<vmem>>, vector<256x128xf32>
    %138 = arith.truncf %137 : vector<256x128xf32> to vector<256x128xbf16>
    %cst_65 = arith.constant dense<0.000000e+00> : vector<2x128xf32>
    %139 = tpu.matmul %136, %138, %cst_65 {dimension_numbers = #tpu.dot_dimension_numbers<[1], [0], [0], [1], [0, 0, 1, 1], [], []>} : vector<2x256xbf16>, vector<256x128xbf16>, vector<2x128xf32> -> vector<2x128xf32>
    %c0_66 = arith.constant 0 : index
    %c0_67 = arith.constant 0 : index
    %140 = vector.load %arg20[%c0_66, %c0_67] : memref<1x128xf32, #tpu.memory_space<vmem>>, vector<1x128xf32>
    %141 = vector.broadcast %140 : vector<1x128xf32> to vector<2x128xf32>
    %142 = arith.addf %139, %141 : vector<2x128xf32>
    %cst_68 = arith.constant dense<0.000000e+00> : vector<128xf32>
    %143 = vector.multi_reduction <add>, %142, %cst_68 [0] : vector<2x128xf32> to vector<128xf32>
    %144 = vector.shape_cast %143 : vector<128xf32> to vector<1x128xf32>
    %cst_69 = arith.constant 2.000000e+00 : f32
    %145 = vector.broadcast %cst_69 : f32 to vector<1x128xf32>
    %146 = arith.divf %144, %145 : vector<1x128xf32>
    %147 = vector.broadcast %146 : vector<1x128xf32> to vector<2x128xf32>
    %148 = arith.subf %142, %147 : vector<2x128xf32>
    %149 = arith.mulf %148, %148 : vector<2x128xf32>
    %cst_70 = arith.constant dense<0.000000e+00> : vector<128xf32>
    %150 = vector.multi_reduction <add>, %149, %cst_70 [0] : vector<2x128xf32> to vector<128xf32>
    %151 = vector.shape_cast %150 : vector<128xf32> to vector<1x128xf32>
    %cst_71 = arith.constant 2.000000e+00 : f32
    %152 = vector.broadcast %cst_71 : f32 to vector<1x128xf32>
    %153 = arith.divf %151, %152 : vector<1x128xf32>
    %154 = vector.broadcast %146 : vector<1x128xf32> to vector<2x128xf32>
    %155 = arith.subf %142, %154 : vector<2x128xf32>
    %cst_72 = arith.constant 9.99999974E-6 : f32
    %156 = vector.broadcast %cst_72 : f32 to vector<1x128xf32>
    %157 = arith.addf %153, %156 : vector<1x128xf32>
    %158 = math.rsqrt %157 : vector<1x128xf32>
    %159 = vector.broadcast %158 : vector<1x128xf32> to vector<2x128xf32>
    %160 = arith.mulf %155, %159 : vector<2x128xf32>
    %c0_73 = arith.constant 0 : index
    %c0_74 = arith.constant 0 : index
    %161 = vector.load %arg21[%c0_73, %c0_74] : memref<1x128xf32, #tpu.memory_space<vmem>>, vector<1x128xf32>
    %162 = vector.broadcast %161 : vector<1x128xf32> to vector<2x128xf32>
    %163 = arith.mulf %160, %162 : vector<2x128xf32>
    %c0_75 = arith.constant 0 : index
    %c0_76 = arith.constant 0 : index
    %164 = vector.load %arg22[%c0_75, %c0_76] : memref<1x128xf32, #tpu.memory_space<vmem>>, vector<1x128xf32>
    %165 = vector.broadcast %164 : vector<1x128xf32> to vector<2x128xf32>
    %166 = arith.addf %163, %165 : vector<2x128xf32>
    %cst_77 = arith.constant 0.000000e+00 : f32
    %167 = vector.broadcast %cst_77 : f32 to vector<2x128xf32>
    %168 = arith.maximumf %166, %167 : vector<2x128xf32>
    %169 = arith.truncf %168 : vector<2x128xf32> to vector<2x128xbf16>
    %c0_78 = arith.constant 0 : index
    %c0_79 = arith.constant 0 : index
    %170 = vector.load %arg23[%c0_78, %c0_79] : memref<128x128xf32, #tpu.memory_space<vmem>>, vector<128x128xf32>
    %171 = arith.truncf %170 : vector<128x128xf32> to vector<128x128xbf16>
    %cst_80 = arith.constant dense<0.000000e+00> : vector<2x128xf32>
    %172 = tpu.matmul %169, %171, %cst_80 {dimension_numbers = #tpu.dot_dimension_numbers<[1], [0], [0], [1], [0, 0, 1, 1], [], []>} : vector<2x128xbf16>, vector<128x128xbf16>, vector<2x128xf32> -> vector<2x128xf32>
    %c0_81 = arith.constant 0 : index
    %c0_82 = arith.constant 0 : index
    %173 = vector.load %arg24[%c0_81, %c0_82] : memref<1x128xf32, #tpu.memory_space<vmem>>, vector<1x128xf32>
    %174 = vector.broadcast %173 : vector<1x128xf32> to vector<2x128xf32>
    %175 = arith.addf %172, %174 : vector<2x128xf32>
    %cst_83 = arith.constant 0.000000e+00 : f32
    %176 = vector.broadcast %cst_83 : f32 to vector<2x128xf32>
    %177 = arith.maximumf %175, %176 : vector<2x128xf32>
    %178 = vector.broadcast %cst_83 : f32 to vector<2x128xf32>
    %179 = arith.subf %175, %178 : vector<2x128xf32>
    %180 = arith.cmpf one, %179, %179 : vector<2x128xf32>
    %181 = vector.broadcast %cst_83 : f32 to vector<2x128xf32>
    %182 = arith.addf %175, %181 : vector<2x128xf32>
    %183 = math.absf %179 : vector<2x128xf32>
    %cst_84 = arith.constant 0.000000e+00 : f32
    %184 = vector.broadcast %cst_84 : f32 to vector<2x128xf32>
    %185 = arith.subf %184, %183 : vector<2x128xf32>
    %186 = math.exp %185 : vector<2x128xf32>
    %187 = math.log1p %186 : vector<2x128xf32>
    %188 = arith.addf %177, %187 : vector<2x128xf32>
    %189 = arith.select %180, %182, %188 : vector<2x128xi1>, vector<2x128xf32>
    %cst_85 = arith.constant 9.99999993E-9 : f32
    %190 = vector.broadcast %cst_85 : f32 to vector<2x128xf32>
    %191 = arith.addf %189, %190 : vector<2x128xf32>
    %192 = math.sqrt %191 : vector<2x128xf32>
    %c0_86 = arith.constant 0 : index
    %c0_87 = arith.constant 0 : index
    %193 = vector.load %arg31[%c0_86, %c0_87] : memref<2x128xf32, #tpu.memory_space<vmem>>, vector<2x128xf32>
    %194 = arith.mulf %192, %193 : vector<2x128xf32>
    %195 = arith.addf %102, %194 : vector<2x128xf32>
    %196 = math.log %191 : vector<2x128xf32>
    %cst_88 = arith.constant 0.000000e+00 : f32
    %197 = vector.broadcast %cst_88 : f32 to vector<2x128xf32>
    %198 = arith.subf %197, %196 : vector<2x128xf32>
    %199 = arith.addf %198, %191 : vector<2x128xf32>
    %200 = arith.mulf %102, %102 : vector<2x128xf32>
    %201 = arith.addf %199, %200 : vector<2x128xf32>
    %cst_89 = arith.constant 1.000000e+00 : f32
    %202 = vector.broadcast %cst_89 : f32 to vector<2x128xf32>
    %203 = arith.subf %201, %202 : vector<2x128xf32>
    %cst_90 = arith.constant 5.000000e-01 : f32
    %204 = vector.broadcast %cst_90 : f32 to vector<2x128xf32>
    %205 = arith.mulf %204, %203 : vector<2x128xf32>
    %cst_91 = arith.constant dense<0.000000e+00> : vector<2xf32>
    %206 = vector.multi_reduction <add>, %205, %cst_91 [1] : vector<2x128xf32> to vector<2xf32>
    %207 = vector.shape_cast %206 : vector<2xf32> to vector<2x1xf32>
    %cst_92 = arith.constant dense<0.000000e+00> : vector<1xf32>
    %208 = vector.multi_reduction <add>, %207, %cst_92 [0] : vector<2x1xf32> to vector<1xf32>
    %209 = vector.shape_cast %208 : vector<1xf32> to vector<1x1xf32>
    %cst_93 = arith.constant 2.000000e+00 : f32
    %210 = vector.broadcast %cst_93 : f32 to vector<1x1xf32>
    %211 = arith.divf %209, %210 : vector<1x1xf32>
    %c0_94 = arith.constant 0 : index
    %c0_95 = arith.constant 0 : index
    %212 = vector.load %arg33[%c0_94, %c0_95] : memref<1x1xf32, #tpu.memory_space<vmem>>, vector<1x1xf32>
    tpu.vector_store %arg33[%c0_94, %c0_95], %211 {strides = array<i32>} : memref<1x1xf32, #tpu.memory_space<vmem>>, vector<1x1xf32>,
    %213 = arith.truncf %195 : vector<2x128xf32> to vector<2x128xbf16>
    %c0_96 = arith.constant 0 : index
    %c0_97 = arith.constant 0 : index
    %214 = vector.load %arg25[%c0_96, %c0_97] : memref<128x256xf32, #tpu.memory_space<vmem>>, vector<128x256xf32>
    %215 = arith.truncf %214 : vector<128x256xf32> to vector<128x256xbf16>
    %cst_98 = arith.constant dense<0.000000e+00> : vector<2x256xf32>
    %216 = tpu.matmul %213, %215, %cst_98 {dimension_numbers = #tpu.dot_dimension_numbers<[1], [0], [0], [1], [0, 0, 1, 1], [], []>} : vector<2x128xbf16>, vector<128x256xbf16>, vector<2x256xf32> -> vector<2x256xf32>
    %c0_99 = arith.constant 0 : index
    %c0_100 = arith.constant 0 : index
    %217 = vector.load %arg26[%c0_99, %c0_100] : memref<1x256xf32, #tpu.memory_space<vmem>>, vector<1x256xf32>
    %218 = vector.broadcast %217 : vector<1x256xf32> to vector<2x256xf32>
    %219 = arith.addf %216, %218 : vector<2x256xf32>
    %cst_101 = arith.constant 0.000000e+00 : f32
    %220 = vector.broadcast %cst_101 : f32 to vector<2x256xf32>
    %221 = arith.maximumf %219, %220 : vector<2x256xf32>
    %222 = arith.truncf %221 : vector<2x256xf32> to vector<2x256xbf16>
    %c0_102 = arith.constant 0 : index
    %c0_103 = arith.constant 0 : index
    %223 = vector.load %arg27[%c0_102, %c0_103] : memref<256x256xf32, #tpu.memory_space<vmem>>, vector<256x256xf32>
    %224 = arith.truncf %223 : vector<256x256xf32> to vector<256x256xbf16>
    %cst_104 = arith.constant dense<0.000000e+00> : vector<2x256xf32>
    %225 = tpu.matmul %222, %224, %cst_104 {dimension_numbers = #tpu.dot_dimension_numbers<[1], [0], [0], [1], [0, 0, 1, 1], [], []>} : vector<2x256xbf16>, vector<256x256xbf16>, vector<2x256xf32> -> vector<2x256xf32>
    %c0_105 = arith.constant 0 : index
    %c0_106 = arith.constant 0 : index
    %226 = vector.load %arg28[%c0_105, %c0_106] : memref<1x256xf32, #tpu.memory_space<vmem>>, vector<1x256xf32>
    %227 = vector.broadcast %226 : vector<1x256xf32> to vector<2x256xf32>
    %228 = arith.addf %225, %227 : vector<2x256xf32>
    %cst_107 = arith.constant 0.000000e+00 : f32
    %229 = vector.broadcast %cst_107 : f32 to vector<2x256xf32>
    %230 = arith.maximumf %228, %229 : vector<2x256xf32>
    %231 = arith.truncf %230 : vector<2x256xf32> to vector<2x256xbf16>
    %c0_108 = arith.constant 0 : index
    %c0_109 = arith.constant 0 : index
    %232 = vector.load %arg29[%c0_108, %c0_109] : memref<256x192xf32, #tpu.memory_space<vmem>>, vector<256x192xf32>
    %233 = arith.truncf %232 : vector<256x192xf32> to vector<256x192xbf16>
    %cst_110 = arith.constant dense<0.000000e+00> : vector<2x192xf32>
    %234 = tpu.matmul %231, %233, %cst_110 {dimension_numbers = #tpu.dot_dimension_numbers<[1], [0], [0], [1], [0, 0, 1, 1], [], []>} : vector<2x256xbf16>, vector<256x192xbf16>, vector<2x192xf32> -> vector<2x192xf32>
    %c0_111 = arith.constant 0 : index
    %c0_112 = arith.constant 0 : index
    %235 = vector.load %arg30[%c0_111, %c0_112] : memref<1x192xf32, #tpu.memory_space<vmem>>, vector<1x192xf32>
    %236 = vector.broadcast %235 : vector<1x192xf32> to vector<2x192xf32>
    %237 = arith.addf %234, %236 : vector<2x192xf32>
    %c0_113 = arith.constant 0 : index
    %c0_114 = arith.constant 0 : index
    %238 = vector.load %arg32[%c0_113, %c0_114] : memref<2x192xf32, #tpu.memory_space<vmem>>, vector<2x192xf32>
    tpu.vector_store %arg32[%c0_113, %c0_114], %237 {strides = array<i32>} : memref<2x192xf32, #tpu.memory_space<vmem>>, vector<2x192xf32>,
    return
  }
}

module attributes {stable_mosaic.version = 11 : i64} {
  func.func @_chamfer_kernel(%arg0: i32, %arg1: i32, %arg2: memref<1x3x64xf32, #tpu.memory_space<vmem>>, %arg3: memref<1x64x3xf32, #tpu.memory_space<vmem>>, %arg4: memref<1x1xf32, #tpu.memory_space<vmem>>, %arg5: memref<1x64xf32, #tpu.memory_space<vmem>>, %arg6: memref<1x1xf32, #tpu.memory_space<vmem>>, %arg7: memref<1x1xf32, #tpu.memory_space<vmem>>) attributes {dimension_semantics = [#tpu.dimension_semantics<arbitrary>, #tpu.dimension_semantics<arbitrary>], iteration_bounds = array<i64: 2, 1>, scalar_prefetch = 0 : i64, scratch_operands = 3 : i64, tpu.core_type = #tpu.core_type<tc>, window_params = [{transform_indices = @transform_0, window_bounds = array<i64: 1, 3, 64>}, {transform_indices = @transform_1, window_bounds = array<i64: 1, 64, 3>}, {pipeline_mode = #tpu.pipeline_mode<synchronous>, transform_indices = @transform_2, window_bounds = array<i64: 1, 1>}]} {
    %c1_i32 = arith.constant 1 : i32
    %0 = arith.muli %arg0, %c1_i32 : i32
    %1 = arith.addi %0, %arg1 : i32
    %c0_i32 = arith.constant 0 : i32
    %2 = arith.cmpi eq, %1, %c0_i32 : i32
    %3 = arith.extui %2 : i1 to i32
    %c0_i32_0 = arith.constant 0 : i32
    %4 = arith.cmpi ne, %3, %c0_i32_0 : i32
    scf.if %4 {
      %cst_23 = arith.constant 0.000000e+00 : f32
      %53 = vector.broadcast %cst_23 : f32 to vector<1x1xf32>
      %c0_24 = arith.constant 0 : index
      %c0_25 = arith.constant 0 : index
      %54 = vector.load %arg6[%c0_24, %c0_25] : memref<1x1xf32, #tpu.memory_space<vmem>>, vector<1x1xf32>
      tpu.vector_store %arg6[%c0_24, %c0_25], %53 {strides = array<i32>} : memref<1x1xf32, #tpu.memory_space<vmem>>, vector<1x1xf32>,
      %cst_26 = arith.constant 0.000000e+00 : f32
      %55 = vector.broadcast %cst_26 : f32 to vector<1x1xf32>
      %c0_27 = arith.constant 0 : index
      %c0_28 = arith.constant 0 : index
      %56 = vector.load %arg7[%c0_27, %c0_28] : memref<1x1xf32, #tpu.memory_space<vmem>>, vector<1x1xf32>
      tpu.vector_store %arg7[%c0_27, %c0_28], %55 {strides = array<i32>} : memref<1x1xf32, #tpu.memory_space<vmem>>, vector<1x1xf32>,
      %cst_29 = arith.constant 0.000000e+00 : f32
      %57 = vector.broadcast %cst_29 : f32 to vector<1x1xf32>
      %c0_30 = arith.constant 0 : index
      %c0_31 = arith.constant 0 : index
      %58 = vector.load %arg4[%c0_30, %c0_31] : memref<1x1xf32, #tpu.memory_space<vmem>>, vector<1x1xf32>
      tpu.vector_store %arg4[%c0_30, %c0_31], %57 {strides = array<i32>} : memref<1x1xf32, #tpu.memory_space<vmem>>, vector<1x1xf32>,
    } else {
    }
    %c0_i32_1 = arith.constant 0 : i32
    %5 = arith.cmpi eq, %arg1, %c0_i32_1 : i32
    %6 = arith.extui %5 : i1 to i32
    %c0_i32_2 = arith.constant 0 : i32
    %7 = arith.cmpi ne, %6, %c0_i32_2 : i32
    scf.if %7 {
      %cst_23 = arith.constant 0x7F800000 : f32
      %53 = vector.broadcast %cst_23 : f32 to vector<1x64xf32>
      %c0_24 = arith.constant 0 : index
      %c0_25 = arith.constant 0 : index
      %54 = vector.load %arg5[%c0_24, %c0_25] : memref<1x64xf32, #tpu.memory_space<vmem>>, vector<1x64xf32>
      tpu.vector_store %arg5[%c0_24, %c0_25], %53 {strides = array<i32>} : memref<1x64xf32, #tpu.memory_space<vmem>>, vector<1x64xf32>,
    } else {
    }
    %c0 = arith.constant 0 : index
    %c0_3 = arith.constant 0 : index
    %c0_4 = arith.constant 0 : index
    %8 = vector.load %arg2[%c0, %c0_3, %c0_4] : memref<1x3x64xf32, #tpu.memory_space<vmem>>, vector<1x3x64xf32>
    %9 = vector.shape_cast %8 : vector<1x3x64xf32> to vector<3x64xf32>
    %c0_5 = arith.constant 0 : index
    %c0_6 = arith.constant 0 : index
    %c0_7 = arith.constant 0 : index
    %10 = vector.load %arg3[%c0_5, %c0_6, %c0_7] : memref<1x64x3xf32, #tpu.memory_space<vmem>>, vector<1x64x3xf32>
    %11 = vector.shape_cast %10 : vector<1x64x3xf32> to vector<64x3xf32>
    %cst = arith.constant 0.000000e+00 : f32
    %12 = vector.broadcast %cst : f32 to vector<64x64xf32>
    %13 = vector.extract_strided_slice %11 {offsets = [0, 0], sizes = [64, 1], strides = [1, 1]} : vector<64x3xf32> to vector<64x1xf32>
    %14 = vector.extract_strided_slice %9 {offsets = [0, 0], sizes = [1, 64], strides = [1, 1]} : vector<3x64xf32> to vector<1x64xf32>
    %15 = vector.broadcast %13 : vector<64x1xf32> to vector<64x64xf32>
    %16 = vector.broadcast %14 : vector<1x64xf32> to vector<64x64xf32>
    %17 = arith.subf %15, %16 : vector<64x64xf32>
    %18 = arith.mulf %17, %17 : vector<64x64xf32>
    %19 = arith.addf %12, %18 : vector<64x64xf32>
    %20 = vector.extract_strided_slice %11 {offsets = [0, 1], sizes = [64, 1], strides = [1, 1]} : vector<64x3xf32> to vector<64x1xf32>
    %21 = vector.extract_strided_slice %9 {offsets = [1, 0], sizes = [1, 64], strides = [1, 1]} : vector<3x64xf32> to vector<1x64xf32>
    %22 = vector.broadcast %20 : vector<64x1xf32> to vector<64x64xf32>
    %23 = vector.broadcast %21 : vector<1x64xf32> to vector<64x64xf32>
    %24 = arith.subf %22, %23 : vector<64x64xf32>
    %25 = arith.mulf %24, %24 : vector<64x64xf32>
    %26 = arith.addf %19, %25 : vector<64x64xf32>
    %27 = vector.extract_strided_slice %11 {offsets = [0, 2], sizes = [64, 1], strides = [1, 1]} : vector<64x3xf32> to vector<64x1xf32>
    %28 = vector.extract_strided_slice %9 {offsets = [2, 0], sizes = [1, 64], strides = [1, 1]} : vector<3x64xf32> to vector<1x64xf32>
    %29 = vector.broadcast %27 : vector<64x1xf32> to vector<64x64xf32>
    %30 = vector.broadcast %28 : vector<1x64xf32> to vector<64x64xf32>
    %31 = arith.subf %29, %30 : vector<64x64xf32>
    %32 = arith.mulf %31, %31 : vector<64x64xf32>
    %33 = arith.addf %26, %32 : vector<64x64xf32>
    %c0_8 = arith.constant 0 : index
    %c0_9 = arith.constant 0 : index
    %34 = vector.load %arg7[%c0_8, %c0_9] : memref<1x1xf32, #tpu.memory_space<vmem>>, vector<1x1xf32>
    %cst_10 = arith.constant dense<0x7F800000> : vector<64xf32>
    %35 = vector.multi_reduction <minimumf>, %33, %cst_10 [1] : vector<64x64xf32> to vector<64xf32>
    %36 = vector.shape_cast %35 : vector<64xf32> to vector<64x1xf32>
    %37 = math.sqrt %36 : vector<64x1xf32>
    %cst_11 = arith.constant dense<0.000000e+00> : vector<1xf32>
    %38 = vector.multi_reduction <add>, %37, %cst_11 [0] : vector<64x1xf32> to vector<1xf32>
    %39 = vector.shape_cast %38 : vector<1xf32> to vector<1x1xf32>
    %40 = arith.addf %34, %39 : vector<1x1xf32>
    %c0_12 = arith.constant 0 : index
    %c0_13 = arith.constant 0 : index
    %41 = vector.load %arg7[%c0_12, %c0_13] : memref<1x1xf32, #tpu.memory_space<vmem>>, vector<1x1xf32>
    tpu.vector_store %arg7[%c0_12, %c0_13], %40 {strides = array<i32>} : memref<1x1xf32, #tpu.memory_space<vmem>>, vector<1x1xf32>,
    %c0_14 = arith.constant 0 : index
    %c0_15 = arith.constant 0 : index
    %42 = vector.load %arg5[%c0_14, %c0_15] : memref<1x64xf32, #tpu.memory_space<vmem>>, vector<1x64xf32>
    %cst_16 = arith.constant dense<0x7F800000> : vector<64xf32>
    %43 = vector.multi_reduction <minimumf>, %33, %cst_16 [0] : vector<64x64xf32> to vector<64xf32>
    %44 = vector.shape_cast %43 : vector<64xf32> to vector<1x64xf32>
    %45 = arith.minimumf %42, %44 : vector<1x64xf32>
    %c0_17 = arith.constant 0 : index
    %c0_18 = arith.constant 0 : index
    %46 = vector.load %arg5[%c0_17, %c0_18] : memref<1x64xf32, #tpu.memory_space<vmem>>, vector<1x64xf32>
    tpu.vector_store %arg5[%c0_17, %c0_18], %45 {strides = array<i32>} : memref<1x64xf32, #tpu.memory_space<vmem>>, vector<1x64xf32>,
    %c0_i32_19 = arith.constant 0 : i32
    %47 = arith.cmpi eq, %arg1, %c0_i32_19 : i32
    %48 = arith.extui %47 : i1 to i32
    %c0_i32_20 = arith.constant 0 : i32
    %49 = arith.cmpi ne, %48, %c0_i32_20 : i32
    scf.if %49 {
      %c0_23 = arith.constant 0 : index
      %c0_24 = arith.constant 0 : index
      %53 = vector.load %arg6[%c0_23, %c0_24] : memref<1x1xf32, #tpu.memory_space<vmem>>, vector<1x1xf32>
      %c0_25 = arith.constant 0 : index
      %c0_26 = arith.constant 0 : index
      %54 = vector.load %arg5[%c0_25, %c0_26] : memref<1x64xf32, #tpu.memory_space<vmem>>, vector<1x64xf32>
      %55 = math.sqrt %54 : vector<1x64xf32>
      %cst_27 = arith.constant dense<0.000000e+00> : vector<1xf32>
      %56 = vector.multi_reduction <add>, %55, %cst_27 [1] : vector<1x64xf32> to vector<1xf32>
      %57 = vector.shape_cast %56 : vector<1xf32> to vector<1x1xf32>
      %58 = arith.addf %53, %57 : vector<1x1xf32>
      %c0_28 = arith.constant 0 : index
      %c0_29 = arith.constant 0 : index
      %59 = vector.load %arg6[%c0_28, %c0_29] : memref<1x1xf32, #tpu.memory_space<vmem>>, vector<1x1xf32>
      tpu.vector_store %arg6[%c0_28, %c0_29], %58 {strides = array<i32>} : memref<1x1xf32, #tpu.memory_space<vmem>>, vector<1x1xf32>,
    } else {
    }
    %c1_i32_21 = arith.constant 1 : i32
    %50 = arith.cmpi eq, %1, %c1_i32_21 : i32
    %51 = arith.extui %50 : i1 to i32
    %c0_i32_22 = arith.constant 0 : i32
    %52 = arith.cmpi ne, %51, %c0_i32_22 : i32
    scf.if %52 {
      %c0_23 = arith.constant 0 : index
      %c0_24 = arith.constant 0 : index
      %53 = vector.load %arg6[%c0_23, %c0_24] : memref<1x1xf32, #tpu.memory_space<vmem>>, vector<1x1xf32>
      %cst_25 = arith.constant 1.280000e+02 : f32
      %54 = vector.broadcast %cst_25 : f32 to vector<1x1xf32>
      %55 = arith.divf %53, %54 : vector<1x1xf32>
      %c0_26 = arith.constant 0 : index
      %c0_27 = arith.constant 0 : index
      %56 = vector.load %arg7[%c0_26, %c0_27] : memref<1x1xf32, #tpu.memory_space<vmem>>, vector<1x1xf32>
      %cst_28 = arith.constant 1.280000e+02 : f32
      %57 = vector.broadcast %cst_28 : f32 to vector<1x1xf32>
      %58 = arith.divf %56, %57 : vector<1x1xf32>
      %59 = arith.addf %55, %58 : vector<1x1xf32>
      %cst_29 = arith.constant 5.000000e-01 : f32
      %60 = vector.broadcast %cst_29 : f32 to vector<1x1xf32>
      %61 = arith.mulf %60, %59 : vector<1x1xf32>
      %c0_30 = arith.constant 0 : index
      %c0_31 = arith.constant 0 : index
      %62 = vector.load %arg4[%c0_30, %c0_31] : memref<1x1xf32, #tpu.memory_space<vmem>>, vector<1x1xf32>
      tpu.vector_store %arg4[%c0_30, %c0_31], %61 {strides = array<i32>} : memref<1x1xf32, #tpu.memory_space<vmem>>, vector<1x1xf32>,
    } else {
    }
    return
  }
  func.func @transform_0(%arg0: i32, %arg1: i32) -> (i32, i32, i32) {
    %c0_i32 = arith.constant 0 : i32
    %c0_i32_0 = arith.constant 0 : i32
    %c0_i32_1 = arith.constant 0 : i32
    return %arg0, %c0_i32, %c0_i32_0 : i32, i32, i32
  }
  func.func @transform_1(%arg0: i32, %arg1: i32) -> (i32, i32, i32) {
    %c0_i32 = arith.constant 0 : i32
    %c0_i32_0 = arith.constant 0 : i32
    return %arg0, %arg1, %c0_i32 : i32, i32, i32
  }
  func.func @transform_2(%arg0: i32, %arg1: i32) -> (i32, i32) {
    %c0_i32 = arith.constant 0 : i32
    %c0_i32_0 = arith.constant 0 : i32
    %c0_i32_1 = arith.constant 0 : i32
    return %c0_i32, %c0_i32_0 : i32, i32
  }
}

</mosaic_0001>

<bundles_post_ra>
// kernel: base_vae_forward.6
= control target key start
LH: loop header
LB: loop body
LE: loop exit
PB: predicated region body
PF: predicated region fallthrough
CT: control target
= control target key end

     0   :  { %10 = vsyncpa [#allocation3], 0  ;;  %s952_s0 = inlined_call_operand.vmem [shape: f32[2,64,3], index: 0, kind: input, shape index: {}]   ;;  %s953_s1 = inlined_call_operand.hbm [shape: f32[3,128], index: 1, kind: input, shape index: {}]   ;;  %s954_s2 = inlined_call_operand.hbm [shape: f32[1,128], index: 2, kind: input, shape index: {}]   ;;  %s955_s3 = inlined_call_operand.vmem [shape: f32[2,64,128], index: 3, kind: output, shape index: {0}]   ;;  %s956_s4 = inlined_call_operand.vmem [shape: f32[2,128], index: 4, kind: output, shape index: {1}]  }
   0x1   :  { %11 = vsyncpa [#allocation5], 0  ;;  %s801_s15 = smov 0   ;;  %s803_s16 = smov 0  }
   0x2   :  { %s805_s17 = smov 0  }
   0x3 LB: > { %s601_s18 = sadd.s32 4294967295, %s768_s17   ;;  %s29_s19 = sadd.s32 1, %s764_s16  ;;  %s768_s17 = sphi %s805_s17, %s17_s17   ;;  %s764_s16 = sphi %s803_s16, %s960_s16   ;;  %s760_s15 = sphi %s801_s15, %s959_s15  }
   0x4   : > { %p31_p0 = scmp.ge.s32.totalorder %s29_s19, 2  ;;  %p603_p1 = scmp.ge.s32.totalorder %s768_s17, 1 }
   0x5   : > { %p153_p2 = scmp.lt.s32.totalorder %s768_s17, 3  ;;  %p826_p4 = scmp.eq.s32.totalorder %s601_s18, 0 }
   0x6   : > { %s962_s19 = smov (%p31_p0, %s29_s19), 0  ;;  %s165_s24 = sshll.u32 %s953_s1, 4  ;;  %s166_s24 = int_to_ptr.hbm [resolvable:$true] %s165_s24 }
   0x7   : > { %p822_p3 = pnand %p603_p1, %p153_p2  ;;  %s770_s25 = smov [#allocation2]  }
   0x8   : > { %s167_s26 = sshll.u32 %s770_s25, 4  ;;  %s177_s29 = sshll.u32 %s954_s2, 4  ;;  %s168_s26 = int_to_ptr.vmem [resolvable:$true] %s167_s26  ;;  %s178_s29 = int_to_ptr.hbm [resolvable:$true] %s177_s29 }
   0x9   : > { %p627_p5 = pneg %p822_p3  ;;  %s771_s30 = smov [#allocation4]  }
   0xa   : > { %s179_s5 = sshll.u32 %s771_s30, 4  ;;  %205 = sbr.rel (%p822_p3) target bundleno = 247 (0xf7), region = 32  ;;  %s180_s5 = int_to_ptr.vmem [resolvable:$true] %s179_s5 }
   0xb   : > { %p628_p6 = pnand %p826_p4, %p627_p5 }
   0xd   : > { %630 = dma.hbm_to_vmem [thread:$0]  (!%p628_p6), %s166_s24, 64, %s168_s26, [#allocation3]  }
   0xe   : > { %633 = dma.hbm_to_vmem [thread:$0]  (!%p628_p6), %s178_s29, 16, %s180_s5, [#allocation5]  }
   0xf   : > { %751 = dma.done.wait (%p826_p4), [#allocation3], 64  }
  0x10   : > { %753 = vsyncadd (%p826_p4), [#allocation3], 4294967232 }
  0x11   : > { %755 = dma.done.wait (%p826_p4), [#allocation5], 16  }
  0x12   : > { %757 = vsyncadd (%p826_p4), [#allocation5], 4294967280  ;;  %p246_p7 = scmp.lt.s32.totalorder %s760_s15, 1  ;;  %v772_v0 = vmov 0   ;;  %v773_v9 = vmov 1   ;;  %v774_v10 = vmov 2  }
  0x13   : > { %670 = vset.pattern.permute.xlu2 %v772_v0  ;;  %669 = vset.pattern.permute.xlu1 %v772_v0  ;;  %v274_v18 = vld [vmem:[#allocation2] sm:$0x7]  ;;  %v872_v30 = vld [vmem:[#allocation4] ss:$0 sm:$0xff]  ;;  %p614_p8 = scmp.ne.s32.totalorder %s760_s15, 0 }
  0x14   : > { %668 = vset.pattern.permute.xlu0 %v772_v0  ;;  %s852_s6 = scalar_select %p246_p7, %s760_s15, 1  ;;  %v862_v21 = vperm.slane %v274_v18, 0  ;;  %v864_v22 = vperm.slane %v274_v18, 1  ;;  %v870_v26 = vperm.slane %v274_v18, 2 }
  0x16   : > { %s617_s7 = sshll.u32 %s852_s6, 6 }
  0x17   : > { %s253_s10 = scalar_lea.vmem %s952_s0, %s617_s7  ;;  %s880_s13 = scalar_lea.vmem %s955_s3, %s617_s7 }
  0x18   : > { %v270_v1 = vld [vmem:[%s253_s10 + $0x20] sm:$0xff]  ;;  %v268_v2 = vld [vmem:[%s253_s10 + $0x10] sm:$0xff]  ;;  %v271_v4 = vld [vmem:[%s253_s10 + $0x28] sm:$0xff] }
  0x19   : > { %v266_v3 = vld [vmem:[%s253_s10] sm:$0xff]  ;;  %297 = vperm.xlu2 %670, %v270_v1   ;;  %287 = vperm.xlu1 %669, %v268_v2   ;;  %v269_v5 = vld [vmem:[%s253_s10 + $0x18] sm:$0xff]  ;;  %v267_v6 = vld [vmem:[%s253_s10 + $0x8] sm:$0xff] }
  0x1a   : > { %277 = vperm.xlu0 %668, %v266_v3   ;;  %v273_v7 = vld [vmem:[%s253_s10 + $0x38] sm:$0xff]  ;;  %v272_v8 = vld [vmem:[%s253_s10 + $0x30] sm:$0xff] }
  0x21   : > { %302 = vperm.xlu2 %670, %v271_v4   ;;  %292 = vperm.xlu1 %669, %v269_v5  }
  0x22   : > { %282 = vperm.xlu0 %668, %v267_v6  }
  0x29   : > { %671 = vset.pattern.permute.xlu2 %v773_v9  ;;  %312 = vperm.xlu1 %669, %v273_v7  }
  0x2a   : > { %307 = vperm.xlu0 %668, %v272_v8   ;;  %325 = vperm.xlu2 %671, %v266_v3  }
  0x31   : > { %673 = vset.pattern.permute.xlu1 %v773_v9 }
  0x32   : > { %672 = vset.pattern.permute.xlu0 %v773_v9  ;;  %333 = vperm.xlu1 %673, %v268_v2  }
  0x33   : > { %337 = vperm.xlu2 %671, %v269_v5   ;;  %329 = vperm.xlu0 %672, %v267_v6  }
  0x3a   : > { %341 = vperm.xlu1 %673, %v270_v1  }
  0x3b   : > { %345 = vperm.xlu2 %671, %v271_v4   ;;  %349 = vperm.xlu0 %672, %v272_v8  }
  0x42   : > { %353 = vperm.xlu1 %673, %v273_v7  }
  0x43   : > { %674 = vset.pattern.permute.xlu2 %v774_v10  ;;  %675 = vset.pattern.permute.xlu0 %v774_v10 }
  0x44   : > { %374 = vperm.xlu2 %674, %v266_v3   ;;  %378 = vperm.xlu0 %675, %v267_v6  }
  0x4a   : > { %676 = vset.pattern.permute.xlu1 %v774_v10 }
  0x4b   : > { %382 = vperm.xlu1 %676, %v268_v2  }
  0x4c   : > { %386 = vperm.xlu2 %674, %v269_v5   ;;  %398 = vperm.xlu0 %675, %v272_v8  }
  0x53   : > { %390 = vperm.xlu1 %676, %v270_v1  }
  0x54   : > { %394 = vperm.xlu2 %674, %v271_v4  }
  0x5b   : > { %402 = vperm.xlu1 %676, %v273_v7  }
  0x73   : > { %v860_v11 = vpop.permute.xlu2 %297 }
  0x7b   : > { %v303_v12 = vpop.permute.xlu2 %302 }
  0x7c   : > { %v321_v42 = vmul.f32 %v862_v21, %v303_v12  ;;  %v320_v12 = vmul.f32 %v862_v21, %v860_v11 }
  0x84   : > { %v326_v13 = vpop.permute.xlu2 %325 }
  0x85   : > { %v357_v23 = vmul.f32 %v864_v22, %v326_v13 }
  0x8b   : > { %v288_v14 = vpop.permute.xlu1 %287 }
  0x8c   : > { %v278_v15 = vpop.permute.xlu0 %277  ;;  %v318_v62 = vmul.f32 %v862_v21, %v288_v14 }
  0x8d   : > { %v338_v16 = vpop.permute.xlu2 %337  ;;  %v316_v24 = vmul.f32 %v862_v21, %v278_v15 }
  0x8e   : > { %v360_v33 = vmul.f32 %v864_v22, %v338_v16 }
  0x8f   : > { %v365_v28 = vadd.f32 %v357_v23, %v316_v24 }
  0x93   : > { %v293_v17 = vpop.permute.xlu1 %292 }
  0x94   : > { %v283_v19 = vpop.permute.xlu0 %282  ;;  %v319_v34 = vmul.f32 %v862_v21, %v293_v17 }
  0x95   : > { %v346_v20 = vpop.permute.xlu2 %345  ;;  %v317_v54 = vmul.f32 %v862_v21, %v283_v19 }
  0x96   : > { %v368_v39 = vadd.f32 %v360_v33, %v319_v34  ;;  %v362_v43 = vmul.f32 %v864_v22, %v346_v20 }
  0x98   : > { %v370_v48 = vadd.f32 %v362_v43, %v321_v42 }
  0x9b   : > { %v868_v25 = vpop.permute.xlu1 %312 }
  0x9c   : > { %v308_v27 = vpop.permute.xlu0 %307  ;;  %v323_v19 = vmul.f32 %v862_v21, %v868_v25 }
  0x9d   : > { %v322_v63 = vmul.f32 %v862_v21, %v308_v27 }
  0x9e   : > { %v375_v29 = vpop.permute.xlu2 %374 }
  0x9f   : > { %v406_v31 = vmul.f32 %v870_v26, %v375_v29 }
  0xa1   : > { %v414_v32 = vadd.f32 %v406_v31, %v365_v28 }
  0xa3   : > { %v885_v35 = vadd.f32 %v872_v30, %v414_v32 }
  0xa4   : > { %v334_v36 = vpop.permute.xlu1 %333 }
  0xa5   : > { %434 = vst [vmem:[%s880_s13] sm:$0xff] %v885_v35  ;;  %v330_v37 = vpop.permute.xlu0 %329  ;;  %v359_v59 = vmul.f32 %v864_v22, %v334_v36 }
  0xa6   : > { %v387_v38 = vpop.permute.xlu2 %386  ;;  %v358_v51 = vmul.f32 %v864_v22, %v330_v37 }
  0xa7   : > { %v409_v40 = vmul.f32 %v870_v26, %v387_v38  ;;  %v367_v1 = vadd.f32 %v359_v59, %v318_v62 }
  0xa8   : > { %v366_v56 = vadd.f32 %v358_v51, %v317_v54 }
  0xa9   : > { %v417_v41 = vadd.f32 %v409_v40, %v368_v39 }
  0xab   : > { %v893_v44 = vadd.f32 %v872_v30, %v417_v41 }
  0xac   : > { %v342_v45 = vpop.permute.xlu1 %341 }
  0xad   : > { %437 = vst [vmem:[%s880_s13 + $0x18] sm:$0xff] %v893_v44  ;;  %v350_v46 = vpop.permute.xlu0 %349  ;;  %v361_v8 = vmul.f32 %v864_v22, %v342_v45 }
  0xae   : > { %v395_v47 = vpop.permute.xlu2 %394  ;;  %v363_v60 = vmul.f32 %v864_v22, %v350_v46 }
  0xaf   : > { %v411_v49 = vmul.f32 %v870_v26, %v395_v47  ;;  %v369_v14 = vadd.f32 %v361_v8, %v320_v12 }
  0xb0   : > { %v371_v4 = vadd.f32 %v363_v60, %v322_v63 }
  0xb1   : > { %v419_v50 = vadd.f32 %v411_v49, %v370_v48 }
  0xb3   : > { %v431_v52 = vadd.f32 %v872_v30, %v419_v50 }
  0xb4   : > { %v354_v53 = vpop.permute.xlu1 %353 }
  0xb5   : > { %439 = vst [vmem:[%s880_s13 + $0x28] sm:$0xff] %v431_v52  ;;  %v364_v17 = vmul.f32 %v864_v22, %v354_v53 }
  0xb6   : > { %v379_v55 = vpop.permute.xlu0 %378 }
  0xb7   : > { %v407_v57 = vmul.f32 %v870_v26, %v379_v55  ;;  %v372_v23 = vadd.f32 %v364_v17, %v323_v19 }
  0xb9   : > { %v415_v58 = vadd.f32 %v407_v57, %v366_v56 }
  0xbb   : > { %v427_v61 = vadd.f32 %v872_v30, %v415_v58 }
  0xbd   : > { %435 = vst [vmem:[%s880_s13 + $0x8] sm:$0xff] %v427_v61  ;;  %v383_v0 = vpop.permute.xlu1 %382 }
  0xbe   : > { %v408_v2 = vmul.f32 %v870_v26, %v383_v0  ;;  %v399_v3 = vpop.permute.xlu0 %398 }
  0xbf   : > { %v412_v5 = vmul.f32 %v870_v26, %v399_v3 }
  0xc0   : > { %v416_v6 = vadd.f32 %v408_v2, %v367_v1 }
  0xc1   : > { %v420_v7 = vadd.f32 %v412_v5, %v371_v4 }
  0xc2   : > { %v428_v9 = vadd.f32 %v872_v30, %v416_v6 }
  0xc3   : > { %v432_v10 = vadd.f32 %v872_v30, %v420_v7 }
  0xc4   : > { %436 = vst [vmem:[%s880_s13 + $0x10] sm:$0xff] %v428_v9 }
  0xc5   : > { %440 = vst [vmem:[%s880_s13 + $0x30] sm:$0xff] %v432_v10  ;;  %v391_v13 = vpop.permute.xlu1 %390 }
  0xc6   : > { %v410_v15 = vmul.f32 %v870_v26, %v391_v13 }
  0xc8   : > { %v418_v16 = vadd.f32 %v410_v15, %v369_v14 }
  0xca   : > { %v430_v18 = vadd.f32 %v872_v30, %v418_v16 }
  0xcc   : > { %438 = vst [vmem:[%s880_s13 + $0x20] sm:$0xff] %v430_v18 }
  0xcd   : > { %v403_v20 = vpop.permute.xlu1 %402 }
  0xce   : > { %v413_v11 = vmul.f32 %v870_v26, %v403_v20 }
  0xd0   : > { %v421_v24 = vadd.f32 %v413_v11, %v372_v23  ;;  %445 = sbr.rel (%p614_p8) target bundleno = 215 (0xd7), region = 44 }
  0xd2   : > { %v433_v27 = vadd.f32 %v872_v30, %v421_v24 }
  0xd4   : > { %441 = vst [vmem:[%s880_s13 + $0x38] sm:$0xff] %v433_v27 }
  0xd5   : > { %v775_v28 = vmov 0.0  }
  0xd6   : > { %446 = vst [vmem:[%s956_s4] sm:$0x3] %v775_v28 }
  0xd7 PF: > { %v448_v21 = vadd.f32 %v427_v61, %v885_v35  ;;  %v461_v22 = vmul.f32 %v885_v35, %v885_v35  ;;  %v462_v25 = vmul.f32 %v427_v61, %v427_v61  ;;  %v463_v26 = vmul.f32 %v428_v9, %v428_v9 }
  0xd8   : > { %v464_v30 = vmul.f32 %v893_v44, %v893_v44  ;;  %v465_v33 = vmul.f32 %v430_v18, %v430_v18  ;;  %v466_v37 = vmul.f32 %v431_v52, %v431_v52  ;;  %v467_v40 = vmul.f32 %v432_v10, %v432_v10 }
  0xd9   : > { %v449_v29 = vadd.f32 %v448_v21, %v428_v9  ;;  %v469_v31 = vadd.f32 %v462_v25, %v461_v22  ;;  %v468_v43 = vmul.f32 %v433_v27, %v433_v27  ;;  %vm482_vm0 = vcmask 1040384  }
  0xdb   : > { %v450_v32 = vadd.f32 %v449_v29, %v893_v44  ;;  %v470_v34 = vadd.f32 %v469_v31, %v463_v26 }
  0xdd   : > { %v451_v36 = vadd.f32 %v450_v32, %v430_v18  ;;  %v471_v38 = vadd.f32 %v470_v34, %v464_v30 }
  0xdf   : > { %v452_v39 = vadd.f32 %v451_v36, %v431_v52  ;;  %v472_v41 = vadd.f32 %v471_v38, %v465_v33  ;;  %v447_v52 = vld [vmem:[%s956_s4] sm:$0x3] }
  0xe1   : > { %v453_v42 = vadd.f32 %v452_v39, %v432_v10  ;;  %v473_v35 = vadd.f32 %v472_v41, %v466_v37 }
  0xe3   : > { %v454_v45 = vadd.f32 %v453_v42, %v433_v27  ;;  %v474_v46 = vadd.f32 %v473_v35, %v467_v40 }
  0xe5   : > { %v455_v47 = vrot.slane %v454_v45, 4  ;;  %v475_v48 = vadd.f32 %v474_v46, %v468_v43 }
  0xe7   : > { %v456_v49 = vadd.f32 %v455_v47, %v454_v45  ;;  %v476_v50 = vrot.slane %v475_v48, 4 }
  0xe9   : > { %v457_v51 = vrot.slane %v456_v49, 2  ;;  %v477_v53 = vadd.f32 %v476_v50, %v475_v48 }
  0xeb   : > { %v458_v44 = vadd.f32 %v457_v51, %v456_v49  ;;  %v478_v54 = vrot.slane %v477_v53, 2 }
  0xed   : > { %v459_v55 = vrot.slane %v458_v44, 1  ;;  %v479_v56 = vadd.f32 %v478_v54, %v477_v53 }
  0xef   : > { %v460_v57 = vadd.f32 %v459_v55, %v458_v44  ;;  %v480_v58 = vrot.slane %v479_v56, 1 }
  0xf1   : > { %v481_v59 = vadd.f32 %v480_v58, %v479_v56 }
  0xf3   : > { %v483_v60 = vsel %vm482_vm0, %v460_v57, %v481_v59 }
  0xf4   : > { %v484_v61 = vadd.f32 %v483_v60, %v447_v52 }
  0xf6   : > { %485 = vst [vmem:[%s956_s4] sm:$0x3] %v484_v61 }
  0xf7 PF: > { %s17_s17 = sadd.s32 1, %s768_s17   ;;  %s959_s15 = smov %s764_s16 }
  0xf8   : > { %p14_p9 = scmp.ge.s32.totalorder %s17_s17, 4   ;;  %s960_s16 = smov %s962_s19 }
  0xfa   :  { %16 = sbr.rel (!%p14_p9) target bundleno = 3 (0x3), region = 83 }
  0xff   :  { %522 = vsyncpa [#allocation3], 1 }
 0x100   :  { %524 = vsyncpa [#allocation3 + $0x1], 1 }
 0x101   :  { %525 = vsyncpa [#allocation5], 1 }

// kernel: base_vae_forward.7
= control target key start
LH: loop header
LB: loop body
LE: loop exit
PB: predicated region body
PF: predicated region fallthrough
CT: control target
= control target key end

     0   :  { %13 = vsyncpa [#allocation3], 0  ;;  %s1126_s0 = inlined_call_operand.vmem [shape: f32[2,64,128], index: 0, kind: input, shape index: {}]   ;;  %s1127_s1 = inlined_call_operand.hbm [shape: f32[1,128], index: 1, kind: input, shape index: {}]   ;;  %s1128_s2 = inlined_call_operand.hbm [shape: f32[1,128], index: 2, kind: input, shape index: {}]   ;;  %s1129_s3 = inlined_call_operand.vmem [shape: f32[2,128], index: 3, kind: input, shape index: {}]   ;;  %s1130_s4 = inlined_call_operand.hbm [shape: f32[128,128], index: 4, kind: input, shape index: {}]   ;;  %s1131_s5 = inlined_call_operand.hbm [shape: f32[1,128], index: 5, kind: input, shape index: {}]   ;;  %s1132_s6 = inlined_call_operand.vmem [shape: f32[2,64,128], index: 6, kind: output, shape index: {0}]   ;;  %s1133_s7 = inlined_call_operand.vmem [shape: f32[2,128], index: 7, kind: output, shape index: {1}]  }
   0x1   :  { %14 = vsyncpa [#allocation5], 0 }
   0x2   :  { %15 = vsyncpa [#allocation8], 0  ;;  %s1012_s24 = smov 0   ;;  %s1014_s25 = smov 0  }
   0x3   :  { %s1016_s26 = smov 0  }
   0x4 LB: > { %s244_s29 = sshll.u32 %s1128_s2, 4  ;;  %s692_s30 = sadd.s32 4294967295, %s963_s26   ;;  %s963_s26 = sphi %s1016_s26, %s21_s26   ;;  %s959_s25 = sphi %s1014_s25, %s1138_s25   ;;  %s955_s24 = sphi %s1012_s24, %s1137_s24   ;;  %s245_s29 = int_to_ptr.hbm [resolvable:$true] %s244_s29 }
   0x5   : > { %p694_p0 = scmp.ge.s32.totalorder %s963_s26, 1  ;;  %p220_p1 = scmp.lt.s32.totalorder %s963_s26, 3 }
   0x6   : > { %p1033_p2 = scmp.eq.s32.totalorder %s692_s30, 0  ;;  %s965_s10 = smov [#allocation4]  }
   0x7   : > { %p1037_p3 = pnand %p694_p0, %p220_p1  ;;  %s246_s11 = sshll.u32 %s965_s10, 4  ;;  %s247_s11 = int_to_ptr.vmem [resolvable:$true] %s246_s11 }
   0x8   : > { %s33_s13 = sadd.s32 1, %s959_s25  ;;  %s232_s16 = sshll.u32 %s1127_s1, 4  ;;  %s233_s16 = int_to_ptr.hbm [resolvable:$true] %s232_s16 }
   0x9   : > { %p754_p4 = pneg %p1037_p3  ;;  %p35_p6 = scmp.ge.s32.totalorder %s33_s13, 2 }
   0xa   : > { %s258_s19 = sshll.u32 %s1130_s4, 4  ;;  %s966_s20 = smov [#allocation2]   ;;  %s259_s19 = int_to_ptr.hbm [resolvable:$true] %s258_s19 }
   0xb   : > { %p1045_p5 = pnand %p1033_p2, %p754_p4  ;;  %s1140_s13 = smov (%p35_p6, %s33_s13), 0 }
   0xc   : > { %s234_s21 = sshll.u32 %s966_s20, 4  ;;  %s967_s22 = smov [#allocation6]   ;;  %s235_s21 = int_to_ptr.vmem [resolvable:$true] %s234_s21 }
   0xd   : > { %760 = dma.hbm_to_vmem [thread:$0]  (!%p1045_p5), %s245_s29, 16, %s247_s11, [#allocation5]  }
   0xe   : > { %757 = dma.hbm_to_vmem [thread:$0]  (!%p1045_p5), %s233_s16, 16, %s235_s21, [#allocation3]  }
   0xf   : > { %s260_s23 = sshll.u32 %s967_s22, 4  ;;  %s968_s27 = smov 128   ;;  %s261_s23 = int_to_ptr.vmem [resolvable:$true] %s260_s23 }
  0x10   : > { %s969_s28 = smov 8   ;;  %s273_s10 = sshll.u32 %s1131_s5, 4  ;;  %s274_s10 = int_to_ptr.hbm [resolvable:$true] %s273_s10 }
  0x11   : > { %763 = dma.hbm_to_vmem [thread:$0]  (!%p1045_p5), %s259_s19, 2048, %s261_s23, [#allocation5], %s968_s27, %s968_s27, %s969_s28  }
  0x12   : > { %s970_s11 = smov [#allocation7]   ;;  %301 = sbr.rel (%p1037_p3) target bundleno = 262 (0x106), region = 44 }
  0x13   : > { %s275_s14 = sshll.u32 %s970_s11, 4  ;;  %s276_s14 = int_to_ptr.vmem [resolvable:$true] %s275_s14 }
  0x14   : > { %766 = dma.hbm_to_vmem [thread:$0]  (!%p1045_p5), %s274_s10, 16, %s276_s14, [#allocation8]  }
  0x17   : > { %942 = dma.done.wait (%p1033_p2), [#allocation3], 16  }
  0x18   : > { %944 = vsyncadd (%p1033_p2), [#allocation3], 4294967280 }
  0x19   : > { %946 = dma.done.wait (%p1033_p2), [#allocation5], 2064  }
  0x1a   : > { %948 = vsyncadd (%p1033_p2), [#allocation5], 4294965232 }
  0x1b   : > { %950 = dma.done.wait (%p1033_p2), [#allocation8], 16  }
  0x1c   : > { %952 = vsyncadd (%p1033_p2), [#allocation8], 4294967280  ;;  %v463_v0 = vld [vmem:[#allocation6 + $0x70] sm:$0xff]  ;;  %v464_v1 = vld [vmem:[#allocation6 + $0x78] sm:$0xff]  ;;  %p358_p7 = scmp.lt.s32.totalorder %s955_s24, 1  ;;  %p709_p8 = scmp.ne.s32.totalorder %s955_s24, 0 }
  0x1d   : > { %v461_v2 = vld [vmem:[#allocation6 + $0x60] sm:$0xff]  ;;  %v472_v3 = vpack.c.bf16 %v464_v1, %v463_v0  ;;  %v462_v4 = vld [vmem:[#allocation6 + $0x68] sm:$0xff]  ;;  %v459_v6 = vld [vmem:[#allocation6 + $0x50] sm:$0xff] }
  0x1e   : > { %v471_v5 = vpack.c.bf16 %v462_v4, %v461_v2  ;;  %v460_v7 = vld [vmem:[#allocation6 + $0x58] sm:$0xff]  ;;  %v378_v8 = vld [vmem:[%s1129_s3] sm:$0x3]  ;;  %v457_v11 = vld [vmem:[#allocation6 + $0x40] sm:$0xff]  ;;  %s1093_s8 = scalar_select %p358_p7, %s955_s24, 1 }
  0x1f   : > { %477 = vmatpush.bf16.msra.mxu0 %v472_v3  ;;  %714 = vmatpush.bf16.msra.mxu1 %v472_v3  ;;  %v1086_v9 = vmul.f32 0.0078125, %v378_v8  ;;  %v470_v10 = vpack.c.bf16 %v460_v7, %v459_v6  ;;  %v458_v12 = vld [vmem:[#allocation6 + $0x48] sm:$0xff]  ;;  %v455_v16 = vld [vmem:[#allocation6 + $0x30] sm:$0xff]  ;;  %v456_v17 = vld [vmem:[#allocation6 + $0x38] sm:$0xff] }
  0x20   : > { %715 = vmatpush.bf16.msra.mxu2 %v472_v3  ;;  %716 = vmatpush.bf16.msra.mxu3 %v472_v3  ;;  %v469_v15 = vpack.c.bf16 %v458_v12, %v457_v11  ;;  %v468_v20 = vpack.c.bf16 %v456_v17, %v455_v16  ;;  %v453_v21 = vld [vmem:[#allocation6 + $0x20] sm:$0xff]  ;;  %v454_v22 = vld [vmem:[#allocation6 + $0x28] sm:$0xff]  ;;  %v451_v25 = vld [vmem:[#allocation6 + $0x10] sm:$0xff]  ;;  %s712_s15 = sshll.u32 %s1093_s8, 6 }
  0x21   : > { %v382_v13 = vmul.f32 %v1086_v9, %v1086_v9  ;;  %v467_v24 = vpack.c.bf16 %v454_v22, %v453_v21  ;;  %v452_v26 = vld [vmem:[#allocation6 + $0x18] sm:$0xff]  ;;  %v449_v29 = vld [vmem:[#allocation6] sm:$0xff]  ;;  %v450_v30 = vld [vmem:[#allocation6 + $0x8] sm:$0xff]  ;;  %s365_s18 = scalar_lea.vmem %s1126_s0, %s712_s15  ;;  %s375_s21 = scalar_lea.vmem %s1132_s6, %s712_s15 }
  0x22   : > { %v466_v27 = vpack.c.bf16 %v452_v26, %v451_v25  ;;  %v465_v32 = vpack.c.bf16 %v450_v30, %v449_v29  ;;  %v379_v38 = vld [vmem:[#allocation2] sm:$0x1]  ;;  %v380_v40 = vld [vmem:[#allocation4] sm:$0x1]  ;;  %v407_v42 = vld [vmem:[%s365_s18] sm:$0xff] }
  0x23   : > { %478 = vmatpush.bf16.msra.mxu0 %v471_v5  ;;  %717 = vmatpush.bf16.msra.mxu1 %v471_v5  ;;  %v384_v14 = vrot.slane %v382_v13, 7  ;;  %v408_v43 = vld [vmem:[%s365_s18 + $0x8] sm:$0xff]  ;;  %v409_v44 = vld [vmem:[%s365_s18 + $0x10] sm:$0xff]  ;;  %v410_v45 = vld [vmem:[%s365_s18 + $0x18] sm:$0xff] }
  0x24   : > { %718 = vmatpush.bf16.msra.mxu2 %v471_v5  ;;  %719 = vmatpush.bf16.msra.mxu3 %v471_v5  ;;  %v411_v48 = vld [vmem:[%s365_s18 + $0x20] sm:$0xff]  ;;  %v412_v49 = vld [vmem:[%s365_s18 + $0x28] sm:$0xff]  ;;  %v413_v50 = vld [vmem:[%s365_s18 + $0x30] sm:$0xff] }
  0x25   : > { %v386_v18 = vsub.f32 %v1086_v9, %v384_v14  ;;  %v414_v51 = vld [vmem:[%s365_s18 + $0x38] sm:$0xff] }
  0x27   : > { %479 = vmatpush.bf16.msra.mxu0 %v470_v10  ;;  %720 = vmatpush.bf16.msra.mxu1 %v470_v10  ;;  %v387_v19 = vmax.f32 %v386_v18, 0.0  ;;  %v806_v18 = vld [vmem:[#allocation7] ss:$0 sm:$0xff] }
  0x28   : > { %721 = vmatpush.bf16.msra.mxu2 %v470_v10  ;;  %722 = vmatpush.bf16.msra.mxu3 %v470_v10 }
  0x29   : > { %v388_v23 = vadd.f32 1e-05, %v387_v19 }
  0x2b   : > { %480 = vmatpush.bf16.msra.mxu0 %v469_v15  ;;  %723 = vmatpush.bf16.msra.mxu1 %v469_v15  ;;  %807 = vrsqrt.f32 %v388_v23  ;;  %vm395_vm0 = vweird.f32 %v388_v23 }
  0x2c   : > { %724 = vmatpush.bf16.msra.mxu2 %v469_v15  ;;  %725 = vmatpush.bf16.msra.mxu3 %v469_v15 }
  0x2f   : > { %481 = vmatpush.bf16.msra.mxu0 %v468_v20  ;;  %726 = vmatpush.bf16.msra.mxu1 %v468_v20 }
  0x30   : > { %727 = vmatpush.bf16.msra.mxu2 %v468_v20  ;;  %728 = vmatpush.bf16.msra.mxu3 %v468_v20 }
  0x31   : > { %v808_v28 = vpop.eup %807 }
  0x32   : > { %v390_v31 = vmul.f32 %v808_v28, %v388_v23  ;;  %vm396_vm1 = vweird.f32 %v808_v28 }
  0x33   : > { %482 = vmatpush.bf16.msra.mxu0 %v467_v24  ;;  %729 = vmatpush.bf16.msra.mxu1 %v467_v24  ;;  %vm397_vm2 = vmor %vm395_vm0, %vm396_vm1 }
  0x34   : > { %730 = vmatpush.bf16.msra.mxu2 %v467_v24  ;;  %731 = vmatpush.bf16.msra.mxu3 %v467_v24  ;;  %v391_v33 = vmul.f32 %v808_v28, %v390_v31 }
  0x36   : > { %v392_v34 = vmul.f32 0.5, %v391_v33 }
  0x37   : > { %483 = vmatpush.bf16.msra.mxu0 %v466_v27  ;;  %732 = vmatpush.bf16.msra.mxu1 %v466_v27 }
  0x38   : > { %733 = vmatpush.bf16.msra.mxu2 %v466_v27  ;;  %734 = vmatpush.bf16.msra.mxu3 %v466_v27  ;;  %v393_v35 = vsub.f32 1.5, %v392_v34 }
  0x3a   : > { %v394_v36 = vmul.f32 %v808_v28, %v393_v35 }
  0x3b   : > { %484 = vmatpush.bf16.msra.mxu0 %v465_v32  ;;  %735 = vmatpush.bf16.msra.mxu1 %v465_v32 }
  0x3c   : > { %736 = vmatpush.bf16.msra.mxu2 %v465_v32  ;;  %737 = vmatpush.bf16.msra.mxu3 %v465_v32  ;;  %v398_v37 = vsel %vm397_vm2, %v808_v28, %v394_v36 }
  0x3d   : > { %400 = vst [vmem:[#allocation1] sm:$0xff] %v398_v37 }
  0x44   : > { %v402_v39 = vld [vmem:[#allocation1 + $0x1] ss:$9 sm:$0xff] }
  0x45   : > { %v404_v41 = vmul.f32 %v402_v39, %v379_v38 }
  0x47   : > { %v405_v46 = vmul.f32 %v404_v41, %v1086_v9  ;;  %v416_v47 = vperm.slane %v404_v41, 0 }
  0x49   : > { %v406_v52 = vsub.f32 %v380_v40, %v405_v46  ;;  %v418_v53 = vmul.f32 %v416_v47, %v407_v42  ;;  %v419_v54 = vmul.f32 %v416_v47, %v408_v43  ;;  %v420_v55 = vmul.f32 %v416_v47, %v409_v44 }
  0x4a   : > { %v421_v56 = vmul.f32 %v416_v47, %v410_v45  ;;  %v422_v57 = vmul.f32 %v416_v47, %v411_v48  ;;  %v423_v58 = vmul.f32 %v416_v47, %v412_v49  ;;  %v424_v59 = vmul.f32 %v416_v47, %v413_v50 }
  0x4b   : > { %v427_v60 = vperm.slane %v406_v52, 0  ;;  %v425_v61 = vmul.f32 %v416_v47, %v414_v51 }
  0x4d   : > { %v429_v62 = vadd.f32 %v427_v60, %v418_v53  ;;  %v430_v63 = vadd.f32 %v427_v60, %v419_v54  ;;  %v431_v0 = vadd.f32 %v427_v60, %v420_v55  ;;  %v432_v1 = vadd.f32 %v427_v60, %v421_v56 }
  0x4e   : > { %v433_v2 = vadd.f32 %v427_v60, %v422_v57  ;;  %v434_v3 = vadd.f32 %v427_v60, %v423_v58  ;;  %v435_v4 = vadd.f32 %v427_v60, %v424_v59  ;;  %v436_v5 = vadd.f32 %v427_v60, %v425_v61 }
  0x4f   : > { %v437_v6 = vmax.f32 %v429_v62, 0.0  ;;  %v438_v7 = vmax.f32 %v430_v63, 0.0  ;;  %v439_v8 = vmax.f32 %v431_v0, 0.0  ;;  %v440_v9 = vmax.f32 %v432_v1, 0.0 }
  0x50   : > { %v441_v10 = vmax.f32 %v433_v2, 0.0  ;;  %v442_v11 = vmax.f32 %v434_v3, 0.0  ;;  %v443_v12 = vmax.f32 %v435_v4, 0.0  ;;  %v444_v13 = vmax.f32 %v436_v5, 0.0 }
  0x51   : > { %v445_v14 = vpack.c.bf16 %v438_v7, %v437_v6  ;;  %v446_v15 = vpack.c.bf16 %v440_v9, %v439_v8 }
  0x52   : > { %v447_v16 = vpack.c.bf16 %v442_v11, %v441_v10  ;;  %v448_v17 = vpack.c.bf16 %v444_v13, %v443_v12 }
  0x53   : > { %485 = vmatmul.bf16.vlgmr.msra.gmra.mxu0 %v445_v14  ;;  %490 = vmatmul.bf16.vlgmr.msra.gmra.mxu1 %v446_v15 }
  0x54   : > { %495 = vmatmul.bf16.vlgmr.msra.gmra.mxu2 %v447_v16  ;;  %500 = vmatmul.bf16.vlgmr.msra.gmra.mxu3 %v448_v17 }
  0xd0   : > { %v486_v19 = vpop.f32.mrf.mxu0  ;;  %v491_v20 = vpop.f32.mrf.mxu1 }
  0xd1   : > { %v487_v21 = vadd.f32 %v806_v18, %v486_v19  ;;  %v492_v22 = vadd.f32 %v806_v18, %v491_v20 }
  0xd3   : > { %506 = vst [vmem:[%s375_s21] sm:$0xff] %v487_v21 }
  0xd4   : > { %508 = vst [vmem:[%s375_s21 + $0x10] sm:$0xff] %v492_v22 }
  0xd7   : > { %v496_v23 = vpop.f32.mrf.mxu2  ;;  %v501_v24 = vpop.f32.mrf.mxu3 }
  0xd8   : > { %v497_v25 = vadd.f32 %v806_v18, %v496_v23  ;;  %v502_v26 = vadd.f32 %v806_v18, %v501_v24  ;;  %v488_v27 = vpop.f32.mrf.mxu0  ;;  %v493_v28 = vpop.f32.mrf.mxu1 }
  0xd9   : > { %v489_v29 = vadd.f32 %v806_v18, %v488_v27  ;;  %v494_v30 = vadd.f32 %v806_v18, %v493_v28 }
  0xda   : > { %510 = vst [vmem:[%s375_s21 + $0x20] sm:$0xff] %v497_v25 }
  0xdb   : > { %512 = vst [vmem:[%s375_s21 + $0x30] sm:$0xff] %v502_v26 }
  0xdc   : > { %507 = vst [vmem:[%s375_s21 + $0x8] sm:$0xff] %v489_v29 }
  0xdd   : > { %509 = vst [vmem:[%s375_s21 + $0x18] sm:$0xff] %v494_v30 }
  0xdf   : > { %v498_v31 = vpop.f32.mrf.mxu2  ;;  %v503_v32 = vpop.f32.mrf.mxu3  ;;  %517 = sbr.rel (%p709_p8) target bundleno = 230 (0xe6), region = 64 }
  0xe0   : > { %v499_v33 = vadd.f32 %v806_v18, %v498_v31  ;;  %v504_v34 = vadd.f32 %v806_v18, %v503_v32 }
  0xe2   : > { %511 = vst [vmem:[%s375_s21 + $0x28] sm:$0xff] %v499_v33 }
  0xe3   : > { %513 = vst [vmem:[%s375_s21 + $0x38] sm:$0xff] %v504_v34 }
  0xe4   : > { %v971_v35 = vmov 0.0  }
  0xe5   : > { %518 = vst [vmem:[%s1133_s7] sm:$0x3] %v971_v35 }
  0xe6 PF: > { %v520_v36 = vadd.f32 %v489_v29, %v487_v21  ;;  %v533_v37 = vmul.f32 %v487_v21, %v487_v21  ;;  %v534_v38 = vmul.f32 %v489_v29, %v489_v29  ;;  %v535_v39 = vmul.f32 %v492_v22, %v492_v22 }
  0xe7   : > { %v536_v41 = vmul.f32 %v494_v30, %v494_v30  ;;  %v537_v44 = vmul.f32 %v497_v25, %v497_v25  ;;  %v538_v47 = vmul.f32 %v499_v33, %v499_v33  ;;  %v539_v50 = vmul.f32 %v502_v26, %v502_v26 }
  0xe8   : > { %v521_v40 = vadd.f32 %v520_v36, %v492_v22  ;;  %v541_v42 = vadd.f32 %v534_v38, %v533_v37  ;;  %v540_v53 = vmul.f32 %v504_v34, %v504_v34  ;;  %vm554_vm3 = vcmask 1040384  }
  0xea   : > { %v522_v43 = vadd.f32 %v521_v40, %v494_v30  ;;  %v542_v45 = vadd.f32 %v541_v42, %v535_v39 }
  0xec   : > { %v523_v46 = vadd.f32 %v522_v43, %v497_v25  ;;  %v543_v48 = vadd.f32 %v542_v45, %v536_v41  ;;  %v519_v5 = vld [vmem:[%s1133_s7] sm:$0x3] }
  0xee   : > { %v524_v49 = vadd.f32 %v523_v46, %v499_v33  ;;  %v544_v51 = vadd.f32 %v543_v48, %v537_v44 }
  0xf0   : > { %v525_v52 = vadd.f32 %v524_v49, %v502_v26  ;;  %v545_v54 = vadd.f32 %v544_v51, %v538_v47 }
  0xf2   : > { %v526_v55 = vadd.f32 %v525_v52, %v504_v34  ;;  %v546_v56 = vadd.f32 %v545_v54, %v539_v50 }
  0xf4   : > { %v527_v57 = vrot.slane %v526_v55, 4  ;;  %v547_v58 = vadd.f32 %v546_v56, %v540_v53 }
  0xf6   : > { %v528_v59 = vadd.f32 %v527_v57, %v526_v55  ;;  %v548_v60 = vrot.slane %v547_v58, 4 }
  0xf8   : > { %v529_v61 = vrot.slane %v528_v59, 2  ;;  %v549_v62 = vadd.f32 %v548_v60, %v547_v58 }
  0xfa   : > { %v530_v63 = vadd.f32 %v529_v61, %v528_v59  ;;  %v550_v0 = vrot.slane %v549_v62, 2 }
  0xfc   : > { %v531_v1 = vrot.slane %v530_v63, 1  ;;  %v551_v2 = vadd.f32 %v550_v0, %v549_v62 }
  0xfe   : > { %v532_v3 = vadd.f32 %v531_v1, %v530_v63  ;;  %v552_v4 = vrot.slane %v551_v2, 1 }
 0x100   : > { %v553_v6 = vadd.f32 %v552_v4, %v551_v2 }
 0x102   : > { %v555_v7 = vsel %vm554_vm3, %v532_v3, %v553_v6 }
 0x103   : > { %v556_v8 = vadd.f32 %v555_v7, %v519_v5 }
 0x105   : > { %557 = vst [vmem:[%s1133_s7] sm:$0x3] %v556_v8 }
 0x106 PF: > { %s21_s26 = sadd.s32 1, %s963_s26   ;;  %s1137_s24 = smov %s959_s25 }
 0x107   : > { %p18_p9 = scmp.ge.s32.totalorder %s21_s26, 4   ;;  %s1138_s25 = smov %s1140_s13 }
 0x109   :  { %20 = sbr.rel (!%p18_p9) target bundleno = 4 (0x4), region = 104 }
 0x10e   :  { %594 = vsyncpa [#allocation3], 1 }
 0x10f   :  { %596 = vsyncpa [#allocation3 + $0x1], 1 }
 0x110   :  { %597 = vsyncpa [#allocation5], 1 }
 0x111   :  { %598 = vsyncpa [#allocation8], 1 }

// kernel: base_vae_forward.8
= control target key start
LH: loop header
LB: loop body
LE: loop exit
PB: predicated region body
PF: predicated region fallthrough
CT: control target
= control target key end

     0   :  { %13 = vsyncpa [#allocation3], 0  ;;  %s1256_s0 = inlined_call_operand.vmem [shape: f32[2,64,128], index: 0, kind: input, shape index: {}]   ;;  %s1257_s1 = inlined_call_operand.hbm [shape: f32[1,128], index: 1, kind: input, shape index: {}]   ;;  %s1258_s2 = inlined_call_operand.hbm [shape: f32[1,128], index: 2, kind: input, shape index: {}]   ;;  %s1259_s3 = inlined_call_operand.vmem [shape: f32[2,128], index: 3, kind: input, shape index: {}]   ;;  %s1260_s4 = inlined_call_operand.hbm [shape: f32[128,256], index: 4, kind: input, shape index: {}]   ;;  %s1261_s5 = inlined_call_operand.hbm [shape: f32[1,256], index: 5, kind: input, shape index: {}]   ;;  %s1262_s6 = inlined_call_operand.vmem [shape: f32[2,64,256], index: 6, kind: output, shape index: {0}]   ;;  %s1263_s7 = inlined_call_operand.vmem [shape: f32[2,256], index: 7, kind: output, shape index: {1}]  }
   0x1   :  { %14 = vsyncpa [#allocation5], 0 }
   0x2   :  { %15 = vsyncpa [#allocation8], 0  ;;  %s1115_s24 = smov 0   ;;  %s1117_s25 = smov 0  }
   0x3   :  { %s1119_s26 = smov 0  }
   0x4 LB: > { %s244_s29 = sshll.u32 %s1258_s2, 4  ;;  %s804_s30 = sadd.s32 4294967295, %s1066_s26   ;;  %s1066_s26 = sphi %s1119_s26, %s21_s26   ;;  %s1062_s25 = sphi %s1117_s25, %s1268_s25   ;;  %s1058_s24 = sphi %s1115_s24, %s1267_s24   ;;  %s245_s29 = int_to_ptr.hbm [resolvable:$true] %s244_s29 }
   0x5   : > { %p806_p0 = scmp.ge.s32.totalorder %s1066_s26, 1  ;;  %p220_p1 = scmp.lt.s32.totalorder %s1066_s26, 3 }
   0x6   : > { %p1136_p2 = scmp.eq.s32.totalorder %s804_s30, 0  ;;  %s1068_s10 = smov [#allocation4]  }
   0x7   : > { %p1140_p3 = pnand %p806_p0, %p220_p1  ;;  %s246_s11 = sshll.u32 %s1068_s10, 4  ;;  %s247_s11 = int_to_ptr.vmem [resolvable:$true] %s246_s11 }
   0x8   : > { %s33_s13 = sadd.s32 1, %s1062_s25  ;;  %s232_s16 = sshll.u32 %s1257_s1, 4  ;;  %s233_s16 = int_to_ptr.hbm [resolvable:$true] %s232_s16 }
   0x9   : > { %p858_p4 = pneg %p1140_p3  ;;  %p35_p6 = scmp.ge.s32.totalorder %s33_s13, 2 }
   0xa   : > { %s258_s19 = sshll.u32 %s1260_s4, 4  ;;  %s1069_s20 = smov [#allocation2]   ;;  %s259_s19 = int_to_ptr.hbm [resolvable:$true] %s258_s19 }
   0xb   : > { %p1148_p5 = pnand %p1136_p2, %p858_p4  ;;  %s1270_s13 = smov (%p35_p6, %s33_s13), 0 }
   0xc   : > { %s234_s21 = sshll.u32 %s1069_s20, 4  ;;  %s1070_s22 = smov [#allocation6]   ;;  %s235_s21 = int_to_ptr.vmem [resolvable:$true] %s234_s21 }
   0xd   : > { %864 = dma.hbm_to_vmem [thread:$0]  (!%p1148_p5), %s245_s29, 16, %s247_s11, [#allocation5]  }
   0xe   : > { %861 = dma.hbm_to_vmem [thread:$0]  (!%p1148_p5), %s233_s16, 16, %s235_s21, [#allocation3]  }
   0xf   : > { %s260_s23 = sshll.u32 %s1070_s22, 4  ;;  %s1071_s27 = smov 256   ;;  %s261_s23 = int_to_ptr.vmem [resolvable:$true] %s260_s23 }
  0x10   : > { %s1072_s28 = smov 16   ;;  %s273_s10 = sshll.u32 %s1261_s5, 4  ;;  %s274_s10 = int_to_ptr.hbm [resolvable:$true] %s273_s10 }
  0x11   : > { %867 = dma.hbm_to_vmem [thread:$0]  (!%p1148_p5), %s259_s19, 4096, %s261_s23, [#allocation5], %s1071_s27, %s1071_s27, %s1072_s28  }
  0x12   : > { %s1073_s11 = smov [#allocation7]   ;;  %301 = sbr.rel (%p1140_p3) target bundleno = 284 (0x11c), region = 44 }
  0x13   : > { %s275_s14 = sshll.u32 %s1073_s11, 4  ;;  %s276_s14 = int_to_ptr.vmem [resolvable:$true] %s275_s14 }
  0x14   : > { %870 = dma.hbm_to_vmem [thread:$0]  (!%p1148_p5), %s274_s10, 32, %s276_s14, [#allocation8]  }
  0x17   : > { %1045 = dma.done.wait (%p1136_p2), [#allocation3], 16  }
  0x18   : > { %1047 = vsyncadd (%p1136_p2), [#allocation3], 4294967280 }
  0x19   : > { %1049 = dma.done.wait (%p1136_p2), [#allocation5], 4112  }
  0x1a   : > { %1051 = vsyncadd (%p1136_p2), [#allocation5], 4294963184 }
  0x1b   : > { %1053 = dma.done.wait (%p1136_p2), [#allocation8], 32  }
  0x1c   : > { %1055 = vsyncadd (%p1136_p2), [#allocation8], 4294967264  ;;  %v479_v0 = vld [vmem:[#allocation6 + $0xe0] sm:$0xff]  ;;  %v481_v1 = vld [vmem:[#allocation6 + $0xf0] sm:$0xff]  ;;  %p359_p7 = scmp.lt.s32.totalorder %s1058_s24, 1  ;;  %p821_p8 = scmp.ne.s32.totalorder %s1058_s24, 0 }
  0x1d   : > { %v480_v2 = vld [vmem:[#allocation6 + $0xe8] sm:$0xff]  ;;  %v497_v3 = vpack.c.bf16 %v481_v1, %v479_v0  ;;  %v482_v4 = vld [vmem:[#allocation6 + $0xf8] sm:$0xff]  ;;  %v475_v5 = vld [vmem:[#allocation6 + $0xc0] sm:$0xff] }
  0x1e   : > { %v477_v6 = vld [vmem:[#allocation6 + $0xd0] sm:$0xff]  ;;  %v498_v7 = vpack.c.bf16 %v482_v4, %v480_v2  ;;  %v476_v8 = vld [vmem:[#allocation6 + $0xc8] sm:$0xff]  ;;  %v478_v9 = vld [vmem:[#allocation6 + $0xd8] sm:$0xff]  ;;  %s1196_s12 = scalar_select %p359_p7, %s1058_s24, 1 }
  0x1f   : > { %505 = vmatpush.bf16.msra.mxu0 %v497_v3  ;;  %826 = vmatpush.bf16.msra.mxu2 %v497_v3  ;;  %v495_v10 = vpack.c.bf16 %v477_v6, %v475_v5  ;;  %v496_v11 = vpack.c.bf16 %v478_v9, %v476_v8  ;;  %v471_v12 = vld [vmem:[#allocation6 + $0xa0] sm:$0xff]  ;;  %v473_v13 = vld [vmem:[#allocation6 + $0xb0] sm:$0xff]  ;;  %v472_v14 = vld [vmem:[#allocation6 + $0xa8] sm:$0xff] }
  0x20   : > { %534 = vmatpush.bf16.msra.mxu1 %v498_v7  ;;  %834 = vmatpush.bf16.msra.mxu3 %v498_v7  ;;  %v474_v15 = vld [vmem:[#allocation6 + $0xb8] sm:$0xff]  ;;  %v493_v16 = vpack.c.bf16 %v473_v13, %v471_v12  ;;  %v467_v18 = vld [vmem:[#allocation6 + $0x80] sm:$0xff]  ;;  %v469_v19 = vld [vmem:[#allocation6 + $0x90] sm:$0xff]  ;;  %s824_s15 = sshll.u32 %s1196_s12, 6  ;;  %s825_s19 = sshll.u32 %s1196_s12, 7 }
  0x21   : > { %v494_v17 = vpack.c.bf16 %v474_v15, %v472_v14  ;;  %v468_v20 = vld [vmem:[#allocation6 + $0x88] sm:$0xff]  ;;  %v470_v21 = vld [vmem:[#allocation6 + $0x98] sm:$0xff]  ;;  %v380_v22 = vld [vmem:[%s1259_s3] sm:$0x3]  ;;  %v491_v23 = vpack.c.bf16 %v469_v19, %v467_v18  ;;  %s366_s18 = scalar_lea.vmem %s1256_s0, %s824_s15  ;;  %s1207_s22 = scalar_lea.vmem %s1262_s6, %s825_s19 }
  0x22   : > { %v1189_v24 = vmul.f32 0.0078125, %v380_v22  ;;  %v492_v25 = vpack.c.bf16 %v470_v21, %v468_v20  ;;  %v463_v26 = vld [vmem:[#allocation6 + $0x60] sm:$0xff]  ;;  %v465_v27 = vld [vmem:[#allocation6 + $0x70] sm:$0xff]  ;;  %v464_v28 = vld [vmem:[#allocation6 + $0x68] sm:$0xff] }
  0x23   : > { %506 = vmatpush.bf16.msra.mxu0 %v495_v10  ;;  %827 = vmatpush.bf16.msra.mxu2 %v495_v10  ;;  %v466_v29 = vld [vmem:[#allocation6 + $0x78] sm:$0xff]  ;;  %v489_v31 = vpack.c.bf16 %v465_v27, %v463_v26  ;;  %v459_v34 = vld [vmem:[#allocation6 + $0x40] sm:$0xff]  ;;  %v461_v35 = vld [vmem:[#allocation6 + $0x50] sm:$0xff] }
  0x24   : > { %535 = vmatpush.bf16.msra.mxu1 %v496_v11  ;;  %835 = vmatpush.bf16.msra.mxu3 %v496_v11  ;;  %v384_v30 = vmul.f32 %v1189_v24, %v1189_v24  ;;  %v490_v33 = vpack.c.bf16 %v466_v29, %v464_v28  ;;  %v460_v36 = vld [vmem:[#allocation6 + $0x48] sm:$0xff]  ;;  %v462_v37 = vld [vmem:[#allocation6 + $0x58] sm:$0xff]  ;;  %v487_v39 = vpack.c.bf16 %v461_v35, %v459_v34  ;;  %v455_v42 = vld [vmem:[#allocation6 + $0x20] sm:$0xff] }
  0x25   : > { %v488_v41 = vpack.c.bf16 %v462_v37, %v460_v36  ;;  %v457_v43 = vld [vmem:[#allocation6 + $0x30] sm:$0xff]  ;;  %v456_v44 = vld [vmem:[#allocation6 + $0x28] sm:$0xff]  ;;  %v458_v45 = vld [vmem:[#allocation6 + $0x38] sm:$0xff] }
  0x26   : > { %v386_v32 = vrot.slane %v384_v30, 7  ;;  %v485_v47 = vpack.c.bf16 %v457_v43, %v455_v42  ;;  %v486_v48 = vpack.c.bf16 %v458_v45, %v456_v44  ;;  %v451_v49 = vld [vmem:[#allocation6] sm:$0xff]  ;;  %v453_v50 = vld [vmem:[#allocation6 + $0x10] sm:$0xff]  ;;  %v452_v51 = vld [vmem:[#allocation6 + $0x8] sm:$0xff] }
  0x27   : > { %507 = vmatpush.bf16.msra.mxu0 %v493_v16  ;;  %828 = vmatpush.bf16.msra.mxu2 %v493_v16  ;;  %v454_v52 = vld [vmem:[#allocation6 + $0x18] sm:$0xff]  ;;  %v483_v53 = vpack.c.bf16 %v453_v50, %v451_v49  ;;  %v411_v22 = vld [vmem:[%s366_s18 + $0x10] sm:$0xff]  ;;  %v499_v42 = vld [vmem:[#allocation7] sm:$0x3] }
  0x28   : > { %536 = vmatpush.bf16.msra.mxu1 %v494_v17  ;;  %836 = vmatpush.bf16.msra.mxu3 %v494_v17  ;;  %v388_v38 = vsub.f32 %v1189_v24, %v386_v32  ;;  %v484_v54 = vpack.c.bf16 %v454_v52, %v452_v51  ;;  %v381_v62 = vld [vmem:[#allocation2] sm:$0x1]  ;;  %v382_v0 = vld [vmem:[#allocation4] sm:$0x1]  ;;  %v409_v2 = vld [vmem:[%s366_s18] sm:$0xff]  ;;  %v501_v43 = vperm.slane %v499_v42, 0 }
  0x29   : > { %v410_v3 = vld [vmem:[%s366_s18 + $0x8] sm:$0xff]  ;;  %v413_v4 = vld [vmem:[%s366_s18 + $0x20] sm:$0xff]  ;;  %v502_v44 = vperm.slane %v499_v42, 1 }
  0x2a   : > { %v389_v40 = vmax.f32 %v388_v38, 0.0  ;;  %v414_v7 = vld [vmem:[%s366_s18 + $0x28] sm:$0xff] }
  0x2b   : > { %508 = vmatpush.bf16.msra.mxu0 %v491_v23  ;;  %829 = vmatpush.bf16.msra.mxu2 %v491_v23  ;;  %v412_v23 = vld [vmem:[%s366_s18 + $0x18] sm:$0xff] }
  0x2c   : > { %537 = vmatpush.bf16.msra.mxu1 %v492_v25  ;;  %837 = vmatpush.bf16.msra.mxu3 %v492_v25  ;;  %v390_v46 = vadd.f32 1e-05, %v389_v40  ;;  %v415_v25 = vld [vmem:[%s366_s18 + $0x30] sm:$0xff] }
  0x2e   : > { %910 = vrsqrt.f32 %v390_v46  ;;  %vm397_vm0 = vweird.f32 %v390_v46 }
  0x2f   : > { %509 = vmatpush.bf16.msra.mxu0 %v489_v31  ;;  %830 = vmatpush.bf16.msra.mxu2 %v489_v31 }
  0x30   : > { %538 = vmatpush.bf16.msra.mxu1 %v490_v33  ;;  %838 = vmatpush.bf16.msra.mxu3 %v490_v33 }
  0x33   : > { %510 = vmatpush.bf16.msra.mxu0 %v487_v39  ;;  %831 = vmatpush.bf16.msra.mxu2 %v487_v39 }
  0x34   : > { %539 = vmatpush.bf16.msra.mxu1 %v488_v41  ;;  %839 = vmatpush.bf16.msra.mxu3 %v488_v41  ;;  %v911_v55 = vpop.eup %910 }
  0x35   : > { %v392_v56 = vmul.f32 %v911_v55, %v390_v46  ;;  %vm398_vm1 = vweird.f32 %v911_v55 }
  0x36   : > { %vm399_vm2 = vmor %vm397_vm0, %vm398_vm1 }
  0x37   : > { %511 = vmatpush.bf16.msra.mxu0 %v485_v47  ;;  %832 = vmatpush.bf16.msra.mxu2 %v485_v47  ;;  %v393_v57 = vmul.f32 %v911_v55, %v392_v56 }
  0x38   : > { %540 = vmatpush.bf16.msra.mxu1 %v486_v48  ;;  %840 = vmatpush.bf16.msra.mxu3 %v486_v48 }
  0x39   : > { %v394_v58 = vmul.f32 0.5, %v393_v57 }
  0x3b   : > { %512 = vmatpush.bf16.msra.mxu0 %v483_v53  ;;  %833 = vmatpush.bf16.msra.mxu2 %v483_v53  ;;  %v395_v59 = vsub.f32 1.5, %v394_v58 }
  0x3c   : > { %541 = vmatpush.bf16.msra.mxu1 %v484_v54  ;;  %841 = vmatpush.bf16.msra.mxu3 %v484_v54 }
  0x3d   : > { %v396_v60 = vmul.f32 %v911_v55, %v395_v59 }
  0x3f   : > { %v400_v61 = vsel %vm399_vm2, %v911_v55, %v396_v60 }
  0x40   : > { %402 = vst [vmem:[#allocation1] sm:$0xff] %v400_v61 }
  0x47   : > { %v404_v63 = vld [vmem:[#allocation1 + $0x1] ss:$9 sm:$0xff] }
  0x48   : > { %v406_v1 = vmul.f32 %v404_v63, %v381_v62 }
  0x4a   : > { %v407_v5 = vmul.f32 %v406_v1, %v1189_v24  ;;  %v418_v6 = vperm.slane %v406_v1, 0  ;;  %v416_v24 = vld [vmem:[%s366_s18 + $0x38] sm:$0xff] }
  0x4c   : > { %v408_v8 = vsub.f32 %v382_v0, %v407_v5  ;;  %v420_v9 = vmul.f32 %v418_v6, %v409_v2  ;;  %v421_v10 = vmul.f32 %v418_v6, %v410_v3  ;;  %v424_v11 = vmul.f32 %v418_v6, %v413_v4 }
  0x4d   : > { %v425_v12 = vmul.f32 %v418_v6, %v414_v7  ;;  %v422_v28 = vmul.f32 %v418_v6, %v411_v22  ;;  %v423_v29 = vmul.f32 %v418_v6, %v412_v23  ;;  %v426_v30 = vmul.f32 %v418_v6, %v415_v25 }
  0x4e   : > { %v429_v13 = vperm.slane %v408_v8, 0  ;;  %v427_v31 = vmul.f32 %v418_v6, %v416_v24 }
  0x50   : > { %v431_v14 = vadd.f32 %v429_v13, %v420_v9  ;;  %v432_v15 = vadd.f32 %v429_v13, %v421_v10  ;;  %v435_v16 = vadd.f32 %v429_v13, %v424_v11  ;;  %v436_v17 = vadd.f32 %v429_v13, %v425_v12 }
  0x51   : > { %v433_v32 = vadd.f32 %v429_v13, %v422_v28  ;;  %v434_v33 = vadd.f32 %v429_v13, %v423_v29  ;;  %v437_v34 = vadd.f32 %v429_v13, %v426_v30  ;;  %v438_v35 = vadd.f32 %v429_v13, %v427_v31 }
  0x52   : > { %v439_v18 = vmax.f32 %v431_v14, 0.0  ;;  %v440_v19 = vmax.f32 %v432_v15, 0.0  ;;  %v443_v20 = vmax.f32 %v435_v16, 0.0  ;;  %v444_v21 = vmax.f32 %v436_v17, 0.0 }
  0x53   : > { %v441_v36 = vmax.f32 %v433_v32, 0.0  ;;  %v442_v37 = vmax.f32 %v434_v33, 0.0  ;;  %v445_v38 = vmax.f32 %v437_v34, 0.0  ;;  %v446_v39 = vmax.f32 %v438_v35, 0.0 }
  0x54   : > { %v447_v26 = vpack.c.bf16 %v440_v19, %v439_v18  ;;  %v449_v27 = vpack.c.bf16 %v444_v21, %v443_v20 }
  0x55   : > { %v448_v40 = vpack.c.bf16 %v442_v37, %v441_v36  ;;  %v450_v41 = vpack.c.bf16 %v446_v39, %v445_v38 }
  0x56   : > { %513 = vmatmul.bf16.vlgmr.msra.gmra.mxu0 %v447_v26  ;;  %523 = vmatmul.bf16.vlgmr.msra.gmra.mxu2 %v449_v27 }
  0x57   : > { %542 = vmatmul.bf16.vlgmr.msra.gmra.mxu1 %v447_v26  ;;  %552 = vmatmul.bf16.vlgmr.msra.gmra.mxu3 %v449_v27 }
  0x66   : > { %518 = vmatmul.bf16.gmra.mxu0 %v448_v40  ;;  %528 = vmatmul.bf16.gmra.mxu2 %v450_v41 }
  0x67   : > { %547 = vmatmul.bf16.gmra.mxu1 %v448_v40  ;;  %557 = vmatmul.bf16.gmra.mxu3 %v450_v41 }
  0xd3   : > { %v514_v45 = vpop.f32.mrf.mxu0 }
  0xd4   : > { %v515_v46 = vadd.f32 %v514_v45, %v501_v43  ;;  %v543_v47 = vpop.f32.mrf.mxu1 }
  0xd5   : > { %v544_v48 = vadd.f32 %v543_v47, %v502_v44 }
  0xd6   : > { %563 = vst [vmem:[%s1207_s22] sm:$0xff] %v515_v46 }
  0xd7   : > { %564 = vst [vmem:[%s1207_s22 + $0x8] sm:$0xff] %v544_v48 }
  0xd9   : > { %v524_v49 = vpop.f32.mrf.mxu2 }
  0xda   : > { %v1211_v50 = vadd.f32 %v524_v49, %v501_v43  ;;  %v553_v51 = vpop.f32.mrf.mxu3 }
  0xdb   : > { %v1213_v52 = vadd.f32 %v553_v51, %v502_v44  ;;  %v516_v53 = vpop.f32.mrf.mxu0 }
  0xdc   : > { %571 = vst [vmem:[%s1207_s22 + $0x40] sm:$0xff] %v1211_v50  ;;  %v517_v54 = vadd.f32 %v516_v53, %v501_v43  ;;  %v545_v55 = vpop.f32.mrf.mxu1 }
  0xdd   : > { %572 = vst [vmem:[%s1207_s22 + $0x48] sm:$0xff] %v1213_v52  ;;  %v546_v56 = vadd.f32 %v545_v55, %v502_v44 }
  0xde   : > { %565 = vst [vmem:[%s1207_s22 + $0x10] sm:$0xff] %v517_v54 }
  0xdf   : > { %566 = vst [vmem:[%s1207_s22 + $0x18] sm:$0xff] %v546_v56 }
  0xe1   : > { %v526_v57 = vpop.f32.mrf.mxu2 }
  0xe2   : > { %v527_v58 = vadd.f32 %v526_v57, %v501_v43  ;;  %v555_v59 = vpop.f32.mrf.mxu3 }
  0xe3   : > { %v556_v60 = vadd.f32 %v555_v59, %v502_v44  ;;  %v519_v61 = vpop.f32.mrf.mxu0 }
  0xe4   : > { %573 = vst [vmem:[%s1207_s22 + $0x50] sm:$0xff] %v527_v58  ;;  %v520_v62 = vadd.f32 %v519_v61, %v501_v43  ;;  %v548_v63 = vpop.f32.mrf.mxu1 }
  0xe5   : > { %574 = vst [vmem:[%s1207_s22 + $0x58] sm:$0xff] %v556_v60  ;;  %v549_v0 = vadd.f32 %v548_v63, %v502_v44 }
  0xe6   : > { %567 = vst [vmem:[%s1207_s22 + $0x20] sm:$0xff] %v520_v62 }
  0xe7   : > { %568 = vst [vmem:[%s1207_s22 + $0x28] sm:$0xff] %v549_v0 }
  0xe9   : > { %v529_v1 = vpop.f32.mrf.mxu2 }
  0xea   : > { %v530_v2 = vadd.f32 %v529_v1, %v501_v43  ;;  %v558_v3 = vpop.f32.mrf.mxu3 }
  0xeb   : > { %v559_v4 = vadd.f32 %v558_v3, %v502_v44  ;;  %v521_v5 = vpop.f32.mrf.mxu0 }
  0xec   : > { %575 = vst [vmem:[%s1207_s22 + $0x60] sm:$0xff] %v530_v2  ;;  %v522_v6 = vadd.f32 %v521_v5, %v501_v43  ;;  %v550_v7 = vpop.f32.mrf.mxu1 }
  0xed   : > { %576 = vst [vmem:[%s1207_s22 + $0x68] sm:$0xff] %v559_v4  ;;  %v551_v8 = vadd.f32 %v550_v7, %v502_v44 }
  0xee   : > { %569 = vst [vmem:[%s1207_s22 + $0x30] sm:$0xff] %v522_v6 }
  0xef   : > { %570 = vst [vmem:[%s1207_s22 + $0x38] sm:$0xff] %v551_v8 }
  0xf1   : > { %v531_v9 = vpop.f32.mrf.mxu2  ;;  %582 = sbr.rel (%p821_p8) target bundleno = 248 (0xf8), region = 64 }
  0xf2   : > { %v532_v10 = vadd.f32 %v531_v9, %v501_v43  ;;  %v560_v11 = vpop.f32.mrf.mxu3 }
  0xf3   : > { %v561_v12 = vadd.f32 %v560_v11, %v502_v44 }
  0xf4   : > { %577 = vst [vmem:[%s1207_s22 + $0x70] sm:$0xff] %v532_v10 }
  0xf5   : > { %578 = vst [vmem:[%s1207_s22 + $0x78] sm:$0xff] %v561_v12 }
  0xf6   : > { %v1074_v13 = vmov 0.0  }
  0xf7   : > { %583 = vst [vmem:[%s1263_s7] sm:$0xf] %v1074_v13 }
  0xf8 PF: > { %v585_v14 = vadd.f32 %v517_v54, %v515_v46  ;;  %v598_v15 = vadd.f32 %v546_v56, %v544_v48  ;;  %v611_v16 = vmul.f32 %v515_v46, %v515_v46  ;;  %v612_v17 = vmul.f32 %v544_v48, %v544_v48 }
  0xf9   : > { %v613_v18 = vmul.f32 %v517_v54, %v517_v54  ;;  %v614_v19 = vmul.f32 %v546_v56, %v546_v56  ;;  %v615_v22 = vmul.f32 %v520_v62, %v520_v62  ;;  %v616_v23 = vmul.f32 %v549_v0, %v549_v0 }
  0xfa   : > { %v586_v20 = vadd.f32 %v585_v14, %v520_v62  ;;  %v599_v21 = vadd.f32 %v598_v15, %v549_v0  ;;  %v617_v26 = vmul.f32 %v522_v6, %v522_v6  ;;  %v618_v27 = vmul.f32 %v551_v8, %v551_v8 }
  0xfb   : > { %v627_v28 = vadd.f32 %v613_v18, %v611_v16  ;;  %v640_v29 = vadd.f32 %v614_v19, %v612_v17  ;;  %v619_v32 = vmul.f32 %v1211_v50, %v1211_v50  ;;  %v620_v33 = vmul.f32 %v1213_v52, %v1213_v52 }
  0xfc   : > { %v587_v25 = vadd.f32 %v586_v20, %v522_v6  ;;  %v600_v24 = vadd.f32 %v599_v21, %v551_v8  ;;  %v621_v38 = vmul.f32 %v527_v58, %v527_v58  ;;  %v622_v39 = vmul.f32 %v556_v60, %v556_v60 }
  0xfd   : > { %v628_v34 = vadd.f32 %v627_v28, %v615_v22  ;;  %v641_v35 = vadd.f32 %v640_v29, %v616_v23  ;;  %v623_v44 = vmul.f32 %v530_v2, %v530_v2  ;;  %v624_v45 = vmul.f32 %v559_v4, %v559_v4 }
  0xfe   : > { %v588_v30 = vadd.f32 %v587_v25, %v1211_v50  ;;  %v601_v31 = vadd.f32 %v600_v24, %v1213_v52  ;;  %v625_v50 = vmul.f32 %v532_v10, %v532_v10  ;;  %v626_v51 = vmul.f32 %v561_v12, %v561_v12  ;;  %v584_v20 = vld [vmem:[%s1263_s7] sm:$0xf] }
  0xff   : > { %v629_v40 = vadd.f32 %v628_v34, %v617_v26  ;;  %v642_v41 = vadd.f32 %v641_v35, %v618_v27  ;;  %vm653_vm3 = vcmask 1040384   ;;  %vm659_vm4 = vcmask 1041408  }
 0x100   : > { %v589_v36 = vadd.f32 %v588_v30, %v527_v58  ;;  %v602_v37 = vadd.f32 %v601_v31, %v556_v60 }
 0x101   : > { %v630_v46 = vadd.f32 %v629_v40, %v619_v32  ;;  %v643_v47 = vadd.f32 %v642_v41, %v620_v33 }
 0x102   : > { %v590_v42 = vadd.f32 %v589_v36, %v530_v2  ;;  %v603_v43 = vadd.f32 %v602_v37, %v559_v4 }
 0x103   : > { %v631_v53 = vadd.f32 %v630_v46, %v621_v38  ;;  %v644_v52 = vadd.f32 %v643_v47, %v622_v39 }
 0x104   : > { %v591_v48 = vadd.f32 %v590_v42, %v532_v10  ;;  %v604_v49 = vadd.f32 %v603_v43, %v561_v12 }
 0x105   : > { %v632_v56 = vadd.f32 %v631_v53, %v623_v44  ;;  %v645_v57 = vadd.f32 %v644_v52, %v624_v45 }
 0x106   : > { %v592_v54 = vrot.slane %v591_v48, 4  ;;  %v605_v55 = vrot.slane %v604_v49, 4 }
 0x107   : > { %v633_v60 = vadd.f32 %v632_v56, %v625_v50  ;;  %v646_v61 = vadd.f32 %v645_v57, %v626_v51 }
 0x108   : > { %v593_v58 = vadd.f32 %v592_v54, %v591_v48  ;;  %v606_v59 = vadd.f32 %v605_v55, %v604_v49 }
 0x109   : > { %v634_v0 = vrot.slane %v633_v60, 4  ;;  %v647_v1 = vrot.slane %v646_v61, 4 }
 0x10a   : > { %v594_v62 = vrot.slane %v593_v58, 2  ;;  %v607_v63 = vrot.slane %v606_v59, 2 }
 0x10b   : > { %v635_v4 = vadd.f32 %v634_v0, %v633_v60  ;;  %v648_v5 = vadd.f32 %v647_v1, %v646_v61 }
 0x10c   : > { %v595_v2 = vadd.f32 %v594_v62, %v593_v58  ;;  %v608_v3 = vadd.f32 %v607_v63, %v606_v59 }
 0x10d   : > { %v636_v8 = vrot.slane %v635_v4, 2  ;;  %v649_v9 = vrot.slane %v648_v5, 2 }
 0x10e   : > { %v596_v6 = vrot.slane %v595_v2, 1  ;;  %v609_v7 = vrot.slane %v608_v3, 1 }
 0x10f   : > { %v637_v10 = vadd.f32 %v636_v8, %v635_v4  ;;  %v650_v11 = vadd.f32 %v649_v9, %v648_v5 }
 0x110   : > { %v597_v12 = vadd.f32 %v596_v6, %v595_v2  ;;  %v610_v13 = vadd.f32 %v609_v7, %v608_v3 }
 0x111   : > { %v638_v14 = vrot.slane %v637_v10, 1  ;;  %v651_v15 = vrot.slane %v650_v11, 1 }
 0x113   : > { %v639_v16 = vadd.f32 %v638_v14, %v637_v10  ;;  %v652_v17 = vadd.f32 %v651_v15, %v650_v11 }
 0x115   : > { %v654_v18 = vsel %vm653_vm3, %v597_v12, %v639_v16  ;;  %v655_v19 = vsel %vm653_vm3, %v610_v13, %v652_v17 }
 0x116   : > { %v658_v21 = vrot.slane %v655_v19, 6 }
 0x118   : > { %v660_v22 = vsel %vm659_vm4, %v654_v18, %v658_v21 }
 0x119   : > { %v662_v23 = vadd.f32 %v660_v22, %v584_v20 }
 0x11b   : > { %663 = vst [vmem:[%s1263_s7] sm:$0xf] %v662_v23 }
 0x11c PF: > { %s21_s26 = sadd.s32 1, %s1066_s26   ;;  %s1267_s24 = smov %s1062_s25 }
 0x11d   : > { %p18_p9 = scmp.ge.s32.totalorder %s21_s26, 4   ;;  %s1268_s25 = smov %s1270_s13 }
 0x11f   :  { %20 = sbr.rel (!%p18_p9) target bundleno = 4 (0x4), region = 104 }
 0x124   :  { %702 = vsyncpa [#allocation3], 1 }
 0x125   :  { %704 = vsyncpa [#allocation3 + $0x1], 1 }
 0x126   :  { %705 = vsyncpa [#allocation5], 1 }
 0x127   :  { %706 = vsyncpa [#allocation8], 1 }

// kernel: base_vae_forward.9
= control target key start
LH: loop header
LB: loop body
LE: loop exit
PB: predicated region body
PF: predicated region fallthrough
CT: control target
= control target key end

     0   :  { %s1399_s24 = smov 0   ;;  %s1401_s25 = smov 0   ;;  %s2228_s0 = inlined_call_operand.vmem [shape: f32[2,64,256], index: 0, kind: input, shape index: {}]   ;;  %s2229_s1 = inlined_call_operand.vmem [shape: f32[1,256], index: 1, kind: input, shape index: {}]   ;;  %s2230_s2 = inlined_call_operand.vmem [shape: f32[1,256], index: 2, kind: input, shape index: {}]   ;;  %s2231_s3 = inlined_call_operand.vmem [shape: f32[2,256], index: 3, kind: input, shape index: {}]   ;;  %s2232_s4 = inlined_call_operand.vmem [shape: f32[256,512], index: 4, kind: input, shape index: {}]   ;;  %s2233_s5 = inlined_call_operand.vmem [shape: f32[1,512], index: 5, kind: input, shape index: {}]   ;;  %s2234_s6 = inlined_call_operand.vmem [shape: f32[2,2,512], index: 6, kind: output, shape index: {0}]   ;;  %s2235_s7 = inlined_call_operand.vmem [shape: f32[2,512], index: 7, kind: output, shape index: {1}]  }
   0x1   :  { %s1403_s26 = smov 0  }
   0x2 LB: > { %s30_s27 = sadd.s32 1, %s1350_s25  ;;  %p1293_p0 = scmp.ge.s32.totalorder %s1354_s26, 1  ;;  %s1354_s26 = sphi %s1403_s26, %s18_s26   ;;  %s1350_s25 = sphi %s1401_s25, %s2239_s25   ;;  %s1346_s24 = sphi %s1399_s24, %s2238_s24  }
   0x3   : > { %p32_p1 = scmp.ge.s32.totalorder %s30_s27, 2  ;;  %p255_p2 = scmp.lt.s32.totalorder %s1354_s26, 3 }
   0x5   : > { %s2241_s27 = smov (%p32_p1, %s30_s27), 0  ;;  %p256_p3 = pnand %p1293_p0, %p255_p2 }
   0x6   : > { %p293_p4 = scmp.lt.s32.totalorder (!%p256_p3), %s1346_s24, 1  ;;  %p1298_p5 = scmp.ne.s32.totalorder (!%p256_p3), %s1346_s24, 0 }
   0x7   : > { %259 = sbr.rel (%p256_p3) target bundleno = 435 (0x1b3), region = 44 }
   0xc   : > { %v492_v0 = vld [vmem:[%s2232_s4 + $0x1c0] sm:$0xff]  ;;  %v493_v5 = vld [vmem:[%s2232_s4 + $0x1c8] sm:$0xff]  ;;  %s1665_s30 = scalar_select %p293_p4, %s1346_s24, 1  ;;  %vm347_vm3 = vcmask 1040384   ;;  %vm349_vm4 = vcmask 1042434   ;;  %vm351_vm5 = vcmask 1041408  }
   0xd   : > { %v496_v1 = vld [vmem:[%s2232_s4 + $0x1e0] sm:$0xff]  ;;  %v497_v6 = vld [vmem:[%s2232_s4 + $0x1e8] sm:$0xff]  ;;  %vm880_vm6 = vcmask 1045508   ;;  %vm882_vm7 = vcmask 1043456  }
   0xe   : > { %v556_v2 = vld [vmem:[%s2232_s4 + $0x3c0] sm:$0xff]  ;;  %v592_v3 = vpack.c.bf16 %v496_v1, %v492_v0  ;;  %v593_v8 = vpack.c.bf16 %v497_v6, %v493_v5  ;;  %v557_v9 = vld [vmem:[%s2232_s4 + $0x3c8] sm:$0xff]  ;;  %s1301_s12 = sshll.u32 %s1665_s30, 7  ;;  %s1302_s19 = sshll.u32 %s1665_s30, 3 }
   0xf   : > { %v560_v4 = vld [vmem:[%s2232_s4 + $0x3e0] sm:$0xff]  ;;  %v561_v10 = vld [vmem:[%s2232_s4 + $0x3e8] sm:$0xff]  ;;  %s1680_s17 = scalar_lea.vmem %s2228_s0, %s1301_s12  ;;  %s307_s22 = scalar_lea.vmem %s2234_s6, %s1302_s19 }
  0x10   : > { %v624_v7 = vpack.c.bf16 %v560_v4, %v556_v2  ;;  %v484_v11 = vld [vmem:[%s2232_s4 + $0x180] sm:$0xff]  ;;  %638 = vmatpush.bf16.msra.mxu0 %v592_v3  ;;  %v625_v12 = vpack.c.bf16 %v561_v10, %v557_v9  ;;  %696 = vmatpush.bf16.msra.mxu2 %v593_v8  ;;  %v485_v18 = vld [vmem:[%s2232_s4 + $0x188] sm:$0xff] }
  0x11   : > { %v488_v13 = vld [vmem:[%s2232_s4 + $0x1a0] sm:$0xff]  ;;  %v489_v19 = vld [vmem:[%s2232_s4 + $0x1a8] sm:$0xff] }
  0x12   : > { %v548_v14 = vld [vmem:[%s2232_s4 + $0x380] sm:$0xff]  ;;  %667 = vmatpush.bf16.msra.mxu1 %v624_v7  ;;  %v588_v16 = vpack.c.bf16 %v488_v13, %v484_v11  ;;  %v549_v20 = vld [vmem:[%s2232_s4 + $0x388] sm:$0xff]  ;;  %725 = vmatpush.bf16.msra.mxu3 %v625_v12  ;;  %v589_v21 = vpack.c.bf16 %v489_v19, %v485_v18 }
  0x13   : > { %v552_v15 = vld [vmem:[%s2232_s4 + $0x3a0] sm:$0xff]  ;;  %v553_v22 = vld [vmem:[%s2232_s4 + $0x3a8] sm:$0xff] }
  0x14   : > { %v620_v17 = vpack.c.bf16 %v552_v15, %v548_v14  ;;  %v476_v23 = vld [vmem:[%s2232_s4 + $0x140] sm:$0xff]  ;;  %v621_v25 = vpack.c.bf16 %v553_v22, %v549_v20  ;;  %v477_v28 = vld [vmem:[%s2232_s4 + $0x148] sm:$0xff]  ;;  %639 = vmatpush.bf16.msra.mxu0 %v588_v16  ;;  %697 = vmatpush.bf16.msra.mxu2 %v589_v21 }
  0x15   : > { %v480_v24 = vld [vmem:[%s2232_s4 + $0x160] sm:$0xff]  ;;  %v481_v30 = vld [vmem:[%s2232_s4 + $0x168] sm:$0xff] }
  0x16   : > { %v540_v26 = vld [vmem:[%s2232_s4 + $0x340] sm:$0xff]  ;;  %v584_v29 = vpack.c.bf16 %v480_v24, %v476_v23  ;;  %v541_v31 = vld [vmem:[%s2232_s4 + $0x348] sm:$0xff]  ;;  %668 = vmatpush.bf16.msra.mxu1 %v620_v17  ;;  %v585_v34 = vpack.c.bf16 %v481_v30, %v477_v28  ;;  %726 = vmatpush.bf16.msra.mxu3 %v621_v25 }
  0x17   : > { %v544_v27 = vld [vmem:[%s2232_s4 + $0x360] sm:$0xff]  ;;  %v545_v32 = vld [vmem:[%s2232_s4 + $0x368] sm:$0xff] }
  0x18   : > { %v616_v33 = vpack.c.bf16 %v544_v27, %v540_v26  ;;  %v468_v35 = vld [vmem:[%s2232_s4 + $0x100] sm:$0xff]  ;;  %v617_v38 = vpack.c.bf16 %v545_v32, %v541_v31  ;;  %v469_v40 = vld [vmem:[%s2232_s4 + $0x108] sm:$0xff]  ;;  %640 = vmatpush.bf16.msra.mxu0 %v584_v29  ;;  %698 = vmatpush.bf16.msra.mxu2 %v585_v34 }
  0x19   : > { %v472_v36 = vld [vmem:[%s2232_s4 + $0x120] sm:$0xff]  ;;  %v473_v41 = vld [vmem:[%s2232_s4 + $0x128] sm:$0xff] }
  0x1a   : > { %v532_v37 = vld [vmem:[%s2232_s4 + $0x300] sm:$0xff]  ;;  %v533_v42 = vld [vmem:[%s2232_s4 + $0x308] sm:$0xff]  ;;  %v580_v44 = vpack.c.bf16 %v472_v36, %v468_v35  ;;  %669 = vmatpush.bf16.msra.mxu1 %v616_v33  ;;  %v581_v46 = vpack.c.bf16 %v473_v41, %v469_v40  ;;  %727 = vmatpush.bf16.msra.mxu3 %v617_v38 }
  0x1b   : > { %v536_v39 = vld [vmem:[%s2232_s4 + $0x320] sm:$0xff]  ;;  %v537_v43 = vld [vmem:[%s2232_s4 + $0x328] sm:$0xff] }
  0x1c   : > { %v612_v45 = vpack.c.bf16 %v536_v39, %v532_v37  ;;  %v460_v47 = vld [vmem:[%s2232_s4 + $0xc0] sm:$0xff]  ;;  %v613_v50 = vpack.c.bf16 %v537_v43, %v533_v42  ;;  %v461_v52 = vld [vmem:[%s2232_s4 + $0xc8] sm:$0xff]  ;;  %641 = vmatpush.bf16.msra.mxu0 %v580_v44  ;;  %699 = vmatpush.bf16.msra.mxu2 %v581_v46  ;;  %v495_v46 = vld [vmem:[%s2232_s4 + $0x1d8] sm:$0xff] }
  0x1d   : > { %v464_v48 = vld [vmem:[%s2232_s4 + $0xe0] sm:$0xff]  ;;  %v465_v53 = vld [vmem:[%s2232_s4 + $0xe8] sm:$0xff] }
  0x1e   : > { %v524_v49 = vld [vmem:[%s2232_s4 + $0x2c0] sm:$0xff]  ;;  %v525_v54 = vld [vmem:[%s2232_s4 + $0x2c8] sm:$0xff]  ;;  %v576_v56 = vpack.c.bf16 %v464_v48, %v460_v47  ;;  %670 = vmatpush.bf16.msra.mxu1 %v612_v45  ;;  %v577_v58 = vpack.c.bf16 %v465_v53, %v461_v52  ;;  %728 = vmatpush.bf16.msra.mxu3 %v613_v50  ;;  %v499_v47 = vld [vmem:[%s2232_s4 + $0x1f8] sm:$0xff] }
  0x1f   : > { %v528_v51 = vld [vmem:[%s2232_s4 + $0x2e0] sm:$0xff]  ;;  %v529_v55 = vld [vmem:[%s2232_s4 + $0x2e8] sm:$0xff]  ;;  %v559_v48 = vld [vmem:[%s2232_s4 + $0x3d8] sm:$0xff] }
  0x20   : > { %v608_v57 = vpack.c.bf16 %v528_v51, %v524_v49  ;;  %v452_v59 = vld [vmem:[%s2232_s4 + $0x80] sm:$0xff]  ;;  %v609_v62 = vpack.c.bf16 %v529_v55, %v525_v54  ;;  %v453_v0 = vld [vmem:[%s2232_s4 + $0x88] sm:$0xff]  ;;  %642 = vmatpush.bf16.msra.mxu0 %v576_v56  ;;  %700 = vmatpush.bf16.msra.mxu2 %v577_v58  ;;  %v595_v49 = vpack.c.bf16 %v499_v47, %v495_v46  ;;  %v563_v50 = vld [vmem:[%s2232_s4 + $0x3f8] sm:$0xff] }
  0x21   : > { %v456_v60 = vld [vmem:[%s2232_s4 + $0xa0] sm:$0xff]  ;;  %v457_v1 = vld [vmem:[%s2232_s4 + $0xa8] sm:$0xff]  ;;  %v494_v51 = vld [vmem:[%s2232_s4 + $0x1d0] sm:$0xff]  ;;  %v627_v54 = vpack.c.bf16 %v563_v50, %v559_v48 }
  0x22   : > { %v516_v61 = vld [vmem:[%s2232_s4 + $0x280] sm:$0xff]  ;;  %v517_v2 = vld [vmem:[%s2232_s4 + $0x288] sm:$0xff]  ;;  %v572_v4 = vpack.c.bf16 %v456_v60, %v452_v59  ;;  %671 = vmatpush.bf16.msra.mxu1 %v608_v57  ;;  %v573_v7 = vpack.c.bf16 %v457_v1, %v453_v0  ;;  %729 = vmatpush.bf16.msra.mxu3 %v609_v62  ;;  %v498_v52 = vld [vmem:[%s2232_s4 + $0x1f0] sm:$0xff] }
  0x23   : > { %v520_v63 = vld [vmem:[%s2232_s4 + $0x2a0] sm:$0xff]  ;;  %v521_v3 = vld [vmem:[%s2232_s4 + $0x2a8] sm:$0xff]  ;;  %v594_v55 = vpack.c.bf16 %v498_v52, %v494_v51  ;;  %v558_v56 = vld [vmem:[%s2232_s4 + $0x3d0] sm:$0xff] }
  0x24   : > { %v444_v5 = vld [vmem:[%s2232_s4 + $0x40] sm:$0xff]  ;;  %v604_v6 = vpack.c.bf16 %v520_v63, %v516_v61  ;;  %v605_v11 = vpack.c.bf16 %v521_v3, %v517_v2  ;;  %v445_v12 = vld [vmem:[%s2232_s4 + $0x48] sm:$0xff]  ;;  %643 = vmatpush.bf16.msra.mxu0 %v572_v4  ;;  %701 = vmatpush.bf16.msra.mxu2 %v573_v7  ;;  %v562_v57 = vld [vmem:[%s2232_s4 + $0x3f0] sm:$0xff]  ;;  %v1356_v3 = vmov 857870592  }
  0x25   : > { %v448_v8 = vld [vmem:[%s2232_s4 + $0x60] sm:$0xff]  ;;  %v449_v13 = vld [vmem:[%s2232_s4 + $0x68] sm:$0xff]  ;;  %v487_v58 = vld [vmem:[%s2232_s4 + $0x198] sm:$0xff]  ;;  %v626_v59 = vpack.c.bf16 %v562_v57, %v558_v56  ;;  %v338_v4 = vunpack.c.l.s4 %v1356_v3 }
  0x26   : > { %v508_v9 = vld [vmem:[%s2232_s4 + $0x240] sm:$0xff]  ;;  %v509_v15 = vld [vmem:[%s2232_s4 + $0x248] sm:$0xff]  ;;  %v568_v18 = vpack.c.bf16 %v448_v8, %v444_v5  ;;  %672 = vmatpush.bf16.msra.mxu1 %v604_v6  ;;  %v569_v20 = vpack.c.bf16 %v449_v13, %v445_v12  ;;  %730 = vmatpush.bf16.msra.mxu3 %v605_v11  ;;  %v491_v60 = vld [vmem:[%s2232_s4 + $0x1b8] sm:$0xff] }
  0x27   : > { %v512_v10 = vld [vmem:[%s2232_s4 + $0x260] sm:$0xff]  ;;  %v513_v16 = vld [vmem:[%s2232_s4 + $0x268] sm:$0xff]  ;;  %v551_v61 = vld [vmem:[%s2232_s4 + $0x398] sm:$0xff]  ;;  %v591_v63 = vpack.c.bf16 %v491_v60, %v487_v58  ;;  %v339_v7 = vunpack.c.0.s8 %v338_v4 }
  0x28   : > { %v309_v14 = vld [vmem:[%s2231_s3] sm:$0xf]  ;;  %v600_v19 = vpack.c.bf16 %v512_v10, %v508_v9  ;;  %v601_v25 = vpack.c.bf16 %v513_v16, %v509_v15  ;;  %v437_v27 = vld [vmem:[%s2232_s4 + $0x8] sm:$0xff]  ;;  %644 = vmatpush.bf16.msra.mxu0 %v568_v18  ;;  %702 = vmatpush.bf16.msra.mxu2 %v569_v20  ;;  %v555_v62 = vld [vmem:[%s2232_s4 + $0x3b8] sm:$0xff] }
  0x29   : > { %v1590_v17 = vmul.f32 0.0078125, %v309_v14  ;;  %v436_v21 = vld [vmem:[%s2232_s4] sm:$0xff]  ;;  %v441_v28 = vld [vmem:[%s2232_s4 + $0x28] sm:$0xff]  ;;  %v623_v0 = vpack.c.bf16 %v555_v62, %v551_v61  ;;  %v486_v1 = vld [vmem:[%s2232_s4 + $0x190] sm:$0xff] }
  0x2a   : > { %v440_v22 = vld [vmem:[%s2232_s4 + $0x20] sm:$0xff]  ;;  %v501_v29 = vld [vmem:[%s2232_s4 + $0x208] sm:$0xff]  ;;  %673 = vmatpush.bf16.msra.mxu1 %v600_v19  ;;  %v565_v34 = vpack.c.bf16 %v441_v28, %v437_v27  ;;  %731 = vmatpush.bf16.msra.mxu3 %v601_v25  ;;  %v490_v2 = vld [vmem:[%s2232_s4 + $0x1b0] sm:$0xff] }
  0x2b   : > { %v500_v23 = vld [vmem:[%s2232_s4 + $0x200] sm:$0xff]  ;;  %v313_v24 = vmul.f32 %v1590_v17, %v1590_v17  ;;  %v505_v30 = vld [vmem:[%s2232_s4 + $0x228] sm:$0xff]  ;;  %v564_v32 = vpack.c.bf16 %v440_v22, %v436_v21  ;;  %v590_v5 = vpack.c.bf16 %v490_v2, %v486_v1  ;;  %v357_v14 = vld [vmem:[%s1680_s17 + $0x10] sm:$0xff] }
  0x2c   : > { %v504_v26 = vld [vmem:[%s2232_s4 + $0x220] sm:$0xff]  ;;  %v597_v36 = vpack.c.bf16 %v505_v30, %v501_v29  ;;  %703 = vmatpush.bf16.msra.mxu2 %v565_v34  ;;  %v356_v15 = vld [vmem:[%s1680_s17 + $0x8] sm:$0xff]  ;;  %v358_v19 = vld [vmem:[%s1680_s17 + $0x18] sm:$0xff] }
  0x2d   : > { %v315_v31 = vrot.slane %v313_v24, 7  ;;  %v596_v33 = vpack.c.bf16 %v504_v26, %v500_v23  ;;  %645 = vmatpush.bf16.msra.mxu0 %v564_v32  ;;  %v310_v6 = vld [vmem:[%s2229_s1] sm:$0x3]  ;;  %v550_v20 = vld [vmem:[%s2232_s4 + $0x390] sm:$0xff]  ;;  %v479_v21 = vld [vmem:[%s2232_s4 + $0x158] sm:$0xff] }
  0x2e   : > { %732 = vmatpush.bf16.msra.mxu3 %v597_v36  ;;  %v355_v12 = vld [vmem:[%s1680_s17] sm:$0xff]  ;;  %v483_v26 = vld [vmem:[%s2232_s4 + $0x178] sm:$0xff]  ;;  %v482_v34 = vld [vmem:[%s2232_s4 + $0x170] sm:$0xff] }
  0x2f   : > { %v317_v35 = vsub.f32 %v1590_v17, %v315_v31  ;;  %674 = vmatpush.bf16.msra.mxu1 %v596_v33  ;;  %v311_v18 = vld [vmem:[%s2230_s2] sm:$0x3]  ;;  %v543_v27 = vld [vmem:[%s2232_s4 + $0x358] sm:$0xff]  ;;  %v587_v31 = vpack.c.bf16 %v483_v26, %v479_v21  ;;  %v478_v33 = vld [vmem:[%s2232_s4 + $0x150] sm:$0xff] }
  0x30   : > { %812 = vmatpush.bf16.msrb.mxu2 %v595_v49  ;;  %v547_v28 = vld [vmem:[%s2232_s4 + $0x378] sm:$0xff]  ;;  %v470_v48 = vld [vmem:[%s2232_s4 + $0x110] sm:$0xff]  ;;  %v360_v2 = vld [vmem:[%s1680_s17 + $0x28] sm:$0xff] }
  0x31   : > { %v318_v37 = vmax.f32 %v317_v35, 0.0  ;;  %754 = vmatpush.bf16.msrb.mxu0 %v594_v55  ;;  %v619_v32 = vpack.c.bf16 %v547_v28, %v543_v27  ;;  %v542_v35 = vld [vmem:[%s2232_s4 + $0x350] sm:$0xff]  ;;  %v535_v46 = vld [vmem:[%s2232_s4 + $0x318] sm:$0xff] }
  0x32   : > { %841 = vmatpush.bf16.msrb.mxu3 %v627_v54  ;;  %v539_v47 = vld [vmem:[%s2232_s4 + $0x338] sm:$0xff]  ;;  %v474_v52 = vld [vmem:[%s2232_s4 + $0x130] sm:$0xff] }
  0x33   : > { %v319_v38 = vadd.f32 1e-05, %v318_v37  ;;  %783 = vmatpush.bf16.msrb.mxu1 %v626_v59  ;;  %v615_v51 = vpack.c.bf16 %v539_v47, %v535_v46  ;;  %v361_v1 = vld [vmem:[%s1680_s17 + $0x30] sm:$0xff]  ;;  %v362_v3 = vld [vmem:[%s1680_s17 + $0x38] sm:$0xff]  ;;  %v363_v46 = vld [vmem:[%s1680_s17 + $0x40] sm:$0xff] }
  0x34   : > { %813 = vmatpush.bf16.msrb.mxu2 %v591_v63  ;;  %v365_v47 = vld [vmem:[%s1680_s17 + $0x50] sm:$0xff] }
  0x35   : > { %1330 = vrsqrt.f32 %v319_v38  ;;  %vm326_vm0 = vweird.f32 %v319_v38  ;;  %755 = vmatpush.bf16.msrb.mxu0 %v590_v5 }
  0x36   : > { %842 = vmatpush.bf16.msrb.mxu3 %v623_v0  ;;  %v359_v0 = vld [vmem:[%s1680_s17 + $0x20] sm:$0xff] }
  0x38   : > { %814 = vmatpush.bf16.msrb.mxu2 %v587_v31  ;;  %v459_v31 = vld [vmem:[%s2232_s4 + $0xb8] sm:$0xff] }
  0x3a   : > { %843 = vmatpush.bf16.msrb.mxu3 %v619_v32 }
  0x3b   : > { %v1331_v39 = vpop.eup %1330 }
  0x3c   : > { %v321_v40 = vmul.f32 %v1331_v39, %v319_v38  ;;  %vm327_vm1 = vweird.f32 %v1331_v39 }
  0x3d   : > { %vm1619_vm2 = vmor %vm326_vm0, %vm327_vm1 }
  0x3e   : > { %v322_v41 = vmul.f32 %v1331_v39, %v321_v40  ;;  %v546_v40 = vld [vmem:[%s2232_s4 + $0x370] sm:$0xff]  ;;  %844 = vmatpush.bf16.msrb.mxu3 %v615_v51 }
  0x3f   : > { %v618_v44 = vpack.c.bf16 %v546_v40, %v542_v35  ;;  %v523_v35 = vld [vmem:[%s2232_s4 + $0x2b8] sm:$0xff] }
  0x40   : > { %v323_v42 = vmul.f32 0.5, %v322_v41  ;;  %v471_v41 = vld [vmem:[%s2232_s4 + $0x118] sm:$0xff] }
  0x42   : > { %v324_v43 = vsub.f32 1.5, %v323_v42  ;;  %v475_v42 = vld [vmem:[%s2232_s4 + $0x138] sm:$0xff] }
  0x44   : > { %v325_v45 = vmul.f32 %v1331_v39, %v324_v43 }
  0x46   : > { %v329_v53 = vsel %vm1619_vm2, %v1331_v39, %v325_v45  ;;  %v586_v39 = vpack.c.bf16 %v482_v34, %v478_v33  ;;  %v583_v45 = vpack.c.bf16 %v475_v42, %v471_v41  ;;  %v519_v34 = vld [vmem:[%s2232_s4 + $0x298] sm:$0xff] }
  0x47   : > { %331 = vst [vmem:[#allocation1] sm:$0xff] %v329_v53  ;;  %v582_v53 = vpack.c.bf16 %v474_v52, %v470_v48  ;;  %v364_v48 = vld [vmem:[%s1680_s17 + $0x48] sm:$0xff] }
  0x48   : > { %756 = vmatpush.bf16.msrb.mxu0 %v586_v39  ;;  %815 = vmatpush.bf16.msrb.mxu2 %v583_v45 }
  0x4c   : > { %757 = vmatpush.bf16.msrb.mxu0 %v582_v53 }
  0x4e   : > { %v333_v8 = vld [vmem:[#allocation1 + $0x1] ss:$2 sm:$0xff] }
  0x4f   : > { %v335_v9 = vmul.f32 %v333_v8, %v310_v6 }
  0x51   : > { %v340_v10 = vperm.slane %v335_v9, %v339_v7  ;;  %v1682_v11 = vperm.slane %v335_v9, 0  ;;  %v1688_v16 = vperm.slane %v335_v9, 1 }
  0x53   : > { %v342_v13 = vmul.f32 %v340_v10, %v1590_v17  ;;  %v554_v17 = vld [vmem:[%s2232_s4 + $0x3b0] sm:$0xff]  ;;  %v375_v25 = vmul.f32 %v1682_v11, %v355_v12  ;;  %v377_v29 = vmul.f32 %v1682_v11, %v357_v14  ;;  %v376_v38 = vmul.f32 %v1688_v16, %v356_v15  ;;  %v467_v15 = vld [vmem:[%s2232_s4 + $0xf8] sm:$0xff] }
  0x54   : > { %v622_v30 = vpack.c.bf16 %v554_v17, %v550_v20  ;;  %v378_v50 = vmul.f32 %v1688_v16, %v358_v19  ;;  %v379_v6 = vmul.f32 %v1682_v11, %v359_v0  ;;  %v381_v7 = vmul.f32 %v1682_v11, %v361_v1  ;;  %v534_v10 = vld [vmem:[%s2232_s4 + $0x310] sm:$0xff]  ;;  %v531_v19 = vld [vmem:[%s2232_s4 + $0x2f8] sm:$0xff] }
  0x55   : > { %v344_v22 = vrot.slane %v342_v13, 1  ;;  %v345_v23 = vrot.slane %v342_v13, 2  ;;  %v346_v24 = vrot.slane %v342_v13, 3  ;;  %v380_v8 = vmul.f32 %v1688_v16, %v360_v2  ;;  %v538_v12 = vld [vmem:[%s2232_s4 + $0x330] sm:$0xff] }
  0x56   : > { %784 = vmatpush.bf16.msrb.mxu1 %v622_v30  ;;  %v382_v9 = vmul.f32 %v1688_v16, %v362_v3  ;;  %v614_v14 = vpack.c.bf16 %v538_v12, %v534_v10  ;;  %v455_v30 = vld [vmem:[%s2232_s4 + $0x98] sm:$0xff]  ;;  %v385_v51 = vmul.f32 %v1682_v11, %v365_v47  ;;  %v384_v52 = vmul.f32 %v1688_v16, %v364_v48  ;;  %v446_v2 = vld [vmem:[%s2232_s4 + $0x50] sm:$0xff] }
  0x57   : > { %v348_v36 = vsel %vm347_vm3, %v342_v13, %v344_v22  ;;  %v350_v37 = vsel %vm349_vm4, %v345_v23, %v346_v24  ;;  %v463_v13 = vld [vmem:[%s2232_s4 + $0xd8] sm:$0xff]  ;;  %v462_v22 = vld [vmem:[%s2232_s4 + $0xd0] sm:$0xff]  ;;  %v575_v33 = vpack.c.bf16 %v459_v31, %v455_v30 }
  0x58   : > { %v352_v43 = vsel %vm351_vm5, %v348_v36, %v350_v37  ;;  %v579_v17 = vpack.c.bf16 %v467_v15, %v463_v13  ;;  %v466_v23 = vld [vmem:[%s2232_s4 + $0xf0] sm:$0xff]  ;;  %v607_v37 = vpack.c.bf16 %v523_v35, %v519_v34  ;;  %v439_v13 = vld [vmem:[%s2232_s4 + $0x18] sm:$0xff]  ;;  %v368_v35 = vld [vmem:[%s1680_s17 + $0x68] sm:$0xff] }
  0x59   : > { %v354_v49 = vsub.f32 %v311_v18, %v352_v43  ;;  %v527_v18 = vld [vmem:[%s2232_s4 + $0x2d8] sm:$0xff]  ;;  %v526_v24 = vld [vmem:[%s2232_s4 + $0x2d0] sm:$0xff]  ;;  %v578_v28 = vpack.c.bf16 %v466_v23, %v462_v22 }
  0x5a   : > { %785 = vmatpush.bf16.msrb.mxu1 %v618_v44  ;;  %v611_v21 = vpack.c.bf16 %v531_v19, %v527_v18  ;;  %816 = vmatpush.bf16.msrb.mxu2 %v579_v17  ;;  %v454_v36 = vld [vmem:[%s2232_s4 + $0x90] sm:$0xff]  ;;  %v503_v19 = vld [vmem:[%s2232_s4 + $0x218] sm:$0xff] }
  0x5b   : > { %v1749_v54 = vperm.slane %v354_v49, 0  ;;  %v1751_v55 = vperm.slane %v354_v49, 1  ;;  %758 = vmatpush.bf16.msrb.mxu0 %v578_v28  ;;  %v366_v49 = vld [vmem:[%s1680_s17 + $0x58] sm:$0xff]  ;;  %v450_v3 = vld [vmem:[%s2232_s4 + $0x70] sm:$0xff] }
  0x5c   : > { %845 = vmatpush.bf16.msrb.mxu3 %v611_v21  ;;  %v386_v53 = vmul.f32 %v1688_v16, %v366_v49  ;;  %v570_v10 = vpack.c.bf16 %v450_v3, %v446_v2  ;;  %v514_v12 = vld [vmem:[%s2232_s4 + $0x270] sm:$0xff] }
  0x5d   : > { %v396_v56 = vadd.f32 %v1749_v54, %v375_v25  ;;  %v398_v57 = vadd.f32 %v1749_v54, %v377_v29  ;;  %v397_v58 = vadd.f32 %v1751_v55, %v376_v38  ;;  %v399_v59 = vadd.f32 %v1751_v55, %v378_v50  ;;  %v530_v29 = vld [vmem:[%s2232_s4 + $0x2f0] sm:$0xff] }
  0x5e   : > { %v400_v20 = vadd.f32 %v1749_v54, %v379_v6  ;;  %v402_v25 = vadd.f32 %v1749_v54, %v381_v7  ;;  %v401_v26 = vadd.f32 %v1751_v55, %v380_v8  ;;  %v403_v27 = vadd.f32 %v1751_v55, %v382_v9  ;;  %786 = vmatpush.bf16.msrb.mxu1 %v614_v14  ;;  %v458_v38 = vld [vmem:[%s2232_s4 + $0xb0] sm:$0xff]  ;;  %v443_v14 = vld [vmem:[%s2232_s4 + $0x38] sm:$0xff] }
  0x5f   : > { %v412_v60 = vmax.f32 %v396_v56, 0.0  ;;  %v414_v61 = vmax.f32 %v398_v57, 0.0  ;;  %v413_v62 = vmax.f32 %v397_v58, 0.0  ;;  %v415_v63 = vmax.f32 %v399_v59, 0.0  ;;  %817 = vmatpush.bf16.msrb.mxu2 %v575_v33  ;;  %v518_v56 = vld [vmem:[%s2232_s4 + $0x290] sm:$0xff]  ;;  %v447_v58 = vld [vmem:[%s2232_s4 + $0x58] sm:$0xff] }
  0x60   : > { %v610_v32 = vpack.c.bf16 %v530_v29, %v526_v24  ;;  %v574_v39 = vpack.c.bf16 %v458_v38, %v454_v36  ;;  %v416_v40 = vmax.f32 %v400_v20, 0.0  ;;  %v418_v41 = vmax.f32 %v402_v25, 0.0  ;;  %846 = vmatpush.bf16.msrb.mxu3 %v607_v37  ;;  %v522_v57 = vld [vmem:[%s2232_s4 + $0x2b0] sm:$0xff]  ;;  %v507_v20 = vld [vmem:[%s2232_s4 + $0x238] sm:$0xff]  ;;  %v367_v33 = vld [vmem:[%s1680_s17 + $0x60] sm:$0xff] }
  0x61   : > { %v1761_v4 = vpack.c.bf16 %v414_v61, %v412_v60  ;;  %v1763_v5 = vpack.c.bf16 %v415_v63, %v413_v62  ;;  %v417_v42 = vmax.f32 %v401_v26, 0.0  ;;  %v419_v43 = vmax.f32 %v403_v27, 0.0  ;;  %v451_v60 = vld [vmem:[%s2232_s4 + $0x78] sm:$0xff]  ;;  %v510_v6 = vld [vmem:[%s2232_s4 + $0x250] sm:$0xff] }
  0x62   : > { %787 = vmatpush.bf16.msrb.mxu1 %v610_v32  ;;  %759 = vmatpush.bf16.msrb.mxu0 %v574_v39  ;;  %v1825_v44 = vpack.c.bf16 %v418_v41, %v416_v40  ;;  %v383_v50 = vmul.f32 %v1682_v11, %v363_v46  ;;  %v606_v59 = vpack.c.bf16 %v522_v57, %v518_v56  ;;  %v511_v61 = vld [vmem:[%s2232_s4 + $0x258] sm:$0xff]  ;;  %v438_v17 = vld [vmem:[%s2232_s4 + $0x10] sm:$0xff] }
  0x63   : > { %646 = vmatmul.bf16.vlgmr.msra.gmra.mxu0 %v1761_v4  ;;  %675 = vmatmul.bf16.vlgmr.msra.gmra.mxu1 %v1763_v5  ;;  %v1827_v45 = vpack.c.bf16 %v419_v43, %v417_v42  ;;  %v515_v62 = vld [vmem:[%s2232_s4 + $0x278] sm:$0xff]  ;;  %v571_v0 = vpack.c.bf16 %v451_v60, %v447_v58  ;;  %v406_v7 = vadd.f32 %v1749_v54, %v385_v51  ;;  %v442_v22 = vld [vmem:[%s2232_s4 + $0x30] sm:$0xff] }
  0x64   : > { %704 = vmatmul.bf16.vlgmr.msra.gmra.mxu2 %v1761_v4  ;;  %733 = vmatmul.bf16.vlgmr.msra.gmra.mxu3 %v1763_v5  ;;  %v404_v63 = vadd.f32 %v1749_v54, %v383_v50  ;;  %v603_v1 = vpack.c.bf16 %v515_v62, %v511_v61  ;;  %v405_v8 = vadd.f32 %v1751_v55, %v384_v52  ;;  %v502_v23 = vld [vmem:[%s2232_s4 + $0x210] sm:$0xff]  ;;  %v370_v36 = vld [vmem:[%s1680_s17 + $0x78] sm:$0xff] }
  0x65   : > { %v407_v9 = vadd.f32 %v1751_v55, %v386_v53  ;;  %818 = vmatpush.bf16.msrb.mxu2 %v571_v0  ;;  %v602_v15 = vpack.c.bf16 %v514_v12, %v510_v6  ;;  %v567_v18 = vpack.c.bf16 %v443_v14, %v439_v13  ;;  %v599_v21 = vpack.c.bf16 %v507_v20, %v503_v19  ;;  %v506_v24 = vld [vmem:[%s2232_s4 + $0x230] sm:$0xff] }
  0x66   : > { %788 = vmatpush.bf16.msrb.mxu1 %v606_v59  ;;  %847 = vmatpush.bf16.msrb.mxu3 %v603_v1  ;;  %v420_v25 = vmax.f32 %v404_v63, 0.0  ;;  %v566_v26 = vpack.c.bf16 %v442_v22, %v438_v17  ;;  %v422_v27 = vmax.f32 %v406_v7, 0.0  ;;  %v421_v28 = vmax.f32 %v405_v8, 0.0  ;;  %v369_v34 = vld [vmem:[%s1680_s17 + $0x70] sm:$0xff] }
  0x67   : > { %760 = vmatpush.bf16.msrb.mxu0 %v570_v10  ;;  %v423_v29 = vmax.f32 %v407_v9, 0.0  ;;  %v598_v30 = vpack.c.bf16 %v506_v24, %v502_v23  ;;  %v387_v37 = vmul.f32 %v1682_v11, %v367_v33  ;;  %v389_v38 = vmul.f32 %v1682_v11, %v369_v34 }
  0x68   : > { %v432_v31 = vpack.c.bf16 %v422_v27, %v420_v25  ;;  %v388_v39 = vmul.f32 %v1688_v16, %v368_v35  ;;  %v390_v40 = vmul.f32 %v1688_v16, %v370_v36  ;;  %v1922_v16 = vld [vmem:[%s2233_s5] sm:$0xf] }
  0x69   : > { %819 = vmatpush.bf16.msrb.mxu2 %v567_v18  ;;  %v433_v32 = vpack.c.bf16 %v423_v29, %v421_v28  ;;  %v408_v41 = vadd.f32 %v1749_v54, %v387_v37  ;;  %v410_v42 = vadd.f32 %v1749_v54, %v389_v38  ;;  %v1925_v54 = vperm.slane %v1922_v16, 0 }
  0x6a   : > { %789 = vmatpush.bf16.msrb.mxu1 %v602_v15  ;;  %848 = vmatpush.bf16.msrb.mxu3 %v599_v21  ;;  %v409_v43 = vadd.f32 %v1751_v55, %v388_v39  ;;  %v411_v46 = vadd.f32 %v1751_v55, %v390_v40 }
  0x6b   : > { %761 = vmatpush.bf16.msrb.mxu0 %v566_v26  ;;  %v424_v47 = vmax.f32 %v408_v41, 0.0  ;;  %v426_v48 = vmax.f32 %v410_v42, 0.0 }
  0x6c   : > { %v425_v49 = vmax.f32 %v409_v43, 0.0  ;;  %v427_v50 = vmax.f32 %v411_v46, 0.0 }
  0x6d   : > { %v434_v51 = vpack.c.bf16 %v426_v48, %v424_v47 }
  0x6e   : > { %790 = vmatpush.bf16.msrb.mxu1 %v598_v30  ;;  %v435_v11 = vpack.c.bf16 %v427_v50, %v425_v49 }
  0x73   : > { %651 = vmatmul.bf16.gmra.mxu0 %v1825_v44  ;;  %680 = vmatmul.bf16.gmra.mxu1 %v1827_v45 }
  0x74   : > { %709 = vmatmul.bf16.gmra.mxu2 %v1825_v44  ;;  %738 = vmatmul.bf16.gmra.mxu3 %v1827_v45 }
  0x83   : > { %656 = vmatmul.bf16.gmra.mxu0 %v432_v31  ;;  %685 = vmatmul.bf16.gmra.mxu1 %v433_v32 }
  0x84   : > { %714 = vmatmul.bf16.gmra.mxu2 %v432_v31  ;;  %743 = vmatmul.bf16.gmra.mxu3 %v433_v32 }
  0x93   : > { %661 = vmatmul.bf16.gmra.mxu0 %v434_v51  ;;  %690 = vmatmul.bf16.gmra.mxu1 %v435_v11 }
  0x94   : > { %719 = vmatmul.bf16.gmra.mxu2 %v434_v51  ;;  %748 = vmatmul.bf16.gmra.mxu3 %v435_v11 }
  0xa3   : > { %762 = vmatmul.bf16.vlgmr.msrb.gmra.mxu0 %v1761_v4  ;;  %791 = vmatmul.bf16.vlgmr.msrb.gmra.mxu1 %v1763_v5 }
  0xa4   : > { %820 = vmatmul.bf16.vlgmr.msrb.gmra.mxu2 %v1761_v4  ;;  %849 = vmatmul.bf16.vlgmr.msrb.gmra.mxu3 %v1763_v5 }
  0xb3   : > { %767 = vmatmul.bf16.gmra.mxu0 %v1825_v44  ;;  %796 = vmatmul.bf16.gmra.mxu1 %v1827_v45 }
  0xb4   : > { %825 = vmatmul.bf16.gmra.mxu2 %v1825_v44  ;;  %854 = vmatmul.bf16.gmra.mxu3 %v1827_v45  ;;  %v1931_v45 = vperm.slane %v1922_v16, 1 }
  0xc3   : > { %772 = vmatmul.bf16.gmra.mxu0 %v432_v31  ;;  %801 = vmatmul.bf16.gmra.mxu1 %v433_v32 }
  0xc4   : > { %830 = vmatmul.bf16.gmra.mxu2 %v432_v31  ;;  %859 = vmatmul.bf16.gmra.mxu3 %v433_v32 }
  0xd3   : > { %777 = vmatmul.bf16.gmra.mxu0 %v434_v51  ;;  %806 = vmatmul.bf16.gmra.mxu1 %v435_v11 }
  0xd4   : > { %835 = vmatmul.bf16.gmra.mxu2 %v434_v51  ;;  %864 = vmatmul.bf16.gmra.mxu3 %v435_v11 }
  0xe0   : > { %v647_v55 = vpop.f32.mrf.mxu0  ;;  %v676_v4 = vpop.f32.mrf.mxu1 }
  0xe1   : > { %v648_v5 = vadd.f32 %v647_v55, %v1925_v54 }
  0xe3   : > { %v1928_v44 = vadd.f32 %v676_v4, %v648_v5 }
  0xe7   : > { %v705_v52 = vpop.f32.mrf.mxu2  ;;  %v734_v53 = vpop.f32.mrf.mxu3 }
  0xe8   : > { %v706_v56 = vadd.f32 %v705_v52, %v1931_v45  ;;  %v649_v57 = vpop.f32.mrf.mxu0  ;;  %v678_v58 = vpop.f32.mrf.mxu1 }
  0xe9   : > { %v650_v59 = vadd.f32 %v649_v57, %v1925_v54 }
  0xea   : > { %v1935_v60 = vadd.f32 %v734_v53, %v706_v56 }
  0xeb   : > { %v1937_v61 = vadd.f32 %v678_v58, %v650_v59 }
  0xed   : > { %v887_v62 = vmax.f32 %v1928_v44, %v1937_v61  ;;  %v953_v63 = vmin.f32 %v1928_v44, %v1937_v61 }
  0xef   : > { %v707_v0 = vpop.f32.mrf.mxu2  ;;  %v736_v1 = vpop.f32.mrf.mxu3 }
  0xf0   : > { %v708_v2 = vadd.f32 %v707_v0, %v1931_v45  ;;  %v652_v3 = vpop.f32.mrf.mxu0  ;;  %v681_v6 = vpop.f32.mrf.mxu1 }
  0xf1   : > { %v653_v7 = vadd.f32 %v652_v3, %v1925_v54 }
  0xf2   : > { %v1945_v8 = vadd.f32 %v736_v1, %v708_v2 }
  0xf3   : > { %v1947_v9 = vadd.f32 %v681_v6, %v653_v7 }
  0xf4   : > { %v900_v10 = vmax.f32 %v1935_v60, %v1945_v8  ;;  %v966_v12 = vmin.f32 %v1935_v60, %v1945_v8 }
  0xf5   : > { %v888_v13 = vmax.f32 %v887_v62, %v1947_v9  ;;  %v954_v14 = vmin.f32 %v953_v63, %v1947_v9 }
  0xf7   : > { %v710_v15 = vpop.f32.mrf.mxu2  ;;  %v739_v18 = vpop.f32.mrf.mxu3 }
  0xf8   : > { %v711_v19 = vadd.f32 %v710_v15, %v1931_v45  ;;  %v654_v20 = vpop.f32.mrf.mxu0  ;;  %v683_v17 = vpop.f32.mrf.mxu1 }
  0xf9   : > { %v655_v21 = vadd.f32 %v654_v20, %v1925_v54 }
  0xfa   : > { %v1957_v22 = vadd.f32 %v739_v18, %v711_v19 }
  0xfb   : > { %v1959_v23 = vadd.f32 %v683_v17, %v655_v21 }
  0xfc   : > { %v901_v24 = vmax.f32 %v900_v10, %v1957_v22  ;;  %v967_v25 = vmin.f32 %v966_v12, %v1957_v22 }
  0xfd   : > { %v889_v26 = vmax.f32 %v888_v13, %v1959_v23  ;;  %v955_v27 = vmin.f32 %v954_v14, %v1959_v23 }
  0xff   : > { %v712_v28 = vpop.f32.mrf.mxu2  ;;  %v741_v29 = vpop.f32.mrf.mxu3 }
 0x100   : > { %v713_v30 = vadd.f32 %v712_v28, %v1931_v45  ;;  %v657_v31 = vpop.f32.mrf.mxu0  ;;  %v686_v32 = vpop.f32.mrf.mxu1 }
 0x101   : > { %v658_v33 = vadd.f32 %v657_v31, %v1925_v54 }
 0x102   : > { %v1967_v34 = vadd.f32 %v741_v29, %v713_v30 }
 0x103   : > { %v1969_v35 = vadd.f32 %v686_v32, %v658_v33 }
 0x104   : > { %v902_v36 = vmax.f32 %v901_v24, %v1967_v34  ;;  %v968_v37 = vmin.f32 %v967_v25, %v1967_v34 }
 0x105   : > { %v890_v38 = vmax.f32 %v889_v26, %v1969_v35  ;;  %v956_v39 = vmin.f32 %v955_v27, %v1969_v35 }
 0x107   : > { %v715_v40 = vpop.f32.mrf.mxu2  ;;  %v744_v41 = vpop.f32.mrf.mxu3 }
 0x108   : > { %v716_v42 = vadd.f32 %v715_v40, %v1931_v45  ;;  %v659_v43 = vpop.f32.mrf.mxu0  ;;  %v688_v46 = vpop.f32.mrf.mxu1 }
 0x109   : > { %v660_v47 = vadd.f32 %v659_v43, %v1925_v54 }
 0x10a   : > { %v1977_v48 = vadd.f32 %v744_v41, %v716_v42 }
 0x10b   : > { %v1979_v49 = vadd.f32 %v688_v46, %v660_v47 }
 0x10c   : > { %v903_v50 = vmax.f32 %v902_v36, %v1977_v48  ;;  %v969_v51 = vmin.f32 %v968_v37, %v1977_v48 }
 0x10d   : > { %v891_v11 = vmax.f32 %v890_v38, %v1979_v49  ;;  %v957_v55 = vmin.f32 %v956_v39, %v1979_v49 }
 0x10f   : > { %v717_v4 = vpop.f32.mrf.mxu2  ;;  %v746_v5 = vpop.f32.mrf.mxu3 }
 0x110   : > { %v718_v52 = vadd.f32 %v717_v4, %v1931_v45  ;;  %v662_v53 = vpop.f32.mrf.mxu0  ;;  %v691_v56 = vpop.f32.mrf.mxu1 }
 0x111   : > { %v663_v57 = vadd.f32 %v662_v53, %v1925_v54 }
 0x112   : > { %v1987_v58 = vadd.f32 %v746_v5, %v718_v52 }
 0x113   : > { %v1989_v59 = vadd.f32 %v691_v56, %v663_v57 }
 0x114   : > { %v904_v62 = vmax.f32 %v903_v50, %v1987_v58  ;;  %v970_v63 = vmin.f32 %v969_v51, %v1987_v58 }
 0x115   : > { %v892_v0 = vmax.f32 %v891_v11, %v1989_v59  ;;  %v958_v1 = vmin.f32 %v957_v55, %v1989_v59 }
 0x117   : > { %v720_v2 = vpop.f32.mrf.mxu2  ;;  %v749_v3 = vpop.f32.mrf.mxu3 }
 0x118   : > { %v721_v6 = vadd.f32 %v720_v2, %v1931_v45  ;;  %v664_v7 = vpop.f32.mrf.mxu0  ;;  %v693_v10 = vpop.f32.mrf.mxu1 }
 0x119   : > { %v665_v12 = vadd.f32 %v664_v7, %v1925_v54 }
 0x11a   : > { %v1997_v13 = vadd.f32 %v749_v3, %v721_v6 }
 0x11b   : > { %v1999_v14 = vadd.f32 %v693_v10, %v665_v12 }
 0x11c   : > { %v905_v15 = vmax.f32 %v904_v62, %v1997_v13  ;;  %v971_v18 = vmin.f32 %v970_v63, %v1997_v13 }
 0x11d   : > { %v893_v19 = vmax.f32 %v892_v0, %v1999_v14  ;;  %v959_v20 = vmin.f32 %v958_v1, %v1999_v14 }
 0x11f   : > { %v894_v17 = vrot.slane %v893_v19, 4  ;;  %v960_v21 = vrot.slane %v959_v20, 4  ;;  %v722_v24 = vpop.f32.mrf.mxu2  ;;  %v751_v25 = vpop.f32.mrf.mxu3 }
 0x120   : > { %v723_v26 = vadd.f32 %v722_v24, %v1931_v45  ;;  %v763_v27 = vpop.f32.mrf.mxu0  ;;  %v792_v54 = vpop.f32.mrf.mxu1 }
 0x121   : > { %v895_v28 = vmax.f32 %v893_v19, %v894_v17  ;;  %v961_v29 = vmin.f32 %v959_v20, %v960_v21 }
 0x122   : > { %v2006_v30 = vadd.f32 %v751_v25, %v723_v26  ;;  %v632_v26 = vperm.slane %v1922_v16, 2 }
 0x123   : > { %v896_v33 = vrot.slane %v895_v28, 2  ;;  %v962_v36 = vrot.slane %v961_v29, 2 }
 0x124   : > { %v906_v31 = vmax.f32 %v905_v15, %v2006_v30  ;;  %v972_v32 = vmin.f32 %v971_v18, %v2006_v30 }
 0x125   : > { %v897_v46 = vmax.f32 %v895_v28, %v896_v33  ;;  %v963_v47 = vmin.f32 %v961_v29, %v962_v36  ;;  %v764_v36 = vadd.f32 %v763_v27, %v632_v26 }
 0x126   : > { %v907_v37 = vrot.slane %v906_v31, 4  ;;  %v973_v38 = vrot.slane %v972_v32, 4 }
 0x127   : > { %v821_v39 = vpop.f32.mrf.mxu2  ;;  %v2010_v40 = vpop.f32.mrf.mxu3  ;;  %v898_v4 = vrot.slane %v897_v46, 1  ;;  %v964_v5 = vrot.slane %v963_v47, 1 }
 0x128   : > { %v908_v41 = vmax.f32 %v906_v31, %v907_v37  ;;  %v974_v42 = vmin.f32 %v972_v32, %v973_v38  ;;  %v765_v45 = vpop.f32.mrf.mxu0  ;;  %v794_v43 = vpop.f32.mrf.mxu1 }
 0x129   : > { %v899_v2 = vmax.f32 %v897_v46, %v898_v4  ;;  %v965_v3 = vmin.f32 %v963_v47, %v964_v5  ;;  %v766_v33 = vadd.f32 %v765_v45, %v632_v26  ;;  %v2022_v46 = vadd.f32 %v792_v54, %v764_v36 }
 0x12a   : > { %v909_v50 = vrot.slane %v908_v41, 2  ;;  %v975_v51 = vrot.slane %v974_v42, 2 }
 0x12b   : > { %v2019_v38 = vadd.f32 %v794_v43, %v766_v33 }
 0x12c   : > { %v910_v11 = vmax.f32 %v908_v41, %v909_v50  ;;  %v976_v55 = vmin.f32 %v974_v42, %v975_v51  ;;  %v633_v42 = vperm.slane %v1922_v16, 3 }
 0x12d   : > { %v913_v45 = vmax.f32 %v2022_v46, %v2019_v38  ;;  %v979_v27 = vmin.f32 %v2022_v46, %v2019_v38 }
 0x12e   : > { %v911_v52 = vrot.slane %v910_v11, 1  ;;  %v977_v53 = vrot.slane %v976_v55, 1  ;;  %v822_v16 = vadd.f32 %v821_v39, %v633_v42 }
 0x12f   : > { %v823_v56 = vpop.f32.mrf.mxu2  ;;  %v852_v57 = vpop.f32.mrf.mxu3 }
 0x130   : > { %v912_v62 = vmax.f32 %v910_v11, %v911_v52  ;;  %v978_v63 = vmin.f32 %v976_v55, %v977_v53  ;;  %v768_v0 = vpop.f32.mrf.mxu0  ;;  %v797_v1 = vpop.f32.mrf.mxu1  ;;  %v824_v55 = vadd.f32 %v823_v56, %v633_v42 }
 0x131   : > { %v769_v37 = vadd.f32 %v768_v0, %v632_v26 }
 0x132   : > { %v943_v6 = vrot.slane %v912_v62, 6  ;;  %v1009_v7 = vrot.slane %v978_v63, 6  ;;  %v2036_v0 = vadd.f32 %v852_v57, %v824_v55 }
 0x133   : > { %v2024_v47 = vadd.f32 %v797_v1, %v769_v37 }
 0x134   : > { %v2013_v10 = vsel %vm351_vm5, %v899_v2, %v943_v6  ;;  %v2016_v12 = vsel %vm351_vm5, %v965_v3, %v1009_v7  ;;  %v2043_v7 = vadd.f32 %v2010_v40, %v822_v16 }
 0x135   : > { %v914_v53 = vmax.f32 %v913_v45, %v2024_v47  ;;  %v980_v62 = vmin.f32 %v979_v27, %v2024_v47 }
 0x137   : > { %v826_v15 = vpop.f32.mrf.mxu2  ;;  %v855_v18 = vpop.f32.mrf.mxu3 }
 0x138   : > { %v770_v19 = vpop.f32.mrf.mxu0  ;;  %v799_v20 = vpop.f32.mrf.mxu1  ;;  %v827_v54 = vadd.f32 %v826_v15, %v633_v42 }
 0x139   : > { %v771_v41 = vadd.f32 %v770_v19, %v632_v26 }
 0x13a   : > { %v2045_v39 = vadd.f32 %v855_v18, %v827_v54 }
 0x13b   : > { %v2030_v43 = vadd.f32 %v799_v20, %v771_v41 }
 0x13d   : > { %v915_v2 = vmax.f32 %v914_v53, %v2030_v43  ;;  %v981_v3 = vmin.f32 %v980_v62, %v2030_v43 }
 0x13f   : > { %v828_v17 = vpop.f32.mrf.mxu2  ;;  %v857_v21 = vpop.f32.mrf.mxu3 }
 0x140   : > { %v773_v24 = vpop.f32.mrf.mxu0  ;;  %v802_v25 = vpop.f32.mrf.mxu1  ;;  %v829_v1 = vadd.f32 %v828_v17, %v633_v42 }
 0x141   : > { %v774_v50 = vadd.f32 %v773_v24, %v632_v26 }
 0x143   : > { %v2034_v63 = vadd.f32 %v802_v25, %v774_v50  ;;  %v926_v25 = vmax.f32 %v2043_v7, %v2036_v0 }
 0x145   : > { %v916_v19 = vmax.f32 %v915_v2, %v2034_v63  ;;  %v982_v20 = vmin.f32 %v981_v3, %v2034_v63  ;;  %v927_v37 = vmax.f32 %v926_v25, %v2045_v39 }
 0x147   : > { %v831_v28 = vpop.f32.mrf.mxu2  ;;  %v860_v29 = vpop.f32.mrf.mxu3 }
 0x148   : > { %v775_v31 = vpop.f32.mrf.mxu0  ;;  %v804_v32 = vpop.f32.mrf.mxu1  ;;  %v832_v15 = vadd.f32 %v831_v28, %v633_v42 }
 0x149   : > { %v776_v52 = vadd.f32 %v775_v31, %v632_v26  ;;  %v992_v31 = vmin.f32 %v2043_v7, %v2036_v0 }
 0x14a   : > { %v2061_v50 = vadd.f32 %v860_v29, %v832_v15 }
 0x14b   : > { %v2040_v6 = vadd.f32 %v804_v32, %v776_v52  ;;  %v2055_v32 = vadd.f32 %v857_v21, %v829_v1  ;;  %v993_v41 = vmin.f32 %v992_v31, %v2045_v39 }
 0x14d   : > { %v917_v28 = vmax.f32 %v916_v19, %v2040_v6  ;;  %v983_v33 = vmin.f32 %v982_v20, %v2040_v6  ;;  %v994_v27 = vmin.f32 %v993_v41, %v2055_v32 }
 0x14f   : > { %v833_v51 = vpop.f32.mrf.mxu2  ;;  %v862_v11 = vpop.f32.mrf.mxu3  ;;  %v995_v54 = vmin.f32 %v994_v27, %v2061_v50 }
 0x150   : > { %v778_v4 = vpop.f32.mrf.mxu0  ;;  %v807_v5 = vpop.f32.mrf.mxu1  ;;  %v834_v40 = vadd.f32 %v833_v51, %v633_v42  ;;  %v928_v51 = vmax.f32 %v927_v37, %v2055_v32 }
 0x151   : > { %v779_v56 = vadd.f32 %v778_v4, %v632_v26 }
 0x152   : > { %v2069_v52 = vadd.f32 %v862_v11, %v834_v40  ;;  %v929_v29 = vmax.f32 %v928_v51, %v2061_v50 }
 0x153   : > { %v2049_v24 = vadd.f32 %v807_v5, %v779_v56 }
 0x154   : > { %v930_v2 = vmax.f32 %v929_v29, %v2069_v52  ;;  %v996_v3 = vmin.f32 %v995_v54, %v2069_v52 }
 0x155   : > { %v918_v5 = vmax.f32 %v917_v28, %v2049_v24  ;;  %v984_v21 = vmin.f32 %v983_v33, %v2049_v24 }
 0x157   : > { %v836_v57 = vpop.f32.mrf.mxu2  ;;  %v865_v17 = vpop.f32.mrf.mxu3 }
 0x158   : > { %v780_v18 = vpop.f32.mrf.mxu0  ;;  %v837_v55 = vadd.f32 %v836_v57, %v633_v42  ;;  %v809_v4 = vpop.f32.mrf.mxu1 }
 0x159   : > { %v781_v36 = vadd.f32 %v780_v18, %v632_v26 }
 0x15a   : > { %v2075_v53 = vadd.f32 %v865_v17, %v837_v55 }
 0x15b   : > { %v2065_v45 = vadd.f32 %v809_v4, %v781_v36 }
 0x15c   : > { %v931_v57 = vmax.f32 %v930_v2, %v2075_v53  ;;  %v997_v25 = vmin.f32 %v996_v3, %v2075_v53 }
 0x15d   : > { %v919_v26 = vmax.f32 %v918_v5, %v2065_v45  ;;  %v985_v16 = vmin.f32 %v984_v21, %v2065_v45 }
 0x15f   : > { %v920_v62 = vrot.slane %v919_v26, 4  ;;  %v986_v56 = vrot.slane %v985_v16, 4  ;;  %v838_v1 = vpop.f32.mrf.mxu2  ;;  %v867_v20 = vpop.f32.mrf.mxu3 }
 0x160   : > { %v839_v15 = vadd.f32 %v838_v1, %v633_v42  ;;  %v1357_v42 = vmov inf  }
 0x161   : > { %v921_v11 = vmax.f32 %v919_v26, %v920_v62  ;;  %v987_v19 = vmin.f32 %v985_v16, %v986_v56  ;;  %v874_v55 = vsel %vm347_vm3, -inf, %v1357_v42 }
 0x162   : > { %v2081_v31 = vadd.f32 %v867_v20, %v839_v15  ;;  %v876_v16 = vrot.slane %v874_v55, 6  ;;  %v877_v29 = vrot.slane %v874_v55, 4  ;;  %v878_v54 = vrot.slane %v874_v55, 2 }
 0x163   : > { %v922_v40 = vrot.slane %v921_v11, 2  ;;  %v988_v17 = vrot.slane %v987_v19, 2 }
 0x164   : > { %v932_v18 = vmax.f32 %v931_v57, %v2081_v31  ;;  %v998_v28 = vmin.f32 %v997_v25, %v2081_v31 }
 0x165   : > { %v923_v33 = vmax.f32 %v921_v11, %v922_v40  ;;  %v989_v36 = vmin.f32 %v987_v19, %v988_v17  ;;  %v879_v11 = vsel %vm351_vm5, %v874_v55, %v876_v16  ;;  %v881_v19 = vsel %vm880_vm6, %v877_v29, %v878_v54 }
 0x166   : > { %v933_v37 = vrot.slane %v932_v18, 4  ;;  %v999_v41 = vrot.slane %v998_v28, 4 }
 0x167   : > { %v924_v21 = vrot.slane %v923_v33, 1  ;;  %v990_v51 = vrot.slane %v989_v36, 1 }
 0x168   : > { %v934_v4 = vmax.f32 %v932_v18, %v933_v37  ;;  %v1000_v5 = vmin.f32 %v998_v28, %v999_v41  ;;  %v883_v28 = vsel %vm882_vm7, %v879_v11, %v881_v19 }
 0x169   : > { %v925_v1 = vmax.f32 %v923_v33, %v924_v21  ;;  %v991_v2 = vmin.f32 %v989_v36, %v990_v51 }
 0x16a   : > { %v935_v27 = vrot.slane %v934_v4, 2  ;;  %v1001_v26 = vrot.slane %v1000_v5, 2 }
 0x16b   : > { %v944_v25 = vrot.slane %v925_v1, 4  ;;  %v1010_v40 = vrot.slane %v991_v2, 4 }
 0x16c   : > { %v936_v62 = vmax.f32 %v934_v4, %v935_v27  ;;  %v1002_v56 = vmin.f32 %v1000_v5, %v1001_v26 }
 0x16e   : > { %v937_v3 = vrot.slane %v936_v62, 1  ;;  %v1003_v15 = vrot.slane %v1002_v56, 1 }
 0x170   : > { %v938_v20 = vmax.f32 %v936_v62, %v937_v3  ;;  %v1004_v57 = vmin.f32 %v1002_v56, %v1003_v15 }
 0x172   : > { %v945_v17 = vrot.slane %v938_v20, 2  ;;  %v1011_v18 = vrot.slane %v1004_v57, 2 }
 0x174   : > { %v948_v37 = vsel %vm880_vm6, %v944_v25, %v945_v17  ;;  %v1013_v33 = vsel %vm880_vm6, %v1010_v40, %v1011_v18 }
 0x175   : > { %v950_v36 = vsel %vm882_vm7, %v2013_v10, %v948_v37  ;;  %v1014_v41 = vsel %vm882_vm7, %v2016_v12, %v1013_v33 }
 0x176   : > { %v952_v42 = vmax.f32 %v883_v28, %v950_v36  ;;  %v1015_v55 = vrot.slane %v1014_v41, 7 }
 0x178   : > { %v1017_v4 = vmin.f32 %v883_v28, %v1015_v55  ;;  %v1019_v5 = vperm.slane %v952_v42, 0  ;;  %v1020_v21 = vperm.slane %v952_v42, 2  ;;  %v1021_v51 = vperm.slane %v952_v42, 4 }
 0x179   : > { %v1022_v27 = vperm.slane %v952_v42, 6 }
 0x17a   : > { %v1028_v26 = vperm.slane %v1017_v4, 1  ;;  %v1029_v16 = vperm.slane %v1017_v4, 3  ;;  %v1030_v29 = vperm.slane %v1017_v4, 5  ;;  %v1031_v54 = vperm.slane %v1017_v4, 7 }
 0x17c   : > { %v1036_v62 = vsel %vm347_vm3, %v1019_v5, %v1028_v26  ;;  %v1037_v56 = vsel %vm347_vm3, %v1020_v21, %v1029_v16  ;;  %v1038_v10 = vsel %vm347_vm3, %v1021_v51, %v1030_v29  ;;  %v1039_v12 = vsel %vm347_vm3, %v1022_v27, %v1031_v54 }
 0x17d   : > { %v1044_v1 = vrot.slane %v1037_v56, 6  ;;  %v1045_v2 = vrot.slane %v1038_v10, 4  ;;  %v1046_v3 = vrot.slane %v1039_v12, 2  ;;  %1055 = sbr.rel (%p1298_p5) target bundleno = 388 (0x184), region = 52 }
 0x17f   : > { %v1047_v15 = vsel %vm351_vm5, %v1036_v62, %v1044_v1  ;;  %v1048_v11 = vsel %vm880_vm6, %v1045_v2, %v1046_v3 }
 0x180   : > { %v1049_v19 = vsel %vm882_vm7, %v1047_v15, %v1048_v11 }
 0x181   : > { %1051 = vst [vmem:[%s307_s22] sm:$0xff] %v1049_v19 }
 0x182   : > { %v1358_v20 = vmov 0.0  }
 0x183   : > { %1056 = vst [vmem:[%s2235_s7] sm:$0xff] %v1358_v20 }
 0x184 PF: > { %v1058_v57 = vadd.f32 %v1937_v61, %v1928_v44  ;;  %v1071_v25 = vadd.f32 %v1945_v8, %v1935_v60  ;;  %v1084_v40 = vadd.f32 %v2019_v38, %v2022_v46  ;;  %v1097_v17 = vadd.f32 %v2036_v0, %v2043_v7 }
 0x185   : > { %v1110_v54 = vmul.f32 %v1928_v44, %v1928_v44  ;;  %v1111_v62 = vmul.f32 %v1935_v60, %v1935_v60  ;;  %v1112_v56 = vmul.f32 %v2022_v46, %v2022_v46  ;;  %v1113_v10 = vmul.f32 %v2043_v7, %v2043_v7 }
 0x186   : > { %v1059_v18 = vadd.f32 %v1058_v57, %v1947_v9  ;;  %v1072_v28 = vadd.f32 %v1071_v25, %v1957_v22  ;;  %v1085_v37 = vadd.f32 %v1084_v40, %v2024_v47  ;;  %v1098_v33 = vadd.f32 %v1097_v17, %v2045_v39 }
 0x187   : > { %v1114_v44 = vmul.f32 %v1937_v61, %v1937_v61  ;;  %v1115_v60 = vmul.f32 %v1945_v8, %v1945_v8  ;;  %v1116_v46 = vmul.f32 %v2019_v38, %v2019_v38  ;;  %v1117_v7 = vmul.f32 %v2036_v0, %v2036_v0 }
 0x188   : > { %v1060_v36 = vadd.f32 %v1059_v18, %v1959_v23  ;;  %v1073_v41 = vadd.f32 %v1072_v28, %v1967_v34  ;;  %v1086_v42 = vadd.f32 %v1085_v37, %v2030_v43  ;;  %v1099_v55 = vadd.f32 %v1098_v33, %v2055_v32 }
 0x189   : > { %v1118_v15 = vmul.f32 %v1947_v9, %v1947_v9  ;;  %v1119_v11 = vmul.f32 %v1957_v22, %v1957_v22  ;;  %v1120_v19 = vmul.f32 %v2024_v47, %v2024_v47  ;;  %v1121_v61 = vmul.f32 %v2045_v39, %v2045_v39 }
 0x18a   : > { %v1061_v4 = vadd.f32 %v1060_v36, %v1969_v35  ;;  %v1074_v5 = vadd.f32 %v1073_v41, %v1977_v48  ;;  %v1087_v21 = vadd.f32 %v1086_v42, %v2034_v63  ;;  %v1100_v51 = vadd.f32 %v1099_v55, %v2061_v50 }
 0x18b   : > { %v1122_v8 = vmul.f32 %v1959_v23, %v1959_v23  ;;  %v1123_v38 = vmul.f32 %v1967_v34, %v1967_v34  ;;  %v1124_v0 = vmul.f32 %v2030_v43, %v2030_v43  ;;  %v1125_v9 = vmul.f32 %v2055_v32, %v2055_v32 }
 0x18c   : > { %v1062_v27 = vadd.f32 %v1061_v4, %v1979_v49  ;;  %v1075_v26 = vadd.f32 %v1074_v5, %v1987_v58  ;;  %v1088_v16 = vadd.f32 %v1087_v21, %v2040_v6  ;;  %v1101_v29 = vadd.f32 %v1100_v51, %v2069_v52 }
 0x18d   : > { %v1126_v23 = vmul.f32 %v1969_v35, %v1969_v35  ;;  %v1127_v34 = vmul.f32 %v1977_v48, %v1977_v48  ;;  %v1128_v43 = vmul.f32 %v2034_v63, %v2034_v63  ;;  %v1129_v32 = vmul.f32 %v2061_v50, %v2061_v50 }
 0x18e   : > { %v1063_v12 = vadd.f32 %v1062_v27, %v1989_v59  ;;  %v1076_v1 = vadd.f32 %v1075_v26, %v1997_v13  ;;  %v1089_v2 = vadd.f32 %v1088_v16, %v2049_v24  ;;  %v1102_v3 = vadd.f32 %v1101_v29, %v2075_v53 }
 0x18f   : > { %v1130_v57 = vmul.f32 %v1979_v49, %v1979_v49  ;;  %v1131_v25 = vmul.f32 %v1987_v58, %v1987_v58  ;;  %v1132_v40 = vmul.f32 %v2040_v6, %v2040_v6  ;;  %v1133_v35 = vmul.f32 %v2069_v52, %v2069_v52 }
 0x190   : > { %v1064_v22 = vadd.f32 %v1063_v12, %v1999_v14  ;;  %v1077_v20 = vadd.f32 %v1076_v1, %v2006_v30  ;;  %v1090_v47 = vadd.f32 %v1089_v2, %v2065_v45  ;;  %v1103_v39 = vadd.f32 %v1102_v3, %v2081_v31 }
 0x191   : > { %v1142_v17 = vadd.f32 %v1114_v44, %v1110_v54  ;;  %v1155_v48 = vadd.f32 %v1115_v60, %v1111_v62  ;;  %v1168_v18 = vadd.f32 %v1116_v46, %v1112_v56  ;;  %v1181_v28 = vadd.f32 %v1117_v7, %v1113_v10 }
 0x192   : > { %v1065_v63 = vrot.slane %v1064_v22, 4  ;;  %v1078_v37 = vrot.slane %v1077_v20, 4  ;;  %v1091_v33 = vrot.slane %v1090_v47, 4  ;;  %v1104_v50 = vrot.slane %v1103_v39, 4 }
 0x193   : > { %v1143_v36 = vadd.f32 %v1142_v17, %v1118_v15  ;;  %v1156_v41 = vadd.f32 %v1155_v48, %v1119_v11  ;;  %v1169_v49 = vadd.f32 %v1168_v18, %v1120_v19  ;;  %v1182_v42 = vadd.f32 %v1181_v28, %v1121_v61 }
 0x194   : > { %v1134_v58 = vmul.f32 %v1989_v59, %v1989_v59  ;;  %v1135_v6 = vmul.f32 %v1997_v13, %v1997_v13  ;;  %v1136_v52 = vmul.f32 %v2049_v24, %v2049_v24  ;;  %v1137_v55 = vmul.f32 %v2075_v53, %v2075_v53 }
 0x195   : > { %v1144_v4 = vadd.f32 %v1143_v36, %v1122_v8  ;;  %v1157_v5 = vadd.f32 %v1156_v41, %v1123_v38  ;;  %v1170_v21 = vadd.f32 %v1169_v49, %v1124_v0  ;;  %v1183_v51 = vadd.f32 %v1182_v42, %v1125_v9 }
 0x196   : > { %v1066_v27 = vadd.f32 %v1065_v63, %v1064_v22  ;;  %v1079_v26 = vadd.f32 %v1078_v37, %v1077_v20  ;;  %v1092_v16 = vadd.f32 %v1091_v33, %v1090_v47  ;;  %v1105_v29 = vadd.f32 %v1104_v50, %v1103_v39 }
 0x197   : > { %v1145_v54 = vadd.f32 %v1144_v4, %v1126_v23  ;;  %v1158_v62 = vadd.f32 %v1157_v5, %v1127_v34  ;;  %v1171_v59 = vadd.f32 %v1170_v21, %v1128_v43  ;;  %v1184_v56 = vadd.f32 %v1183_v51, %v1129_v32 }
 0x198   : > { %v1138_v13 = vmul.f32 %v1999_v14, %v1999_v14  ;;  %v1139_v24 = vmul.f32 %v2006_v30, %v2006_v30  ;;  %v1140_v53 = vmul.f32 %v2065_v45, %v2065_v45  ;;  %v1141_v10 = vmul.f32 %v2081_v31, %v2081_v31 }
 0x199   : > { %v1146_v12 = vadd.f32 %v1145_v54, %v1130_v57  ;;  %v1159_v1 = vadd.f32 %v1158_v62, %v1131_v25  ;;  %v1172_v2 = vadd.f32 %v1171_v59, %v1132_v40  ;;  %v1185_v3 = vadd.f32 %v1184_v56, %v1133_v35  ;;  %v1057_v56 = vld [vmem:[%s2235_s7] sm:$0xff] }
 0x19a   : > { %v1067_v44 = vrot.slane %v1066_v27, 2  ;;  %v1080_v60 = vrot.slane %v1079_v26, 2  ;;  %v1093_v46 = vrot.slane %v1092_v16, 2  ;;  %v1106_v7 = vrot.slane %v1105_v29, 2 }
 0x19b   : > { %v1147_v15 = vadd.f32 %v1146_v12, %v1134_v58  ;;  %v1160_v11 = vadd.f32 %v1159_v1, %v1135_v6  ;;  %v1173_v14 = vadd.f32 %v1172_v2, %v1136_v52  ;;  %v1186_v19 = vadd.f32 %v1185_v3, %v1137_v55 }
 0x19c   : > { %v1068_v45 = vadd.f32 %v1067_v44, %v1066_v27  ;;  %v1081_v0 = vadd.f32 %v1080_v60, %v1079_v26  ;;  %v1094_v9 = vadd.f32 %v1093_v46, %v1092_v16  ;;  %v1107_v31 = vadd.f32 %v1106_v7, %v1105_v29 }
 0x19d   : > { %v1148_v61 = vadd.f32 %v1147_v15, %v1138_v13  ;;  %v1161_v30 = vadd.f32 %v1160_v11, %v1139_v24  ;;  %v1174_v8 = vadd.f32 %v1173_v14, %v1140_v53  ;;  %v1187_v38 = vadd.f32 %v1186_v19, %v1141_v10 }
 0x19e   : > { %v1069_v57 = vrot.slane %v1068_v45, 1  ;;  %v1082_v25 = vrot.slane %v1081_v0, 1  ;;  %v1095_v40 = vrot.slane %v1094_v9, 1  ;;  %v1108_v35 = vrot.slane %v1107_v31, 1 }
 0x19f   : > { %v1149_v22 = vrot.slane %v1148_v61, 4  ;;  %v1162_v20 = vrot.slane %v1161_v30, 4  ;;  %v1175_v47 = vrot.slane %v1174_v8, 4  ;;  %v1188_v39 = vrot.slane %v1187_v38, 4 }
 0x1a0   : > { %v1070_v36 = vadd.f32 %v1069_v57, %v1068_v45  ;;  %v1083_v41 = vadd.f32 %v1082_v25, %v1081_v0  ;;  %v1096_v49 = vadd.f32 %v1095_v40, %v1094_v9  ;;  %v1109_v42 = vadd.f32 %v1108_v35, %v1107_v31 }
 0x1a1   : > { %v1150_v23 = vadd.f32 %v1149_v22, %v1148_v61  ;;  %v1163_v34 = vadd.f32 %v1162_v20, %v1161_v30  ;;  %v1176_v43 = vadd.f32 %v1175_v47, %v1174_v8  ;;  %v1189_v32 = vadd.f32 %v1188_v39, %v1187_v38 }
 0x1a3   : > { %v1151_v17 = vrot.slane %v1150_v23, 2  ;;  %v1164_v48 = vrot.slane %v1163_v34, 2  ;;  %v1177_v18 = vrot.slane %v1176_v43, 2  ;;  %v1190_v28 = vrot.slane %v1189_v32, 2 }
 0x1a5   : > { %v1152_v63 = vadd.f32 %v1151_v17, %v1150_v23  ;;  %v1165_v37 = vadd.f32 %v1164_v48, %v1163_v34  ;;  %v1178_v33 = vadd.f32 %v1177_v18, %v1176_v43  ;;  %v1191_v50 = vadd.f32 %v1190_v28, %v1189_v32 }
 0x1a7   : > { %v1153_v58 = vrot.slane %v1152_v63, 1  ;;  %v1166_v6 = vrot.slane %v1165_v37, 1  ;;  %v1179_v52 = vrot.slane %v1178_v33, 1  ;;  %v1192_v55 = vrot.slane %v1191_v50, 1 }
 0x1a9   : > { %v1154_v4 = vadd.f32 %v1153_v58, %v1152_v63  ;;  %v1167_v5 = vadd.f32 %v1166_v6, %v1165_v37  ;;  %v1180_v21 = vadd.f32 %v1179_v52, %v1178_v33  ;;  %v1193_v51 = vadd.f32 %v1192_v55, %v1191_v50 }
 0x1ab   : > { %v1194_v27 = vsel %vm347_vm3, %v1070_v36, %v1154_v4  ;;  %v1195_v26 = vsel %vm347_vm3, %v1083_v41, %v1167_v5  ;;  %v1196_v16 = vsel %vm347_vm3, %v1096_v49, %v1180_v21  ;;  %v1197_v29 = vsel %vm347_vm3, %v1109_v42, %v1193_v51 }
 0x1ac   : > { %v1202_v54 = vrot.slane %v1195_v26, 6  ;;  %v1203_v62 = vrot.slane %v1196_v16, 4  ;;  %v1204_v59 = vrot.slane %v1197_v29, 2 }
 0x1ae   : > { %v1205_v13 = vsel %vm351_vm5, %v1194_v27, %v1202_v54  ;;  %v1206_v24 = vsel %vm880_vm6, %v1203_v62, %v1204_v59 }
 0x1af   : > { %v1207_v53 = vsel %vm882_vm7, %v1205_v13, %v1206_v24 }
 0x1b0   : > { %v1209_v10 = vadd.f32 %v1207_v53, %v1057_v56 }
 0x1b2   : > { %1210 = vst [vmem:[%s2235_s7] sm:$0xff] %v1209_v10 }
 0x1b3 PF: > { %s18_s26 = sadd.s32 1, %s1354_s26   ;;  %s2238_s24 = smov %s1350_s25 }
 0x1b4   : > { %p15_p6 = scmp.ge.s32.totalorder %s18_s26, 4   ;;  %s2239_s25 = smov %s2241_s27 }
 0x1b6   :  { %17 = sbr.rel (!%p15_p6) target bundleno = 2 (0x2), region = 91 }

// kernel: base_vae_forward.11
= control target key start
LH: loop header
LB: loop body
LE: loop exit
PB: predicated region body
PF: predicated region fallthrough
CT: control target
= control target key end

     0   :  { %7 = vsyncpa [#allocation6], 0  ;;  %s806_s9 = smov 0   ;;  %s808_s10 = smov 0   ;;  %s966_s0 = inlined_call_operand.vmem [shape: f32[2,3,64], index: 0, kind: input, shape index: {}]   ;;  %s967_s1 = inlined_call_operand.vmem [shape: f32[2,64,3], index: 1, kind: input, shape index: {}]   ;;  %s968_s2 = inlined_call_operand.hbm [shape: f32[1,1], index: 2, kind: output, shape index: {}]  }
   0x1   :  { %s810_s11 = smov 0  }
   0x2 LB: > { %s648_s12 = sadd.s32 4294967295, %s782_s11   ;;  %s25_s13 = sadd.s32 1, %s778_s10  ;;  %s782_s11 = sphi %s810_s11, %s13_s11   ;;  %s778_s10 = sphi %s808_s10, %s970_s10   ;;  %s774_s9 = sphi %s806_s9, %s969_s9  }
   0x3   : > { %p27_p0 = scmp.ge.s32.totalorder %s25_s13, 2  ;;  %p651_p1 = scmp.ge.s32.totalorder %s782_s11, 1 }
   0x4   : > { %p136_p2 = scmp.lt.s32.totalorder %s782_s11, 3 }
   0x5   : > { %s972_s13 = smov (%p27_p0, %s25_s13), 0 }
   0x6   : > { %p137_p3 = pnand %p651_p1, %p136_p2 }
   0x7   : > { %p161_p4 = scmp.lt.s32.totalorder (!%p137_p3), %s774_s9, 1  ;;  %p655_p5 = scmp.ne.s32.totalorder (!%p137_p3), %s774_s9, 0 }
   0x8   : > { %140 = sbr.rel (%p137_p3) target bundleno = 413 (0x19d), region = 28 }
   0xd   : > { %s162_s14 = scalar_select %p161_p4, %s774_s9, 1 }
   0xe   : > { %179 = sbr.rel (%p655_p5) target bundleno = 23 (0x17), region = 32 }
   0xf   : > { %s652_s15 = sshll.u32 %s162_s14, 2  ;;  %s661_s16 = sshll.u32 %s162_s14, 6 }
  0x10   : > { %s832_s19 = scalar_lea.vmem %s966_s0, %s652_s15  ;;  %s173_s22 = scalar_lea.vmem %s967_s1, %s661_s16 }
  0x13   : > { %vm180_vm0 = vcmask 0   ;;  %v784_v0 = vmov 0.0  }
  0x14   : > { %181 = vst.msk [vmem:[#allocation3] sm:$0x1] %vm180_vm0, %v784_v0 }
  0x15   : > { %182 = vst.msk [vmem:[#allocation4] sm:$0x1] %vm180_vm0, %v784_v0 }
  0x16   : > { %183 = vst.msk [vmem:[#allocation5] sm:$0x1] %vm180_vm0, %v784_v0 }
  0x17 PF: > { %v195_v1 = vld [vmem:[%s173_s22 + $0x20] sm:$0xff]  ;;  %v193_v2 = vld [vmem:[%s173_s22 + $0x10] sm:$0xff]  ;;  %v785_v4 = vmov 0   ;;  %v196_v5 = vld [vmem:[%s173_s22 + $0x28] sm:$0xff]  ;;  %v786_v10 = vmov 1   ;;  %v787_v11 = vmov 2  }
  0x18   : > { %v191_v3 = vld [vmem:[%s173_s22] sm:$0xff]  ;;  %701 = vset.pattern.permute.xlu2 %v785_v4  ;;  %700 = vset.pattern.permute.xlu1 %v785_v4  ;;  %v194_v6 = vld [vmem:[%s173_s22 + $0x18] sm:$0xff]  ;;  %v192_v7 = vld [vmem:[%s173_s22 + $0x8] sm:$0xff]  ;;  %vm379_vm1 = vcmask 523264   ;;  %vm188_vm2 = vcmask 516096   ;;  %p656_p6 = scmp.ne.s32.totalorder %s774_s9, 1 }
  0x19   : > { %699 = vset.pattern.permute.xlu0 %v785_v4  ;;  %221 = vperm.xlu2 %701, %v195_v1   ;;  %v198_v8 = vld [vmem:[%s173_s22 + $0x38] sm:$0xff]  ;;  %v197_v9 = vld [vmem:[%s173_s22 + $0x30] sm:$0xff]  ;;  %v190_v18 = vld [vmem:[%s832_s19] sm:$0x7] }
  0x1a   : > { %211 = vperm.xlu1 %700, %v193_v2   ;;  %201 = vperm.xlu0 %699, %v191_v3   ;;  %v841_v21 = vperm.slane %v190_v18, 0  ;;  %v843_v22 = vperm.slane %v190_v18, 1  ;;  %v847_v28 = vperm.slane %v190_v18, 2 }
  0x21   : > { %226 = vperm.xlu2 %701, %v196_v5  }
  0x22   : > { %216 = vperm.xlu1 %700, %v194_v6   ;;  %206 = vperm.xlu0 %699, %v192_v7  }
  0x29   : > { %702 = vset.pattern.permute.xlu2 %v786_v10 }
  0x2a   : > { %236 = vperm.xlu1 %700, %v198_v8   ;;  %231 = vperm.xlu0 %699, %v197_v9  }
  0x2b   : > { %265 = vperm.xlu2 %702, %v191_v3  }
  0x32   : > { %704 = vset.pattern.permute.xlu1 %v786_v10  ;;  %703 = vset.pattern.permute.xlu0 %v786_v10 }
  0x33   : > { %273 = vperm.xlu1 %704, %v193_v2   ;;  %277 = vperm.xlu2 %702, %v194_v6  }
  0x34   : > { %269 = vperm.xlu0 %703, %v192_v7  }
  0x3b   : > { %281 = vperm.xlu1 %704, %v195_v1   ;;  %285 = vperm.xlu2 %702, %v196_v5  }
  0x3c   : > { %289 = vperm.xlu0 %703, %v197_v9  }
  0x43   : > { %293 = vperm.xlu1 %704, %v198_v8   ;;  %705 = vset.pattern.permute.xlu2 %v787_v11 }
  0x44   : > { %706 = vset.pattern.permute.xlu0 %v787_v11  ;;  %322 = vperm.xlu2 %705, %v191_v3  }
  0x45   : > { %326 = vperm.xlu0 %706, %v192_v7  }
  0x4b   : > { %707 = vset.pattern.permute.xlu1 %v787_v11 }
  0x4c   : > { %330 = vperm.xlu1 %707, %v193_v2   ;;  %334 = vperm.xlu2 %705, %v194_v6  }
  0x4d   : > { %346 = vperm.xlu0 %706, %v197_v9  }
  0x54   : > { %338 = vperm.xlu1 %707, %v195_v1   ;;  %342 = vperm.xlu2 %705, %v196_v5  }
  0x5c   : > { %350 = vperm.xlu1 %707, %v198_v8  }
  0x73   : > { %v838_v12 = vpop.permute.xlu2 %221 }
  0x7b   : > { %v227_v13 = vpop.permute.xlu2 %226 }
  0x7c   : > { %v245_v57 = vsub.f32 %v227_v13, %v841_v21 }
  0x7e   : > { %v253_v2 = vmul.f32 %v245_v57, %v245_v57 }
  0x85   : > { %v266_v14 = vpop.permute.xlu2 %265 }
  0x86   : > { %v297_v24 = vsub.f32 %v266_v14, %v843_v22 }
  0x88   : > { %v305_v26 = vmul.f32 %v297_v24, %v297_v24  ;;  %v244_v24 = vsub.f32 %v838_v12, %v841_v21 }
  0x8c   : > { %v212_v15 = vpop.permute.xlu1 %211  ;;  %v202_v16 = vpop.permute.xlu0 %201 }
  0x8d   : > { %v278_v17 = vpop.permute.xlu2 %277  ;;  %v240_v25 = vsub.f32 %v202_v16, %v841_v21  ;;  %v242_v1 = vsub.f32 %v212_v15, %v841_v21 }
  0x8e   : > { %v300_v34 = vsub.f32 %v278_v17, %v843_v22 }
  0x8f   : > { %v248_v27 = vmul.f32 %v240_v25, %v240_v25  ;;  %v250_v9 = vmul.f32 %v242_v1, %v242_v1 }
  0x90   : > { %v308_v38 = vmul.f32 %v300_v34, %v300_v34 }
  0x91   : > { %v313_v32 = vadd.f32 %v305_v26, %v248_v27 }
  0x94   : > { %v217_v19 = vpop.permute.xlu1 %216  ;;  %v207_v20 = vpop.permute.xlu0 %206 }
  0x95   : > { %v286_v23 = vpop.permute.xlu2 %285  ;;  %v243_v35 = vsub.f32 %v217_v19, %v841_v21  ;;  %v241_v52 = vsub.f32 %v207_v20, %v841_v21  ;;  %v788_v20 = vmov inf  }
  0x96   : > { %v302_v59 = vsub.f32 %v286_v23, %v843_v22  ;;  %189 = vst.msk [vmem:[#allocation2] sm:$0x1] %vm188_vm2, %v788_v20 }
  0x97   : > { %v251_v39 = vmul.f32 %v243_v35, %v243_v35  ;;  %v249_v58 = vmul.f32 %v241_v52, %v241_v52  ;;  %v252_v35 = vmul.f32 %v244_v24, %v244_v24 }
  0x98   : > { %v310_v3 = vmul.f32 %v302_v59, %v302_v59 }
  0x99   : > { %v316_v45 = vadd.f32 %v308_v38, %v251_v39 }
  0x9a   : > { %v318_v14 = vadd.f32 %v310_v3, %v253_v2 }
  0x9c   : > { %v849_v29 = vpop.permute.xlu1 %236  ;;  %v232_v30 = vpop.permute.xlu0 %231 }
  0x9d   : > { %v246_v16 = vsub.f32 %v232_v30, %v841_v21 }
  0x9e   : > { %v323_v31 = vpop.permute.xlu2 %322 }
  0x9f   : > { %v354_v33 = vsub.f32 %v323_v31, %v847_v28  ;;  %v254_v27 = vmul.f32 %v246_v16, %v246_v16 }
  0xa1   : > { %v362_v36 = vmul.f32 %v354_v33, %v354_v33 }
  0xa3   : > { %v370_v37 = vadd.f32 %v362_v36, %v313_v32 }
  0xa5   : > { %v274_v40 = vpop.permute.xlu1 %273  ;;  %v855_v41 = vsel %vm379_vm1, %v370_v37, inf }
  0xa6   : > { %v270_v42 = vpop.permute.xlu0 %269  ;;  %v335_v43 = vpop.permute.xlu2 %334  ;;  %381 = vmin.xlane.f32.xlu2 %v855_v41  ;;  %v299_v61 = vsub.f32 %v274_v40, %v843_v22 }
  0xa7   : > { %v357_v44 = vsub.f32 %v335_v43, %v847_v28  ;;  %v298_v51 = vsub.f32 %v270_v42, %v843_v22  ;;  %v247_v42 = vsub.f32 %v849_v29, %v841_v21 }
  0xa8   : > { %v307_v5 = vmul.f32 %v299_v61, %v299_v61 }
  0xa9   : > { %v365_v46 = vmul.f32 %v357_v44, %v357_v44  ;;  %v306_v54 = vmul.f32 %v298_v51, %v298_v51 }
  0xaa   : > { %v315_v15 = vadd.f32 %v307_v5, %v250_v9 }
  0xab   : > { %v373_v47 = vadd.f32 %v365_v46, %v316_v45  ;;  %v314_v62 = vadd.f32 %v306_v54, %v249_v58 }
  0xad   : > { %v282_v48 = vpop.permute.xlu1 %281  ;;  %v860_v49 = vsel %vm379_vm1, %v373_v47, inf }
  0xae   : > { %v290_v50 = vpop.permute.xlu0 %289  ;;  %390 = vmin.xlane.f32.xlu2 %v860_v49  ;;  %v343_v55 = vpop.permute.xlu2 %342  ;;  %v301_v17 = vsub.f32 %v282_v48, %v843_v22  ;;  %v255_v48 = vmul.f32 %v247_v42, %v247_v42 }
  0xaf   : > { %v359_v63 = vsub.f32 %v343_v55, %v847_v28  ;;  %v303_v10 = vsub.f32 %v290_v50, %v843_v22 }
  0xb0   : > { %v309_v31 = vmul.f32 %v301_v17, %v301_v17 }
  0xb1   : > { %v367_v6 = vmul.f32 %v359_v63, %v359_v63  ;;  %v311_v25 = vmul.f32 %v303_v10, %v303_v10  ;;  %v516_v63 = vld [vmem:[#allocation2] sm:$0x1] }
  0xb2   : > { %v317_v38 = vadd.f32 %v309_v31, %v252_v35 }
  0xb3   : > { %v375_v23 = vadd.f32 %v367_v6, %v318_v14  ;;  %v319_v36 = vadd.f32 %v311_v25, %v254_v27 }
  0xb5   : > { %v294_v53 = vpop.permute.xlu1 %293  ;;  %v395_v34 = vsel %vm379_vm1, %v375_v23, inf }
  0xb6   : > { %v304_v39 = vsub.f32 %v294_v53, %v843_v22 }
  0xb7   : > { %v327_v56 = vpop.permute.xlu0 %326 }
  0xb8   : > { %v355_v60 = vsub.f32 %v327_v56, %v847_v28  ;;  %v312_v44 = vmul.f32 %v304_v39, %v304_v39 }
  0xba   : > { %v363_v0 = vmul.f32 %v355_v60, %v355_v60  ;;  %v320_v51 = vadd.f32 %v312_v44, %v255_v48 }
  0xbc   : > { %v371_v4 = vadd.f32 %v363_v0, %v314_v62 }
  0xbe   : > { %v331_v7 = vpop.permute.xlu1 %330  ;;  %v383_v8 = vsel %vm379_vm1, %v371_v4, inf }
  0xbf   : > { %v356_v11 = vsub.f32 %v331_v7, %v847_v28  ;;  %v347_v13 = vpop.permute.xlu0 %346  ;;  %384 = vmin.xlane.f32.xlu0 %v383_v8  ;;  %v518_v21 = vmin.f32 %v383_v8, %v395_v34 }
  0xc0   : > { %v360_v19 = vsub.f32 %v347_v13, %v847_v28 }
  0xc1   : > { %v364_v18 = vmul.f32 %v356_v11, %v356_v11 }
  0xc2   : > { %v368_v32 = vmul.f32 %v360_v19, %v360_v19 }
  0xc3   : > { %v372_v26 = vadd.f32 %v364_v18, %v315_v15 }
  0xc4   : > { %v376_v40 = vadd.f32 %v368_v32, %v319_v36 }
  0xc5   : > { %v386_v30 = vsel %vm379_vm1, %v372_v26, inf }
  0xc6   : > { %v339_v33 = vpop.permute.xlu1 %338  ;;  %387 = vmin.xlane.f32.xlu1 %v386_v30  ;;  %v398_v45 = vsel %vm379_vm1, %v376_v40, inf }
  0xc7   : > { %v358_v37 = vsub.f32 %v339_v33, %v847_v28  ;;  %396 = vmin.xlane.f32.xlu0 %v395_v34  ;;  %v519_v29 = vmin.f32 %v386_v30, %v398_v45 }
  0xc9   : > { %v366_v12 = vmul.f32 %v358_v37, %v358_v37 }
  0xcb   : > { %v374_v43 = vadd.f32 %v366_v12, %v317_v38 }
  0xcd   : > { %v392_v46 = vsel %vm379_vm1, %v374_v43, inf }
  0xce   : > { %v351_v47 = vpop.permute.xlu1 %350  ;;  %399 = vmin.xlane.f32.xlu1 %v398_v45  ;;  %393 = vmin.xlane.f32.xlu2 %v392_v46  ;;  %v517_v53 = vmin.f32 %v855_v41, %v392_v46 }
  0xcf   : > { %v361_v50 = vsub.f32 %v351_v47, %v847_v28 }
  0xd0   : > { %v521_v56 = vmin.f32 %v517_v53, %v518_v21 }
  0xd1   : > { %v369_v52 = vmul.f32 %v361_v50, %v361_v50 }
  0xd3   : > { %v377_v22 = vadd.f32 %v369_v52, %v320_v51 }
  0xd5   : > { %v401_v54 = vsel %vm379_vm1, %v377_v22, inf }
  0xd6   : > { %v520_v55 = vmin.f32 %v860_v49, %v401_v54  ;;  %402 = vmin.xlane.f32.xlu2 %v401_v54 }
  0xd8   : > { %v522_v57 = vmin.f32 %v519_v29, %v520_v55 }
  0xda   : > { %v523_v58 = vmin.f32 %v521_v56, %v522_v57 }
  0xdc   : > { %v524_v59 = vrot.slane %v523_v58, 4 }
  0xde   : > { %v525_v60 = vmin.f32 %v523_v58, %v524_v59 }
  0xe0   : > { %v526_v61 = vrot.slane %v525_v60, 2 }
  0xe2   : > { %v527_v62 = vmin.f32 %v525_v60, %v526_v61 }
  0xe4   : > { %v528_v28 = vrot.slane %v527_v62, 1 }
  0xe6   : > { %v529_v0 = vmin.f32 %v527_v62, %v528_v28 }
  0xe8   : > { %v530_v1 = vmin.f32 %v516_v63, %v529_v0 }
  0xea   : > { %532 = vst.msk [vmem:[#allocation2] sm:$0x1] %vm188_vm2, %v530_v1 }
  0xf1   : > { %v537_v41 = vld [vmem:[#allocation2] sm:$0x1] }
  0xf2   : > { %708 = vrsqrt.f32 %v537_v41  ;;  %vm545_vm3 = vcmp.eq.f32.partialorder %v537_v41, inf  ;;  %v548_v8 = vand.u32 2147483648, %v537_v41  ;;  %vm547_vm4 = vcmp.eq.f32.partialorder %v537_v41, 0.0 }
  0xf8   : > { %v709_v2 = vpop.eup %708 }
  0xf9   : > { %v539_v3 = vmul.f32 %v709_v2, %v537_v41 }
  0xfb   : > { %v540_v4 = vmul.f32 %v709_v2, %v539_v3 }
  0xfd   : > { %v541_v49 = vmul.f32 0.5, %v540_v4 }
  0xff   : > { %v542_v5 = vsub.f32 1.5, %v541_v49 }
 0x101   : > { %v543_v6 = vmul.f32 %v709_v2, %v542_v5 }
 0x103   : > { %v544_v7 = vmul.f32 %v543_v6, %v537_v41 }
 0x105   : > { %v546_v9 = vsel %vm545_vm3, %v537_v41, %v544_v7 }
 0x106   : > { %v549_v10 = vsel %vm547_vm4, %v548_v8, %v546_v9 }
 0x107   : > { %v550_v11 = vsel %vm188_vm2, %v549_v10, 0.0 }
 0x108   : > { %551 = vadd.xlane.f32.xlu0 %v550_v11 }
 0x119   : > { %v894_v13 = vpop.xlane.xlu2 %381 }
 0x11a   : > { %710 = vrsqrt.f32 %v894_v13  ;;  %vm411_vm5 = vcmp.eq.f32.partialorder %v894_v13, inf  ;;  %v414_v21 = vand.u32 2147483648, %v894_v13  ;;  %vm413_vm9 = vcmp.eq.f32.partialorder %v894_v13, 0.0 }
 0x120   : > { %v711_v16 = vpop.eup %710 }
 0x121   : > { %v897_v14 = vpop.xlane.xlu2 %390  ;;  %v405_v17 = vmul.f32 %v711_v16, %v894_v13 }
 0x122   : > { %712 = vrsqrt.f32 %v897_v14  ;;  %vm447_vm11 = vcmp.eq.f32.partialorder %v897_v14, inf  ;;  %vm449_vm12 = vcmp.eq.f32.partialorder %v897_v14, 0.0 }
 0x123   : > { %v406_v19 = vmul.f32 %v711_v16, %v405_v17  ;;  %v450_v17 = vand.u32 2147483648, %v897_v14 }
 0x125   : > { %v407_v27 = vmul.f32 0.5, %v406_v19 }
 0x127   : > { %v408_v33 = vsub.f32 1.5, %v407_v27 }
 0x128   : > { %v713_v18 = vpop.eup %712 }
 0x129   : > { %v441_v20 = vmul.f32 %v713_v18, %v897_v14  ;;  %v409_v43 = vmul.f32 %v711_v16, %v408_v33 }
 0x12b   : > { %v442_v31 = vmul.f32 %v713_v18, %v441_v20  ;;  %v410_v51 = vmul.f32 %v409_v43, %v894_v13 }
 0x12d   : > { %v443_v35 = vmul.f32 0.5, %v442_v31  ;;  %v412_v60 = vsel %vm411_vm5, %v894_v13, %v410_v51  ;;  %vm514_vm5 = vcmask 0  }
 0x12e   : > { %v415_v5 = vsel %vm413_vm9, %v414_v21, %v412_v60 }
 0x12f   : > { %v444_v45 = vsub.f32 1.5, %v443_v35 }
 0x131   : > { %v445_v53 = vmul.f32 %v713_v18, %v444_v45 }
 0x132   : > { %v385_v15 = vpop.xlane.xlu0 %384 }
 0x133   : > { %714 = vrsqrt.f32 %v385_v15  ;;  %vm423_vm6 = vcmp.eq.f32.partialorder %v385_v15, inf  ;;  %v426_v61 = vand.u32 2147483648, %v385_v15  ;;  %v446_v63 = vmul.f32 %v445_v53, %v897_v14 }
 0x134   : > { %vm425_vm7 = vcmp.eq.f32.partialorder %v385_v15, 0.0 }
 0x135   : > { %v448_v11 = vsel %vm447_vm11, %v897_v14, %v446_v63 }
 0x139   : > { %v715_v23 = vpop.eup %714  ;;  %v388_v24 = vpop.xlane.xlu1 %387 }
 0x13a   : > { %v417_v25 = vmul.f32 %v715_v23, %v385_v15  ;;  %716 = vrsqrt.f32 %v388_v24  ;;  %v902_v26 = vpop.xlane.xlu0 %396  ;;  %vm435_vm8 = vcmp.eq.f32.partialorder %v388_v24, inf  ;;  %v438_v2 = vand.u32 2147483648, %v388_v24 }
 0x13b   : > { %718 = vrsqrt.f32 %v902_v26  ;;  %vm437_vm10 = vcmp.eq.f32.partialorder %v388_v24, 0.0  ;;  %vm471_vm13 = vcmp.eq.f32.partialorder %v902_v26, inf  ;;  %v474_v14 = vand.u32 2147483648, %v902_v26 }
 0x13c   : > { %v418_v32 = vmul.f32 %v715_v23, %v417_v25  ;;  %vm473_vm0 = vcmp.eq.f32.partialorder %v902_v26, 0.0 }
 0x13e   : > { %v419_v30 = vmul.f32 0.5, %v418_v32 }
 0x140   : > { %v717_v34 = vpop.eup %716  ;;  %v420_v36 = vsub.f32 1.5, %v419_v30 }
 0x141   : > { %v719_v37 = vpop.eup %718  ;;  %v429_v38 = vmul.f32 %v717_v34, %v388_v24  ;;  %v905_v39 = vpop.xlane.xlu1 %399 }
 0x142   : > { %v907_v12 = vpop.xlane.xlu2 %393  ;;  %v421_v40 = vmul.f32 %v715_v23, %v420_v36  ;;  %v465_v42 = vmul.f32 %v719_v37, %v902_v26  ;;  %720 = vrsqrt.f32 %v905_v39  ;;  %v451_v23 = vsel %vm449_vm12, %v450_v17, %v448_v11 }
 0x143   : > { %v430_v44 = vmul.f32 %v717_v34, %v429_v38  ;;  %722 = vrsqrt.f32 %v907_v12  ;;  %vm459_vm14 = vcmp.eq.f32.partialorder %v907_v12, inf  ;;  %v462_v27 = vand.u32 2147483648, %v907_v12 }
 0x144   : > { %v466_v46 = vmul.f32 %v719_v37, %v465_v42  ;;  %v422_v48 = vmul.f32 %v421_v40, %v385_v15  ;;  %vm461_vm15 = vcmp.eq.f32.partialorder %v907_v12, 0.0  ;;  %vm483_vm1 = vcmp.eq.f32.partialorder %v905_v39, inf }
 0x145   : > { %v431_v47 = vmul.f32 0.5, %v430_v44  ;;  %v486_v42 = vand.u32 2147483648, %v905_v39  ;;  %vm485_vm2 = vcmp.eq.f32.partialorder %v905_v39, 0.0 }
 0x146   : > { %v467_v50 = vmul.f32 0.5, %v466_v46  ;;  %v424_v57 = vsel %vm423_vm6, %v385_v15, %v422_v48 }
 0x147   : > { %v432_v52 = vsub.f32 1.5, %v431_v47  ;;  %v427_v1 = vsel %vm425_vm7, %v426_v61, %v424_v57 }
 0x148   : > { %v721_v22 = vpop.eup %720  ;;  %v468_v58 = vsub.f32 1.5, %v467_v50  ;;  %v500_v9 = vadd.f32 %v427_v1, %v415_v5 }
 0x149   : > { %v723_v54 = vpop.eup %722  ;;  %v433_v29 = vmul.f32 %v717_v34, %v432_v52  ;;  %v477_v55 = vmul.f32 %v721_v22, %v905_v39 }
 0x14a   : > { %v916_v56 = vpop.xlane.xlu2 %402  ;;  %v453_v59 = vmul.f32 %v723_v54, %v907_v12  ;;  %v469_v4 = vmul.f32 %v719_v37, %v468_v58 }
 0x14b   : > { %724 = vrsqrt.f32 %v916_v56  ;;  %v434_v62 = vmul.f32 %v433_v29, %v388_v24  ;;  %v478_v28 = vmul.f32 %v721_v22, %v477_v55  ;;  %vm495_vm3 = vcmp.eq.f32.partialorder %v916_v56, inf  ;;  %v536_v29 = vld [vmem:[#allocation3] sm:$0x1] }
 0x14c   : > { %v454_v0 = vmul.f32 %v723_v54, %v453_v59  ;;  %v470_v13 = vmul.f32 %v469_v4, %v902_v26  ;;  %v498_v45 = vand.u32 2147483648, %v916_v56  ;;  %vm497_vm4 = vcmp.eq.f32.partialorder %v916_v56, 0.0 }
 0x14d   : > { %v436_v41 = vsel %vm435_vm8, %v388_v24, %v434_v62  ;;  %v479_v3 = vmul.f32 0.5, %v478_v28 }
 0x14e   : > { %v455_v49 = vmul.f32 0.5, %v454_v0  ;;  %v439_v6 = vsel %vm437_vm10, %v438_v2, %v436_v41  ;;  %v472_v32 = vsel %vm471_vm13, %v902_v26, %v470_v13 }
 0x14f   : > { %v480_v7 = vsub.f32 1.5, %v479_v3  ;;  %v501_v18 = vadd.f32 %v500_v9, %v439_v6  ;;  %v475_v37 = vsel %vm473_vm0, %v474_v14, %v472_v32 }
 0x150   : > { %v456_v10 = vsub.f32 1.5, %v455_v49 }
 0x151   : > { %v725_v8 = vpop.eup %724  ;;  %v481_v16 = vmul.f32 %v721_v22, %v480_v7  ;;  %v502_v30 = vadd.f32 %v501_v18, %v451_v23 }
 0x152   : > { %v489_v15 = vmul.f32 %v725_v8, %v916_v56  ;;  %v457_v19 = vmul.f32 %v723_v54, %v456_v10 }
 0x153   : > { %v482_v25 = vmul.f32 %v481_v16, %v905_v39 }
 0x154   : > { %v490_v20 = vmul.f32 %v725_v8, %v489_v15  ;;  %v458_v24 = vmul.f32 %v457_v19, %v907_v12 }
 0x155   : > { %v484_v38 = vsel %vm483_vm1, %v905_v39, %v482_v25  ;;  %v378_v39 = vld [vmem:[#allocation4] sm:$0x1] }
 0x156   : > { %v491_v31 = vmul.f32 0.5, %v490_v20  ;;  %v460_v33 = vsel %vm459_vm14, %v907_v12, %v458_v24  ;;  %v487_v44 = vsel %vm485_vm2, %v486_v42, %v484_v38 }
 0x157   : > { %v463_v34 = vsel %vm461_vm15, %v462_v27, %v460_v33 }
 0x158   : > { %v492_v35 = vsub.f32 1.5, %v491_v31  ;;  %v503_v36 = vadd.f32 %v502_v30, %v463_v34 }
 0x15a   : > { %v493_v40 = vmul.f32 %v725_v8, %v492_v35  ;;  %v504_v43 = vadd.f32 %v503_v36, %v475_v37 }
 0x15c   : > { %v494_v12 = vmul.f32 %v493_v40, %v916_v56  ;;  %v505_v26 = vadd.f32 %v504_v43, %v487_v44 }
 0x15e   : > { %v496_v46 = vsel %vm495_vm3, %v916_v56, %v494_v12 }
 0x15f   : > { %v499_v47 = vsel %vm497_vm4, %v498_v45, %v496_v46 }
 0x160   : > { %v506_v48 = vadd.f32 %v505_v26, %v499_v47 }
 0x162   : > { %v507_v50 = vrot.slane %v506_v48, 4 }
 0x164   : > { %v508_v51 = vadd.f32 %v507_v50, %v506_v48 }
 0x166   : > { %v509_v52 = vrot.slane %v508_v51, 2 }
 0x168   : > { %v510_v22 = vadd.f32 %v509_v52, %v508_v51 }
 0x16a   : > { %v511_v53 = vrot.slane %v510_v22, 1 }
 0x16c   : > { %v512_v54 = vadd.f32 %v511_v53, %v510_v22 }
 0x16e   : > { %v513_v21 = vadd.f32 %v512_v54, %v378_v39 }
 0x170   : > { %515 = vst.msk [vmem:[#allocation4] sm:$0x1] %vm514_vm5, %v513_v21 }
 0x17a   : > { %558 = sbr.rel (%p656_p6) target bundleno = 407 (0x197), region = 44 }
 0x17b   : > { %v552_v55 = vpop.xlane.xlu0 %551 }
 0x17c   : > { %v553_v57 = vadd.f32 %v552_v55, %v536_v29 }
 0x17e   : > { %554 = vst.msk [vmem:[#allocation3] sm:$0x1] %vm514_vm5, %v553_v57 }
 0x17f   : > { %v789_v56 = vmov 128.0   ;;  %v568_v63 = vld [vmem:[#allocation4] sm:$0x1] }
 0x180   : > { %726 = vrcp.f32 %v789_v56 }
 0x185   : > { %v559_v62 = vld [vmem:[#allocation3] sm:$0x1] }
 0x186   : > { %v727_v58 = vpop.eup %726 }
 0x187   : > { %v561_v59 = vmul.f32 128.0, %v727_v58  ;;  %vm565_vm6 = vweird.f32 %v727_v58 }
 0x189   : > { %v562_v60 = vsub.f32 1.0, %v561_v59 }
 0x18b   : > { %v563_v61 = vmul.f32 %v727_v58, %v562_v60 }
 0x18d   : > { %v564_v28 = vadd.f32 %v727_v58, %v563_v61 }
 0x18f   : > { %v566_v0 = vsel %vm565_vm6, %v727_v58, %v564_v28 }
 0x190   : > { %v567_v1 = vmul.f32 %v566_v0, %v559_v62  ;;  %v569_v41 = vmul.f32 %v568_v63, %v566_v0 }
 0x192   : > { %v570_v2 = vadd.f32 %v569_v41, %v567_v1 }
 0x194   : > { %v571_v3 = vmul.f32 0.5, %v570_v2 }
 0x196   : > { %572 = vst.msk [vmem:[#allocation5] sm:$0x1] %vm514_vm5, %v571_v3 }
 0x197 PF: > { %p666_p7 = scmp.eq.s32.totalorder %s648_s12, 1  ;;  %s581_s25 = sshll.u32 %s968_s2, 4  ;;  %s582_s25 = int_to_ptr.hbm [resolvable:$true] %s581_s25 }
 0x198   : > { %s790_s26 = smov [#allocation5]  }
 0x199   : > { %s579_s27 = sshll.u32 %s790_s26, 4  ;;  %s580_s27 = int_to_ptr.vmem [resolvable:$true] %s579_s27 }
 0x19a   : > { %663 = dma.vmem_to_hbm [thread:$0]  (%p666_p7), %s580_s27, 16, %s582_s25, [#allocation6]  }
 0x19b   : > { %769 = dma.done.wait (%p666_p7), [#allocation6], 16  }
 0x19c   : > { %771 = vsyncadd (%p666_p7), [#allocation6], 4294967280 }
 0x19d PF: > { %s13_s11 = sadd.s32 1, %s782_s11   ;;  %s969_s9 = smov %s778_s10 }
 0x19e   : > { %p10_p8 = scmp.ge.s32.totalorder %s13_s11, 4   ;;  %s970_s10 = smov %s972_s13 }
 0x1a0   :  { %12 = sbr.rel (!%p10_p8) target bundleno = 2 (0x2), region = 74 }
 0x1a5   :  { %595 = vsyncpa [#allocation6], 1 }
 0x1a6   :  { %597 = vsyncpa [#allocation6 + $0x1], 1 }

// kernel: base_vae_forward.10
= control target key start
LH: loop header
LB: loop body
LE: loop exit
PB: predicated region body
PF: predicated region fallthrough
CT: control target
= control target key end

     0   :  { %s2167_s6 = smov 1   ;;  %s2168_s10 = smov 2   ;;  %s2960_s0 = inlined_call_operand.smem [shape: u32[34], index: -1, kind: input, shape index: {}] }
   0x1   :  { %s2221_s5 = sld [smem:[%s2960_s0]]   ;;  %s2169_s14 = smov 3  }
   0x2   :  { %s2226_s9 = sld [smem:[%s2960_s0 + %s2167_s6]]   ;;  %s2170_s18 = smov 4  }
   0x3   :  { %s2231_s13 = sld [smem:[%s2960_s0 + %s2168_s10]]   ;;  %s2171_s22 = smov 5  }
   0x4   :  { %s2236_s17 = sld [smem:[%s2960_s0 + %s2169_s14]]   ;;  %s2172_s26 = smov 6  }
   0x5   :  { %s2241_s21 = sld [smem:[%s2960_s0 + %s2170_s18]]   ;;  %s2173_s30 = smov 7  }
   0x6   :  { %s2246_s25 = sld [smem:[%s2960_s0 + %s2171_s22]]   ;;  %s2174_s4 = smov 8  }
   0x7   :  { %s2251_s29 = sld [smem:[%s2960_s0 + %s2172_s26]]   ;;  %s2175_s10 = smov 9  }
   0x8   :  { %s2256_s3 = sld [smem:[%s2960_s0 + %s2173_s30]]   ;;  %s2176_s15 = smov 10  }
   0x9   :  { %s2261_s8 = sld [smem:[%s2960_s0 + %s2174_s4]]   ;;  %s2177_s20 = smov 11  }
   0xa   :  { %s2266_s14 = sld [smem:[%s2960_s0 + %s2175_s10]]   ;;  %s2178_s26 = smov 12  }
   0xb   :  { %s2271_s19 = sld [smem:[%s2960_s0 + %s2176_s15]]   ;;  %s2179_s1 = smov 13  }
   0xc   :  { %s2276_s24 = sld [smem:[%s2960_s0 + %s2177_s20]]   ;;  %s2180_s7 = smov 14  }
   0xd   :  { %s2281_s30 = sld [smem:[%s2960_s0 + %s2178_s26]]   ;;  %s2181_s15 = smov 15  }
   0xe   :  { %s2286_s6 = sld [smem:[%s2960_s0 + %s2179_s1]]   ;;  %s2182_s22 = smov 16  }
   0xf   :  { %s2291_s12 = sld [smem:[%s2960_s0 + %s2180_s7]]   ;;  %s2183_s28 = smov 17  }
  0x10   :  { %s2296_s20 = sld [smem:[%s2960_s0 + %s2181_s15]]   ;;  %s2184_s7 = smov 18  }
  0x11   :  { %2964 = sst [smem:[#allocation16_spill]] %s2271_s19  ;;  %s2185_s15 = smov 19  }
  0x12   :  { %2965 = sst [smem:[#allocation17_spill]] %s2276_s24 }
  0x13   :  { %2966 = sst [smem:[#allocation18_spill]] %s2281_s30 }
  0x14   :  { %s2301_s27 = sld [smem:[%s2960_s0 + %s2182_s22]]   ;;  %s2186_s22 = smov 20  }
  0x15   :  { %2967 = sst [smem:[#allocation19_spill]] %s2291_s12 }
  0x16   :  { %2968 = sst [smem:[#allocation20_spill]] %s2296_s20 }
  0x17   :  { %s2306_s4 = sld [smem:[%s2960_s0 + %s2183_s28]]   ;;  %s2187_s28 = smov 21  }
  0x18   :  { %s2311_s12 = sld [smem:[%s2960_s0 + %s2184_s7]]   ;;  %s2188_s7 = smov 22  }
  0x19   :  { %s2316_s30 = sld [smem:[%s2960_s0 + %s2185_s15]]   ;;  %s2189_s15 = smov 23  }
  0x1a   :  { %2969 = sst [smem:[#allocation21_spill]] %s2301_s27 }
  0x1b   :  { %s2321_s27 = sld [smem:[%s2960_s0 + %s2186_s22]]   ;;  %s2190_s22 = smov 24  }
  0x1c   :  { %s2336_s24 = sld [smem:[%s2960_s0 + %s2189_s15]]   ;;  %s2193_s15 = smov 27  }
  0x1d   :  { %2970 = sst [smem:[#allocation22_spill]] %s2306_s4 }
  0x1e   :  { %2971 = sst [smem:[#allocation23_spill]] %s2311_s12 }
  0x1f   :  { %s2326_s4 = sld [smem:[%s2960_s0 + %s2187_s28]]   ;;  %s2191_s28 = smov 25  }
  0x20   :  { %s2331_s12 = sld [smem:[%s2960_s0 + %s2188_s7]]   ;;  %s2192_s7 = smov 26  }
  0x21   :  { %2972 = sst [smem:[#allocation24_spill]] %s2321_s27 }
  0x22   :  { %s2341_s27 = sld [smem:[%s2960_s0 + %s2190_s22]]   ;;  %s2194_s22 = smov 28  }
  0x23   :  { %s2356_s19 = sld [smem:[%s2960_s0 + %s2193_s15]]   ;;  %s2197_s15 = smov 31  }
  0x25   :  { %2973 = sst [smem:[#allocation25_spill]] %s2326_s4 }
  0x26   :  { %2974 = sst [smem:[#allocation26_spill]] %s2331_s12 }
  0x27   :  { %s2346_s4 = sld [smem:[%s2960_s0 + %s2191_s28]]   ;;  %s2195_s28 = smov 29  }
  0x28   :  { %2975 = sst [smem:[#allocation27_spill]] %s2341_s27 }
  0x29   :  { %s2351_s12 = sld [smem:[%s2960_s0 + %s2192_s7]]   ;;  %s2196_s7 = smov 30  }
  0x2a   :  { %2977 = sst [smem:[#allocation29_spill]] %s2356_s19 }
  0x2b   :  { %s2361_s27 = sld [smem:[%s2960_s0 + %s2194_s22]]   ;;  %s2198_s22 = smov 32  }
  0x2c   :  { %s2366_s20 = sld [smem:[%s2960_s0 + %s2195_s28]]   ;;  %s2199_s28 = smov 33  }
  0x2d   :  { %s2376_s19 = sld [smem:[%s2960_s0 + %s2197_s15]]  }
  0x2f   :  { %2976 = sst [smem:[#allocation28_spill]] %s2351_s12 }
  0x30   :  { %s2371_s12 = sld [smem:[%s2960_s0 + %s2196_s7]]  }
  0x31   :  { %2978 = sst [smem:[#allocation30_spill]] %s2361_s27 }
  0x32   :  { %2979 = sst [smem:[#allocation31_spill]] %s2366_s20 }
  0x33   :  { %s2381_s27 = sld [smem:[%s2960_s0 + %s2198_s22]]  }
  0x34   :  { %s2386_s20 = sld [smem:[%s2960_s0 + %s2199_s28]]  }
  0x35   :  { %73 = vsyncpa [#allocation3], 0 }
  0x36   :  { %74 = vsyncpa [#allocation6], 0 }
  0x37   :  { %75 = vsyncpa [#allocation9], 0 }
  0x38   :  { %76 = vsyncpa [#allocation4], 0  ;;  %s118_s7 = sshll.u32 %s2286_s6, 4  ;;  %s2200_s10 = smov [#allocation5]   ;;  %s119_s7 = int_to_ptr.hbm [resolvable:$true] %s118_s7 }
  0x39   :  { %s120_s11 = sshll.u32 %s2200_s10, 4  ;;  %s160_s15 = sshll.u32 %s2336_s24, 4  ;;  %s121_s11 = int_to_ptr.vmem [resolvable:$true] %s120_s11  ;;  %s161_s15 = int_to_ptr.hbm [resolvable:$true] %s160_s15 }
  0x3a   :  { %s2015_s16 = sshra.s32 %s119_s7, 4  ;;  %s2019_s0 = scalar_lea.hbm %s2286_s6, 128  ;;  %s2016_s16 = int_to_ptr.hbm [resolvable:$true] %s2015_s16 }
  0x3b   :  { %s2017_s18 = scalar_lea.hbm %s2016_s16, 128  ;;  %p2020_p1 = scmp.lt.s32.totalorder %s2016_s16, %s2286_s6 }
  0x3c   :  { %p2018_p0 = scmp.ne.s32.totalorder %s2016_s16, %s2017_s18  ;;  %p2021_p2 = scmp.lt.s32.totalorder %s2019_s0, %s2017_s18 }
  0x3e   :  { %p2022_p3 = por %p2021_p2, %p2020_p1 }
  0x40   :  { %p2023_p4 = pnand %p2022_p3, %p2018_p0 }
  0x42   :  { %2026 = shalt.err (!%p2023_p4)
}
  0x43   :  { %s2201_s22 = smov 128   ;;  %s2202_s23 = smov 8  }
  0x44   :  { %126 = dma.hbm_to_vmem [thread:$0]  %s119_s7, 2048, %s121_s11, [#allocation6], %s2201_s22, %s2201_s22, %s2202_s23  }
  0x45   :  { %s2203_s26 = smov [#allocation8]   ;;  %s99_s1 = sshll.u32 %s2266_s14, 4  ;;  %s2396_s1 = int_to_ptr.hbm [resolvable:$true] %s99_s1 }
  0x46   :  { %s162_s28 = sshll.u32 %s2203_s26, 4  ;;  %s2039_s6 = sshra.s32 %s161_s15, 4  ;;  %s163_s28 = int_to_ptr.vmem [resolvable:$true] %s162_s28  ;;  %s2040_s6 = int_to_ptr.hbm [resolvable:$true] %s2039_s6 }
  0x47   :  { %s2041_s2 = scalar_lea.hbm %s2040_s6, 128  ;;  %s2043_s10 = scalar_lea.hbm %s2336_s24, 128 }
  0x48   :  { %p2042_p5 = scmp.ne.s32.totalorder %s2040_s6, %s2041_s2  ;;  %p2044_p6 = scmp.lt.s32.totalorder %s2040_s6, %s2336_s24 }
  0x49   :  { %p2045_p7 = scmp.lt.s32.totalorder %s2043_s10, %s2041_s2 }
  0x4b   :  { %p2046_p8 = por %p2045_p7, %p2044_p6 }
  0x4d   :  { %p2047_p9 = pnand %p2046_p8, %p2042_p5 }
  0x4f   :  { %2050 = shalt.err (!%p2047_p9)
}
  0x50   :  { %168 = dma.hbm_to_vmem [thread:$0]  %s161_s15, 2048, %s163_s28, [#allocation9], %s2201_s22, %s2201_s22, %s2202_s23  }
  0x51   :  { %s141_s7 = sshll.u32 %s2316_s30, 4  ;;  %s2204_s11 = smov [#allocation2]   ;;  %s2404_s7 = int_to_ptr.hbm [resolvable:$true] %s141_s7 }
  0x52   :  { %s101_s16 = sshll.u32 %s2204_s11, 4  ;;  %s2063_s18 = sshra.s32 %s2396_s1, 4  ;;  %s102_s16 = int_to_ptr.vmem [resolvable:$true] %s101_s16  ;;  %s2064_s18 = int_to_ptr.hbm [resolvable:$true] %s2063_s18 }
  0x53   :  { %s2065_s24 = scalar_lea.hbm %s2064_s18, 256  ;;  %s2067_s0 = scalar_lea.hbm %s2266_s14, 256 }
  0x54   :  { %p2066_p10 = scmp.ne.s32.totalorder %s2064_s18, %s2065_s24  ;;  %p2068_p11 = scmp.lt.s32.totalorder %s2064_s18, %s2266_s14 }
  0x55   :  { %p2069_p12 = scmp.lt.s32.totalorder %s2067_s0, %s2065_s24 }
  0x57   :  { %p2070_p13 = por %p2069_p12, %p2068_p11 }
  0x59   :  { %p2071_p0 = pnand %p2070_p13, %p2066_p10 }
  0x5b   :  { %2074 = shalt.err (!%p2071_p0)
}
  0x5c   :  { %107 = dma.hbm_to_vmem [thread:$0]  %s2396_s1, 4096, %s102_s16, [#allocation3], %s2201_s22, %s2201_s22, %s2202_s23  }
  0x5d   :  { %s2205_s15 = smov [#allocation7]   ;;  %s175_s28 = sshll.u32 %s2346_s4, 4  ;;  %s2414_s28 = int_to_ptr.hbm [resolvable:$true] %s175_s28 }
  0x5e   :  { %s143_s26 = sshll.u32 %s2205_s15, 4  ;;  %s2087_s14 = sshra.s32 %s2404_s7, 4  ;;  %s144_s26 = int_to_ptr.vmem [resolvable:$true] %s143_s26  ;;  %s2088_s14 = int_to_ptr.hbm [resolvable:$true] %s2087_s14 }
  0x5f   :  { %s2089_s6 = scalar_lea.hbm %s2088_s14, 256  ;;  %s2091_s2 = scalar_lea.hbm %s2316_s30, 256 }
  0x60   :  { %p2090_p1 = scmp.ne.s32.totalorder %s2088_s14, %s2089_s6  ;;  %p2092_p2 = scmp.lt.s32.totalorder %s2088_s14, %s2316_s30 }
  0x61   :  { %p2093_p3 = scmp.lt.s32.totalorder %s2091_s2, %s2089_s6 }
  0x63   :  { %p2094_p4 = por %p2093_p3, %p2092_p2 }
  0x65   :  { %p2095_p5 = pnand %p2094_p4, %p2090_p1 }
  0x67   :  { %2098 = shalt.err (!%p2095_p5)
}
  0x68   :  { %149 = dma.hbm_to_vmem [thread:$0]  %s2404_s7, 4096, %s144_s26, [#allocation6], %s2201_s22, %s2201_s22, %s2202_s23  }
  0x69   :  { %s2206_s1 = smov [#allocation10]   ;;  %s2111_s11 = sshra.s32 %s2414_s28, 4  ;;  %s2112_s11 = int_to_ptr.hbm [resolvable:$true] %s2111_s11 }
  0x6a   :  { %s177_s10 = sshll.u32 %s2206_s1, 4  ;;  %s2113_s16 = scalar_lea.hbm %s2112_s11, 256  ;;  %s178_s10 = int_to_ptr.vmem [resolvable:$true] %s177_s10 }
  0x6b   :  { %p2114_p6 = scmp.ne.s32.totalorder %s2112_s11, %s2113_s16  ;;  %s2115_s30 = scalar_lea.hbm %s2346_s4, 256 }
  0x6c   :  { %p2116_p7 = scmp.lt.s32.totalorder %s2112_s11, %s2346_s4  ;;  %p2117_p8 = scmp.lt.s32.totalorder %s2115_s30, %s2113_s16 }
  0x6e   :  { %p2118_p9 = por %p2117_p8, %p2116_p7 }
  0x70   :  { %p2119_p10 = pnand %p2118_p9, %p2114_p6 }
  0x72   :  { %2122 = shalt.err (!%p2119_p10)
}
  0x73   :  { %s2207_s18 = smov 256   ;;  %s2208_s24 = smov 16  }
  0x74   :  { %183 = dma.hbm_to_vmem [thread:$0]  %s2414_s28, 4096, %s178_s10, [#allocation9], %s2207_s18, %s2207_s18, %s2208_s24  }
  0x75   :  { %2159 = dma.done.wait [#allocation3], 4096  }
  0x76   :  { %2160 = vsyncadd [#allocation3], 4294963200 }
  0x77   :  { %2161 = dma.done.wait [#allocation6], 6144  }
  0x78   :  { %2162 = vsyncadd [#allocation6], 4294961152 }
  0x79   :  { %2163 = dma.done.wait [#allocation9], 6144  }
  0x7a   :  { %2164 = vsyncadd [#allocation9], 4294961152  ;;  %v355_v0 = vld [vmem:[%s2246_s25 + $0xe0] sm:$0xff]  ;;  %v357_v1 = vld [vmem:[%s2246_s25 + $0xf0] sm:$0xff]  ;;  %vm254_vm4 = vcmask 1040384   ;;  %vm256_vm5 = vcmask 1042434  }
  0x7b   :  { %v387_v2 = vld [vmem:[%s2246_s25 + $0x1e0] sm:$0xff]  ;;  %v469_v3 = vpack.c.bf16 %v357_v1, %v355_v0  ;;  %v389_v4 = vld [vmem:[%s2246_s25 + $0x1f0] sm:$0xff]  ;;  %vm258_vm6 = vcmask 1041408   ;;  %s2999_s4 = sld [smem:[#allocation26_spill]]  ;;  %s2212_s26 = smov [#allocation11]  }
  0x7c   :  { %v419_v5 = vld [vmem:[%s2246_s25 + $0x2e0] sm:$0xff]  ;;  %v421_v6 = vld [vmem:[%s2246_s25 + $0x2f0] sm:$0xff]  ;;  %v485_v7 = vpack.c.bf16 %v389_v4, %v387_v2  ;;  %s3000_s22 = sld [smem:[#allocation27_spill]]  ;;  %s1887_s28 = sshll.u32 %s2212_s26, 4  ;;  %s1888_s28 = int_to_ptr.vmem [resolvable:$true] %s1887_s28 }
  0x7d   :  { %v501_v8 = vpack.c.bf16 %v421_v6, %v419_v5  ;;  %v451_v9 = vld [vmem:[%s2246_s25 + $0x3e0] sm:$0xff]  ;;  %v453_v10 = vld [vmem:[%s2246_s25 + $0x3f0] sm:$0xff]  ;;  %525 = vmatpush.bf16.msra.mxu0 %v469_v3  ;;  %s3001_s23 = sld [smem:[#allocation29_spill]]  ;;  %s1889_s14 = sshll.u32 %s2386_s20, 4  ;;  %s1890_s14 = int_to_ptr.hbm [resolvable:$true] %s1889_s14 }
  0x7e   :  { %v351_v11 = vld [vmem:[%s2246_s25 + $0xc0] sm:$0xff]  ;;  %v517_v12 = vpack.c.bf16 %v453_v10, %v451_v9  ;;  %v353_v13 = vld [vmem:[%s2246_s25 + $0xd0] sm:$0xff]  ;;  %538 = vmatpush.bf16.msra.mxu1 %v485_v7  ;;  %s3002_s7 = sld [smem:[#allocation19_spill]]  ;;  %s2147_s6 = sshra.s32 %s1890_s14, 4  ;;  %s2148_s6 = int_to_ptr.hbm [resolvable:$true] %s2147_s6 }
  0x7f   :  { %v383_v14 = vld [vmem:[%s2246_s25 + $0x1c0] sm:$0xff]  ;;  %v385_v15 = vld [vmem:[%s2246_s25 + $0x1d0] sm:$0xff]  ;;  %551 = vmatpush.bf16.msra.mxu2 %v501_v8  ;;  %v467_v16 = vpack.c.bf16 %v353_v13, %v351_v11  ;;  %s3004_s0 = sld [smem:[#allocation28_spill]]  ;;  %s2149_s2 = scalar_lea.hbm %s2148_s6, 1 }
  0x80   :  { %v483_v17 = vpack.c.bf16 %v385_v15, %v383_v14  ;;  %v415_v18 = vld [vmem:[%s2246_s25 + $0x2c0] sm:$0xff]  ;;  %v417_v19 = vld [vmem:[%s2246_s25 + $0x2d0] sm:$0xff]  ;;  %564 = vmatpush.bf16.msra.mxu3 %v517_v12  ;;  %s3005_s15 = sld [smem:[#allocation30_spill]]  ;;  %p2150_p11 = scmp.ne.s32.totalorder %s2148_s6, %s2149_s2 }
  0x81   :  { %v447_v20 = vld [vmem:[%s2246_s25 + $0x3c0] sm:$0xff]  ;;  %v499_v21 = vpack.c.bf16 %v417_v19, %v415_v18  ;;  %v449_v22 = vld [vmem:[%s2246_s25 + $0x3d0] sm:$0xff]  ;;  %526 = vmatpush.bf16.msra.mxu0 %v467_v16  ;;  %s2151_s1 = scalar_lea.hbm %s2386_s20, 1  ;;  %p2152_p12 = scmp.lt.s32.totalorder %s2148_s6, %s2386_s20 }
  0x82   :  { %v347_v23 = vld [vmem:[%s2246_s25 + $0xa0] sm:$0xff]  ;;  %v349_v24 = vld [vmem:[%s2246_s25 + $0xb0] sm:$0xff]  ;;  %v515_v25 = vpack.c.bf16 %v449_v22, %v447_v20  ;;  %539 = vmatpush.bf16.msra.mxu1 %v483_v17  ;;  %p2153_p13 = scmp.lt.s32.totalorder %s2151_s1, %s2149_s2 }
  0x83   :  { %v379_v26 = vld [vmem:[%s2246_s25 + $0x1a0] sm:$0xff]  ;;  %v381_v27 = vld [vmem:[%s2246_s25 + $0x1b0] sm:$0xff]  ;;  %v465_v29 = vpack.c.bf16 %v349_v24, %v347_v23  ;;  %552 = vmatpush.bf16.msra.mxu2 %v499_v21 }
  0x84   :  { %v411_v28 = vld [vmem:[%s2246_s25 + $0x2a0] sm:$0xff]  ;;  %v413_v30 = vld [vmem:[%s2246_s25 + $0x2b0] sm:$0xff]  ;;  %v481_v33 = vpack.c.bf16 %v381_v27, %v379_v26  ;;  %565 = vmatpush.bf16.msra.mxu3 %v515_v25  ;;  %p2154_p0 = por %p2153_p13, %p2152_p12 }
  0x85   :  { %v443_v31 = vld [vmem:[%s2246_s25 + $0x3a0] sm:$0xff]  ;;  %v445_v32 = vld [vmem:[%s2246_s25 + $0x3b0] sm:$0xff]  ;;  %v497_v34 = vpack.c.bf16 %v413_v30, %v411_v28  ;;  %527 = vmatpush.bf16.msra.mxu0 %v465_v29  ;;  %v356_v28 = vld [vmem:[%s2246_s25 + $0xe8] sm:$0xff] }
  0x86   :  { %v343_v35 = vld [vmem:[%s2246_s25 + $0x80] sm:$0xff]  ;;  %v345_v36 = vld [vmem:[%s2246_s25 + $0x90] sm:$0xff]  ;;  %v513_v38 = vpack.c.bf16 %v445_v32, %v443_v31  ;;  %540 = vmatpush.bf16.msra.mxu1 %v481_v33  ;;  %v358_v29 = vld [vmem:[%s2246_s25 + $0xf8] sm:$0xff]  ;;  %p2155_p1 = pnand %p2154_p0, %p2150_p11 }
  0x87   :  { %v375_v37 = vld [vmem:[%s2246_s25 + $0x180] sm:$0xff]  ;;  %v377_v39 = vld [vmem:[%s2246_s25 + $0x190] sm:$0xff]  ;;  %v463_v44 = vpack.c.bf16 %v345_v36, %v343_v35  ;;  %553 = vmatpush.bf16.msra.mxu2 %v497_v34  ;;  %v388_v30 = vld [vmem:[%s2246_s25 + $0x1e8] sm:$0xff] }
  0x88   :  { %v407_v40 = vld [vmem:[%s2246_s25 + $0x280] sm:$0xff]  ;;  %v409_v41 = vld [vmem:[%s2246_s25 + $0x290] sm:$0xff]  ;;  %v479_v45 = vpack.c.bf16 %v377_v39, %v375_v37  ;;  %566 = vmatpush.bf16.msra.mxu3 %v513_v38  ;;  %v390_v32 = vld [vmem:[%s2246_s25 + $0x1f8] sm:$0xff] }
  0x89   :  { %v439_v42 = vld [vmem:[%s2246_s25 + $0x380] sm:$0xff]  ;;  %v441_v43 = vld [vmem:[%s2246_s25 + $0x390] sm:$0xff]  ;;  %v495_v46 = vpack.c.bf16 %v409_v41, %v407_v40  ;;  %528 = vmatpush.bf16.msra.mxu0 %v463_v44  ;;  %v420_v33 = vld [vmem:[%s2246_s25 + $0x2e8] sm:$0xff]  ;;  %v470_v40 = vpack.c.bf16 %v358_v29, %v356_v28 }
  0x8a   :  { %v339_v47 = vld [vmem:[%s2246_s25 + $0x60] sm:$0xff]  ;;  %v341_v48 = vld [vmem:[%s2246_s25 + $0x70] sm:$0xff]  ;;  %v511_v50 = vpack.c.bf16 %v441_v43, %v439_v42  ;;  %541 = vmatpush.bf16.msra.mxu1 %v479_v45  ;;  %v422_v34 = vld [vmem:[%s2246_s25 + $0x2f8] sm:$0xff]  ;;  %v486_v43 = vpack.c.bf16 %v390_v32, %v388_v30 }
  0x8b   :  { %v371_v49 = vld [vmem:[%s2246_s25 + $0x160] sm:$0xff]  ;;  %v373_v51 = vld [vmem:[%s2246_s25 + $0x170] sm:$0xff]  ;;  %v461_v56 = vpack.c.bf16 %v341_v48, %v339_v47  ;;  %554 = vmatpush.bf16.msra.mxu2 %v495_v46  ;;  %v452_v37 = vld [vmem:[%s2246_s25 + $0x3e8] sm:$0xff]  ;;  %v502_v44 = vpack.c.bf16 %v422_v34, %v420_v33 }
  0x8c   :  { %v403_v52 = vld [vmem:[%s2246_s25 + $0x260] sm:$0xff]  ;;  %v405_v53 = vld [vmem:[%s2246_s25 + $0x270] sm:$0xff]  ;;  %v477_v57 = vpack.c.bf16 %v373_v51, %v371_v49  ;;  %567 = vmatpush.bf16.msra.mxu3 %v511_v50  ;;  %v454_v38 = vld [vmem:[%s2246_s25 + $0x3f8] sm:$0xff] }
  0x8d   :  { %v435_v54 = vld [vmem:[%s2246_s25 + $0x360] sm:$0xff]  ;;  %v437_v55 = vld [vmem:[%s2246_s25 + $0x370] sm:$0xff]  ;;  %v493_v58 = vpack.c.bf16 %v405_v53, %v403_v52  ;;  %529 = vmatpush.bf16.msra.mxu0 %v461_v56  ;;  %v352_v41 = vld [vmem:[%s2246_s25 + $0xc8] sm:$0xff]  ;;  %v518_v48 = vpack.c.bf16 %v454_v38, %v452_v37 }
  0x8e   :  { %v335_v59 = vld [vmem:[%s2246_s25 + $0x40] sm:$0xff]  ;;  %v337_v60 = vld [vmem:[%s2246_s25 + $0x50] sm:$0xff]  ;;  %v509_v62 = vpack.c.bf16 %v437_v55, %v435_v54  ;;  %542 = vmatpush.bf16.msra.mxu1 %v477_v57  ;;  %v354_v42 = vld [vmem:[%s2246_s25 + $0xd8] sm:$0xff] }
  0x8f   :  { %v367_v61 = vld [vmem:[%s2246_s25 + $0x140] sm:$0xff]  ;;  %v369_v63 = vld [vmem:[%s2246_s25 + $0x150] sm:$0xff]  ;;  %v459_v4 = vpack.c.bf16 %v337_v60, %v335_v59  ;;  %555 = vmatpush.bf16.msra.mxu2 %v493_v58  ;;  %v384_v45 = vld [vmem:[%s2246_s25 + $0x1c8] sm:$0xff]  ;;  %v468_v55 = vpack.c.bf16 %v354_v42, %v352_v41 }
  0x90   :  { %v399_v0 = vld [vmem:[%s2246_s25 + $0x240] sm:$0xff]  ;;  %v401_v1 = vld [vmem:[%s2246_s25 + $0x250] sm:$0xff]  ;;  %v475_v5 = vpack.c.bf16 %v369_v63, %v367_v61  ;;  %568 = vmatpush.bf16.msra.mxu3 %v509_v62  ;;  %v386_v46 = vld [vmem:[%s2246_s25 + $0x1d8] sm:$0xff] }
  0x91   :  { %v431_v2 = vld [vmem:[%s2246_s25 + $0x340] sm:$0xff]  ;;  %v433_v3 = vld [vmem:[%s2246_s25 + $0x350] sm:$0xff]  ;;  %v491_v6 = vpack.c.bf16 %v401_v1, %v399_v0  ;;  %530 = vmatpush.bf16.msra.mxu0 %v459_v4  ;;  %v416_v47 = vld [vmem:[%s2246_s25 + $0x2c8] sm:$0xff]  ;;  %v484_v61 = vpack.c.bf16 %v386_v46, %v384_v45 }
  0x92   :  { %v331_v7 = vld [vmem:[%s2246_s25 + $0x20] sm:$0xff]  ;;  %v333_v8 = vld [vmem:[%s2246_s25 + $0x30] sm:$0xff]  ;;  %v507_v10 = vpack.c.bf16 %v433_v3, %v431_v2  ;;  %543 = vmatpush.bf16.msra.mxu1 %v475_v5  ;;  %v418_v49 = vld [vmem:[%s2246_s25 + $0x2d8] sm:$0xff] }
  0x93   :  { %v363_v9 = vld [vmem:[%s2246_s25 + $0x120] sm:$0xff]  ;;  %v365_v11 = vld [vmem:[%s2246_s25 + $0x130] sm:$0xff]  ;;  %v457_v16 = vpack.c.bf16 %v333_v8, %v331_v7  ;;  %556 = vmatpush.bf16.msra.mxu2 %v491_v6  ;;  %v448_v50 = vld [vmem:[%s2246_s25 + $0x3c8] sm:$0xff]  ;;  %v500_v62 = vpack.c.bf16 %v418_v49, %v416_v47 }
  0x94   :  { %v395_v12 = vld [vmem:[%s2246_s25 + $0x220] sm:$0xff]  ;;  %v397_v13 = vld [vmem:[%s2246_s25 + $0x230] sm:$0xff]  ;;  %v473_v19 = vpack.c.bf16 %v365_v11, %v363_v9  ;;  %569 = vmatpush.bf16.msra.mxu3 %v507_v10  ;;  %v450_v51 = vld [vmem:[%s2246_s25 + $0x3d8] sm:$0xff] }
  0x95   :  { %v427_v14 = vld [vmem:[%s2246_s25 + $0x320] sm:$0xff]  ;;  %v429_v15 = vld [vmem:[%s2246_s25 + $0x330] sm:$0xff]  ;;  %v489_v20 = vpack.c.bf16 %v397_v13, %v395_v12  ;;  %531 = vmatpush.bf16.msra.mxu0 %v457_v16  ;;  %v348_v52 = vld [vmem:[%s2246_s25 + $0xa8] sm:$0xff]  ;;  %v516_v63 = vpack.c.bf16 %v450_v51, %v448_v50 }
  0x96   :  { %v327_v17 = vld [vmem:[%s2246_s25] sm:$0xff]  ;;  %v329_v18 = vld [vmem:[%s2246_s25 + $0x10] sm:$0xff]  ;;  %v505_v24 = vpack.c.bf16 %v429_v15, %v427_v14  ;;  %544 = vmatpush.bf16.msra.mxu1 %v473_v19  ;;  %v350_v53 = vld [vmem:[%s2246_s25 + $0xb8] sm:$0xff] }
  0x97   :  { %v359_v21 = vld [vmem:[%s2246_s25 + $0x100] sm:$0xff]  ;;  %v361_v22 = vld [vmem:[%s2246_s25 + $0x110] sm:$0xff]  ;;  %v455_v31 = vpack.c.bf16 %v329_v18, %v327_v17  ;;  %557 = vmatpush.bf16.msra.mxu2 %v489_v20  ;;  %v380_v56 = vld [vmem:[%s2246_s25 + $0x1a8] sm:$0xff]  ;;  %v466_v3 = vpack.c.bf16 %v350_v53, %v348_v52 }
  0x98   :  { %v391_v23 = vld [vmem:[%s2246_s25 + $0x200] sm:$0xff]  ;;  %v393_v25 = vld [vmem:[%s2246_s25 + $0x210] sm:$0xff]  ;;  %v471_v35 = vpack.c.bf16 %v361_v22, %v359_v21  ;;  %570 = vmatpush.bf16.msra.mxu3 %v505_v24  ;;  %v382_v57 = vld [vmem:[%s2246_s25 + $0x1b8] sm:$0xff] }
  0x99   :  { %v423_v26 = vld [vmem:[%s2246_s25 + $0x300] sm:$0xff]  ;;  %v425_v27 = vld [vmem:[%s2246_s25 + $0x310] sm:$0xff]  ;;  %v487_v36 = vpack.c.bf16 %v393_v25, %v391_v23  ;;  %532 = vmatpush.bf16.msra.mxu0 %v455_v31  ;;  %v412_v58 = vld [vmem:[%s2246_s25 + $0x2a8] sm:$0xff]  ;;  %v482_v5 = vpack.c.bf16 %v382_v57, %v380_v56 }
  0x9a   :  { %v503_v39 = vpack.c.bf16 %v425_v27, %v423_v26  ;;  %545 = vmatpush.bf16.msra.mxu1 %v471_v35  ;;  %v216_v54 = vld [vmem:[%s2231_s13] sm:$0xff]  ;;  %v414_v59 = vld [vmem:[%s2246_s25 + $0x2b8] sm:$0xff]  ;;  %v444_v1 = vld [vmem:[%s2246_s25 + $0x3a8] sm:$0xff]  ;;  %s2992_s13 = sld [smem:[#allocation17_spill]] }
  0x9b   :  { %558 = vmatpush.bf16.msra.mxu2 %v487_v36  ;;  %v2514_v60 = vmul.f32 0.0078125, %v216_v54  ;;  %v446_v2 = vld [vmem:[%s2246_s25 + $0x3b8] sm:$0xff]  ;;  %v498_v6 = vpack.c.bf16 %v414_v59, %v412_v58  ;;  %v344_v7 = vld [vmem:[%s2246_s25 + $0x88] sm:$0xff]  ;;  %v263_v41 = vld [vmem:[%s2221_s5] sm:$0xff]  ;;  %s2990_s5 = sld [smem:[#allocation20_spill]] }
  0x9c   :  { %571 = vmatpush.bf16.msra.mxu3 %v503_v39  ;;  %v346_v8 = vld [vmem:[%s2246_s25 + $0x98] sm:$0xff]  ;;  %v376_v9 = vld [vmem:[%s2246_s25 + $0x188] sm:$0xff]  ;;  %v514_v10 = vpack.c.bf16 %v446_v2, %v444_v1 }
  0x9d   :  { %577 = vmatpush.bf16.msrb.mxu0 %v470_v40  ;;  %v220_v0 = vmul.f32 %v2514_v60, %v2514_v60  ;;  %v378_v11 = vld [vmem:[%s2246_s25 + $0x198] sm:$0xff]  ;;  %v408_v12 = vld [vmem:[%s2246_s25 + $0x288] sm:$0xff]  ;;  %v464_v17 = vpack.c.bf16 %v346_v8, %v344_v7  ;;  %v2209_v7 = vmov 857870592  }
  0x9e   :  { %590 = vmatpush.bf16.msrb.mxu1 %v486_v43  ;;  %v410_v13 = vld [vmem:[%s2246_s25 + $0x298] sm:$0xff]  ;;  %v440_v15 = vld [vmem:[%s2246_s25 + $0x388] sm:$0xff]  ;;  %v480_v19 = vpack.c.bf16 %v378_v11, %v376_v9  ;;  %v245_v8 = vunpack.c.l.s4 %v2209_v7 }
  0x9f   :  { %603 = vmatpush.bf16.msrb.mxu2 %v502_v44  ;;  %v222_v4 = vrot.slane %v220_v0, 7  ;;  %v442_v16 = vld [vmem:[%s2246_s25 + $0x398] sm:$0xff]  ;;  %v496_v20 = vpack.c.bf16 %v410_v13, %v408_v12  ;;  %v340_v28 = vld [vmem:[%s2246_s25 + $0x68] sm:$0xff] }
  0xa0   :  { %616 = vmatpush.bf16.msrb.mxu3 %v518_v48  ;;  %v512_v21 = vpack.c.bf16 %v442_v16, %v440_v15  ;;  %v342_v29 = vld [vmem:[%s2246_s25 + $0x78] sm:$0xff]  ;;  %v372_v30 = vld [vmem:[%s2246_s25 + $0x168] sm:$0xff]  ;;  %v217_v16 = vld [vmem:[%s2236_s17] sm:$0xf]  ;;  %s2993_s17 = sld [smem:[#allocation18_spill]] }
  0xa1   :  { %578 = vmatpush.bf16.msrb.mxu0 %v468_v55  ;;  %v224_v14 = vsub.f32 %v2514_v60, %v222_v4  ;;  %v462_v31 = vpack.c.bf16 %v342_v29, %v340_v28  ;;  %v374_v32 = vld [vmem:[%s2246_s25 + $0x178] sm:$0xff]  ;;  %v404_v33 = vld [vmem:[%s2246_s25 + $0x268] sm:$0xff]  ;;  %v2210_v29 = vmov 0  }
  0xa2   :  { %591 = vmatpush.bf16.msrb.mxu1 %v484_v61  ;;  %v406_v34 = vld [vmem:[%s2246_s25 + $0x278] sm:$0xff]  ;;  %v478_v36 = vpack.c.bf16 %v374_v32, %v372_v30  ;;  %v436_v38 = vld [vmem:[%s2246_s25 + $0x368] sm:$0xff] }
  0xa3   :  { %604 = vmatpush.bf16.msrb.mxu2 %v500_v62  ;;  %v225_v18 = vmax.f32 %v224_v14, 0.0  ;;  %v494_v37 = vpack.c.bf16 %v406_v34, %v404_v33  ;;  %v438_v39 = vld [vmem:[%s2246_s25 + $0x378] sm:$0xff]  ;;  %v336_v40 = vld [vmem:[%s2246_s25 + $0x48] sm:$0xff] }
  0xa4   :  { %617 = vmatpush.bf16.msrb.mxu3 %v516_v63  ;;  %v510_v42 = vpack.c.bf16 %v438_v39, %v436_v38  ;;  %v338_v43 = vld [vmem:[%s2246_s25 + $0x58] sm:$0xff]  ;;  %v368_v44 = vld [vmem:[%s2246_s25 + $0x148] sm:$0xff] }
  0xa5   :  { %579 = vmatpush.bf16.msrb.mxu0 %v466_v3  ;;  %v226_v22 = vadd.f32 1e-05, %v225_v18  ;;  %v370_v45 = vld [vmem:[%s2246_s25 + $0x158] sm:$0xff]  ;;  %v460_v47 = vpack.c.bf16 %v338_v43, %v336_v40  ;;  %v400_v49 = vld [vmem:[%s2246_s25 + $0x248] sm:$0xff] }
  0xa6   :  { %592 = vmatpush.bf16.msrb.mxu1 %v482_v5  ;;  %v476_v48 = vpack.c.bf16 %v370_v45, %v368_v44  ;;  %v402_v50 = vld [vmem:[%s2246_s25 + $0x258] sm:$0xff]  ;;  %v432_v51 = vld [vmem:[%s2246_s25 + $0x348] sm:$0xff] }
  0xa7   :  { %605 = vmatpush.bf16.msrb.mxu2 %v498_v6  ;;  %1991 = vrsqrt.f32 %v226_v22  ;;  %vm233_vm0 = vweird.f32 %v226_v22  ;;  %v492_v52 = vpack.c.bf16 %v402_v50, %v400_v49  ;;  %v434_v53 = vld [vmem:[%s2246_s25 + $0x358] sm:$0xff]  ;;  %v332_v54 = vld [vmem:[%s2246_s25 + $0x28] sm:$0xff] }
  0xa8   :  { %618 = vmatpush.bf16.msrb.mxu3 %v514_v10  ;;  %v334_v55 = vld [vmem:[%s2246_s25 + $0x38] sm:$0xff]  ;;  %v508_v57 = vpack.c.bf16 %v434_v53, %v432_v51  ;;  %v364_v58 = vld [vmem:[%s2246_s25 + $0x128] sm:$0xff] }
  0xa9   :  { %580 = vmatpush.bf16.msrb.mxu0 %v464_v17  ;;  %v366_v59 = vld [vmem:[%s2246_s25 + $0x138] sm:$0xff]  ;;  %v396_v61 = vld [vmem:[%s2246_s25 + $0x228] sm:$0xff]  ;;  %v458_v62 = vpack.c.bf16 %v334_v55, %v332_v54 }
  0xaa   :  { %593 = vmatpush.bf16.msrb.mxu1 %v480_v19  ;;  %v398_v63 = vld [vmem:[%s2246_s25 + $0x238] sm:$0xff]  ;;  %v428_v0 = vld [vmem:[%s2246_s25 + $0x328] sm:$0xff]  ;;  %v474_v2 = vpack.c.bf16 %v366_v59, %v364_v58  ;;  %v246_v19 = vunpack.c.0.s8 %v245_v8 }
  0xab   :  { %606 = vmatpush.bf16.msrb.mxu2 %v496_v20  ;;  %v430_v1 = vld [vmem:[%s2246_s25 + $0x338] sm:$0xff]  ;;  %v490_v3 = vpack.c.bf16 %v398_v63, %v396_v61  ;;  %v328_v4 = vld [vmem:[%s2246_s25 + $0x8] sm:$0xff] }
  0xac   :  { %619 = vmatpush.bf16.msrb.mxu3 %v512_v21  ;;  %v330_v5 = vld [vmem:[%s2246_s25 + $0x18] sm:$0xff]  ;;  %v360_v6 = vld [vmem:[%s2246_s25 + $0x108] sm:$0xff]  ;;  %v506_v9 = vpack.c.bf16 %v430_v1, %v428_v0 }
  0xad   :  { %v1992_v23 = vpop.eup %1991  ;;  %581 = vmatpush.bf16.msrb.mxu0 %v462_v31  ;;  %v362_v10 = vld [vmem:[%s2246_s25 + $0x118] sm:$0xff]  ;;  %v392_v11 = vld [vmem:[%s2246_s25 + $0x208] sm:$0xff]  ;;  %v456_v15 = vpack.c.bf16 %v330_v5, %v328_v4 }
  0xae   :  { %v228_v24 = vmul.f32 %v1992_v23, %v226_v22  ;;  %vm234_vm1 = vweird.f32 %v1992_v23  ;;  %594 = vmatpush.bf16.msrb.mxu1 %v478_v36  ;;  %v394_v12 = vld [vmem:[%s2246_s25 + $0x218] sm:$0xff]  ;;  %v424_v13 = vld [vmem:[%s2246_s25 + $0x308] sm:$0xff]  ;;  %v472_v17 = vpack.c.bf16 %v362_v10, %v360_v6  ;;  %v264_v22 = vld [vmem:[%s2226_s9] sm:$0xff]  ;;  %s2991_s9 = sld [smem:[#allocation16_spill]] }
  0xaf   :  { %vm2529_vm2 = vmor %vm233_vm0, %vm234_vm1  ;;  %607 = vmatpush.bf16.msrb.mxu2 %v494_v37  ;;  %v426_v14 = vld [vmem:[%s2246_s25 + $0x318] sm:$0xff]  ;;  %v488_v18 = vpack.c.bf16 %v394_v12, %v392_v11  ;;  %v519_v12 = vld [vmem:[%s2251_s29] sm:$0x3]  ;;  %s2995_s25 = sld [smem:[#allocation22_spill]] }
  0xb0   :  { %v229_v25 = vmul.f32 %v1992_v23, %v228_v24  ;;  %620 = vmatpush.bf16.msrb.mxu3 %v510_v42  ;;  %v504_v20 = vpack.c.bf16 %v426_v14, %v424_v13  ;;  %v521_v13 = vperm.slane %v519_v12, 0  ;;  %v2211_v14 = vmov 2.0   ;;  %s2996_s29 = sld [smem:[#allocation23_spill]] }
  0xb1   :  { %582 = vmatpush.bf16.msrb.mxu0 %v460_v47  ;;  %1993 = vrcp.f32 %v2211_v14  ;;  %v720_v14 = vld [vmem:[#allocation2 + $0x20] sm:$0xff] }
  0xb2   :  { %v230_v27 = vmul.f32 0.5, %v229_v25  ;;  %595 = vmatpush.bf16.msrb.mxu1 %v476_v48 }
  0xb3   :  { %608 = vmatpush.bf16.msrb.mxu2 %v492_v52 }
  0xb4   :  { %v231_v35 = vsub.f32 1.5, %v230_v27  ;;  %621 = vmatpush.bf16.msrb.mxu3 %v508_v57 }
  0xb5   :  { %583 = vmatpush.bf16.msrb.mxu0 %v458_v62 }
  0xb6   :  { %v232_v46 = vmul.f32 %v1992_v23, %v231_v35  ;;  %596 = vmatpush.bf16.msrb.mxu1 %v474_v2 }
  0xb7   :  { %609 = vmatpush.bf16.msrb.mxu2 %v490_v3 }
  0xb8   :  { %v236_v56 = vsel %vm2529_vm2, %v1992_v23, %v232_v46  ;;  %622 = vmatpush.bf16.msrb.mxu3 %v506_v9 }
  0xb9   :  { %238 = vst [vmem:[#allocation1] sm:$0xff] %v236_v56  ;;  %584 = vmatpush.bf16.msrb.mxu0 %v456_v15 }
  0xba   :  { %275 = vst [vmem:[#allocation1] ss:$4 sm:$0xff] %v263_v41  ;;  %597 = vmatpush.bf16.msrb.mxu1 %v472_v17  ;;  %v218_v41 = vld [vmem:[%s2241_s21] sm:$0xf]  ;;  %s2994_s21 = sld [smem:[#allocation21_spill]] }
  0xbb   :  { %610 = vmatpush.bf16.msrb.mxu2 %v488_v18  ;;  %v1994_v18 = vpop.eup %1993 }
  0xbc   :  { %623 = vmatpush.bf16.msrb.mxu3 %v504_v20  ;;  %v644_v20 = vmul.f32 2.0, %v1994_v18  ;;  %vm648_vm11 = vweird.f32 %v1994_v18 }
  0xc0   :  { %v240_v21 = vld [vmem:[#allocation1 + $0x1] ss:$2 sm:$0xff] }
  0xc1   :  { %v242_v23 = vmul.f32 %v240_v21, %v217_v16  ;;  %v276_v24 = vld.sshfl [vmem:[#allocation1] sm:$0xff pattern:$0x73625140]  ;;  %v277_v25 = vld.sshfl [vmem:[#allocation1 + $0x8] sm:$0xff pattern:$0x73625140] }
  0xc2   :  { %v278_v26 = vld.sshfl [vmem:[#allocation1 + $0x10] sm:$0xff pattern:$0x73625140]  ;;  %v279_v27 = vld.sshfl [vmem:[#allocation1 + $0x18] sm:$0xff pattern:$0x73625140] }
  0xc3   :  { %v247_v28 = vperm.slane %v242_v23, %v246_v19  ;;  %vm262_vm3 = vcmp.ge.f32.partialorder %v242_v23, 0.0  ;;  %285 = vst [vmem:[#allocation1] ss:$4 sm:$0xff] %v264_v22  ;;  %v298_v35 = vperm.slane %v242_v23, 0  ;;  %v299_v40 = vperm.slane %v242_v23, 1 }
  0xc4   :  { %v265_v30 = vsel %vm262_vm3, 1, %v2210_v29  ;;  %v301_v44 = vperm.slane %v242_v23, 3  ;;  %v731_v29 = vld [vmem:[#allocation2 + $0x78] sm:$0xff] }
  0xc5   :  { %v249_v31 = vmul.f32 %v247_v28, %v2514_v60  ;;  %v266_v32 = vperm.slane %v265_v30, 0  ;;  %v267_v33 = vperm.slane %v265_v30, 1  ;;  %v268_v34 = vperm.slane %v265_v30, 2  ;;  %v730_v28 = vld [vmem:[#allocation2 + $0x70] sm:$0xff] }
  0xc6   :  { %v269_v36 = vperm.slane %v265_v30, 3  ;;  %v300_v60 = vperm.slane %v242_v23, 2  ;;  %v755_v30 = vpack.c.bf16 %v731_v29, %v730_v28  ;;  %v719_v28 = vld [vmem:[#allocation2 + $0x18] sm:$0xff]  ;;  %v742_v29 = vld [vmem:[#allocation2 + $0xd0] sm:$0xff] }
  0xc7   :  { %v251_v37 = vrot.slane %v249_v31, 1  ;;  %v252_v38 = vrot.slane %v249_v31, 2  ;;  %v253_v39 = vrot.slane %v249_v31, 3  ;;  %vm2572_vm7 = vcmp.eq.s32.totalorder %v266_v32, 1 }
  0xc8   :  { %vm2576_vm8 = vcmp.eq.s32.totalorder %v267_v33, 1  ;;  %vm2581_vm9 = vcmp.eq.s32.totalorder %v268_v34, 1  ;;  %vm2585_vm10 = vcmp.eq.s32.totalorder %v269_v36, 1  ;;  %v522_v33 = vperm.slane %v519_v12, 1  ;;  %v729_v36 = vld [vmem:[#allocation2 + $0x68] sm:$0xff] }
  0xc9   :  { %v255_v45 = vsel %vm254_vm4, %v249_v31, %v251_v37  ;;  %v257_v46 = vsel %vm256_vm5, %v252_v38, %v253_v39 }
  0xca   :  { %v259_v49 = vsel %vm258_vm6, %v255_v45, %v257_v46  ;;  %v286_v50 = vld.sshfl [vmem:[#allocation1] sm:$0xff pattern:$0x73625140]  ;;  %v287_v51 = vld.sshfl [vmem:[#allocation1 + $0x8] sm:$0xff pattern:$0x73625140] }
  0xcb   :  { %v261_v52 = vsub.f32 %v218_v41, %v259_v49  ;;  %v294_v53 = vsel %vm2572_vm7, %v276_v24, %v286_v50  ;;  %v295_v54 = vsel %vm2576_vm8, %v277_v25, %v287_v51  ;;  %v288_v55 = vld.sshfl [vmem:[#allocation1 + $0x10] sm:$0xff pattern:$0x73625140]  ;;  %v289_v56 = vld.sshfl [vmem:[#allocation1 + $0x18] sm:$0xff pattern:$0x73625140] }
  0xcc   :  { %v306_v57 = vmul.f32 %v298_v35, %v294_v53  ;;  %v307_v58 = vmul.f32 %v299_v40, %v295_v54  ;;  %v296_v59 = vsel %vm2581_vm9, %v278_v26, %v288_v55  ;;  %v297_v61 = vsel %vm2585_vm10, %v279_v27, %v289_v56  ;;  %v728_v35 = vld [vmem:[#allocation2 + $0x60] sm:$0xff]  ;;  %v726_v45 = vld [vmem:[#allocation2 + $0x50] sm:$0xff]  ;;  %v727_v46 = vld [vmem:[#allocation2 + $0x58] sm:$0xff] }
  0xcd   :  { %v311_v62 = vperm.slane %v261_v52, 0  ;;  %v312_v63 = vperm.slane %v261_v52, 1  ;;  %v308_v0 = vmul.f32 %v300_v60, %v296_v59  ;;  %v313_v1 = vperm.slane %v261_v52, 2  ;;  %v725_v53 = vld [vmem:[#allocation2 + $0x48] sm:$0xff] }
  0xce   :  { %v309_v2 = vmul.f32 %v301_v44, %v297_v61  ;;  %v314_v3 = vperm.slane %v261_v52, 3  ;;  %v645_v27 = vsub.f32 1.0, %v644_v20  ;;  %v754_v40 = vpack.c.bf16 %v729_v36, %v728_v35  ;;  %v724_v52 = vld [vmem:[#allocation2 + $0x40] sm:$0xff] }
  0xcf   :  { %v319_v4 = vadd.f32 %v311_v62, %v306_v57  ;;  %v320_v5 = vadd.f32 %v312_v63, %v307_v58  ;;  %v321_v6 = vadd.f32 %v313_v1, %v308_v0  ;;  %v753_v48 = vpack.c.bf16 %v727_v46, %v726_v45  ;;  %v722_v0 = vld [vmem:[#allocation2 + $0x30] sm:$0xff]  ;;  %v723_v1 = vld [vmem:[#allocation2 + $0x38] sm:$0xff] }
  0xd0   :  { %v322_v7 = vadd.f32 %v314_v3, %v309_v2  ;;  %v646_v34 = vmul.f32 %v1994_v18, %v645_v27  ;;  %v752_v57 = vpack.c.bf16 %v725_v53, %v724_v52  ;;  %v746_v2 = vld [vmem:[#allocation2 + $0xf0] sm:$0xff] }
  0xd1   :  { %v2598_v8 = vpack.c.bf16 %v319_v4, %v319_v4  ;;  %v2600_v9 = vpack.c.bf16 %v320_v5, %v320_v5  ;;  %v2602_v10 = vpack.c.bf16 %v321_v6, %v321_v6  ;;  %v751_v4 = vpack.c.bf16 %v723_v1, %v722_v0  ;;  %v747_v5 = vld [vmem:[#allocation2 + $0xf8] sm:$0xff]  ;;  %v718_v27 = vld [vmem:[#allocation2 + $0x10] sm:$0xff] }
  0xd2   :  { %v2604_v11 = vpack.c.bf16 %v322_v7, %v322_v7  ;;  %v647_v44 = vadd.f32 %v1994_v18, %v646_v34  ;;  %v763_v7 = vpack.c.bf16 %v747_v5, %v746_v2  ;;  %v738_v46 = vld [vmem:[#allocation2 + $0xb0] sm:$0xff]  ;;  %v733_v2 = vld [vmem:[#allocation2 + $0x88] sm:$0xff] }
  0xd3   :  { %533 = vmatmul.bf16.vlgmr.msra.gmra.mxu0 %v2598_v8  ;;  %546 = vmatmul.bf16.vlgmr.msra.gmra.mxu1 %v2600_v9 }
  0xd4   :  { %559 = vmatmul.bf16.vlgmr.msra.gmra.mxu2 %v2602_v10  ;;  %572 = vmatmul.bf16.vlgmr.msra.gmra.mxu3 %v2604_v11  ;;  %v2616_v51 = vsel %vm648_vm11, %v1994_v18, %v647_v44 }
  0xd5   :  { %768 = vmatpush.bf16.msra.mxu0 %v755_v30  ;;  %781 = vmatpush.bf16.msra.mxu1 %v763_v7 }
  0xd9   :  { %769 = vmatpush.bf16.msra.mxu0 %v754_v40 }
  0xdd   :  { %770 = vmatpush.bf16.msra.mxu0 %v753_v48 }
  0xe1   :  { %771 = vmatpush.bf16.msra.mxu0 %v752_v57 }
  0xe3   :  { %585 = vmatmul.bf16.vlgmr.msrb.gmra.mxu0 %v2598_v8  ;;  %598 = vmatmul.bf16.vlgmr.msrb.gmra.mxu1 %v2600_v9 }
  0xe4   :  { %611 = vmatmul.bf16.vlgmr.msrb.gmra.mxu2 %v2602_v10  ;;  %624 = vmatmul.bf16.vlgmr.msrb.gmra.mxu3 %v2604_v11 }
  0xe5   :  { %772 = vmatpush.bf16.msra.mxu0 %v751_v4 }
 0x150   :  { %v534_v15 = vpop.f32.mrf.mxu0  ;;  %v547_v16 = vpop.f32.mrf.mxu1 }
 0x151   :  { %v535_v17 = vadd.f32 %v534_v15, %v521_v13  ;;  %v721_v15 = vld [vmem:[#allocation2 + $0x28] sm:$0xff] }
 0x153   :  { %v548_v19 = vadd.f32 %v547_v16, %v535_v17  ;;  %v744_v16 = vld [vmem:[#allocation2 + $0xe0] sm:$0xff] }
 0x157   :  { %v560_v21 = vpop.f32.mrf.mxu2  ;;  %v573_v22 = vpop.f32.mrf.mxu3 }
 0x158   :  { %v561_v23 = vadd.f32 %v560_v21, %v548_v19  ;;  %v536_v24 = vpop.f32.mrf.mxu0  ;;  %v549_v25 = vpop.f32.mrf.mxu1  ;;  %v750_v21 = vpack.c.bf16 %v721_v15, %v720_v14 }
 0x15a   :  { %v574_v26 = vadd.f32 %v573_v22, %v561_v23  ;;  %v745_v22 = vld [vmem:[#allocation2 + $0xe8] sm:$0xff]  ;;  %773 = vmatpush.bf16.msra.mxu0 %v750_v21  ;;  %v704_v21 = vld [vmem:[%s2261_s8] sm:$0x3]  ;;  %s2998_s8 = sld [smem:[#allocation25_spill]] }
 0x15b   :  { %v762_v24 = vpack.c.bf16 %v745_v22, %v744_v16 }
 0x15c   :  { %v629_v31 = vsel %vm258_vm6, %v574_v26, 0.0 }
 0x15d   :  { %v630_v32 = vrot.slane %v629_v31, 4  ;;  %782 = vmatpush.bf16.msra.mxu1 %v762_v24 }
 0x15f   :  { %v631_v37 = vadd.f32 %v630_v32, %v629_v31  ;;  %v562_v38 = vpop.f32.mrf.mxu2  ;;  %v575_v39 = vpop.f32.mrf.mxu3  ;;  %v749_v31 = vpack.c.bf16 %v719_v28, %v718_v27  ;;  %v743_v32 = vld [vmem:[#allocation2 + $0xd8] sm:$0xff] }
 0x160   :  { %v586_v41 = vpop.f32.mrf.mxu0  ;;  %v599_v42 = vpop.f32.mrf.mxu1  ;;  %v761_v34 = vpack.c.bf16 %v743_v32, %v742_v29  ;;  %v717_v38 = vld [vmem:[#allocation2 + $0x8] sm:$0xff]  ;;  %v740_v39 = vld [vmem:[#allocation2 + $0xc0] sm:$0xff] }
 0x161   :  { %v632_v43 = vrot.slane %v631_v37, 2  ;;  %v587_v60 = vadd.f32 %v586_v41, %v522_v33  ;;  %774 = vmatpush.bf16.msra.mxu0 %v749_v31 }
 0x162   :  { %783 = vmatpush.bf16.msra.mxu1 %v761_v34 }
 0x163   :  { %v633_v47 = vadd.f32 %v632_v43, %v631_v37  ;;  %v600_v49 = vadd.f32 %v599_v42, %v587_v60  ;;  %v716_v37 = vld [vmem:[#allocation2] sm:$0xff]  ;;  %v741_v42 = vld [vmem:[#allocation2 + $0xc8] sm:$0xff] }
 0x164   :  { %v748_v41 = vpack.c.bf16 %v717_v38, %v716_v37  ;;  %v760_v60 = vpack.c.bf16 %v741_v42, %v740_v39  ;;  %v707_v39 = vperm.slane %v704_v21, 1 }
 0x165   :  { %v634_v50 = vrot.slane %v633_v47, 1 }
 0x166   :  { %775 = vmatpush.bf16.msra.mxu0 %v748_v41  ;;  %784 = vmatpush.bf16.msra.mxu1 %v760_v60  ;;  %v851_v60 = vld [vmem:[#allocation5 + $0x78] sm:$0xff] }
 0x167   :  { %v635_v54 = vadd.f32 %v634_v50, %v633_v47  ;;  %v612_v55 = vpop.f32.mrf.mxu2  ;;  %v625_v56 = vpop.f32.mrf.mxu3  ;;  %v739_v47 = vld [vmem:[#allocation2 + $0xb8] sm:$0xff] }
 0x168   :  { %v613_v58 = vadd.f32 %v612_v55, %v600_v49  ;;  %v588_v59 = vpop.f32.mrf.mxu0  ;;  %v601_v61 = vpop.f32.mrf.mxu1  ;;  %v759_v49 = vpack.c.bf16 %v739_v47, %v738_v46  ;;  %v737_v55 = vld [vmem:[#allocation2 + $0xa8] sm:$0xff] }
 0x169   :  { %v650_v62 = vmul.f32 %v2616_v51, %v635_v54  ;;  %v736_v54 = vld [vmem:[#allocation2 + $0xa0] sm:$0xff]  ;;  %v734_v61 = vld [vmem:[#allocation2 + $0x90] sm:$0xff]  ;;  %v849_v46 = vld [vmem:[#allocation5 + $0x68] sm:$0xff] }
 0x16a   :  { %v626_v63 = vadd.f32 %v625_v56, %v613_v58  ;;  %785 = vmatpush.bf16.msra.mxu1 %v759_v49  ;;  %v758_v57 = vpack.c.bf16 %v737_v55, %v736_v54  ;;  %v846_v49 = vld [vmem:[#allocation5 + $0x50] sm:$0xff]  ;;  %v845_v54 = vld [vmem:[#allocation5 + $0x48] sm:$0xff] }
 0x16b   :  { %v2619_v3 = vsub.f32 %v574_v26, %v650_v62  ;;  %v735_v62 = vld [vmem:[#allocation2 + $0x98] sm:$0xff] }
 0x16c   :  { %v636_v6 = vsel %vm258_vm6, %v626_v63, 0.0  ;;  %v757_v0 = vpack.c.bf16 %v735_v62, %v734_v61  ;;  %v843_v61 = vld [vmem:[#allocation5 + $0x38] sm:$0xff] }
 0x16d   :  { %v654_v12 = vmul.f32 %v2619_v3, %v2619_v3  ;;  %v637_v13 = vrot.slane %v636_v6, 4 }
 0x16e   :  { %786 = vmatpush.bf16.msra.mxu1 %v758_v57  ;;  %v907_v57 = vld [vmem:[%s2990_s5 + $0xf0] sm:$0xff] }
 0x16f   :  { %v656_v17 = vsel %vm258_vm6, %v654_v12, 0.0  ;;  %v638_v18 = vadd.f32 %v637_v13, %v636_v6  ;;  %v614_v19 = vpop.f32.mrf.mxu2  ;;  %v627_v20 = vpop.f32.mrf.mxu3 }
 0x170   :  { %v657_v23 = vrot.slane %v656_v17, 4 }
 0x171   :  { %v639_v25 = vrot.slane %v638_v18, 2 }
 0x172   :  { %v658_v26 = vadd.f32 %v657_v23, %v656_v17  ;;  %787 = vmatpush.bf16.msra.mxu1 %v757_v0 }
 0x173   :  { %v640_v30 = vadd.f32 %v639_v25, %v638_v18  ;;  %v696_v18 = vld [vmem:[%s2256_s3] sm:$0x3]  ;;  %v706_v25 = vperm.slane %v704_v21, 0  ;;  %s2997_s3 = sld [smem:[#allocation24_spill]] }
 0x174   :  { %v659_v33 = vrot.slane %v658_v26, 2  ;;  %v698_v22 = vperm.slane %v696_v18, 0 }
 0x175   :  { %v641_v35 = vrot.slane %v640_v30, 1 }
 0x176   :  { %v660_v36 = vadd.f32 %v659_v33, %v658_v26 }
 0x177   :  { %v642_v40 = vadd.f32 %v641_v35, %v640_v30 }
 0x178   :  { %v661_v43 = vrot.slane %v660_v36, 1 }
 0x179   :  { %v651_v44 = vmul.f32 %v2616_v51, %v642_v40 }
 0x17a   :  { %v662_v45 = vadd.f32 %v661_v43, %v660_v36  ;;  %v699_v36 = vperm.slane %v696_v18, 1  ;;  %v850_v43 = vld [vmem:[#allocation5 + $0x70] sm:$0xff] }
 0x17b   :  { %v653_v48 = vsub.f32 %v626_v63, %v651_v44  ;;  %v732_v63 = vld [vmem:[#allocation2 + $0x80] sm:$0xff]  ;;  %v859_v44 = vpack.c.bf16 %v851_v60, %v850_v43  ;;  %v838_v18 = vld [vmem:[#allocation5 + $0x10] sm:$0xff]  ;;  %v889_v60 = vld [vmem:[%s2990_s5 + $0x60] sm:$0xff] }
 0x17c   :  { %v670_v50 = vmul.f32 %v662_v45, %v2616_v51  ;;  %v756_v6 = vpack.c.bf16 %v733_v2, %v732_v63  ;;  %v848_v45 = vld [vmem:[#allocation5 + $0x60] sm:$0xff]  ;;  %v903_v63 = vld [vmem:[%s2990_s5 + $0xd0] sm:$0xff]  ;;  %v1983_v2 = vld [vmem:[%s2991_s9] ss:$0 sm:$0xff] }
 0x17d   :  { %v655_v52 = vmul.f32 %v653_v48, %v653_v48  ;;  %864 = vmatpush.bf16.msra.mxu2 %v859_v44  ;;  %v858_v47 = vpack.c.bf16 %v849_v46, %v848_v45  ;;  %v891_v44 = vld [vmem:[%s2990_s5 + $0x70] sm:$0xff]  ;;  %v929_v45 = vld [vmem:[%s2990_s5 + $0x1a0] sm:$0xff] }
 0x17e   :  { %v672_v53 = vadd.f32 1e-05, %v670_v50  ;;  %788 = vmatpush.bf16.msra.mxu1 %v756_v6  ;;  %v847_v50 = vld [vmem:[#allocation5 + $0x58] sm:$0xff]  ;;  %v841_v6 = vld [vmem:[#allocation5 + $0x28] sm:$0xff]  ;;  %v1011_v46 = vpack.c.bf16 %v891_v44, %v889_v60 }
 0x17f   :  { %v663_v56 = vsel %vm258_vm6, %v655_v52, 0.0  ;;  %v913_v44 = vld [vmem:[%s2990_s5 + $0x120] sm:$0xff] }
 0x180   :  { %1995 = vrsqrt.f32 %v672_v53  ;;  %v664_v58 = vrot.slane %v663_v56, 4  ;;  %vm680_vm13 = vweird.f32 %v672_v53 }
 0x181   :  { %865 = vmatpush.bf16.msra.mxu2 %v858_v47  ;;  %v931_v47 = vld [vmem:[%s2990_s5 + $0x1b0] sm:$0xff] }
 0x182   :  { %v665_v59 = vadd.f32 %v664_v58, %v663_v56  ;;  %v905_v56 = vld [vmem:[%s2990_s5 + $0xe0] sm:$0xff] }
 0x183   :  { %v1019_v58 = vpack.c.bf16 %v907_v57, %v905_v56  ;;  %v999_v56 = vld [vmem:[%s2990_s5 + $0x3d0] sm:$0xff] }
 0x184   :  { %v666_v1 = vrot.slane %v665_v59, 2 }
 0x185   :  { %1075 = vmatpush.bf16.msra.mxu3 %v1019_v58 }
 0x186   :  { %v1996_v4 = vpop.eup %1995  ;;  %v667_v5 = vadd.f32 %v666_v1, %v665_v59  ;;  %v842_v59 = vld [vmem:[#allocation5 + $0x30] sm:$0xff]  ;;  %v901_v1 = vld [vmem:[%s2990_s5 + $0xc0] sm:$0xff] }
 0x187   :  { %v675_v7 = vmul.f32 %v1996_v4, %v672_v53  ;;  %vm681_vm12 = vweird.f32 %v1996_v4  ;;  %v844_v53 = vld [vmem:[#allocation5 + $0x40] sm:$0xff]  ;;  %v855_v0 = vpack.c.bf16 %v843_v61, %v842_v59  ;;  %v885_v59 = vld [vmem:[%s2990_s5 + $0x40] sm:$0xff]  ;;  %v887_v61 = vld [vmem:[%s2990_s5 + $0x50] sm:$0xff] }
 0x188   :  { %v668_v12 = vrot.slane %v667_v5, 1  ;;  %vm682_vm14 = vmor %vm680_vm13, %vm681_vm12  ;;  %v856_v55 = vpack.c.bf16 %v845_v54, %v844_v53  ;;  %v963_v53 = vld [vmem:[%s2990_s5 + $0x2b0] sm:$0xff]  ;;  %v997_v54 = vld [vmem:[%s2990_s5 + $0x3c0] sm:$0xff] }
 0x189   :  { %v676_v13 = vmul.f32 %v1996_v4, %v675_v7  ;;  %v1065_v58 = vpack.c.bf16 %v999_v56, %v997_v54  ;;  %v981_v54 = vld [vmem:[%s2990_s5 + $0x340] sm:$0xff] }
 0x18a   :  { %v669_v14 = vadd.f32 %v668_v12, %v667_v5  ;;  %v840_v5 = vld [vmem:[#allocation5 + $0x20] sm:$0xff]  ;;  %v897_v12 = vld [vmem:[%s2990_s5 + $0xa0] sm:$0xff] }
 0x18b   :  { %v677_v15 = vmul.f32 0.5, %v676_v13  ;;  %v854_v7 = vpack.c.bf16 %v841_v6, %v840_v5  ;;  %v899_v13 = vld [vmem:[%s2990_s5 + $0xb0] sm:$0xff]  ;;  %v993_v6 = vld [vmem:[%s2990_s5 + $0x3a0] sm:$0xff] }
 0x18c   :  { %v671_v16 = vmul.f32 %v669_v14, %v2616_v51  ;;  %v937_v14 = vld [vmem:[%s2990_s5 + $0x1e0] sm:$0xff]  ;;  %v959_v5 = vld [vmem:[%s2990_s5 + $0x290] sm:$0xff] }
 0x18d   :  { %v678_v17 = vsub.f32 1.5, %v677_v15 }
 0x18e   :  { %v673_v19 = vadd.f32 1e-05, %v671_v16  ;;  %v1015_v16 = vpack.c.bf16 %v899_v13, %v897_v12  ;;  %v995_v12 = vld [vmem:[%s2990_s5 + $0x3b0] sm:$0xff] }
 0x18f   :  { %v679_v20 = vmul.f32 %v1996_v4, %v678_v17  ;;  %v939_v17 = vld [vmem:[%s2990_s5 + $0x1f0] sm:$0xff] }
 0x190   :  { %1997 = vrsqrt.f32 %v673_v19  ;;  %vm690_vm0 = vweird.f32 %v673_v19  ;;  %v1035_v21 = vpack.c.bf16 %v939_v17, %v937_v14  ;;  %v1063_v14 = vpack.c.bf16 %v995_v12, %v993_v6  ;;  %v921_v17 = vld [vmem:[%s2990_s5 + $0x160] sm:$0xff] }
 0x191   :  { %v683_v23 = vsel %vm682_vm14, %v1996_v4, %v679_v20  ;;  %v1017_v4 = vpack.c.bf16 %v903_v63, %v901_v1  ;;  %v927_v1 = vld [vmem:[%s2990_s5 + $0x190] sm:$0xff]  ;;  %v941_v6 = vld [vmem:[%s2990_s5 + $0x200] sm:$0xff] }
 0x192   :  { %v694_v24 = vmul.f32 %v683_v23, %v2619_v3  ;;  %v969_v23 = vld [vmem:[%s2990_s5 + $0x2e0] sm:$0xff]  ;;  %1088 = vmatpush.bf16.msrb.mxu0 %v1035_v21 }
 0x193   :  { %1076 = vmatpush.bf16.msra.mxu3 %v1017_v4  ;;  %v957_v4 = vld [vmem:[%s2990_s5 + $0x280] sm:$0xff] }
 0x194   :  { %v702_v26 = vmul.f32 %v698_v22, %v694_v24  ;;  %v971_v24 = vld [vmem:[%s2990_s5 + $0x2f0] sm:$0xff] }
 0x196   :  { %v1998_v27 = vpop.eup %1997  ;;  %v710_v28 = vadd.f32 %v706_v25, %v702_v26  ;;  %v1051_v26 = vpack.c.bf16 %v971_v24, %v969_v23  ;;  %v955_v23 = vld [vmem:[%s2990_s5 + $0x270] sm:$0xff]  ;;  %v989_v24 = vld [vmem:[%s2990_s5 + $0x380] sm:$0xff] }
 0x197   :  { %v685_v29 = vmul.f32 %v1998_v27, %v673_v19  ;;  %vm691_vm15 = vweird.f32 %v1998_v27  ;;  %v839_v19 = vld [vmem:[#allocation5 + $0x18] sm:$0xff]  ;;  %1077 = vmatpush.bf16.msra.mxu3 %v1015_v16  ;;  %v883_v16 = vld [vmem:[%s2990_s5 + $0x30] sm:$0xff] }
 0x198   :  { %v712_v30 = vmax.f32 %v710_v28, 0.0  ;;  %vm692_vm1 = vmor %vm690_vm0, %vm691_vm15  ;;  %v853_v22 = vpack.c.bf16 %v839_v19, %v838_v18  ;;  %v895_v28 = vld [vmem:[%s2990_s5 + $0x90] sm:$0xff]  ;;  %1101 = vmatpush.bf16.msrb.mxu1 %v1051_v26 }
 0x199   :  { %v686_v31 = vmul.f32 %v1998_v27, %v685_v29  ;;  %v933_v29 = vld [vmem:[%s2990_s5 + $0x1c0] sm:$0xff]  ;;  %v923_v19 = vld [vmem:[%s2990_s5 + $0x170] sm:$0xff] }
 0x19a   :  { %v714_v32 = vpack.c.bf16 %v712_v30, %v712_v30  ;;  %v1027_v21 = vpack.c.bf16 %v923_v19, %v921_v17  ;;  %v970_v17 = vld [vmem:[%s2990_s5 + $0x2e8] sm:$0xff]  ;;  %v972_v19 = vld [vmem:[%s2990_s5 + $0x2f8] sm:$0xff] }
 0x19b   :  { %v687_v33 = vmul.f32 0.5, %v686_v31 }
 0x19c   :  { %776 = vmatmul.bf16.vlgmr.msra.gmra.mxu0 %v714_v32  ;;  %v935_v32 = vld [vmem:[%s2990_s5 + $0x1d0] sm:$0xff] }
 0x19d   :  { %v688_v34 = vsub.f32 1.5, %v687_v33  ;;  %v836_v33 = vld [vmem:[#allocation5] sm:$0xff] }
 0x19f   :  { %v689_v35 = vmul.f32 %v1998_v27, %v688_v34  ;;  %v837_v34 = vld [vmem:[#allocation5 + $0x8] sm:$0xff] }
 0x1a1   :  { %v693_v37 = vsel %vm692_vm1, %v1998_v27, %v689_v35  ;;  %v893_v27 = vld [vmem:[%s2990_s5 + $0x80] sm:$0xff] }
 0x1a2   :  { %v695_v38 = vmul.f32 %v693_v37, %v653_v48  ;;  %v857_v48 = vpack.c.bf16 %v847_v50, %v846_v49  ;;  %v1013_v31 = vpack.c.bf16 %v895_v28, %v893_v27  ;;  %v852_v37 = vpack.c.bf16 %v837_v34, %v836_v33  ;;  %v991_v27 = vld [vmem:[%s2990_s5 + $0x390] sm:$0xff] }
 0x1a3   :  { %v919_v34 = vld [vmem:[%s2990_s5 + $0x150] sm:$0xff] }
 0x1a4   :  { %v703_v3 = vmul.f32 %v699_v36, %v695_v38  ;;  %866 = vmatpush.bf16.msra.mxu2 %v857_v48  ;;  %v1033_v36 = vpack.c.bf16 %v935_v32, %v933_v29  ;;  %v965_v38 = vld [vmem:[%s2990_s5 + $0x2c0] sm:$0xff]  ;;  %1078 = vmatpush.bf16.msra.mxu3 %v1013_v31  ;;  %v1061_v29 = vpack.c.bf16 %v991_v27, %v989_v24  ;;  %v879_v31 = vld [vmem:[%s2990_s5 + $0x10] sm:$0xff]  ;;  %v936_v27 = vld [vmem:[%s2990_s5 + $0x1d8] sm:$0xff] }
 0x1a5   :  { %v961_v48 = vld [vmem:[%s2990_s5 + $0x2a0] sm:$0xff] }
 0x1a6   :  { %v711_v40 = vadd.f32 %v707_v39, %v703_v3  ;;  %v967_v39 = vld [vmem:[%s2990_s5 + $0x2d0] sm:$0xff]  ;;  %v1001_v3 = vld [vmem:[%s2990_s5 + $0x3e0] sm:$0xff]  ;;  %1089 = vmatpush.bf16.msrb.mxu0 %v1033_v36  ;;  %v908_v36 = vld [vmem:[%s2990_s5 + $0xf8] sm:$0xff] }
 0x1a7   :  { %v917_v32 = vld [vmem:[%s2990_s5 + $0x140] sm:$0xff] }
 0x1a8   :  { %v713_v41 = vmax.f32 %v711_v40, 0.0  ;;  %867 = vmatpush.bf16.msra.mxu2 %v856_v55  ;;  %v1049_v40 = vpack.c.bf16 %v967_v39, %v965_v38  ;;  %1079 = vmatpush.bf16.msra.mxu3 %v1011_v46  ;;  %v1047_v55 = vpack.c.bf16 %v963_v53, %v961_v48  ;;  %v949_v39 = vld [vmem:[%s2990_s5 + $0x240] sm:$0xff]  ;;  %v947_v53 = vld [vmem:[%s2990_s5 + $0x230] sm:$0xff] }
 0x1a9   :  { %v945_v48 = vld [vmem:[%s2990_s5 + $0x220] sm:$0xff] }
 0x1aa   :  { %v715_v42 = vpack.c.bf16 %v713_v41, %v713_v41  ;;  %v1003_v41 = vld [vmem:[%s2990_s5 + $0x3f0] sm:$0xff]  ;;  %1102 = vmatpush.bf16.msrb.mxu1 %v1049_v40  ;;  %v985_v40 = vld [vmem:[%s2990_s5 + $0x360] sm:$0xff]  ;;  %v1039_v56 = vpack.c.bf16 %v947_v53, %v945_v48  ;;  %v960_v48 = vld [vmem:[%s2990_s5 + $0x298] sm:$0xff] }
 0x1ab   :  { %v1067_v43 = vpack.c.bf16 %v1003_v41, %v1001_v3  ;;  %v951_v3 = vld [vmem:[%s2990_s5 + $0x250] sm:$0xff] }
 0x1ac   :  { %789 = vmatmul.bf16.vlgmr.msra.gmra.mxu1 %v715_v42  ;;  %868 = vmatpush.bf16.msra.mxu2 %v855_v0  ;;  %v1009_v0 = vpack.c.bf16 %v887_v61, %v885_v59  ;;  %v1041_v41 = vpack.c.bf16 %v951_v3, %v949_v39  ;;  %v909_v59 = vld [vmem:[%s2990_s5 + $0x100] sm:$0xff]  ;;  %v911_v61 = vld [vmem:[%s2990_s5 + $0x110] sm:$0xff]  ;;  %v930_v39 = vld [vmem:[%s2990_s5 + $0x1a8] sm:$0xff] }
 0x1ae   :  { %1103 = vmatpush.bf16.msrb.mxu1 %v1047_v55  ;;  %1080 = vmatpush.bf16.msra.mxu3 %v1009_v0  ;;  %v1021_v0 = vpack.c.bf16 %v911_v61, %v909_v59  ;;  %v924_v59 = vld [vmem:[%s2990_s5 + $0x178] sm:$0xff]  ;;  %v954_v61 = vld [vmem:[%s2990_s5 + $0x268] sm:$0xff] }
 0x1b0   :  { %869 = vmatpush.bf16.msra.mxu2 %v854_v7  ;;  %v1045_v7 = vpack.c.bf16 %v959_v5, %v957_v4  ;;  %v940_v5 = vld [vmem:[%s2990_s5 + $0x1f8] sm:$0xff] }
 0x1b2   :  { %1104 = vmatpush.bf16.msrb.mxu1 %v1045_v7  ;;  %v943_v7 = vld [vmem:[%s2990_s5 + $0x210] sm:$0xff] }
 0x1b4   :  { %870 = vmatpush.bf16.msra.mxu2 %v853_v22  ;;  %v953_v22 = vld [vmem:[%s2990_s5 + $0x260] sm:$0xff] }
 0x1b5   :  { %v1043_v26 = vpack.c.bf16 %v955_v23, %v953_v22  ;;  %v1052_v23 = vpack.c.bf16 %v972_v19, %v970_v17  ;;  %v914_v19 = vld [vmem:[%s2990_s5 + $0x128] sm:$0xff] }
 0x1b7   :  { %1105 = vmatpush.bf16.msrb.mxu1 %v1043_v26  ;;  %v934_v26 = vld [vmem:[%s2990_s5 + $0x1c8] sm:$0xff] }
 0x1b8   :  { %871 = vmatpush.bf16.msra.mxu2 %v852_v37 }
 0x1bb   :  { %1106 = vmatpush.bf16.msrb.mxu1 %v1041_v41  ;;  %v962_v41 = vld [vmem:[%s2990_s5 + $0x2a8] sm:$0xff] }
 0x1bc   :  { %1114 = vmatpush.bf16.msrb.mxu2 %v1067_v43 }
 0x1bf   :  { %1107 = vmatpush.bf16.msrb.mxu1 %v1039_v56  ;;  %v884_v56 = vld [vmem:[%s2990_s5 + $0x38] sm:$0xff] }
 0x1c0   :  { %1115 = vmatpush.bf16.msrb.mxu2 %v1065_v58 }
 0x1c4   :  { %1116 = vmatpush.bf16.msrb.mxu2 %v1063_v14  ;;  %v1037_v14 = vpack.c.bf16 %v943_v7, %v941_v6 }
 0x1c6   :  { %1108 = vmatpush.bf16.msrb.mxu1 %v1037_v14 }
 0x1c8   :  { %1117 = vmatpush.bf16.msrb.mxu2 %v1061_v29  ;;  %v1034_v29 = vpack.c.bf16 %v936_v27, %v934_v26 }
 0x1c9   :  { %1109 = vmatmul.bf16.vlgmr.msrb.gmra.mxu1 %v2602_v10 }
 0x1ca   :  { %1153 = vmatpush.bf16.msra.mxu1 %v1052_v23  ;;  %v946_v23 = vld [vmem:[%s2990_s5 + $0x228] sm:$0xff] }
 0x219   :  { %v777_v52 = vpop.f32.mrf.mxu0 }
 0x21a   :  { %v778_v15 = vadd.f32 %v1983_v2, %v777_v52  ;;  %v1031_v52 = vpack.c.bf16 %v931_v47, %v929_v45  ;;  %v915_v45 = vld [vmem:[%s2990_s5 + $0x130] sm:$0xff] }
 0x21b   :  { %v1023_v47 = vpack.c.bf16 %v915_v45, %v913_v44  ;;  %v886_v45 = vld [vmem:[%s2990_s5 + $0x48] sm:$0xff] }
 0x21c   :  { %1090 = vmatpush.bf16.msrb.mxu0 %v1031_v52 }
 0x221   :  { %v779_v62 = vpop.f32.mrf.mxu0 }
 0x222   :  { %v925_v62 = vld [vmem:[%s2990_s5 + $0x180] sm:$0xff] }
 0x223   :  { %v1029_v2 = vpack.c.bf16 %v927_v1, %v925_v62  ;;  %v898_v1 = vld [vmem:[%s2990_s5 + $0xa8] sm:$0xff] }
 0x225   :  { %1091 = vmatpush.bf16.msrb.mxu0 %v1029_v2  ;;  %v938_v2 = vld [vmem:[%s2990_s5 + $0x1e8] sm:$0xff] }
 0x229   :  { %v790_v20 = vpop.f32.mrf.mxu1  ;;  %1092 = vmatpush.bf16.msrb.mxu0 %v1027_v21  ;;  %v896_v21 = vld [vmem:[%s2990_s5 + $0x98] sm:$0xff] }
 0x22a   :  { %v2643_v25 = vadd.f32 %v790_v20, %v778_v15  ;;  %v881_v15 = vld [vmem:[%s2990_s5 + $0x20] sm:$0xff] }
 0x22b   :  { %v1007_v18 = vpack.c.bf16 %v883_v16, %v881_v15  ;;  %v977_v15 = vld [vmem:[%s2990_s5 + $0x320] sm:$0xff]  ;;  %v979_v16 = vld [vmem:[%s2990_s5 + $0x330] sm:$0xff] }
 0x22c   :  { %v794_v30 = vsel %vm258_vm6, %v2643_v25, 0.0 }
 0x22d   :  { %v795_v35 = vrot.slane %v794_v30, 4  ;;  %1081 = vmatpush.bf16.msra.mxu3 %v1007_v18  ;;  %v1055_v18 = vpack.c.bf16 %v979_v16, %v977_v15  ;;  %v950_v15 = vld [vmem:[%s2990_s5 + $0x248] sm:$0xff]  ;;  %v952_v16 = vld [vmem:[%s2990_s5 + $0x258] sm:$0xff] }
 0x22f   :  { %v796_v42 = vadd.f32 %v795_v35, %v794_v30  ;;  %v877_v30 = vld [vmem:[%s2990_s5] sm:$0xff]  ;;  %v906_v35 = vld [vmem:[%s2990_s5 + $0xe8] sm:$0xff] }
 0x230   :  { %v1005_v33 = vpack.c.bf16 %v879_v31, %v877_v30  ;;  %v1020_v38 = vpack.c.bf16 %v908_v36, %v906_v35  ;;  %v973_v30 = vld [vmem:[%s2990_s5 + $0x300] sm:$0xff]  ;;  %v975_v31 = vld [vmem:[%s2990_s5 + $0x310] sm:$0xff]  ;;  %v968_v35 = vld [vmem:[%s2990_s5 + $0x2d8] sm:$0xff] }
 0x231   :  { %v797_v49 = vrot.slane %v796_v42, 2  ;;  %v792_v50 = vpop.f32.mrf.mxu1 }
 0x232   :  { %1082 = vmatpush.bf16.msra.mxu3 %v1005_v33  ;;  %v904_v50 = vld [vmem:[%s2990_s5 + $0xd8] sm:$0xff]  ;;  %v1053_v33 = vpack.c.bf16 %v975_v31, %v973_v30  ;;  %v910_v30 = vld [vmem:[%s2990_s5 + $0x108] sm:$0xff] }
 0x233   :  { %v798_v57 = vadd.f32 %v797_v49, %v796_v42  ;;  %v987_v42 = vld [vmem:[%s2990_s5 + $0x370] sm:$0xff]  ;;  %v902_v49 = vld [vmem:[%s2990_s5 + $0xc8] sm:$0xff]  ;;  %v912_v31 = vld [vmem:[%s2990_s5 + $0x118] sm:$0xff] }
 0x234   :  { %v1059_v60 = vpack.c.bf16 %v987_v42, %v985_v40  ;;  %v1018_v52 = vpack.c.bf16 %v904_v50, %v902_v49  ;;  %v932_v40 = vld [vmem:[%s2990_s5 + $0x1b8] sm:$0xff] }
 0x235   :  { %v799_v63 = vrot.slane %v798_v57, 1  ;;  %1083 = vmatmul.bf16.vlgmr.msra.gmra.mxu3 %v2598_v8  ;;  %v964_v42 = vld [vmem:[%s2990_s5 + $0x2b8] sm:$0xff] }
 0x236   :  { %1127 = vmatpush.bf16.msrb.mxu3 %v1020_v38  ;;  %1118 = vmatpush.bf16.msrb.mxu2 %v1059_v60  ;;  %v892_v38 = vld [vmem:[%s2990_s5 + $0x78] sm:$0xff]  ;;  %v1032_v60 = vpack.c.bf16 %v932_v40, %v930_v39  ;;  %v1048_v44 = vpack.c.bf16 %v964_v42, %v962_v41  ;;  %v1002_v39 = vld [vmem:[%s2990_s5 + $0x3e8] sm:$0xff] }
 0x237   :  { %v800_v13 = vadd.f32 %v799_v63, %v798_v57  ;;  %v983_v57 = vld [vmem:[%s2990_s5 + $0x350] sm:$0xff]  ;;  %v900_v63 = vld [vmem:[%s2990_s5 + $0xb8] sm:$0xff]  ;;  %v998_v42 = vld [vmem:[%s2990_s5 + $0x3c8] sm:$0xff] }
 0x238   :  { %v1057_v58 = vpack.c.bf16 %v983_v57, %v981_v54  ;;  %v1016_v4 = vpack.c.bf16 %v900_v63, %v898_v1  ;;  %v928_v50 = vld [vmem:[%s2990_s5 + $0x198] sm:$0xff]  ;;  %v922_v57 = vld [vmem:[%s2990_s5 + $0x168] sm:$0xff] }
 0x239   :  { %v801_v20 = vmul.f32 %v800_v13, %v2616_v51  ;;  %v1036_v13 = vpack.c.bf16 %v940_v5, %v938_v2  ;;  %v1028_v1 = vpack.c.bf16 %v924_v59, %v922_v57  ;;  %v880_v5 = vld [vmem:[%s2990_s5 + $0x18] sm:$0xff] }
 0x23a   :  { %1128 = vmatpush.bf16.msrb.mxu3 %v1018_v52  ;;  %1119 = vmatpush.bf16.msrb.mxu2 %v1057_v58  ;;  %v958_v52 = vld [vmem:[%s2990_s5 + $0x288] sm:$0xff]  ;;  %v976_v59 = vld [vmem:[%s2990_s5 + $0x318] sm:$0xff] }
 0x23b   :  { %v2681_v28 = vsub.f32 %v2643_v25, %v801_v20  ;;  %v1025_v25 = vpack.c.bf16 %v919_v34, %v917_v32  ;;  %v894_v20 = vld [vmem:[%s2990_s5 + $0x88] sm:$0xff]  ;;  %v1046_v54 = vpack.c.bf16 %v960_v48, %v958_v52 }
 0x23c   :  { %v1014_v24 = vpack.c.bf16 %v896_v21, %v894_v20  ;;  %v966_v34 = vld [vmem:[%s2990_s5 + $0x2c8] sm:$0xff]  ;;  %v916_v20 = vld [vmem:[%s2990_s5 + $0x138] sm:$0xff] }
 0x23d   :  { %v803_v37 = vmul.f32 %v2681_v28, %v2681_v28  ;;  %1093 = vmatpush.bf16.msrb.mxu0 %v1025_v25  ;;  %v1050_v36 = vpack.c.bf16 %v968_v35, %v966_v34  ;;  %v890_v25 = vld [vmem:[%s2990_s5 + $0x68] sm:$0xff]  ;;  %v944_v35 = vld [vmem:[%s2990_s5 + $0x218] sm:$0xff] }
 0x23e   :  { %1129 = vmatpush.bf16.msrb.mxu3 %v1016_v4  ;;  %1120 = vmatpush.bf16.msrb.mxu2 %v1055_v18  ;;  %v1012_v3 = vpack.c.bf16 %v892_v38, %v890_v25  ;;  %v878_v4 = vld [vmem:[%s2990_s5 + $0x8] sm:$0xff]  ;;  %v1042_v18 = vpack.c.bf16 %v952_v16, %v950_v15 }
 0x23f   :  { %v804_v43 = vsel %vm258_vm6, %v803_v37, 0.0  ;;  %1154 = vmatpush.bf16.msra.mxu1 %v1050_v36  ;;  %v1006_v7 = vpack.c.bf16 %v880_v5, %v878_v4  ;;  %v942_v34 = vld [vmem:[%s2990_s5 + $0x208] sm:$0xff] }
 0x240   :  { %v805_v46 = vrot.slane %v804_v43, 4  ;;  %v982_v48 = vld [vmem:[%s2990_s5 + $0x348] sm:$0xff] }
 0x241   :  { %1094 = vmatpush.bf16.msrb.mxu0 %v1023_v47  ;;  %v926_v47 = vld [vmem:[%s2990_s5 + $0x188] sm:$0xff] }
 0x242   :  { %v806_v55 = vadd.f32 %v805_v46, %v804_v43  ;;  %1130 = vmatpush.bf16.msrb.mxu3 %v1014_v24  ;;  %1121 = vmatpush.bf16.msrb.mxu2 %v1053_v33  ;;  %v888_v46 = vld [vmem:[%s2990_s5 + $0x58] sm:$0xff]  ;;  %v1030_v53 = vpack.c.bf16 %v928_v50, %v926_v47  ;;  %v1022_v33 = vpack.c.bf16 %v912_v31, %v910_v30 }
 0x243   :  { %v1010_v49 = vpack.c.bf16 %v888_v46, %v886_v45  ;;  %1155 = vmatpush.bf16.msra.mxu1 %v1048_v44  ;;  %v948_v24 = vld [vmem:[%s2990_s5 + $0x238] sm:$0xff]  ;;  %v994_v44 = vld [vmem:[%s2990_s5 + $0x3a8] sm:$0xff] }
 0x244   :  { %v807_v62 = vrot.slane %v806_v55, 2  ;;  %v1040_v26 = vpack.c.bf16 %v948_v24, %v946_v23  ;;  %v996_v45 = vld [vmem:[%s2990_s5 + $0x3b8] sm:$0xff]  ;;  %v990_v46 = vld [vmem:[%s2990_s5 + $0x388] sm:$0xff] }
 0x245   :  { %1095 = vmatpush.bf16.msrb.mxu0 %v1021_v0  ;;  %v992_v47 = vld [vmem:[%s2990_s5 + $0x398] sm:$0xff] }
 0x246   :  { %v808_v12 = vadd.f32 %v807_v62, %v806_v55  ;;  %1131 = vmatpush.bf16.msrb.mxu3 %v1012_v3  ;;  %v882_v55 = vld [vmem:[%s2990_s5 + $0x28] sm:$0xff]  ;;  %v956_v62 = vld [vmem:[%s2990_s5 + $0x278] sm:$0xff] }
 0x247   :  { %v1008_v58 = vpack.c.bf16 %v884_v56, %v882_v55  ;;  %1156 = vmatpush.bf16.msra.mxu1 %v1046_v54  ;;  %v1044_v63 = vpack.c.bf16 %v956_v62, %v954_v61  ;;  %v1004_v3 = vld [vmem:[%s2990_s5 + $0x3f8] sm:$0xff]  ;;  %v978_v55 = vld [vmem:[%s2990_s5 + $0x328] sm:$0xff] }
 0x248   :  { %v809_v22 = vrot.slane %v808_v12, 1  ;;  %1096 = vmatmul.bf16.vlgmr.msrb.gmra.mxu0 %v2600_v9  ;;  %v1068_v41 = vpack.c.bf16 %v1004_v3, %v1002_v39  ;;  %v988_v50 = vld [vmem:[%s2990_s5 + $0x378] sm:$0xff] }
 0x249   :  { %1140 = vmatpush.bf16.msra.mxu0 %v1036_v13  ;;  %v920_v13 = vld [vmem:[%s2990_s5 + $0x158] sm:$0xff] }
 0x24a   :  { %v810_v32 = vadd.f32 %v809_v22, %v808_v12  ;;  %1132 = vmatpush.bf16.msrb.mxu3 %v1010_v49  ;;  %v918_v12 = vld [vmem:[%s2990_s5 + $0x148] sm:$0xff]  ;;  %v1024_v22 = vpack.c.bf16 %v916_v20, %v914_v19  ;;  %v980_v56 = vld [vmem:[%s2990_s5 + $0x338] sm:$0xff] }
 0x24b   :  { %1157 = vmatpush.bf16.msra.mxu1 %v1044_v63  ;;  %v1026_v14 = vpack.c.bf16 %v920_v13, %v918_v12  ;;  %v986_v49 = vld [vmem:[%s2990_s5 + $0x368] sm:$0xff]  ;;  %v1056_v57 = vpack.c.bf16 %v980_v56, %v978_v55  ;;  %v1273_v24 = vld [vmem:[#allocation7 + $0x70] sm:$0xff] }
 0x24c   :  { %v811_v37 = vmul.f32 %v810_v32, %v2616_v51  ;;  %v1060_v52 = vpack.c.bf16 %v988_v50, %v986_v49  ;;  %v1263_v56 = vld [vmem:[#allocation7 + $0x20] sm:$0xff] }
 0x24d   :  { %1141 = vmatpush.bf16.msra.mxu0 %v1034_v29  ;;  %v1984_v29 = vld [vmem:[%s2992_s13] ss:$0 sm:$0xff] }
 0x24e   :  { %v812_v43 = vadd.f32 1e-05, %v811_v37  ;;  %1133 = vmatpush.bf16.msrb.mxu3 %v1008_v58  ;;  %v1985_v37 = vld [vmem:[%s2993_s17] ss:$0 sm:$0xff]  ;;  %v974_v58 = vld [vmem:[%s2990_s5 + $0x308] sm:$0xff] }
 0x24f   :  { %1158 = vmatpush.bf16.msra.mxu1 %v1042_v18  ;;  %v1054_v61 = vpack.c.bf16 %v976_v59, %v974_v58  ;;  %v1287_v58 = vld [vmem:[#allocation7 + $0xe0] sm:$0xff] }
 0x250   :  { %1999 = vrsqrt.f32 %v812_v43  ;;  %vm819_vm3 = vweird.f32 %v812_v43 }
 0x251   :  { %1142 = vmatpush.bf16.msra.mxu0 %v1032_v60 }
 0x252   :  { %1134 = vmatpush.bf16.msrb.mxu3 %v1006_v7 }
 0x253   :  { %1159 = vmatpush.bf16.msra.mxu1 %v1040_v26  ;;  %v1274_v26 = vld [vmem:[#allocation7 + $0x78] sm:$0xff] }
 0x255   :  { %1143 = vmatpush.bf16.msra.mxu0 %v1030_v53  ;;  %1135 = vmatmul.bf16.vlgmr.msrb.gmra.mxu3 %v2598_v8  ;;  %v1038_v8 = vpack.c.bf16 %v944_v35, %v942_v34  ;;  %v984_v53 = vld [vmem:[%s2990_s5 + $0x358] sm:$0xff] }
 0x256   :  { %v2000_v0 = vpop.eup %1999  ;;  %v1058_v54 = vpack.c.bf16 %v984_v53, %v982_v48 }
 0x257   :  { %v814_v2 = vmul.f32 %v2000_v0, %v812_v43  ;;  %vm820_vm2 = vweird.f32 %v2000_v0  ;;  %1160 = vmatpush.bf16.msra.mxu1 %v1038_v8  ;;  %v1000_v43 = vld [vmem:[%s2990_s5 + $0x3d8] sm:$0xff] }
 0x258   :  { %vm821_vm4 = vmor %vm819_vm3, %vm820_vm2  ;;  %v1066_v60 = vpack.c.bf16 %v1000_v43, %v998_v42  ;;  %v1268_v42 = vld [vmem:[#allocation7 + $0x48] sm:$0xff]  ;;  %vm1473_vm3 = vcmask 0  }
 0x259   :  { %1144 = vmatpush.bf16.msra.mxu0 %v1028_v1  ;;  %v815_v6 = vmul.f32 %v2000_v0, %v814_v2  ;;  %v1110_v1 = vpop.f32.mrf.mxu1 }
 0x25a   :  { %1161 = vmatmul.bf16.vlgmr.msra.gmra.mxu1 %v2602_v10  ;;  %v1062_v10 = vpack.c.bf16 %v992_v47, %v990_v46  ;;  %v1265_v46 = vld [vmem:[#allocation7 + $0x30] sm:$0xff]  ;;  %v1266_v47 = vld [vmem:[#allocation7 + $0x38] sm:$0xff] }
 0x25b   :  { %v816_v17 = vmul.f32 0.5, %v815_v6  ;;  %v1294_v50 = vpack.c.bf16 %v1266_v47, %v1265_v46 }
 0x25d   :  { %1145 = vmatpush.bf16.msra.mxu0 %v1026_v14  ;;  %v817_v21 = vsub.f32 1.5, %v816_v17  ;;  %v1069_v14 = vld [vmem:[%s2994_s21] sm:$0x3] }
 0x25e   :  { %v1071_v17 = vperm.slane %v1069_v14, 0  ;;  %v1072_v23 = vperm.slane %v1069_v14, 1 }
 0x25f   :  { %v818_v27 = vmul.f32 %v2000_v0, %v817_v21 }
 0x261   :  { %1146 = vmatpush.bf16.msra.mxu0 %v1024_v22  ;;  %v822_v32 = vsel %vm821_vm4, %v2000_v0, %v818_v27  ;;  %v1112_v4 = vpop.f32.mrf.mxu1  ;;  %v1298_v27 = vpack.c.bf16 %v1274_v26, %v1273_v24  ;;  %v1284_v26 = vld [vmem:[#allocation7 + $0xc8] sm:$0xff] }
 0x262   :  { %v823_v36 = vmul.f32 %v822_v32, %v2681_v28  ;;  %v1271_v32 = vld [vmem:[#allocation7 + $0x60] sm:$0xff] }
 0x263   :  { %1311 = vmatpush.bf16.msra.mxu3 %v1298_v27 }
 0x264   :  { %v828_v25 = vmul.f32 %v1984_v29, %v823_v36 }
 0x265   :  { %1147 = vmatpush.bf16.msra.mxu0 %v1022_v33  ;;  %v1272_v33 = vld [vmem:[#allocation7 + $0x68] sm:$0xff] }
 0x266   :  { %v833_v38 = vadd.f32 %v1985_v37, %v828_v25  ;;  %v1297_v35 = vpack.c.bf16 %v1272_v33, %v1271_v32  ;;  %v1269_v25 = vld [vmem:[#allocation7 + $0x50] sm:$0xff]  ;;  %v1282_v33 = vld [vmem:[#allocation7 + $0xb8] sm:$0xff] }
 0x267   :  { %v1281_v32 = vld [vmem:[#allocation7 + $0xb0] sm:$0xff] }
 0x268   :  { %1148 = vmatmul.bf16.vlgmr.msra.gmra.mxu0 %v2600_v9  ;;  %v834_v40 = vmax.f32 %v833_v38, 0.0  ;;  %v1064_v9 = vpack.c.bf16 %v996_v45, %v994_v44  ;;  %1312 = vmatpush.bf16.msra.mxu3 %v1297_v35  ;;  %v1270_v38 = vld [vmem:[#allocation7 + $0x58] sm:$0xff]  ;;  %v1302_v35 = vpack.c.bf16 %v1282_v33, %v1281_v32 }
 0x269   :  { %v1296_v3 = vpack.c.bf16 %v1270_v38, %v1269_v25  ;;  %v1279_v25 = vld [vmem:[#allocation7 + $0xa0] sm:$0xff]  ;;  %v1280_v38 = vld [vmem:[#allocation7 + $0xa8] sm:$0xff]  ;;  %v1394_v32 = vld [vmem:[#allocation8 + $0x78] sm:$0xff] }
 0x26a   :  { %v835_v28 = vpack.c.bf16 %v834_v40, %v834_v40 }
 0x26c   :  { %872 = vmatmul.bf16.vlgmr.msra.gmra.mxu2 %v835_v28  ;;  %1313 = vmatpush.bf16.msra.mxu3 %v1296_v3  ;;  %v1267_v28 = vld [vmem:[#allocation7 + $0x40] sm:$0xff]  ;;  %v1301_v3 = vpack.c.bf16 %v1280_v38, %v1279_v25 }
 0x26d   :  { %1166 = vmatpush.bf16.msra.mxu2 %v1068_v41 }
 0x271   :  { %1167 = vmatpush.bf16.msra.mxu2 %v1066_v60  ;;  %v1295_v60 = vpack.c.bf16 %v1268_v42, %v1267_v28  ;;  %v1277_v28 = vld [vmem:[#allocation7 + $0x90] sm:$0xff]  ;;  %v1278_v42 = vld [vmem:[#allocation7 + $0x98] sm:$0xff] }
 0x273   :  { %1314 = vmatpush.bf16.msra.mxu3 %v1295_v60 }
 0x275   :  { %1168 = vmatpush.bf16.msra.mxu2 %v1064_v9 }
 0x277   :  { %1315 = vmatpush.bf16.msra.mxu3 %v1294_v50 }
 0x279   :  { %1169 = vmatpush.bf16.msra.mxu2 %v1062_v10  ;;  %v1289_v10 = vld [vmem:[#allocation7 + $0xf0] sm:$0xff] }
 0x27c   :  { %1122 = vmatmul.bf16.vlgmr.msrb.gmra.mxu2 %v2604_v11 }
 0x27d   :  { %1170 = vmatpush.bf16.msra.mxu2 %v1060_v52  ;;  %v1290_v52 = vld [vmem:[#allocation7 + $0xf8] sm:$0xff] }
 0x27e   :  { %v1306_v53 = vpack.c.bf16 %v1290_v52, %v1289_v10 }
 0x280   :  { %1324 = vmatpush.bf16.msrb.mxu0 %v1306_v53 }
 0x281   :  { %1171 = vmatpush.bf16.msra.mxu2 %v1058_v54 }
 0x285   :  { %1172 = vmatpush.bf16.msra.mxu2 %v1056_v57  ;;  %v1264_v57 = vld [vmem:[#allocation7 + $0x28] sm:$0xff] }
 0x289   :  { %1173 = vmatpush.bf16.msra.mxu2 %v1054_v61 }
 0x28c   :  { %1174 = vmatmul.bf16.vlgmr.msra.gmra.mxu2 %v2604_v11 }
 0x2b8   :  { %v1084_v62 = vpop.f32.mrf.mxu3 }
 0x2b9   :  { %v1085_v18 = vadd.f32 %v1084_v62, %v1071_v17  ;;  %v1293_v62 = vpack.c.bf16 %v1264_v57, %v1263_v56  ;;  %v1239_v56 = vld [vmem:[%s2995_s25] sm:$0x3] }
 0x2bb   :  { %1316 = vmatpush.bf16.msra.mxu3 %v1293_v62 }
 0x2c0   :  { %v1086_v63 = vpop.f32.mrf.mxu3 }
 0x2c5   :  { %v1097_v0 = vpop.f32.mrf.mxu0 }
 0x2c6   :  { %v1098_v20 = vadd.f32 %v1097_v0, %v1085_v18  ;;  %v1288_v0 = vld [vmem:[#allocation7 + $0xe8] sm:$0xff] }
 0x2c7   :  { %v1305_v63 = vpack.c.bf16 %v1288_v0, %v1287_v58 }
 0x2c8   :  { %v1111_v11 = vadd.f32 %v1110_v1, %v1098_v20 }
 0x2c9   :  { %1325 = vmatpush.bf16.msrb.mxu0 %v1305_v63 }
 0x2cd   :  { %v1099_v2 = vpop.f32.mrf.mxu0 }
 0x2d7   :  { %v1162_v7 = vpop.f32.mrf.mxu1 }
 0x2d8   :  { %v1136_v5 = vpop.f32.mrf.mxu3 }
 0x2d9   :  { %v1137_v31 = vadd.f32 %v1136_v5, %v1072_v23 }
 0x2df   :  { %v1164_v15 = vpop.f32.mrf.mxu1 }
 0x2e0   :  { %v1138_v12 = vpop.f32.mrf.mxu3  ;;  %v1286_v15 = vld [vmem:[#allocation7 + $0xd8] sm:$0xff] }
 0x2e1   :  { %v1285_v12 = vld [vmem:[#allocation7 + $0xd0] sm:$0xff] }
 0x2e2   :  { %v1304_v18 = vpack.c.bf16 %v1286_v15, %v1285_v12 }
 0x2e4   :  { %1326 = vmatpush.bf16.msrb.mxu0 %v1304_v18 }
 0x2e5   :  { %v1149_v6 = vpop.f32.mrf.mxu0 }
 0x2e6   :  { %v1150_v8 = vadd.f32 %v1149_v6, %v1137_v31  ;;  %v1261_v6 = vld [vmem:[#allocation7 + $0x10] sm:$0xff] }
 0x2e8   :  { %v1163_v41 = vadd.f32 %v1162_v7, %v1150_v8  ;;  %v1262_v7 = vld [vmem:[#allocation7 + $0x18] sm:$0xff] }
 0x2e9   :  { %v1292_v14 = vpack.c.bf16 %v1262_v7, %v1261_v6 }
 0x2eb   :  { %1317 = vmatpush.bf16.msra.mxu3 %v1292_v14 }
 0x2ed   :  { %v1151_v13 = vpop.f32.mrf.mxu0 }
 0x2ef   :  { %v2785_v16 = vpop.f32.mrf.mxu2 }
 0x2f7   :  { %v875_v19 = vpop.f32.mrf.mxu2 }
 0x2ff   :  { %v1123_v21 = vpop.f32.mrf.mxu2 }
 0x300   :  { %v1124_v22 = vadd.f32 %v1123_v21, %v1111_v11  ;;  %v1259_v11 = vld [vmem:[#allocation7] sm:$0xff]  ;;  %v1260_v21 = vld [vmem:[#allocation7 + $0x8] sm:$0xff] }
 0x301   :  { %v1291_v24 = vpack.c.bf16 %v1260_v21, %v1259_v11 }
 0x302   :  { %v1179_v29 = vsel %vm258_vm6, %v1124_v22, 0.0 }
 0x303   :  { %v1180_v30 = vrot.slane %v1179_v29, 4  ;;  %1318 = vmatpush.bf16.msra.mxu3 %v1291_v24  ;;  %v1987_v24 = vld [vmem:[%s2997_s3] ss:$0 sm:$0xff] }
 0x305   :  { %v1181_v34 = vadd.f32 %v1180_v30, %v1179_v29 }
 0x307   :  { %v1182_v36 = vrot.slane %v1181_v34, 2  ;;  %v1125_v37 = vpop.f32.mrf.mxu2 }
 0x309   :  { %v1183_v39 = vadd.f32 %v1182_v36, %v1181_v34 }
 0x30b   :  { %v1184_v40 = vrot.slane %v1183_v39, 1 }
 0x30d   :  { %v1185_v43 = vadd.f32 %v1184_v40, %v1183_v39 }
 0x30f   :  { %v1193_v44 = vmul.f32 %v1185_v43, %v2616_v51  ;;  %v1175_v45 = vpop.f32.mrf.mxu2  ;;  %v1300_v43 = vpack.c.bf16 %v1278_v42, %v1277_v28 }
 0x310   :  { %v1176_v9 = vadd.f32 %v1175_v45, %v1163_v41  ;;  %v1276_v45 = vld [vmem:[#allocation7 + $0x88] sm:$0xff] }
 0x311   :  { %v2789_v49 = vsub.f32 %v1124_v22, %v1193_v44  ;;  %v1283_v22 = vld [vmem:[#allocation7 + $0xc0] sm:$0xff] }
 0x312   :  { %v1186_v48 = vsel %vm258_vm6, %v1176_v9, 0.0  ;;  %v1303_v29 = vpack.c.bf16 %v1284_v26, %v1283_v22  ;;  %v1275_v44 = vld [vmem:[#allocation7 + $0x80] sm:$0xff] }
 0x313   :  { %v1197_v54 = vmul.f32 %v2789_v49, %v2789_v49  ;;  %v1187_v55 = vrot.slane %v1186_v48, 4  ;;  %v1299_v47 = vpack.c.bf16 %v1276_v45, %v1275_v44 }
 0x314   :  { %1327 = vmatpush.bf16.msrb.mxu0 %v1303_v29 }
 0x315   :  { %v1199_v59 = vsel %vm258_vm6, %v1197_v54, 0.0  ;;  %v1188_v61 = vadd.f32 %v1187_v55, %v1186_v48 }
 0x316   :  { %v1200_v1 = vrot.slane %v1199_v59, 4 }
 0x317   :  { %v1189_v2 = vrot.slane %v1188_v61, 2  ;;  %v1177_v4 = vpop.f32.mrf.mxu2 }
 0x318   :  { %v1201_v5 = vadd.f32 %v1200_v1, %v1199_v59  ;;  %1328 = vmatpush.bf16.msrb.mxu0 %v1302_v35  ;;  %v1247_v59 = vld [vmem:[%s2996_s29] sm:$0x3] }
 0x319   :  { %v1190_v13 = vadd.f32 %v1189_v2, %v1188_v61  ;;  %v1241_v61 = vperm.slane %v1239_v56, 0  ;;  %v1249_v1 = vperm.slane %v1247_v59, 0 }
 0x31a   :  { %v1202_v17 = vrot.slane %v1201_v5, 2 }
 0x31b   :  { %v1191_v19 = vrot.slane %v1190_v13, 1 }
 0x31c   :  { %v1203_v20 = vadd.f32 %v1202_v17, %v1201_v5  ;;  %1329 = vmatpush.bf16.msrb.mxu0 %v1301_v3  ;;  %v1242_v17 = vperm.slane %v1239_v56, 1  ;;  %v1389_v3 = vld [vmem:[#allocation8 + $0x50] sm:$0xff] }
 0x31d   :  { %v1192_v23 = vadd.f32 %v1191_v19, %v1190_v13 }
 0x31e   :  { %v1204_v27 = vrot.slane %v1203_v20, 1 }
 0x31f   :  { %v1194_v30 = vmul.f32 %v1192_v23, %v2616_v51 }
 0x320   :  { %v1205_v31 = vadd.f32 %v1204_v27, %v1203_v20  ;;  %1330 = vmatpush.bf16.msrb.mxu0 %v1300_v43  ;;  %v1387_v43 = vld [vmem:[#allocation8 + $0x40] sm:$0xff] }
 0x321   :  { %v1196_v34 = vsub.f32 %v1176_v9, %v1194_v30 }
 0x322   :  { %v1213_v36 = vmul.f32 %v1205_v31, %v2616_v51  ;;  %v1393_v31 = vld [vmem:[#allocation8 + $0x70] sm:$0xff] }
 0x323   :  { %v1198_v37 = vmul.f32 %v1196_v34, %v1196_v34  ;;  %v1402_v33 = vpack.c.bf16 %v1394_v32, %v1393_v31  ;;  %v1507_v31 = vld [vmem:[#allocation10 + $0xf8] sm:$0xff] }
 0x324   :  { %v1215_v8 = vadd.f32 1e-05, %v1213_v36  ;;  %1331 = vmatpush.bf16.msrb.mxu0 %v1299_v47  ;;  %v1386_v47 = vld [vmem:[#allocation8 + $0x38] sm:$0xff] }
 0x325   :  { %v1206_v39 = vsel %vm258_vm6, %v1198_v37, 0.0  ;;  %1407 = vmatpush.bf16.msrb.mxu1 %v1402_v33  ;;  %v1392_v37 = vld [vmem:[#allocation8 + $0x68] sm:$0xff]  ;;  %v1990_v33 = vld [vmem:[%s3000_s22] ss:$0 sm:$0xff] }
 0x326   :  { %2001 = vrsqrt.f32 %v1215_v8  ;;  %v1207_v40 = vrot.slane %v1206_v39, 4  ;;  %vm1223_vm7 = vweird.f32 %v1215_v8 }
 0x328   :  { %v1208_v41 = vadd.f32 %v1207_v40, %v1206_v39  ;;  %v1390_v40 = vld [vmem:[#allocation8 + $0x58] sm:$0xff] }
 0x329   :  { %v1400_v28 = vpack.c.bf16 %v1390_v40, %v1389_v3  ;;  %v1497_v40 = vld [vmem:[#allocation10 + $0xa8] sm:$0xff] }
 0x32a   :  { %v1209_v60 = vrot.slane %v1208_v41, 2 }
 0x32c   :  { %v2002_v9 = vpop.eup %2001  ;;  %v1210_v46 = vadd.f32 %v1209_v60, %v1208_v41  ;;  %v1388_v60 = vld [vmem:[#allocation8 + $0x48] sm:$0xff] }
 0x32d   :  { %v1218_v10 = vmul.f32 %v2002_v9, %v1215_v8  ;;  %vm1224_vm5 = vweird.f32 %v2002_v9  ;;  %v1399_v45 = vpack.c.bf16 %v1388_v60, %v1387_v43  ;;  %v1492_v60 = vld [vmem:[#allocation10 + $0x80] sm:$0xff] }
 0x32e   :  { %v1211_v50 = vrot.slane %v1210_v46, 1  ;;  %vm1225_vm8 = vmor %vm1223_vm7, %vm1224_vm5 }
 0x32f   :  { %v1219_v52 = vmul.f32 %v2002_v9, %v1218_v10 }
 0x330   :  { %v1212_v48 = vadd.f32 %v1211_v50, %v1210_v46  ;;  %v1385_v46 = vld [vmem:[#allocation8 + $0x30] sm:$0xff] }
 0x331   :  { %v1220_v53 = vmul.f32 0.5, %v1219_v52  ;;  %v1398_v50 = vpack.c.bf16 %v1386_v47, %v1385_v46  ;;  %v1495_v46 = vld [vmem:[#allocation10 + $0x98] sm:$0xff] }
 0x332   :  { %v1214_v54 = vmul.f32 %v1212_v48, %v2616_v51  ;;  %v1383_v48 = vld [vmem:[#allocation8 + $0x20] sm:$0xff] }
 0x333   :  { %v1221_v55 = vsub.f32 1.5, %v1220_v53  ;;  %v1384_v53 = vld [vmem:[#allocation8 + $0x28] sm:$0xff] }
 0x334   :  { %v1216_v57 = vadd.f32 1e-05, %v1214_v54 }
 0x335   :  { %v1222_v58 = vmul.f32 %v2002_v9, %v1221_v55  ;;  %v1397_v55 = vpack.c.bf16 %v1384_v53, %v1383_v48  ;;  %v1490_v48 = vld [vmem:[#allocation10 + $0x70] sm:$0xff] }
 0x336   :  { %2003 = vrsqrt.f32 %v1216_v57  ;;  %vm1233_vm10 = vweird.f32 %v1216_v57 }
 0x337   :  { %v1226_v62 = vsel %vm1225_vm8, %v2002_v9, %v1222_v58  ;;  %v1381_v58 = vld [vmem:[#allocation8 + $0x10] sm:$0xff] }
 0x338   :  { %v1237_v0 = vmul.f32 %v1226_v62, %v2789_v49  ;;  %v1250_v49 = vperm.slane %v1247_v59, 1  ;;  %v1382_v59 = vld [vmem:[#allocation8 + $0x18] sm:$0xff] }
 0x33a   :  { %v1245_v63 = vmul.f32 %v1241_v61, %v1237_v0  ;;  %v1396_v61 = vpack.c.bf16 %v1382_v59, %v1381_v58  ;;  %v1379_v0 = vld [vmem:[#allocation8] sm:$0xff] }
 0x33b   :  { %v1484_v59 = vld [vmem:[#allocation10 + $0x40] sm:$0xff] }
 0x33c   :  { %v2004_v2 = vpop.eup %2003  ;;  %v1253_v4 = vadd.f32 %v1249_v1, %v1245_v63  ;;  %v1380_v1 = vld [vmem:[#allocation8 + $0x8] sm:$0xff] }
 0x33d   :  { %v1228_v5 = vmul.f32 %v2004_v2, %v1216_v57  ;;  %vm1234_vm9 = vweird.f32 %v2004_v2  ;;  %v1395_v63 = vpack.c.bf16 %v1380_v1, %v1379_v0  ;;  %v1487_v0 = vld [vmem:[#allocation10 + $0x58] sm:$0xff] }
 0x33e   :  { %v1255_v6 = vmax.f32 %v1253_v4, 0.0  ;;  %vm1235_vm11 = vmor %vm1233_vm10, %vm1234_vm9 }
 0x33f   :  { %v1229_v7 = vmul.f32 %v2004_v2, %v1228_v5 }
 0x340   :  { %v1257_v12 = vpack.c.bf16 %v1255_v6, %v1255_v6 }
 0x341   :  { %v1230_v13 = vmul.f32 0.5, %v1229_v7 }
 0x342   :  { %1319 = vmatmul.bf16.vlgmr.msra.gmra.mxu3 %v1257_v12 }
 0x343   :  { %v1231_v14 = vsub.f32 1.5, %v1230_v13 }
 0x345   :  { %v1232_v15 = vmul.f32 %v2004_v2, %v1231_v14 }
 0x347   :  { %v1236_v18 = vsel %vm1235_vm11, %v2004_v2, %v1232_v15 }
 0x348   :  { %v1238_v19 = vmul.f32 %v1236_v18, %v1196_v34  ;;  %v1391_v34 = vld [vmem:[#allocation8 + $0x60] sm:$0xff] }
 0x349   :  { %v1401_v25 = vpack.c.bf16 %v1392_v37, %v1391_v34  ;;  %v1501_v34 = vld [vmem:[#allocation10 + $0xc8] sm:$0xff] }
 0x34a   :  { %v1246_v20 = vmul.f32 %v1242_v17, %v1238_v19  ;;  %v1988_v19 = vld [vmem:[%s2998_s8] ss:$0 sm:$0xff] }
 0x34b   :  { %1408 = vmatpush.bf16.msrb.mxu1 %v1401_v25  ;;  %v1496_v25 = vld [vmem:[#allocation10 + $0xa0] sm:$0xff] }
 0x34c   :  { %v1254_v11 = vadd.f32 %v1250_v49, %v1246_v20 }
 0x34e   :  { %v1256_v21 = vmax.f32 %v1254_v11, 0.0  ;;  %v1989_v11 = vld [vmem:[%s2999_s4] ss:$0 sm:$0xff] }
 0x34f   :  { %1409 = vmatpush.bf16.msrb.mxu1 %v1400_v28 }
 0x350   :  { %v1258_v22 = vpack.c.bf16 %v1256_v21, %v1256_v21 }
 0x352   :  { %1332 = vmatmul.bf16.vlgmr.msrb.gmra.mxu0 %v1258_v22 }
 0x353   :  { %1410 = vmatpush.bf16.msrb.mxu1 %v1399_v45 }
 0x357   :  { %1411 = vmatpush.bf16.msrb.mxu1 %v1398_v50 }
 0x35b   :  { %1412 = vmatpush.bf16.msrb.mxu1 %v1397_v55  ;;  %v1491_v55 = vld [vmem:[#allocation10 + $0x78] sm:$0xff] }
 0x35f   :  { %1413 = vmatpush.bf16.msrb.mxu1 %v1396_v61  ;;  %v1486_v61 = vld [vmem:[#allocation10 + $0x50] sm:$0xff] }
 0x360   :  { %v1512_v1 = vpack.c.bf16 %v1486_v61, %v1484_v59 }
 0x363   :  { %1414 = vmatpush.bf16.msrb.mxu1 %v1395_v63 }
 0x3c5   :  { %v1320_v23 = vpop.f32.mrf.mxu3 }
 0x3c6   :  { %v1321_v27 = vadd.f32 %v1987_v24, %v1320_v23 }
 0x3cd   :  { %v1322_v26 = vpop.f32.mrf.mxu3 }
 0x3ce   :  { %v1504_v26 = vld [vmem:[#allocation10 + $0xe0] sm:$0xff] }
 0x3cf   :  { %v1333_v29 = vpop.f32.mrf.mxu0 }
 0x3d0   :  { %v1334_v30 = vadd.f32 %v1333_v29, %v1321_v27  ;;  %v1506_v27 = vld [vmem:[#allocation10 + $0xf0] sm:$0xff]  ;;  %v1505_v29 = vld [vmem:[#allocation10 + $0xe8] sm:$0xff] }
 0x3d1   :  { %v1523_v32 = vpack.c.bf16 %v1507_v31, %v1505_v29  ;;  %v1588_v31 = vld [vmem:[%s3001_s23 + $0xe0] sm:$0xff] }
 0x3d2   :  { %v1337_v35 = vsel %vm258_vm6, %v1334_v30, 0.0 }
 0x3d3   :  { %v1338_v36 = vrot.slane %v1337_v35, 4  ;;  %1543 = vmatpush.bf16.msrb.mxu3 %v1523_v32  ;;  %v1590_v32 = vld [vmem:[%s3001_s23 + $0xf0] sm:$0xff] }
 0x3d5   :  { %v1339_v8 = vadd.f32 %v1338_v36, %v1337_v35  ;;  %v1500_v35 = vld [vmem:[#allocation10 + $0xc0] sm:$0xff]  ;;  %v1502_v36 = vld [vmem:[#allocation10 + $0xd0] sm:$0xff] }
 0x3d6   :  { %v1520_v37 = vpack.c.bf16 %v1502_v36, %v1500_v35  ;;  %v1638_v36 = vpack.c.bf16 %v1590_v32, %v1588_v31  ;;  %v1576_v31 = vld [vmem:[%s3001_s23 + $0x80] sm:$0xff]  ;;  %v1578_v32 = vld [vmem:[%s3001_s23 + $0x90] sm:$0xff] }
 0x3d7   :  { %v1340_v38 = vrot.slane %v1339_v8, 2  ;;  %v1335_v39 = vpop.f32.mrf.mxu0 }
 0x3d8   :  { %1662 = vmatpush.bf16.msra.mxu0 %v1638_v36  ;;  %v1610_v36 = vld [vmem:[%s3001_s23 + $0x190] sm:$0xff] }
 0x3d9   :  { %v1341_v41 = vadd.f32 %v1340_v38, %v1339_v8  ;;  %v1503_v8 = vld [vmem:[#allocation10 + $0xd8] sm:$0xff]  ;;  %v1498_v38 = vld [vmem:[#allocation10 + $0xb0] sm:$0xff] }
 0x3da   :  { %v1521_v3 = vpack.c.bf16 %v1503_v8, %v1501_v34  ;;  %v1622_v34 = vld [vmem:[%s3001_s23 + $0x1f0] sm:$0xff]  ;;  %v1591_v8 = vld [vmem:[%s3001_s23 + $0xf8] sm:$0xff] }
 0x3db   :  { %v1342_v42 = vrot.slane %v1341_v41, 1 }
 0x3dc   :  { %1544 = vmatpush.bf16.msrb.mxu3 %v1521_v3  ;;  %v1621_v3 = vld [vmem:[%s3001_s23 + $0x1e8] sm:$0xff] }
 0x3dd   :  { %v1343_v44 = vadd.f32 %v1342_v42, %v1341_v41  ;;  %v1499_v41 = vld [vmem:[#allocation10 + $0xb8] sm:$0xff]  ;;  %v1518_v42 = vpack.c.bf16 %v1498_v38, %v1496_v25 }
 0x3de   :  { %v1519_v43 = vpack.c.bf16 %v1499_v41, %v1497_v40  ;;  %v1623_v40 = vld [vmem:[%s3001_s23 + $0x1f8] sm:$0xff] }
 0x3df   :  { %v1344_v9 = vmul.f32 %v1343_v44, %v2616_v51  ;;  %v1494_v44 = vld [vmem:[#allocation10 + $0x90] sm:$0xff]  ;;  %v1655_v41 = vpack.c.bf16 %v1623_v40, %v1621_v3  ;;  %v1572_v40 = vld [vmem:[%s3001_s23 + $0x60] sm:$0xff] }
 0x3e0   :  { %1545 = vmatpush.bf16.msrb.mxu3 %v1519_v43 }
 0x3e1   :  { %v1345_v10 = vsub.f32 %v1334_v30, %v1344_v9  ;;  %v1522_v30 = vpack.c.bf16 %v1506_v27, %v1504_v26  ;;  %v1493_v9 = vld [vmem:[#allocation10 + $0x88] sm:$0xff] }
 0x3e2   :  { %v1517_v50 = vpack.c.bf16 %v1495_v46, %v1493_v9 }
 0x3e3   :  { %v1346_v52 = vmul.f32 %v1345_v10, %v1345_v10  ;;  %1530 = vmatpush.bf16.msrb.mxu2 %v1522_v30 }
 0x3e4   :  { %1546 = vmatpush.bf16.msrb.mxu3 %v1517_v50 }
 0x3e5   :  { %v1347_v54 = vsel %vm258_vm6, %v1346_v52, 0.0  ;;  %v1488_v52 = vld [vmem:[#allocation10 + $0x60] sm:$0xff] }
 0x3e6   :  { %v1348_v56 = vrot.slane %v1347_v54, 4 }
 0x3e7   :  { %1531 = vmatpush.bf16.msrb.mxu2 %v1520_v37  ;;  %v1589_v37 = vld [vmem:[%s3001_s23 + $0xe8] sm:$0xff] }
 0x3e8   :  { %v1349_v57 = vadd.f32 %v1348_v56, %v1347_v54  ;;  %v1489_v54 = vld [vmem:[#allocation10 + $0x68] sm:$0xff] }
 0x3e9   :  { %v1515_v58 = vpack.c.bf16 %v1491_v55, %v1489_v54 }
 0x3ea   :  { %v1350_v62 = vrot.slane %v1349_v57, 2 }
 0x3eb   :  { %1532 = vmatpush.bf16.msrb.mxu2 %v1518_v42  ;;  %1547 = vmatpush.bf16.msrb.mxu3 %v1515_v58  ;;  %v1986_v42 = vld [vmem:[%s3002_s7] ss:$0 sm:$0xff] }
 0x3ec   :  { %v1351_v2 = vadd.f32 %v1350_v62, %v1349_v57  ;;  %v1514_v57 = vpack.c.bf16 %v1490_v48, %v1488_v52  ;;  %v1485_v62 = vld [vmem:[#allocation10 + $0x48] sm:$0xff]  ;;  %v1451_v58 = vld [vmem:[%s2376_s19] sm:$0x3]  ;;  %s3003_s19 = sld [smem:[#allocation31_spill]] }
 0x3ed   :  { %v1513_v63 = vpack.c.bf16 %v1487_v0, %v1485_v62 }
 0x3ee   :  { %v1352_v4 = vrot.slane %v1351_v2, 1 }
 0x3ef   :  { %1548 = vmatpush.bf16.msrb.mxu3 %v1513_v63  ;;  %v1584_v63 = vld [vmem:[%s3001_s23 + $0xc0] sm:$0xff] }
 0x3f0   :  { %v1353_v5 = vadd.f32 %v1352_v4, %v1351_v2 }
 0x3f2   :  { %v1354_v6 = vmul.f32 %v1353_v5, %v2616_v51 }
 0x3f4   :  { %v1355_v7 = vadd.f32 1e-05, %v1354_v6  ;;  %v1480_v6 = vld [vmem:[#allocation10 + $0x20] sm:$0xff] }
 0x3f6   :  { %2005 = vrsqrt.f32 %v1355_v7  ;;  %vm1362_vm13 = vweird.f32 %v1355_v7 }
 0x3fc   :  { %v2006_v12 = vpop.eup %2005 }
 0x3fd   :  { %v1357_v13 = vmul.f32 %v2006_v12, %v1355_v7  ;;  %vm1363_vm12 = vweird.f32 %v2006_v12  ;;  %v1482_v7 = vld [vmem:[#allocation10 + $0x30] sm:$0xff] }
 0x3fe   :  { %vm1364_vm14 = vmor %vm1362_vm13, %vm1363_vm12 }
 0x3ff   :  { %v1358_v14 = vmul.f32 %v2006_v12, %v1357_v13  ;;  %v1510_v13 = vpack.c.bf16 %v1482_v7, %v1480_v6  ;;  %v1618_v6 = vld [vmem:[%s3001_s23 + $0x1d0] sm:$0xff]  ;;  %v1585_v7 = vld [vmem:[%s3001_s23 + $0xc8] sm:$0xff] }
 0x401   :  { %v1359_v15 = vmul.f32 0.5, %v1358_v14  ;;  %v1483_v14 = vld [vmem:[#allocation10 + $0x38] sm:$0xff] }
 0x403   :  { %v1360_v17 = vsub.f32 1.5, %v1359_v15 }
 0x405   :  { %v1361_v18 = vmul.f32 %v2006_v12, %v1360_v17 }
 0x407   :  { %v1365_v49 = vsel %vm1364_vm14, %v2006_v12, %v1361_v18  ;;  %v1481_v12 = vld [vmem:[#allocation10 + $0x28] sm:$0xff]  ;;  %v1476_v18 = vld [vmem:[#allocation10] sm:$0xff] }
 0x408   :  { %v1366_v20 = vmul.f32 %v1365_v49, %v1345_v10  ;;  %v1516_v10 = vpack.c.bf16 %v1494_v44, %v1492_v60  ;;  %v1511_v15 = vpack.c.bf16 %v1483_v14, %v1481_v12  ;;  %v1477_v49 = vld [vmem:[#allocation10 + $0x8] sm:$0xff]  ;;  %v874_v60 = vadd.f32 %v1986_v42, %v2785_v16  ;;  %v1587_v12 = vld [vmem:[%s3001_s23 + $0xd8] sm:$0xff]  ;;  %v1604_v42 = vld [vmem:[%s3001_s23 + $0x160] sm:$0xff] }
 0x409   :  { %v1637_v14 = vpack.c.bf16 %v1587_v12, %v1585_v7  ;;  %v1597_v12 = vld [vmem:[%s3001_s23 + $0x128] sm:$0xff] }
 0x40a   :  { %v1371_v21 = vmul.f32 %v1988_v19, %v1366_v20  ;;  %1533 = vmatpush.bf16.msrb.mxu2 %v1516_v10  ;;  %v1478_v19 = vld [vmem:[#allocation10 + $0x10] sm:$0xff]  ;;  %1549 = vmatpush.bf16.msrb.mxu3 %v1511_v15  ;;  %v1617_v15 = vld [vmem:[%s3001_s23 + $0x1c8] sm:$0xff] }
 0x40c   :  { %v1376_v22 = vadd.f32 %v1989_v11, %v1371_v21  ;;  %v1508_v11 = vpack.c.bf16 %v1478_v19, %v1476_v18  ;;  %v1479_v21 = vld [vmem:[#allocation10 + $0x18] sm:$0xff] }
 0x40d   :  { %v1580_v19 = vld [vmem:[%s3001_s23 + $0xa0] sm:$0xff] }
 0x40e   :  { %v1377_v23 = vmax.f32 %v1376_v22, 0.0  ;;  %1534 = vmatpush.bf16.msrb.mxu2 %v1514_v57  ;;  %v1509_v22 = vpack.c.bf16 %v1479_v21, %v1477_v49  ;;  %v1582_v49 = vld [vmem:[%s3001_s23 + $0xb0] sm:$0xff] }
 0x40f   :  { %v1614_v21 = vld [vmem:[%s3001_s23 + $0x1b0] sm:$0xff] }
 0x410   :  { %v1378_v24 = vpack.c.bf16 %v1377_v23, %v1377_v23  ;;  %1550 = vmatpush.bf16.msrb.mxu3 %v1509_v22  ;;  %v1581_v22 = vld [vmem:[%s3001_s23 + $0xa8] sm:$0xff] }
 0x412   :  { %1415 = vmatmul.bf16.vlgmr.msrb.gmra.mxu1 %v1378_v24  ;;  %1535 = vmatpush.bf16.msrb.mxu2 %v1512_v1 }
 0x414   :  { %1701 = vmatpush.bf16.msra.mxu3 %v1655_v41  ;;  %v1574_v41 = vld [vmem:[%s3001_s23 + $0x70] sm:$0xff] }
 0x416   :  { %1536 = vmatpush.bf16.msrb.mxu2 %v1510_v13 }
 0x41a   :  { %1537 = vmatpush.bf16.msrb.mxu2 %v1508_v11  ;;  %v1634_v11 = vpack.c.bf16 %v1582_v49, %v1580_v19  ;;  %v1594_v49 = vld [vmem:[%s3001_s23 + $0x110] sm:$0xff] }
 0x48f   :  { %v1416_v39 = vpop.f32.mrf.mxu1 }
 0x490   :  { %v2810_v28 = vadd.f32 %v1990_v33, %v1416_v39  ;;  %v1620_v33 = vld [vmem:[%s3001_s23 + $0x1e0] sm:$0xff]  ;;  %v1639_v39 = vpack.c.bf16 %v1591_v8, %v1589_v37  ;;  %v1579_v37 = vld [vmem:[%s3001_s23 + $0x98] sm:$0xff] }
 0x491   :  { %v1654_v38 = vpack.c.bf16 %v1622_v34, %v1620_v33  ;;  %v1608_v33 = vld [vmem:[%s3001_s23 + $0x180] sm:$0xff]  ;;  %v1577_v34 = vld [vmem:[%s3001_s23 + $0x88] sm:$0xff] }
 0x492   :  { %v1423_v45 = vand.u32 2147483647, %v2810_v28  ;;  %v1420_v27 = vmax.f32 %v2810_v28, 0.0  ;;  %vm1421_vm0 = vcmp.ne.f32.partialorder %v2810_v28, %v2810_v28  ;;  %1688 = vmatpush.bf16.msra.mxu2 %v1639_v39  ;;  %v1648_v8 = vpack.c.bf16 %v1610_v36, %v1608_v33  ;;  %v1611_v39 = vld [vmem:[%s3001_s23 + $0x198] sm:$0xff]  ;;  %v1742_v36 = vld [vmem:[%s3003_s19 + $0xc0] sm:$0xff] }
 0x493   :  { %1675 = vmatpush.bf16.msra.mxu1 %v1654_v38  ;;  %v1609_v38 = vld [vmem:[%s3001_s23 + $0x188] sm:$0xff] }
 0x494   :  { %v1424_v47 = vsub.f32 0.0, %v1423_v45  ;;  %v1649_v3 = vpack.c.bf16 %v1611_v39, %v1609_v38  ;;  %v1745_v38 = vld [vmem:[%s3003_s19 + $0xd8] sm:$0xff]  ;;  %v1778_v39 = vld [vmem:[%s3003_s19 + $0x1e0] sm:$0xff] }
 0x496   :  { %v1425_v53 = vmul.f32 1.442695, %v1424_v47  ;;  %v1458_v47 = vmul.f32 %v874_v60, %v874_v60  ;;  %1689 = vmatpush.bf16.msra.mxu2 %v1637_v14 }
 0x497   :  { %v1418_v56 = vpop.f32.mrf.mxu1 }
 0x498   :  { %2007 = vpow2.f32 %v1425_v53 }
 0x49e   :  { %v2008_v2 = vpop.eup %2007 }
 0x49f   :  { %v1427_v4 = vadd.f32 1.0, %v2008_v2  ;;  %v1430_v5 = vmul.f32 -0.5, %v2008_v2  ;;  %v1433_v20 = vand.u32 2147483647, %v2008_v2 }
 0x4a1   :  { %2009 = vlog2.f32 %v1427_v4  ;;  %v1431_v17 = vadd.f32 1.0, %v1430_v5  ;;  %vm1434_vm15 = vcmp.lt.f32.partialorder %v1433_v20, 0.0004427343  ;;  %v1616_v4 = vld [vmem:[%s3001_s23 + $0x1c0] sm:$0xff] }
 0x4a2   :  { %v1652_v13 = vpack.c.bf16 %v1618_v6, %v1616_v4  ;;  %v1612_v20 = vld [vmem:[%s3001_s23 + $0x1a0] sm:$0xff]  ;;  %v1565_v4 = vld [vmem:[%s3001_s23 + $0x28] sm:$0xff] }
 0x4a3   :  { %v1432_v26 = vmul.f32 %v2008_v2, %v1431_v17  ;;  %v1586_v2 = vld [vmem:[%s3001_s23 + $0xd0] sm:$0xff]  ;;  %v1619_v17 = vld [vmem:[%s3001_s23 + $0x1d8] sm:$0xff] }
 0x4a4   :  { %v1636_v5 = vpack.c.bf16 %v1586_v2, %v1584_v63  ;;  %v1653_v18 = vpack.c.bf16 %v1619_v17, %v1617_v15  ;;  %1676 = vmatpush.bf16.msra.mxu1 %v1652_v13  ;;  %v1598_v2 = vld [vmem:[%s3001_s23 + $0x130] sm:$0xff]  ;;  %v1599_v13 = vld [vmem:[%s3001_s23 + $0x138] sm:$0xff]  ;;  %v1560_v15 = vld [vmem:[%s3001_s23] sm:$0xff] }
 0x4a5   :  { %v1643_v14 = vpack.c.bf16 %v1599_v13, %v1597_v12  ;;  %v1562_v17 = vld [vmem:[%s3001_s23 + $0x10] sm:$0xff] }
 0x4a6   :  { %1663 = vmatpush.bf16.msra.mxu0 %v1636_v5  ;;  %1702 = vmatpush.bf16.msra.mxu3 %v1653_v18  ;;  %v1567_v5 = vld [vmem:[%s3001_s23 + $0x38] sm:$0xff]  ;;  %v1592_v18 = vld [vmem:[%s3001_s23 + $0x100] sm:$0xff]  ;;  %v1624_v19 = vpack.c.bf16 %v1562_v17, %v1560_v15  ;;  %v1768_v13 = vld [vmem:[%s3003_s19 + $0x190] sm:$0xff] }
 0x4a7   :  { %v2010_v23 = vpop.eup %2009  ;;  %v1627_v7 = vpack.c.bf16 %v1567_v5, %v1565_v4  ;;  %v1769_v15 = vld [vmem:[%s3003_s19 + $0x198] sm:$0xff] }
 0x4a8   :  { %v1429_v24 = vmul.f32 0.6931472, %v2010_v23  ;;  %v1583_v23 = vld [vmem:[%s3001_s23 + $0xb8] sm:$0xff] }
 0x4aa   :  { %v1435_v29 = vsel %vm1434_vm15, %v1432_v26, %v1429_v24  ;;  %v1650_v24 = vpack.c.bf16 %v1614_v21, %v1612_v20  ;;  %v1635_v26 = vpack.c.bf16 %v1583_v23, %v1581_v22  ;;  %1664 = vmatpush.bf16.msra.mxu0 %v1634_v11  ;;  %v1561_v20 = vld [vmem:[%s3001_s23 + $0x8] sm:$0xff]  ;;  %v1563_v11 = vld [vmem:[%s3001_s23 + $0x18] sm:$0xff]  ;;  %v1640_v21 = vpack.c.bf16 %v1594_v49, %v1592_v18  ;;  %v1732_v49 = vld [vmem:[%s3003_s19 + $0x70] sm:$0xff] }
 0x4ab   :  { %v1436_v30 = vadd.f32 %v1435_v29, %v1420_v27  ;;  %v1613_v27 = vld [vmem:[%s3001_s23 + $0x1a8] sm:$0xff]  ;;  %v1615_v29 = vld [vmem:[%s3001_s23 + $0x1b8] sm:$0xff]  ;;  %v1625_v22 = vpack.c.bf16 %v1563_v11, %v1561_v20 }
 0x4ac   :  { %1677 = vmatpush.bf16.msra.mxu1 %v1650_v24  ;;  %1690 = vmatpush.bf16.msra.mxu2 %v1635_v26  ;;  %v1593_v23 = vld [vmem:[%s3001_s23 + $0x108] sm:$0xff]  ;;  %v1595_v24 = vld [vmem:[%s3001_s23 + $0x118] sm:$0xff] }
 0x4ad   :  { %v1437_v35 = vsel %vm1421_vm0, %v2810_v28, %v1436_v30  ;;  %v1651_v30 = vpack.c.bf16 %v1615_v29, %v1613_v27  ;;  %v1641_v26 = vpack.c.bf16 %v1595_v24, %v1593_v23  ;;  %v1746_v29 = vld [vmem:[%s3003_s19 + $0xe0] sm:$0xff]  ;;  %v1731_v20 = vld [vmem:[%s3003_s19 + $0x68] sm:$0xff]  ;;  %v1733_v11 = vld [vmem:[%s3003_s19 + $0x78] sm:$0xff] }
 0x4ae   :  { %v1438_v25 = vadd.f32 1e-08, %v1437_v35  ;;  %v1632_v35 = vpack.c.bf16 %v1578_v32, %v1576_v31  ;;  %v1747_v31 = vld [vmem:[%s3003_s19 + $0xe8] sm:$0xff] }
 0x4af   :  { %1703 = vmatpush.bf16.msra.mxu3 %v1651_v30  ;;  %v1748_v30 = vld [vmem:[%s3003_s19 + $0xf0] sm:$0xff] }
 0x4b0   :  { %2011 = vlog2.f32 %v1438_v25  ;;  %vm1446_vm1 = vcmp.eq.f32.partialorder %v1438_v25, inf  ;;  %v1449_v16 = vand.u32 2147483648, %v1438_v25  ;;  %vm1448_vm2 = vcmp.eq.f32.partialorder %v1438_v25, 0.0  ;;  %1665 = vmatpush.bf16.msra.mxu0 %v1632_v35  ;;  %1678 = vmatpush.bf16.msra.mxu1 %v1648_v8  ;;  %v1749_v35 = vld [vmem:[%s3003_s19 + $0xf8] sm:$0xff] }
 0x4b1   :  { %2013 = vrsqrt.f32 %v1438_v25  ;;  %v1796_v33 = vpack.c.bf16 %v1748_v30, %v1746_v29  ;;  %v1797_v8 = vpack.c.bf16 %v1749_v35, %v1747_v31  ;;  %v1728_v29 = vld [vmem:[%s3003_s19 + $0x50] sm:$0xff]  ;;  %v1727_v30 = vld [vmem:[%s3003_s19 + $0x48] sm:$0xff]  ;;  %v1729_v31 = vld [vmem:[%s3003_s19 + $0x58] sm:$0xff] }
 0x4b3   :  { %1704 = vmatpush.bf16.msra.mxu3 %v1649_v3 }
 0x4b6   :  { %v2012_v43 = vpop.eup %2011 }
 0x4b7   :  { %v2014_v28 = vpop.eup %2013  ;;  %v1455_v44 = vmul.f32 0.6931472, %v2012_v43  ;;  %v1630_v43 = vpack.c.bf16 %v1574_v41, %v1572_v40  ;;  %v1780_v40 = vld [vmem:[%s3003_s19 + $0x1f0] sm:$0xff]  ;;  %v1779_v41 = vld [vmem:[%s3003_s19 + $0x1e8] sm:$0xff] }
 0x4b8   :  { %v1440_v45 = vmul.f32 %v2014_v28, %v1438_v25 }
 0x4b9   :  { %v1456_v9 = vsub.f32 0.0, %v1455_v44  ;;  %v1575_v44 = vld [vmem:[%s3001_s23 + $0x78] sm:$0xff]  ;;  %1666 = vmatpush.bf16.msra.mxu0 %v1630_v43 }
 0x4ba   :  { %v1441_v46 = vmul.f32 %v2014_v28, %v1440_v45 }
 0x4bb   :  { %v1457_v10 = vadd.f32 %v1456_v9, %v1438_v25 }
 0x4bc   :  { %v1442_v50 = vmul.f32 0.5, %v1441_v46  ;;  %v1605_v46 = vld [vmem:[%s3001_s23 + $0x168] sm:$0xff] }
 0x4bd   :  { %v1459_v52 = vadd.f32 %v1458_v47, %v1457_v10  ;;  %v1607_v47 = vld [vmem:[%s3001_s23 + $0x178] sm:$0xff]  ;;  %v1568_v10 = vld [vmem:[%s3001_s23 + $0x40] sm:$0xff] }
 0x4be   :  { %v1443_v48 = vsub.f32 1.5, %v1442_v50  ;;  %v1647_v50 = vpack.c.bf16 %v1607_v47, %v1605_v46  ;;  %v1739_v46 = vld [vmem:[%s3003_s19 + $0xa8] sm:$0xff]  ;;  %v1741_v47 = vld [vmem:[%s3003_s19 + $0xb8] sm:$0xff] }
 0x4bf   :  { %v1936_v53 = vadd.f32 -1.0, %v1459_v52  ;;  %v1570_v52 = vld [vmem:[%s3001_s23 + $0x50] sm:$0xff] }
 0x4c0   :  { %v1444_v54 = vmul.f32 %v2014_v28, %v1443_v48  ;;  %v1606_v28 = vld [vmem:[%s3001_s23 + $0x170] sm:$0xff]  ;;  %v1600_v48 = vld [vmem:[%s3001_s23 + $0x140] sm:$0xff]  ;;  %1705 = vmatpush.bf16.msra.mxu3 %v1647_v50 }
 0x4c1   :  { %v1461_v55 = vmul.f32 0.5, %v1936_v53  ;;  %v1646_v45 = vpack.c.bf16 %v1606_v28, %v1604_v42  ;;  %v1602_v53 = vld [vmem:[%s3001_s23 + $0x150] sm:$0xff]  ;;  %v1781_v42 = vld [vmem:[%s3003_s19 + $0x1f8] sm:$0xff] }
 0x4c2   :  { %v1445_v56 = vmul.f32 %v1444_v54, %v1438_v25  ;;  %v1628_v54 = vpack.c.bf16 %v1570_v52, %v1568_v10  ;;  %v1774_v10 = vld [vmem:[%s3003_s19 + $0x1c0] sm:$0xff]  ;;  %v1776_v50 = vld [vmem:[%s3003_s19 + $0x1d0] sm:$0xff] }
 0x4c3   :  { %v1462_v57 = vsel %vm258_vm6, %v1461_v55, 0.0  ;;  %1679 = vmatpush.bf16.msra.mxu1 %v1646_v45  ;;  %v1644_v55 = vpack.c.bf16 %v1602_v53, %v1600_v48  ;;  %v1738_v45 = vld [vmem:[%s3003_s19 + $0xa0] sm:$0xff]  ;;  %v1810_v48 = vpack.c.bf16 %v1776_v50, %v1774_v10  ;;  %v1775_v53 = vld [vmem:[%s3003_s19 + $0x1c8] sm:$0xff] }
 0x4c4   :  { %1463 = vadd.xlane.f32.xlu0 %v1462_v57  ;;  %v1447_v59 = vsel %vm1446_vm1, %v1438_v25, %v1445_v56  ;;  %v1633_v25 = vpack.c.bf16 %v1579_v37, %v1577_v34  ;;  %v1569_v56 = vld [vmem:[%s3001_s23 + $0x48] sm:$0xff]  ;;  %v1571_v57 = vld [vmem:[%s3001_s23 + $0x58] sm:$0xff]  ;;  %1667 = vmatpush.bf16.msra.mxu0 %v1628_v54  ;;  %v1744_v34 = vld [vmem:[%s3003_s19 + $0xd0] sm:$0xff] }
 0x4c5   :  { %v1450_v61 = vsel %vm1448_vm2, %v1449_v16, %v1447_v59  ;;  %v1601_v16 = vld [vmem:[%s3001_s23 + $0x148] sm:$0xff]  ;;  %v1603_v59 = vld [vmem:[%s3001_s23 + $0x158] sm:$0xff]  ;;  %v1794_v3 = vpack.c.bf16 %v1744_v34, %v1742_v36 }
 0x4c6   :  { %v1452_v62 = vmul.f32 %v1451_v58, %v1450_v61  ;;  %1691 = vmatpush.bf16.msra.mxu2 %v1633_v25  ;;  %v1629_v58 = vpack.c.bf16 %v1571_v57, %v1569_v56  ;;  %v1645_v61 = vpack.c.bf16 %v1603_v59, %v1601_v16  ;;  %v1743_v25 = vld [vmem:[%s3003_s19 + $0xc8] sm:$0xff]  ;;  %v1777_v54 = vld [vmem:[%s3003_s19 + $0x1d8] sm:$0xff]  ;;  %v1734_v57 = vld [vmem:[%s3003_s19 + $0x80] sm:$0xff]  ;;  %v1793_v59 = vpack.c.bf16 %v1741_v47, %v1739_v46 }
 0x4c7   :  { %1680 = vmatpush.bf16.msra.mxu1 %v1644_v55  ;;  %v1795_v28 = vpack.c.bf16 %v1745_v38, %v1743_v25  ;;  %v1811_v56 = vpack.c.bf16 %v1777_v54, %v1775_v53  ;;  %v1736_v16 = vld [vmem:[%s3003_s19 + $0x90] sm:$0xff]  ;;  %v1722_v46 = vld [vmem:[%s3003_s19 + $0x20] sm:$0xff]  ;;  %v1723_v10 = vld [vmem:[%s3003_s19 + $0x28] sm:$0xff] }
 0x4c8   :  { %v1453_v0 = vadd.f32 %v1452_v62, %v874_v60  ;;  %v1573_v60 = vld [vmem:[%s3001_s23 + $0x68] sm:$0xff]  ;;  %v1564_v62 = vld [vmem:[%s3001_s23 + $0x20] sm:$0xff]  ;;  %1706 = vmatpush.bf16.msra.mxu3 %v1645_v61  ;;  %v1790_v12 = vpack.c.bf16 %v1736_v16, %v1734_v57  ;;  %v1724_v47 = vld [vmem:[%s3003_s19 + $0x30] sm:$0xff] }
 0x4c9   :  { %v1631_v9 = vpack.c.bf16 %v1575_v44, %v1573_v60  ;;  %v1812_v60 = vpack.c.bf16 %v1780_v40, %v1778_v39  ;;  %v1813_v44 = vpack.c.bf16 %v1781_v42, %v1779_v41  ;;  %v1770_v61 = vld [vmem:[%s3003_s19 + $0x1a0] sm:$0xff]  ;;  %v1784_v50 = vpack.c.bf16 %v1724_v47, %v1722_v46  ;;  %v1760_v54 = vld [vmem:[%s3003_s19 + $0x150] sm:$0xff]  ;;  %v1761_v57 = vld [vmem:[%s3003_s19 + $0x158] sm:$0xff] }
 0x4ca   :  { %v1475_v1 = vpack.c.bf16 %v1453_v0, %v1453_v0  ;;  %v1566_v0 = vld [vmem:[%s3001_s23 + $0x30] sm:$0xff]  ;;  %v1758_v53 = vld [vmem:[%s3003_s19 + $0x140] sm:$0xff] }
 0x4cb   :  { %1692 = vmatpush.bf16.msra.mxu2 %v1631_v9  ;;  %v1626_v63 = vpack.c.bf16 %v1566_v0, %v1564_v62  ;;  %v1740_v9 = vld [vmem:[%s3003_s19 + $0xb0] sm:$0xff]  ;;  %v1771_v0 = vld [vmem:[%s3003_s19 + $0x1a8] sm:$0xff] }
 0x4cc   :  { %1538 = vmatmul.bf16.vlgmr.msrb.gmra.mxu2 %v1475_v1  ;;  %1551 = vmatmul.bf16.vlgmr.msrb.gmra.mxu3 %v1475_v1  ;;  %v1596_v1 = vld [vmem:[%s3001_s23 + $0x120] sm:$0xff]  ;;  %v1792_v55 = vpack.c.bf16 %v1740_v9, %v1738_v45  ;;  %v1772_v62 = vld [vmem:[%s3003_s19 + $0x1b0] sm:$0xff]  ;;  %v1765_v45 = vld [vmem:[%s3003_s19 + $0x178] sm:$0xff] }
 0x4cd   :  { %v1642_v6 = vpack.c.bf16 %v1598_v2, %v1596_v1  ;;  %1668 = vmatpush.bf16.msra.mxu0 %v1626_v63  ;;  %1707 = vmatpush.bf16.msra.mxu3 %v1643_v14  ;;  %v1735_v1 = vld [vmem:[%s3003_s19 + $0x88] sm:$0xff]  ;;  %v1737_v63 = vld [vmem:[%s3003_s19 + $0x98] sm:$0xff]  ;;  %v1808_v5 = vpack.c.bf16 %v1772_v62, %v1770_v61 }
 0x4ce   :  { %v1773_v2 = vld [vmem:[%s3003_s19 + $0x1b8] sm:$0xff]  ;;  %v1767_v14 = vld [vmem:[%s3003_s19 + $0x188] sm:$0xff]  ;;  %v1791_v18 = vpack.c.bf16 %v1737_v63, %v1735_v1  ;;  %v1754_v63 = vld [vmem:[%s3003_s19 + $0x120] sm:$0xff] }
 0x4cf   :  { %1693 = vmatpush.bf16.msra.mxu2 %v1629_v58  ;;  %1681 = vmatpush.bf16.msra.mxu1 %v1642_v6  ;;  %v1809_v6 = vpack.c.bf16 %v1773_v2, %v1771_v0  ;;  %v1807_v23 = vpack.c.bf16 %v1769_v15, %v1767_v14  ;;  %v1719_v61 = vld [vmem:[%s3003_s19 + $0x8] sm:$0xff]  ;;  %v1721_v0 = vld [vmem:[%s3003_s19 + $0x18] sm:$0xff]  ;;  %v1756_v2 = vld [vmem:[%s3003_s19 + $0x130] sm:$0xff] }
 0x4d0   :  { %v1783_v1 = vpack.c.bf16 %v1721_v0, %v1719_v61  ;;  %v1751_v14 = vld [vmem:[%s3003_s19 + $0x108] sm:$0xff] }
 0x4d1   :  { %1669 = vmatpush.bf16.msra.mxu0 %v1624_v19  ;;  %1708 = vmatpush.bf16.msra.mxu3 %v1641_v26  ;;  %v1730_v19 = vld [vmem:[%s3003_s19 + $0x60] sm:$0xff]  ;;  %v1789_v26 = vpack.c.bf16 %v1733_v11, %v1731_v20 }
 0x4d2   :  { %v1788_v24 = vpack.c.bf16 %v1732_v49, %v1730_v19  ;;  %v1656_v19 = vld [vmem:[%s3005_s15] sm:$0x3] }
 0x4d3   :  { %1694 = vmatpush.bf16.msra.mxu2 %v1627_v7  ;;  %1682 = vmatpush.bf16.msra.mxu1 %v1640_v21  ;;  %v1766_v7 = vld [vmem:[%s3003_s19 + $0x180] sm:$0xff]  ;;  %v1658_v49 = vperm.slane %v1656_v19, 0 }
 0x4d5   :  { %1820 = vmatpush.bf16.msrb.mxu0 %v1796_v33  ;;  %1859 = vmatpush.bf16.msrb.mxu3 %v1813_v44 }
 0x4d7   :  { %1695 = vmatpush.bf16.msra.mxu2 %v1625_v22  ;;  %1833 = vmatpush.bf16.msrb.mxu1 %v1812_v60  ;;  %v1806_v22 = vpack.c.bf16 %v1768_v13, %v1766_v7  ;;  %v1763_v60 = vld [vmem:[%s3003_s19 + $0x168] sm:$0xff]  ;;  %v1752_v13 = vld [vmem:[%s3003_s19 + $0x110] sm:$0xff] }
 0x4d8   :  { %v1805_v9 = vpack.c.bf16 %v1765_v45, %v1763_v60 }
 0x4d9   :  { %1821 = vmatpush.bf16.msrb.mxu0 %v1794_v3  ;;  %1860 = vmatpush.bf16.msrb.mxu3 %v1811_v56  ;;  %v1802_v56 = vpack.c.bf16 %v1760_v54, %v1758_v53 }
 0x4db   :  { %1846 = vmatpush.bf16.msrb.mxu2 %v1797_v8  ;;  %1834 = vmatpush.bf16.msrb.mxu1 %v1810_v48 }
 0x4dd   :  { %1822 = vmatpush.bf16.msrb.mxu0 %v1792_v55  ;;  %1861 = vmatpush.bf16.msrb.mxu3 %v1809_v6  ;;  %v1759_v55 = vld [vmem:[%s3003_s19 + $0x148] sm:$0xff]  ;;  %v1757_v6 = vld [vmem:[%s3003_s19 + $0x138] sm:$0xff] }
 0x4de   :  { %v1803_v16 = vpack.c.bf16 %v1761_v57, %v1759_v55 }
 0x4df   :  { %1847 = vmatpush.bf16.msrb.mxu2 %v1795_v28  ;;  %1835 = vmatpush.bf16.msrb.mxu1 %v1808_v5  ;;  %v1764_v28 = vld [vmem:[%s3003_s19 + $0x170] sm:$0xff]  ;;  %v1800_v5 = vpack.c.bf16 %v1756_v2, %v1754_v63 }
 0x4e1   :  { %1823 = vmatpush.bf16.msrb.mxu0 %v1790_v12  ;;  %1862 = vmatpush.bf16.msrb.mxu3 %v1807_v23  ;;  %v1750_v12 = vld [vmem:[%s3003_s19 + $0x100] sm:$0xff]  ;;  %v1659_v23 = vperm.slane %v1656_v19, 1 }
 0x4e2   :  { %v1798_v15 = vpack.c.bf16 %v1752_v13, %v1750_v12 }
 0x4e3   :  { %1848 = vmatpush.bf16.msrb.mxu2 %v1793_v59  ;;  %1836 = vmatpush.bf16.msrb.mxu1 %v1806_v22  ;;  %v1720_v59 = vld [vmem:[%s3003_s19 + $0x10] sm:$0xff] }
 0x4e5   :  { %1824 = vmatpush.bf16.msrb.mxu0 %v1788_v24  ;;  %1863 = vmatpush.bf16.msrb.mxu3 %v1805_v9 }
 0x4e7   :  { %1849 = vmatpush.bf16.msrb.mxu2 %v1791_v18 }
 0x4e9   :  { %1864 = vmatpush.bf16.msrb.mxu3 %v1803_v16 }
 0x4eb   :  { %1850 = vmatpush.bf16.msrb.mxu2 %v1789_v26 }
 0x537   :  { %v1464_v27 = vpop.xlane.xlu0 %1463 }
 0x538   :  { %v1465_v32 = vsel %vm258_vm6, %v1464_v27, 0.0  ;;  %v1726_v27 = vld [vmem:[%s3003_s19 + $0x40] sm:$0xff] }
 0x539   :  { %v1466_v37 = vrot.slane %v1465_v32, 4  ;;  %v1786_v33 = vpack.c.bf16 %v1728_v29, %v1726_v27 }
 0x53b   :  { %v1467_v43 = vadd.f32 %v1466_v37, %v1465_v32  ;;  %v1524_v32 = vld [vmem:[%s3004_s0] sm:$0x3]  ;;  %1825 = vmatpush.bf16.msrb.mxu0 %v1786_v33 }
 0x53c   :  { %v1526_v35 = vperm.slane %v1524_v32, 0  ;;  %v1527_v36 = vperm.slane %v1524_v32, 1 }
 0x53d   :  { %v1468_v52 = vrot.slane %v1467_v43, 2 }
 0x53f   :  { %v1469_v58 = vadd.f32 %v1468_v52, %v1467_v43  ;;  %v1762_v43 = vld [vmem:[%s3003_s19 + $0x160] sm:$0xff]  ;;  %v1725_v52 = vld [vmem:[%s3003_s19 + $0x38] sm:$0xff]  ;;  %1826 = vmatpush.bf16.msrb.mxu0 %v1784_v50 }
 0x540   :  { %v1804_v44 = vpack.c.bf16 %v1764_v28, %v1762_v43  ;;  %v1785_v48 = vpack.c.bf16 %v1725_v52, %v1723_v10 }
 0x541   :  { %v1470_v4 = vrot.slane %v1469_v58, 1 }
 0x542   :  { %1837 = vmatpush.bf16.msrb.mxu1 %v1804_v44 }
 0x543   :  { %v1471_v17 = vadd.f32 %v1470_v4, %v1469_v58  ;;  %v1718_v58 = vld [vmem:[%s3003_s19] sm:$0xff]  ;;  %v1755_v4 = vld [vmem:[%s3003_s19 + $0x128] sm:$0xff] }
 0x544   :  { %v1782_v62 = vpack.c.bf16 %v1720_v59, %v1718_v58  ;;  %v1801_v7 = vpack.c.bf16 %v1757_v6, %v1755_v4 }
 0x545   :  { %v1472_v21 = vmul.f32 %v1471_v17, %v2616_v51  ;;  %v1787_v51 = vpack.c.bf16 %v1729_v31, %v1727_v30  ;;  %v1753_v17 = vld [vmem:[%s3003_s19 + $0x118] sm:$0xff] }
 0x546   :  { %1838 = vmatpush.bf16.msrb.mxu1 %v1802_v56  ;;  %1827 = vmatpush.bf16.msrb.mxu0 %v1782_v62  ;;  %v1799_v18 = vpack.c.bf16 %v1753_v17, %v1751_v14 }
 0x547   :  { %1474 = vst.msk [vmem:[#allocation11] sm:$0x1] %vm1473_vm3, %v1472_v21  ;;  %1851 = vmatpush.bf16.msrb.mxu2 %v1787_v51  ;;  %1865 = vmatpush.bf16.msrb.mxu3 %v1801_v7 }
 0x54a   :  { %1839 = vmatpush.bf16.msrb.mxu1 %v1800_v5 }
 0x54b   :  { %1852 = vmatpush.bf16.msrb.mxu2 %v1785_v48  ;;  %1866 = vmatpush.bf16.msrb.mxu3 %v1799_v18 }
 0x54e   :  { %1840 = vmatpush.bf16.msrb.mxu1 %v1798_v15 }
 0x54f   :  { %v1539_v34 = vpop.f32.mrf.mxu2  ;;  %v1552_v37 = vpop.f32.mrf.mxu3  ;;  %1853 = vmatpush.bf16.msrb.mxu2 %v1783_v1 }
 0x550   :  { %v1540_v8 = vadd.f32 %v1539_v34, %v1526_v35  ;;  %v1553_v25 = vadd.f32 %v1552_v37, %v1527_v36 }
 0x552   :  { %v1556_v38 = vmax.f32 %v1540_v8, 0.0  ;;  %v1557_v39 = vmax.f32 %v1553_v25, 0.0 }
 0x554   :  { %v1558_v3 = vpack.c.bf16 %v1556_v38, %v1556_v38  ;;  %v1559_v40 = vpack.c.bf16 %v1557_v39, %v1557_v39 }
 0x556   :  { %1670 = vmatmul.bf16.vlgmr.msra.gmra.mxu0 %v1558_v3  ;;  %1683 = vmatmul.bf16.vlgmr.msra.gmra.mxu1 %v1559_v40 }
 0x557   :  { %1696 = vmatmul.bf16.vlgmr.msra.gmra.mxu2 %v1558_v3  ;;  %1709 = vmatmul.bf16.vlgmr.msra.gmra.mxu3 %v1559_v40  ;;  %v1541_v41 = vpop.f32.mrf.mxu2  ;;  %v1554_v42 = vpop.f32.mrf.mxu3 }
 0x5d3   :  { %v1671_v20 = vpop.f32.mrf.mxu0  ;;  %v1684_v11 = vpop.f32.mrf.mxu1 }
 0x5d4   :  { %v1672_v21 = vadd.f32 %v1671_v20, %v1658_v49 }
 0x5d6   :  { %v1685_v22 = vadd.f32 %v1684_v11, %v1672_v21 }
 0x5d8   :  { %v1714_v24 = vmax.f32 %v1685_v22, 0.0 }
 0x5da   :  { %v1716_v26 = vpack.c.bf16 %v1714_v24, %v1714_v24  ;;  %v1697_v27 = vpop.f32.mrf.mxu2  ;;  %v1710_v29 = vpop.f32.mrf.mxu3 }
 0x5db   :  { %v1698_v30 = vadd.f32 %v1697_v27, %v1659_v23  ;;  %v1673_v31 = vpop.f32.mrf.mxu0  ;;  %v1686_v32 = vpop.f32.mrf.mxu1 }
 0x5dc   :  { %1828 = vmatmul.bf16.vlgmr.msrb.gmra.mxu0 %v1716_v26  ;;  %1854 = vmatmul.bf16.vlgmr.msrb.gmra.mxu2 %v1716_v26 }
 0x5dd   :  { %v1711_v33 = vadd.f32 %v1710_v29, %v1698_v30 }
 0x5df   :  { %v1715_v51 = vmax.f32 %v1711_v33, 0.0 }
 0x5e1   :  { %v1717_v35 = vpack.c.bf16 %v1715_v51, %v1715_v51 }
 0x5e2   :  { %v1699_v36 = vpop.f32.mrf.mxu2  ;;  %v1712_v34 = vpop.f32.mrf.mxu3 }
 0x5e3   :  { %1841 = vmatmul.bf16.vlgmr.msrb.gmra.mxu1 %v1717_v35  ;;  %1867 = vmatmul.bf16.vlgmr.msrb.gmra.mxu3 %v1717_v35 }
 0x5e4   :  { %2158 = shalt.err (!%p2155_p1)
}
 0x5e5   :  { %1892 = dma.vmem_to_hbm [thread:$0]  %s1888_s28, 16, %s1890_s14, [#allocation4]   ;;  %v1814_v25 = vld [vmem:[%s2371_s12] sm:$0x3]  ;;  %vm1877_vm4 = vcmask 519170  }
 0x5e6   :  { %v1817_v39 = vperm.slane %v1814_v25, 1  ;;  %v1816_v40 = vperm.slane %v1814_v25, 0  ;;  %vm1878_vm5 = vmor %vm1877_vm4, %vm258_vm6 }
 0x659   :  { %v1829_v37 = vpop.f32.mrf.mxu0 }
 0x65a   :  { %v1830_v43 = vadd.f32 %v1829_v37, %v1816_v40 }
 0x65f   :  { %v1855_v8 = vpop.f32.mrf.mxu2 }
 0x660   :  { %v1842_v38 = vpop.f32.mrf.mxu1  ;;  %v1856_v41 = vadd.f32 %v1855_v8, %v1817_v39 }
 0x661   :  { %v1831_v3 = vpop.f32.mrf.mxu0  ;;  %v1843_v45 = vadd.f32 %v1842_v38, %v1830_v43 }
 0x666   :  { %v1868_v42 = vpop.f32.mrf.mxu3 }
 0x667   :  { %v1869_v28 = vadd.f32 %v1868_v42, %v1856_v41  ;;  %v1857_v60 = vpop.f32.mrf.mxu2 }
 0x668   :  { %v1844_v44 = vpop.f32.mrf.mxu1 }
 0x669   :  { %v1874_v9 = vrot.slane %v1869_v28, 6 }
 0x66b   :  { %v1875_v46 = vsel %vm258_vm6, %v1843_v45, %v1874_v9 }
 0x66c   :  { %1879 = vst.msk [vmem:[%s2381_s27] sm:$0xf] %vm1878_vm5, %v1875_v46 }
 0x66e   :  { %v1870_v47 = vpop.f32.mrf.mxu3 }
 0x66f   :  { %2165 = dma.done.wait [#allocation4], 16  }
 0x670   :  { %2166 = vsyncadd [#allocation4], 4294967280 }
 0x671   :  { %1899 = vsyncpa [#allocation3], 1 }
 0x672   :  { %1900 = vsyncpa [#allocation6], 1 }
 0x673   :  { %1901 = vsyncpa [#allocation9], 1 }
 0x674   :  { %1902 = vsyncpa [#allocation4], 1 }

</bundles_post_ra>
